<compile_context>
chip_gen: v5e
topology: v5e:2x2
jax: 0.10.0
libtpu: 0.0.40
codegen_flags: <defaults>
</compile_context>

<pallas_src>
import numpy as np
import jax
import jax.numpy as jnp
from jax import lax
from jax.experimental import pallas as pl
from jax.experimental.pallas import tpu as pltpu

TINY = 1e-8
LAM_FLOOR = 1e-4          # floor for effective SG lambdas (avoid 0/0 in _hemi)
LN2 = float(np.log(2.0))
HIDDEN = 256              # svbrdf_network dim=256
PAD_IN = 8                # 3-d point coords zero-padded to 8 input features
PAD_OUT = 8               # small MLP heads zero-padded to 8 output rows
# packed per-pixel rows: 0-2 points | 3-5 normals1 | 6 hit | 7 pad |
#                        8-10 viewdirs | 11-13 background | 14-15 pad
PACK_ROWS = 16

# PhySG / TANGO cosine-lobe SG constants
LAMBDA_COS = 0.0315
MU_COS = 32.7080
ALPHA_COS = 31.7003


# ----------------------------- small helpers (traced inside the kernel) ------
def _dot3(a, b):
    return a[0] * b[0] + a[1] * b[1] + a[2] * b[2]


def _normalize3(a):
    inv = lax.rsqrt(_dot3(a, a) + TINY)
    return (a[0] * inv, a[1] * inv, a[2] * inv)


def _hemi(lam, cos_beta):
    """PhySG approximate hemisphere integral of an SG (per-element lambda).

    All divides replaced with approx EUP reciprocals; lambda floored so the
    ratio / a_u terms stay well conditioned in f32."""
    lam = jnp.maximum(lam, LAM_FLOOR)
    lam2 = lam * lam
    t = jnp.sqrt(lam) * ((1.6988 * lam2 + 10.8438 * lam)
                         * pl.reciprocal(lam2 + 6.2201 * lam + 10.2415, approx=True))
    inv_a = jnp.exp(-t)
    e_cb = jnp.exp(-t * jnp.abs(cos_beta))
    num = jnp.where(cos_beta >= 0.0, 1.0 - inv_a * e_cb, e_cb - inv_a)
    s = num * pl.reciprocal((1.0 - inv_a) * (1.0 + e_cb) + TINY, approx=True)
    e_lam = jnp.exp(-lam)
    a_u = (2.0 * np.pi) * (1.0 - e_lam) * pl.reciprocal(lam, approx=True)
    return a_u * (e_lam + s * (1.0 - e_lam))


def _hemi_const(t_c, inv_a_c, e_lam_c, a_u_c, cos_beta):
    """Hemisphere integral with a per-SG *constant* lambda: the lambda-only
    terms (t, exp(-t), exp(-lam), A_u) are precomputed in the wrapper."""
    e_cb = jnp.exp(-t_c * jnp.abs(cos_beta))
    num = jnp.where(cos_beta >= 0.0, 1.0 - inv_a_c * e_cb, e_cb - inv_a_c)
    s = num * pl.reciprocal((1.0 - inv_a_c) * (1.0 + e_cb) + TINY, approx=True)
    return a_u_c * (e_lam_c + s * (1.0 - e_lam_c))


# ---------------------------------------------------------------- the kernel -
def _make_kernel(max_dt, max_dp):
    def kernel(any_hit_ref,                              # scalar-prefetched per-tile flags (SMEM)
               data_ref, sg_ref,
               w1n_ref, b1n_ref, w2n_ref, b2n_ref, w3n_ref, b3n_ref,  # Normal_estimation_network
               w1d_ref, b1d_ref, w2d_ref, b2d_ref, w3d_ref, b3d_ref,  # svbrdf diffuse-albedo head
               w1r_ref, b1r_ref, w2r_ref, b2r_ref, w3r_ref, b3r_ref,  # svbrdf roughness+specular head
               out_ref):
        data = data_ref[...]                             # [16, T] f32, channel-major
        hit = data[6:7, :]                               # hit mask (0/1)
        bg = data[11:14, :]                              # background RGB rows

        any_hit = any_hit_ref[pl.program_id(0)]

        # ---- all-background tile: skip the MLPs + SG shading entirely -------
        @pl.when(any_hit == 0)
        def _miss_tile():
            out_ref[...] = jnp.concatenate([jnp.clip(bg, 0.0, 1.0), hit], axis=0)

        @pl.when(any_hit != 0)
        def _shade_tile():
            # MLP input stays f32 (no bf16 quantization of raw coordinates).
            # Rows 3-7 (normals1 / hit / pad) sit in the K-pad positions and are
            # killed exactly by the zero-padded columns 3-7 of each first layer.
            x8 = data[0:8, :]

            def mlp(w1, b1, w2, b2, w3, b3):
                # per-head chain: only one [256,T] intermediate live at a time
                h = jnp.dot(w1[...], x8, preferred_element_type=jnp.float32)
                h = jnp.maximum(h + b1[...], 0.0).astype(jnp.bfloat16)
                h = jnp.dot(w2[...], h, preferred_element_type=jnp.float32)
                h = jnp.maximum(h + b2[...], 0.0).astype(jnp.bfloat16)
                return jnp.dot(w3[...], h, preferred_element_type=jnp.float32) + b3[...]

            head_n = mlp(w1n_ref, b1n_ref, w2n_ref, b2n_ref, w3n_ref, b3n_ref)   # [8, T]
            head_d = mlp(w1d_ref, b1d_ref, w2d_ref, b2d_ref, w3d_ref, b3d_ref)   # [8, T]
            head_r = mlp(w1r_ref, b1r_ref, w2r_ref, b2r_ref, w3r_ref, b3r_ref)   # [8, T]

            # nonlinearities on full 8-row blocks (same vreg count as sliced rows)
            sig8 = lambda z: 0.5 * (jnp.tanh(0.5 * z) + 1.0)     # exact sigmoid identity
            sd8 = sig8(head_d)
            sr8 = sig8(head_r)
            tn8 = jnp.tanh(head_n)

            albedo = sd8[0:3, :]                          # diffuse albedo [3, T]
            roughness = sr8[0:1, :]                       # [1, T]
            spec_refl = sr8[1:4, :]                       # [3, T]

            # ---- Normal_estimation_network head -> spherical-angle offsets --
            # TODO(synk): Normal_estimation_network source not provided; reconstructed
            # as MLP(points) -> tanh -> scaled (d_theta, d_phi) applied to normals1.
            angles = jnp.concatenate([tn8[0:1, :] * max_dt,
                                      tn8[1:2, :] * max_dp], axis=0)   # [2, T]
            cos_a = jnp.cos(angles)                       # one EUP pass for both angles
            sin_a = jnp.sin(angles)
            cos_dt, cos_dp = cos_a[0:1, :], cos_a[1:2, :]
            sin_dt, sin_dp = sin_a[0:1, :], sin_a[1:2, :]

            # ---- rotate normals1 by (d_theta, d_phi), renormalize -> normals2
            n1x, n1y, n1z = data[3:4, :], data[4:5, :], data[5:6, :]
            ny_c = jnp.clip(n1y, -1.0 + 1e-6, 1.0 - 1e-6)
            sin_t = jnp.sqrt(1.0 - ny_c * ny_c)
            ny2 = ny_c * cos_dt - sin_t * sin_dt          # cos(theta + dtheta)
            sin_t2 = sin_t * cos_dt + ny_c * sin_dt       # sin(theta + dtheta)
            sc = sin_t2 * pl.reciprocal(jnp.maximum(sin_t, 1e-6), approx=True)
            nx2 = sc * (n1x * cos_dp - n1z * sin_dp)
            nz2 = sc * (n1z * cos_dp + n1x * sin_dp)
            n = _normalize3((nx2, ny2, nz2))              # normals2

            v = (data[8:9, :], data[9:10, :], data[10:11, :])   # view dirs

            # ---- render_with_sg: light-independent warped-BRDF SG (per pixel)
            r2 = roughness * roughness
            inv_r4 = pl.reciprocal(r2 * r2 + TINY, approx=True)
            brdf_lam = 2.0 * inv_r4
            brdf_mu = inv_r4 * (1.0 / np.pi)
            ndv = _dot3(n, v)
            vdl = jnp.maximum(ndv, 0.0)                   # v . lobe  (= dot2)
            w = _normalize3((2.0 * vdl * n[0] - v[0],
                             2.0 * vdl * n[1] - v[1],
                             2.0 * vdl * n[2] - v[2]))
            warp_lam = brdf_lam * pl.reciprocal(4.0 * vdl + TINY, approx=True)
            hv = _normalize3((w[0] + v[0], w[1] + v[1], w[2] + v[2]))
            vdh = jnp.maximum(_dot3(v, hv), 0.0)
            # NOTE: 6.8316 matches the TANGO/PhySG reference implementation
            # (the UE4 paper uses 6.98316); kept as-is for parity.
            fres = spec_refl + (1.0 - spec_refl) * jnp.exp(
                -(5.55473 * vdh + 6.8316) * vdh * LN2)    # Fresnel [3, T]
            ndw = _dot3(w, n)
            dot1 = jnp.maximum(ndw, 0.0)
            dot2 = vdl
            kg = (roughness + 1.0) * (roughness + 1.0) * 0.125
            omk = 1.0 - kg
            G = (dot1 * pl.reciprocal(dot1 * omk + kg + TINY, approx=True)) \
                * (dot2 * pl.reciprocal(dot2 * omk + kg + TINY, approx=True))
            warp_mu = fres * (brdf_mu * G
                              * pl.reciprocal(4.0 * dot1 * dot2 + TINY, approx=True))
            inv_warp_lam = pl.reciprocal(warp_lam + TINY, approx=True)

            # ---- per-light-SG terms, vectorized over the SG (sublane) axis ---
            sgp = sg_ref[...]                             # [M_sg, 16]
            lx, ly, lz = sgp[:, 0:1], sgp[:, 1:2], sgp[:, 2:3]   # light lobes  [M, 1]
            llam = sgp[:, 3:4]                            # light lambdas
            lmu = sgp[:, 4:5]                             # grey light mu (white_light=True)
            rd = sgp[:, 5:6]                              # lambda_cos / llam
            tc, iac = sgp[:, 6:7], sgp[:, 7:8]            # hemi consts for llam
            elc, auc = sgp[:, 8:9], sgp[:, 9:10]

            dot_ln = lx * n[0] + ly * n[1] + lz * n[2]    # [M, T]

            # -- diffuse first (narrow live ranges): (light SG) x (cosine SG) --
            s_d = rd * rd + 1.0 + 2.0 * rd * dot_ln
            inv_td = lax.rsqrt(s_d + TINY)
            tmpd = jnp.minimum(s_d * inv_td, rd + 1.0)    # lambda-trick
            p_lam_d = llam * tmpd
            ed = jnp.exp(llam * (tmpd - rd - 1.0))
            d1d = inv_td * (rd + dot_ln)
            diff_terms = lmu * (MU_COS * ed * _hemi(p_lam_d, d1d)
                                - ALPHA_COS * _hemi_const(tc, iac, elc, auc, dot_ln))
            diff_shared = jnp.maximum(jnp.sum(diff_terms, axis=0, keepdims=True), 0.0)

            # -- specular: (light SG) x (warped BRDF SG), then x (cosine SG) --
            dot_lw = lx * w[0] + ly * w[1] + lz * w[2]    # [M, T]
            ratio1 = llam * inv_warp_lam
            s1 = ratio1 * ratio1 + 1.0 + 2.0 * ratio1 * dot_lw
            inv_t1 = lax.rsqrt(s1 + TINY)
            tmp1 = jnp.minimum(s1 * inv_t1, ratio1 + 1.0)
            f_lam = jnp.maximum(warp_lam * tmp1, LAM_FLOOR)
            e1 = jnp.exp(warp_lam * (tmp1 - ratio1 - 1.0))       # <= 1 after clamp
            dot_fn = inv_t1 * (ratio1 * dot_ln + ndw)            # final_lobe . n

            ratio2 = LAMBDA_COS * pl.reciprocal(f_lam, approx=True)
            s2 = ratio2 * ratio2 + 1.0 + 2.0 * ratio2 * dot_fn
            inv_t2 = lax.rsqrt(s2 + TINY)
            tmp2 = jnp.minimum(s2 * inv_t2, ratio2 + 1.0)
            p_lam = f_lam * tmp2
            e2 = jnp.exp(f_lam * (tmp2 - ratio2 - 1.0))
            d1 = inv_t2 * (ratio2 + dot_fn)                      # lobe_prime . n
            spec_terms = lmu * e1 * (MU_COS * e2 * _hemi(p_lam, d1)
                                     - ALPHA_COS * _hemi(f_lam, dot_fn))
            spec_shared = jnp.maximum(jnp.sum(spec_terms, axis=0, keepdims=True), 0.0)

            # RGB factors (warp_mu, albedo/pi) are SG-independent (white_light=True,
            # grey lgtSG mu) and non-negative, so factoring them out of the clamp
            # and the sublane reduction is exact.
            rgb = warp_mu * spec_shared + albedo * ((1.0 / np.pi) * diff_shared)

            # background compositing + clamp (sg_rgb_values = background; [hit] = rgb)
            img = jnp.clip(jnp.where(hit > 0.5, rgb, bg), 0.0, 1.0)
            out_ref[...] = jnp.concatenate([img, hit], axis=0)   # single [4,T] store
    return kernel


# ---------------------------------------------------------------- wrappers ---
def _pick_tile(n):
    # Largest tile up to 1024 (compute-bound kernel; amortizes grid-step
    # overhead; safe for v7x's smaller VMEM). Prefer an even grid so the
    # "parallel" axis load-balances across two TensorCores.
    for t in (1024, 512, 256, 128):
        if n % t == 0 and (n // t) % 2 == 0:
            return t
    for t in (1024, 512, 256, 128):
        if n % t == 0:
            return t
    raise ValueError("pixel count must be a multiple of 128")


def _vmem_limit_bytes(tile, weights, sgp):
    # explicit scoped-VMEM budget from the real per-tile footprint
    wbytes = sum(int(np.prod(w.shape)) * w.dtype.itemsize for w in weights)
    wbytes += int(np.prod(sgp.shape)) * 4
    io = 2 * (PACK_ROWS + 4) * 4 * tile          # double-buffered in/out tiles
    live = 64 * 8 * 4 * tile                     # headroom for live/spilled [8,T] f32 temps
    total = 2 * wbytes + io + live + (4 << 20)
    return int(min(max(total, 32 << 20), 48 << 20))


def render_views_pallas(packed, params, tile=None):
    rows, n = packed.shape
    assert rows == PACK_ROWS and n % 128 == 0
    if tile is None:
        tile = _pick_tile(n)
    grid = n // tile
    weights = params["weights"]
    sgp = params["sg_params"]
    kernel = _make_kernel(params["max_dt"], params["max_dp"])

    # per-tile "any pixel hit" flags -> scalar-prefetched so all-background
    # tiles skip the MLPs and the SG shading loop.
    any_hit = (jnp.max(packed[6, :].reshape(grid, tile), axis=1) > 0.5).astype(jnp.int32)

    in_specs = ([pl.BlockSpec((PACK_ROWS, tile), lambda i, ah: (0, i)),   # packed pixels
                 pl.BlockSpec(sgp.shape, lambda i, ah: (0, 0))]           # SG constants
                + [pl.BlockSpec(w.shape, lambda i, ah: (0, 0)) for w in weights])

    return pl.pallas_call(
        kernel,
        out_shape=jax.ShapeDtypeStruct((4, n), jnp.float32),
        grid_spec=pltpu.PrefetchScalarGridSpec(
            num_scalar_prefetch=1,
            grid=(grid,),
            in_specs=in_specs,
            out_specs=pl.BlockSpec((4, tile), lambda i, ah: (0, i)),      # lane-dense out
        ),
        compiler_params=pltpu.CompilerParams(
            dimension_semantics=("parallel",),
            vmem_limit_bytes=_vmem_limit_bytes(tile, weights, sgp)),
    )(any_hit, packed, sgp, *weights)


def make_view_inputs(width, elev, azim, radius, background):
    # TODO(synk): open3d RaycastingScene.create_rays_pinhole / cast_rays / PointCloud
    # have no Pallas/JAX equivalent; replaced by an analytic pinhole + unit-sphere
    # raycast producing points / normals1 / view_dirs / hit as the torch forward
    # consumes them, packed channel-major into one [16, N] array.
    fov = np.deg2rad(60.0)
    pos = jnp.array([radius * np.cos(elev) * np.cos(azim),
                     radius * np.sin(elev),
                     radius * np.cos(elev) * np.sin(azim)], jnp.float32)
    fwd = -pos / jnp.linalg.norm(pos)
    up = jnp.array([0.0, -1.0, 0.0], jnp.float32)
    right = jnp.cross(fwd, up)
    right = right / jnp.linalg.norm(right)
    upv = jnp.cross(right, fwd)
    half = float(np.tan(fov / 2.0))
    ys, xs = jnp.meshgrid(jnp.linspace(-half, half, width),
                          jnp.linspace(-half, half, width), indexing="ij")
    dirs = (fwd[None, None, :] + xs[..., None] * right[None, None, :]
            + ys[..., None] * upv[None, None, :])
    dirs = (dirs / jnp.linalg.norm(dirs, axis=-1, keepdims=True)).reshape(-1, 3)

    oc = pos[None, :]
    b = jnp.sum(dirs * oc, axis=-1)
    c = jnp.sum(oc * oc, axis=-1) - 1.0
    disc = b * b - c
    t = -b - jnp.sqrt(jnp.maximum(disc, 0.0))
    hit = (disc > 0.0) & (t > 0.0)
    pts = oc + t[:, None] * dirs
    nrm = pts / jnp.maximum(jnp.linalg.norm(pts, axis=-1, keepdims=True), 1e-8)
    pts = jnp.where(hit[:, None], pts, 0.0)
    nrm = jnp.where(hit[:, None], nrm, jnp.array([0.0, 1.0, 0.0]))

    n = width * width
    packed = jnp.zeros((PACK_ROWS, n), jnp.float32)
    packed = packed.at[0:3, :].set(pts.T.astype(jnp.float32))          # points
    packed = packed.at[3:6, :].set(nrm.T.astype(jnp.float32))          # normals1
    packed = packed.at[6, :].set(hit.astype(jnp.float32))              # hit mask
    packed = packed.at[8:11, :].set((-dirs).T.astype(jnp.float32))     # view dirs
    packed = packed.at[11:14, :].set(background.T.astype(jnp.float32))  # background
    return packed


def init_params(key, num_lgt_sgs=8, max_delta_theta=np.pi / 2, max_delta_phi=np.pi / 2):
    keys = jax.random.split(key, 10)

    def dense(k, fan_in, fan_out, pad_in=None, pad_out=None):
        # PyTorch nn.Linear default init, stored as [out, in] (channel-major matmul)
        k1, k2 = jax.random.split(k)
        bound = 1.0 / np.sqrt(fan_in)
        w = jax.random.uniform(k1, (fan_out, fan_in), jnp.float32, -bound, bound)
        b = jax.random.uniform(k2, (fan_out, 1), jnp.float32, -bound, bound)
        if pad_in is not None:
            w = jnp.pad(w, ((0, 0), (0, pad_in - fan_in)))
        if pad_out is not None:
            w = jnp.pad(w, ((0, pad_out - fan_out), (0, 0)))
            b = jnp.pad(b, ((0, pad_out - fan_out), (0, 0)))
        return w, b

    w1n, b1n = dense(keys[0], 3, HIDDEN, pad_in=PAD_IN)
    w2n, b2n = dense(keys[1], HIDDEN, HIDDEN)
    w3n, b3n = dense(keys[2], HIDDEN, 2, pad_out=PAD_OUT)   # (d_theta, d_phi)
    w1d, b1d = dense(keys[3], 3, HIDDEN, pad_in=PAD_IN)
    w2d, b2d = dense(keys[4], HIDDEN, HIDDEN)
    w3d, b3d = dense(keys[5], HIDDEN, 3, pad_out=PAD_OUT)   # diffuse albedo
    w1r, b1r = dense(keys[6], 3, HIDDEN, pad_in=PAD_IN)
    w2r, b2r = dense(keys[7], HIDDEN, HIDDEN)
    w3r, b3r = dense(keys[8], HIDDEN, 4, pad_out=PAD_OUT)   # roughness + specular(3)

    # First layers stay f32 (raw 3-D coords, no positional encoding to absorb a
    # bf16 quantization; K=8 makes the f32 matmul essentially free).  Hidden
    # layers go bf16 for full-rate MXU with f32 accumulation.
    bf = lambda w: w.astype(jnp.bfloat16)
    weights = [w1n, b1n, bf(w2n), b2n, bf(w3n), b3n,
               w1d, b1d, bf(w2d), b2d, bf(w3d), b3d,
               w1r, b1r, bf(w2r), b2r, bf(w3r), b3r]

    # learnable light SGs of svbrdf_network (white_light=True -> grey mu);
    # normalize(lobe)/abs(lambda, mu) is render_with_sg's per-SG constant
    # preprocessing, plus lambda-only hemisphere-integral constants, all done
    # once here so the kernel never materializes array constants.
    raw = np.asarray(jax.random.normal(keys[9], (num_lgt_sgs, 5)), dtype=np.float64)
    lobes = raw[:, :3] / np.maximum(np.linalg.norm(raw[:, :3], axis=-1, keepdims=True), 1e-8)
    lams = np.abs(raw[:, 3]) * 10.0 + 5.0
    mus = np.abs(raw[:, 4])

    M = int(np.ceil(num_lgt_sgs / 8) * 8)                   # pad SG count to sublane tile
    sgp = np.zeros((M, 16), np.float64)
    sgp[:, 3] = 10.0                                        # benign lambda for pad SGs
    sgp[:num_lgt_sgs, 0:3] = lobes
    sgp[:num_lgt_sgs, 3] = lams
    sgp[:num_lgt_sgs, 4] = mus                              # mu = 0 for pad SGs
    lam = sgp[:, 3]
    sgp[:, 5] = LAMBDA_COS / lam                            # ratio for cosine-SG trick
    lam2 = lam * lam
    t = np.sqrt(lam) * (1.6988 * lam2 + 10.8438 * lam) / (lam2 + 6.2201 * lam + 10.2415)
    sgp[:, 6] = t                                           # hemi consts for lam=l_lam
    sgp[:, 7] = np.exp(-t)
    e_lam = np.exp(-lam)
    sgp[:, 8] = e_lam
    sgp[:, 9] = 2.0 * np.pi / lam * (1.0 - e_lam)

    return {"weights": weights,
            "sg_params": jnp.asarray(sgp, jnp.float32),
            "max_dt": float(max_delta_theta), "max_dp": float(max_delta_phi)}


def neural_style_field_forward(params, num_views=2, center_elev=0.0, center_azim=0.0,
                               radius=2.0, width=16):
    n_pix = width * width
    background = jnp.zeros((n_pix, 3), jnp.float32)          # background='black'
    if num_views > 1:
        elevs = [center_elev] * num_views
        azims = [center_azim + i * (np.pi / 4) for i in range(num_views)]
    else:
        elevs, azims = [center_elev], [center_azim]
    # All views batched into ONE pallas_call: amortizes launch + weight DMA and
    # yields a long, even "parallel" grid for 2-TC sharding on v7x.
    packed = jnp.concatenate(
        [make_view_inputs(width, e, a, radius, background) for e, a in zip(elevs, azims)],
        axis=1)                                              # [16, num_views*n_pix]
    out = render_views_pallas(packed, params)                # (4, num_views*n_pix)
    # channel-major (4, N) slices reshape straight to NCHW (1, 4, W, W).
    return [out[:, i * n_pix:(i + 1) * n_pix].reshape(1, 4, width, width)
            for i in range(len(elevs))]


if __name__ == "__main__":
    key = jax.random.PRNGKey(0)
    params = init_params(key, num_lgt_sgs=8)
    outs = neural_style_field_forward(params, num_views=2, width=16)
    outs = [jax.block_until_ready(o) for o in outs]
    assert all(o.shape == (1, 4, 16, 16) for o in outs)
    assert all(o.dtype == jnp.float32 for o in outs)
    assert all(bool(jnp.isfinite(o).all()) for o in outs)
    print("KERNEL_OK")
</pallas_src>

<mosaic_0001>
module attributes {stable_mosaic.version = 11 : i64} {
  func.func @kernel(%arg0: i32, %arg1: memref<2xi32, #tpu.memory_space<smem>>, %arg2: memref<16x256xf32, #tpu.memory_space<vmem>>, %arg3: memref<8x16xf32, #tpu.memory_space<vmem>>, %arg4: memref<256x8xf32, #tpu.memory_space<vmem>>, %arg5: memref<256x1xf32, #tpu.memory_space<vmem>>, %arg6: memref<256x256xbf16, #tpu.memory_space<vmem>>, %arg7: memref<256x1xf32, #tpu.memory_space<vmem>>, %arg8: memref<8x256xbf16, #tpu.memory_space<vmem>>, %arg9: memref<8x1xf32, #tpu.memory_space<vmem>>, %arg10: memref<256x8xf32, #tpu.memory_space<vmem>>, %arg11: memref<256x1xf32, #tpu.memory_space<vmem>>, %arg12: memref<256x256xbf16, #tpu.memory_space<vmem>>, %arg13: memref<256x1xf32, #tpu.memory_space<vmem>>, %arg14: memref<8x256xbf16, #tpu.memory_space<vmem>>, %arg15: memref<8x1xf32, #tpu.memory_space<vmem>>, %arg16: memref<256x8xf32, #tpu.memory_space<vmem>>, %arg17: memref<256x1xf32, #tpu.memory_space<vmem>>, %arg18: memref<256x256xbf16, #tpu.memory_space<vmem>>, %arg19: memref<256x1xf32, #tpu.memory_space<vmem>>, %arg20: memref<8x256xbf16, #tpu.memory_space<vmem>>, %arg21: memref<8x1xf32, #tpu.memory_space<vmem>>, %arg22: memref<4x256xf32, #tpu.memory_space<vmem>>) attributes {dimension_semantics = [#tpu.dimension_semantics<parallel>], iteration_bounds = array<i64: 2>, scalar_prefetch = 1 : i64, scratch_operands = 0 : i64, tpu.core_type = #tpu.core_type<tc>, window_params = [{transform_indices = @transform_0, window_bounds = array<i64: 16, 256>}, {pipeline_mode = #tpu.pipeline_mode<synchronous>, transform_indices = @transform_1, window_bounds = array<i64: 8, 16>}, {pipeline_mode = #tpu.pipeline_mode<synchronous>, transform_indices = @transform_2, window_bounds = array<i64: 256, 8>}, {pipeline_mode = #tpu.pipeline_mode<synchronous>, transform_indices = @transform_3, window_bounds = array<i64: 256, 1>}, {pipeline_mode = #tpu.pipeline_mode<synchronous>, transform_indices = @transform_4, window_bounds = array<i64: 256, 256>}, {pipeline_mode = #tpu.pipeline_mode<synchronous>, transform_indices = @transform_5, window_bounds = array<i64: 256, 1>}, {pipeline_mode = #tpu.pipeline_mode<synchronous>, transform_indices = @transform_6, window_bounds = array<i64: 8, 256>}, {pipeline_mode = #tpu.pipeline_mode<synchronous>, transform_indices = @transform_7, window_bounds = array<i64: 8, 1>}, {pipeline_mode = #tpu.pipeline_mode<synchronous>, transform_indices = @transform_8, window_bounds = array<i64: 256, 8>}, {pipeline_mode = #tpu.pipeline_mode<synchronous>, transform_indices = @transform_9, window_bounds = array<i64: 256, 1>}, {pipeline_mode = #tpu.pipeline_mode<synchronous>, transform_indices = @transform_10, window_bounds = array<i64: 256, 256>}, {pipeline_mode = #tpu.pipeline_mode<synchronous>, transform_indices = @transform_11, window_bounds = array<i64: 256, 1>}, {pipeline_mode = #tpu.pipeline_mode<synchronous>, transform_indices = @transform_12, window_bounds = array<i64: 8, 256>}, {pipeline_mode = #tpu.pipeline_mode<synchronous>, transform_indices = @transform_13, window_bounds = array<i64: 8, 1>}, {pipeline_mode = #tpu.pipeline_mode<synchronous>, transform_indices = @transform_14, window_bounds = array<i64: 256, 8>}, {pipeline_mode = #tpu.pipeline_mode<synchronous>, transform_indices = @transform_15, window_bounds = array<i64: 256, 1>}, {pipeline_mode = #tpu.pipeline_mode<synchronous>, transform_indices = @transform_16, window_bounds = array<i64: 256, 256>}, {pipeline_mode = #tpu.pipeline_mode<synchronous>, transform_indices = @transform_17, window_bounds = array<i64: 256, 1>}, {pipeline_mode = #tpu.pipeline_mode<synchronous>, transform_indices = @transform_18, window_bounds = array<i64: 8, 256>}, {pipeline_mode = #tpu.pipeline_mode<synchronous>, transform_indices = @transform_19, window_bounds = array<i64: 8, 1>}, {transform_indices = @transform_20, window_bounds = array<i64: 4, 256>}]} {
    %c0 = arith.constant 0 : index
    %c0_0 = arith.constant 0 : index
    %0 = vector.load %arg2[%c0, %c0_0] : memref<16x256xf32, #tpu.memory_space<vmem>>, vector<16x256xf32>
    %1 = vector.extract_strided_slice %0 {offsets = [6, 0], sizes = [1, 256], strides = [1, 1]} : vector<16x256xf32> to vector<1x256xf32>
    %2 = vector.extract_strided_slice %0 {offsets = [11, 0], sizes = [3, 256], strides = [1, 1]} : vector<16x256xf32> to vector<3x256xf32>
    %3 = arith.index_cast %arg0 : i32 to index
    %4 = memref.load %arg1[%3] : memref<2xi32, #tpu.memory_space<smem>>
    %c0_i32 = arith.constant 0 : i32
    %5 = arith.cmpi eq, %4, %c0_i32 : i32
    %6 = arith.extui %5 : i1 to i32
    %c0_i32_1 = arith.constant 0 : i32
    %7 = arith.cmpi ne, %6, %c0_i32_1 : i32
    scf.if %7 {
      %cst = arith.constant 0.000000e+00 : f32
      %cst_4 = arith.constant 1.000000e+00 : f32
      %11 = vector.broadcast %cst : f32 to vector<3x256xf32>
      %12 = arith.maximumf %11, %2 : vector<3x256xf32>
      %13 = vector.broadcast %cst_4 : f32 to vector<3x256xf32>
      %14 = arith.minimumf %13, %12 : vector<3x256xf32>
      %15 = tpu.concatenate %14, %1 in 0 : vector<3x256xf32>, vector<1x256xf32> -> vector<4x256xf32>
      %c0_5 = arith.constant 0 : index
      %c0_6 = arith.constant 0 : index
      %16 = vector.load %arg22[%c0_5, %c0_6] : memref<4x256xf32, #tpu.memory_space<vmem>>, vector<4x256xf32>
      tpu.vector_store %arg22[%c0_5, %c0_6], %15 {strides = array<i32>} : memref<4x256xf32, #tpu.memory_space<vmem>>, vector<4x256xf32>,
    } else {
    }
    %c0_i32_2 = arith.constant 0 : i32
    %8 = arith.cmpi ne, %4, %c0_i32_2 : i32
    %9 = arith.extui %8 : i1 to i32
    %c0_i32_3 = arith.constant 0 : i32
    %10 = arith.cmpi ne, %9, %c0_i32_3 : i32
    scf.if %10 {
      %11 = vector.extract_strided_slice %0 {offsets = [0, 0], sizes = [8, 256], strides = [1, 1]} : vector<16x256xf32> to vector<8x256xf32>
      %c0_4 = arith.constant 0 : index
      %c0_5 = arith.constant 0 : index
      %12 = vector.load %arg4[%c0_4, %c0_5] : memref<256x8xf32, #tpu.memory_space<vmem>>, vector<256x8xf32>
      %cst = arith.constant dense<0.000000e+00> : vector<256x256xf32>
      %13 = tpu.matmul %12, %11, %cst {dimension_numbers = #tpu.dot_dimension_numbers<[1], [0], [0], [1], [0, 0, 1, 1], [], []>} : vector<256x8xf32>, vector<8x256xf32>, vector<256x256xf32> -> vector<256x256xf32>
      %c0_6 = arith.constant 0 : index
      %c0_7 = arith.constant 0 : index
      %14 = vector.load %arg5[%c0_6, %c0_7] : memref<256x1xf32, #tpu.memory_space<vmem>>, vector<256x1xf32>
      %15 = vector.broadcast %14 : vector<256x1xf32> to vector<256x256xf32>
      %16 = arith.addf %13, %15 : vector<256x256xf32>
      %cst_8 = arith.constant 0.000000e+00 : f32
      %17 = vector.broadcast %cst_8 : f32 to vector<256x256xf32>
      %18 = arith.maximumf %16, %17 : vector<256x256xf32>
      %19 = arith.truncf %18 : vector<256x256xf32> to vector<256x256xbf16>
      %c0_9 = arith.constant 0 : index
      %c0_10 = arith.constant 0 : index
      %20 = vector.load %arg6[%c0_9, %c0_10] : memref<256x256xbf16, #tpu.memory_space<vmem>>, vector<256x256xbf16>
      %cst_11 = arith.constant dense<0.000000e+00> : vector<256x256xf32>
      %21 = tpu.matmul %20, %19, %cst_11 {dimension_numbers = #tpu.dot_dimension_numbers<[1], [0], [0], [1], [0, 0, 1, 1], [], []>} : vector<256x256xbf16>, vector<256x256xbf16>, vector<256x256xf32> -> vector<256x256xf32>
      %c0_12 = arith.constant 0 : index
      %c0_13 = arith.constant 0 : index
      %22 = vector.load %arg7[%c0_12, %c0_13] : memref<256x1xf32, #tpu.memory_space<vmem>>, vector<256x1xf32>
      %23 = vector.broadcast %22 : vector<256x1xf32> to vector<256x256xf32>
      %24 = arith.addf %21, %23 : vector<256x256xf32>
      %cst_14 = arith.constant 0.000000e+00 : f32
      %25 = vector.broadcast %cst_14 : f32 to vector<256x256xf32>
      %26 = arith.maximumf %24, %25 : vector<256x256xf32>
      %27 = arith.truncf %26 : vector<256x256xf32> to vector<256x256xbf16>
      %c0_15 = arith.constant 0 : index
      %c0_16 = arith.constant 0 : index
      %28 = vector.load %arg8[%c0_15, %c0_16] : memref<8x256xbf16, #tpu.memory_space<vmem>>, vector<8x256xbf16>
      %cst_17 = arith.constant dense<0.000000e+00> : vector<8x256xf32>
      %29 = tpu.matmul %28, %27, %cst_17 {dimension_numbers = #tpu.dot_dimension_numbers<[1], [0], [0], [1], [0, 0, 1, 1], [], []>} : vector<8x256xbf16>, vector<256x256xbf16>, vector<8x256xf32> -> vector<8x256xf32>
      %c0_18 = arith.constant 0 : index
      %c0_19 = arith.constant 0 : index
      %30 = vector.load %arg9[%c0_18, %c0_19] : memref<8x1xf32, #tpu.memory_space<vmem>>, vector<8x1xf32>
      %31 = vector.broadcast %30 : vector<8x1xf32> to vector<8x256xf32>
      %32 = arith.addf %29, %31 : vector<8x256xf32>
      %c0_20 = arith.constant 0 : index
      %c0_21 = arith.constant 0 : index
      %33 = vector.load %arg10[%c0_20, %c0_21] : memref<256x8xf32, #tpu.memory_space<vmem>>, vector<256x8xf32>
      %cst_22 = arith.constant dense<0.000000e+00> : vector<256x256xf32>
      %34 = tpu.matmul %33, %11, %cst_22 {dimension_numbers = #tpu.dot_dimension_numbers<[1], [0], [0], [1], [0, 0, 1, 1], [], []>} : vector<256x8xf32>, vector<8x256xf32>, vector<256x256xf32> -> vector<256x256xf32>
      %c0_23 = arith.constant 0 : index
      %c0_24 = arith.constant 0 : index
      %35 = vector.load %arg11[%c0_23, %c0_24] : memref<256x1xf32, #tpu.memory_space<vmem>>, vector<256x1xf32>
      %36 = vector.broadcast %35 : vector<256x1xf32> to vector<256x256xf32>
      %37 = arith.addf %34, %36 : vector<256x256xf32>
      %cst_25 = arith.constant 0.000000e+00 : f32
      %38 = vector.broadcast %cst_25 : f32 to vector<256x256xf32>
      %39 = arith.maximumf %37, %38 : vector<256x256xf32>
      %40 = arith.truncf %39 : vector<256x256xf32> to vector<256x256xbf16>
      %c0_26 = arith.constant 0 : index
      %c0_27 = arith.constant 0 : index
      %41 = vector.load %arg12[%c0_26, %c0_27] : memref<256x256xbf16, #tpu.memory_space<vmem>>, vector<256x256xbf16>
      %cst_28 = arith.constant dense<0.000000e+00> : vector<256x256xf32>
      %42 = tpu.matmul %41, %40, %cst_28 {dimension_numbers = #tpu.dot_dimension_numbers<[1], [0], [0], [1], [0, 0, 1, 1], [], []>} : vector<256x256xbf16>, vector<256x256xbf16>, vector<256x256xf32> -> vector<256x256xf32>
      %c0_29 = arith.constant 0 : index
      %c0_30 = arith.constant 0 : index
      %43 = vector.load %arg13[%c0_29, %c0_30] : memref<256x1xf32, #tpu.memory_space<vmem>>, vector<256x1xf32>
      %44 = vector.broadcast %43 : vector<256x1xf32> to vector<256x256xf32>
      %45 = arith.addf %42, %44 : vector<256x256xf32>
      %cst_31 = arith.constant 0.000000e+00 : f32
      %46 = vector.broadcast %cst_31 : f32 to vector<256x256xf32>
      %47 = arith.maximumf %45, %46 : vector<256x256xf32>
      %48 = arith.truncf %47 : vector<256x256xf32> to vector<256x256xbf16>
      %c0_32 = arith.constant 0 : index
      %c0_33 = arith.constant 0 : index
      %49 = vector.load %arg14[%c0_32, %c0_33] : memref<8x256xbf16, #tpu.memory_space<vmem>>, vector<8x256xbf16>
      %cst_34 = arith.constant dense<0.000000e+00> : vector<8x256xf32>
      %50 = tpu.matmul %49, %48, %cst_34 {dimension_numbers = #tpu.dot_dimension_numbers<[1], [0], [0], [1], [0, 0, 1, 1], [], []>} : vector<8x256xbf16>, vector<256x256xbf16>, vector<8x256xf32> -> vector<8x256xf32>
      %c0_35 = arith.constant 0 : index
      %c0_36 = arith.constant 0 : index
      %51 = vector.load %arg15[%c0_35, %c0_36] : memref<8x1xf32, #tpu.memory_space<vmem>>, vector<8x1xf32>
      %52 = vector.broadcast %51 : vector<8x1xf32> to vector<8x256xf32>
      %53 = arith.addf %50, %52 : vector<8x256xf32>
      %c0_37 = arith.constant 0 : index
      %c0_38 = arith.constant 0 : index
      %54 = vector.load %arg16[%c0_37, %c0_38] : memref<256x8xf32, #tpu.memory_space<vmem>>, vector<256x8xf32>
      %cst_39 = arith.constant dense<0.000000e+00> : vector<256x256xf32>
      %55 = tpu.matmul %54, %11, %cst_39 {dimension_numbers = #tpu.dot_dimension_numbers<[1], [0], [0], [1], [0, 0, 1, 1], [], []>} : vector<256x8xf32>, vector<8x256xf32>, vector<256x256xf32> -> vector<256x256xf32>
      %c0_40 = arith.constant 0 : index
      %c0_41 = arith.constant 0 : index
      %56 = vector.load %arg17[%c0_40, %c0_41] : memref<256x1xf32, #tpu.memory_space<vmem>>, vector<256x1xf32>
      %57 = vector.broadcast %56 : vector<256x1xf32> to vector<256x256xf32>
      %58 = arith.addf %55, %57 : vector<256x256xf32>
      %cst_42 = arith.constant 0.000000e+00 : f32
      %59 = vector.broadcast %cst_42 : f32 to vector<256x256xf32>
      %60 = arith.maximumf %58, %59 : vector<256x256xf32>
      %61 = arith.truncf %60 : vector<256x256xf32> to vector<256x256xbf16>
      %c0_43 = arith.constant 0 : index
      %c0_44 = arith.constant 0 : index
      %62 = vector.load %arg18[%c0_43, %c0_44] : memref<256x256xbf16, #tpu.memory_space<vmem>>, vector<256x256xbf16>
      %cst_45 = arith.constant dense<0.000000e+00> : vector<256x256xf32>
      %63 = tpu.matmul %62, %61, %cst_45 {dimension_numbers = #tpu.dot_dimension_numbers<[1], [0], [0], [1], [0, 0, 1, 1], [], []>} : vector<256x256xbf16>, vector<256x256xbf16>, vector<256x256xf32> -> vector<256x256xf32>
      %c0_46 = arith.constant 0 : index
      %c0_47 = arith.constant 0 : index
      %64 = vector.load %arg19[%c0_46, %c0_47] : memref<256x1xf32, #tpu.memory_space<vmem>>, vector<256x1xf32>
      %65 = vector.broadcast %64 : vector<256x1xf32> to vector<256x256xf32>
      %66 = arith.addf %63, %65 : vector<256x256xf32>
      %cst_48 = arith.constant 0.000000e+00 : f32
      %67 = vector.broadcast %cst_48 : f32 to vector<256x256xf32>
      %68 = arith.maximumf %66, %67 : vector<256x256xf32>
      %69 = arith.truncf %68 : vector<256x256xf32> to vector<256x256xbf16>
      %c0_49 = arith.constant 0 : index
      %c0_50 = arith.constant 0 : index
      %70 = vector.load %arg20[%c0_49, %c0_50] : memref<8x256xbf16, #tpu.memory_space<vmem>>, vector<8x256xbf16>
      %cst_51 = arith.constant dense<0.000000e+00> : vector<8x256xf32>
      %71 = tpu.matmul %70, %69, %cst_51 {dimension_numbers = #tpu.dot_dimension_numbers<[1], [0], [0], [1], [0, 0, 1, 1], [], []>} : vector<8x256xbf16>, vector<256x256xbf16>, vector<8x256xf32> -> vector<8x256xf32>
      %c0_52 = arith.constant 0 : index
      %c0_53 = arith.constant 0 : index
      %72 = vector.load %arg21[%c0_52, %c0_53] : memref<8x1xf32, #tpu.memory_space<vmem>>, vector<8x1xf32>
      %73 = vector.broadcast %72 : vector<8x1xf32> to vector<8x256xf32>
      %74 = arith.addf %71, %73 : vector<8x256xf32>
      %cst_54 = arith.constant 5.000000e-01 : f32
      %75 = vector.broadcast %cst_54 : f32 to vector<8x256xf32>
      %76 = arith.mulf %75, %53 : vector<8x256xf32>
      %77 = math.tanh %76 : vector<8x256xf32>
      %cst_55 = arith.constant 1.000000e+00 : f32
      %78 = vector.broadcast %cst_55 : f32 to vector<8x256xf32>
      %79 = arith.addf %77, %78 : vector<8x256xf32>
      %cst_56 = arith.constant 5.000000e-01 : f32
      %80 = vector.broadcast %cst_56 : f32 to vector<8x256xf32>
      %81 = arith.mulf %80, %79 : vector<8x256xf32>
      %cst_57 = arith.constant 5.000000e-01 : f32
      %82 = vector.broadcast %cst_57 : f32 to vector<8x256xf32>
      %83 = arith.mulf %82, %74 : vector<8x256xf32>
      %84 = math.tanh %83 : vector<8x256xf32>
      %cst_58 = arith.constant 1.000000e+00 : f32
      %85 = vector.broadcast %cst_58 : f32 to vector<8x256xf32>
      %86 = arith.addf %84, %85 : vector<8x256xf32>
      %cst_59 = arith.constant 5.000000e-01 : f32
      %87 = vector.broadcast %cst_59 : f32 to vector<8x256xf32>
      %88 = arith.mulf %87, %86 : vector<8x256xf32>
      %89 = math.tanh %32 : vector<8x256xf32>
      %90 = vector.extract_strided_slice %81 {offsets = [0, 0], sizes = [3, 256], strides = [1, 1]} : vector<8x256xf32> to vector<3x256xf32>
      %91 = vector.extract_strided_slice %88 {offsets = [0, 0], sizes = [1, 256], strides = [1, 1]} : vector<8x256xf32> to vector<1x256xf32>
      %92 = vector.extract_strided_slice %88 {offsets = [1, 0], sizes = [3, 256], strides = [1, 1]} : vector<8x256xf32> to vector<3x256xf32>
      %93 = vector.extract_strided_slice %89 {offsets = [0, 0], sizes = [1, 256], strides = [1, 1]} : vector<8x256xf32> to vector<1x256xf32>
      %cst_60 = arith.constant 1.57079637 : f32
      %94 = vector.broadcast %cst_60 : f32 to vector<1x256xf32>
      %95 = arith.mulf %93, %94 : vector<1x256xf32>
      %96 = vector.extract_strided_slice %89 {offsets = [1, 0], sizes = [1, 256], strides = [1, 1]} : vector<8x256xf32> to vector<1x256xf32>
      %cst_61 = arith.constant 1.57079637 : f32
      %97 = vector.broadcast %cst_61 : f32 to vector<1x256xf32>
      %98 = arith.mulf %96, %97 : vector<1x256xf32>
      %99 = tpu.concatenate %95, %98 in 0 : vector<1x256xf32>, vector<1x256xf32> -> vector<2x256xf32>
      %100 = math.cos %99 : vector<2x256xf32>
      %101 = math.sin %99 : vector<2x256xf32>
      %102 = vector.extract_strided_slice %100 {offsets = [0, 0], sizes = [1, 256], strides = [1, 1]} : vector<2x256xf32> to vector<1x256xf32>
      %103 = vector.extract_strided_slice %100 {offsets = [1, 0], sizes = [1, 256], strides = [1, 1]} : vector<2x256xf32> to vector<1x256xf32>
      %104 = vector.extract_strided_slice %101 {offsets = [0, 0], sizes = [1, 256], strides = [1, 1]} : vector<2x256xf32> to vector<1x256xf32>
      %105 = vector.extract_strided_slice %101 {offsets = [1, 0], sizes = [1, 256], strides = [1, 1]} : vector<2x256xf32> to vector<1x256xf32>
      %106 = vector.extract_strided_slice %0 {offsets = [3, 0], sizes = [1, 256], strides = [1, 1]} : vector<16x256xf32> to vector<1x256xf32>
      %107 = vector.extract_strided_slice %0 {offsets = [4, 0], sizes = [1, 256], strides = [1, 1]} : vector<16x256xf32> to vector<1x256xf32>
      %108 = vector.extract_strided_slice %0 {offsets = [5, 0], sizes = [1, 256], strides = [1, 1]} : vector<16x256xf32> to vector<1x256xf32>
      %cst_62 = arith.constant -0.999998986 : f32
      %cst_63 = arith.constant 0.999998986 : f32
      %109 = vector.broadcast %cst_62 : f32 to vector<1x256xf32>
      %110 = arith.maximumf %109, %107 : vector<1x256xf32>
      %111 = vector.broadcast %cst_63 : f32 to vector<1x256xf32>
      %112 = arith.minimumf %111, %110 : vector<1x256xf32>
      %113 = arith.mulf %112, %112 : vector<1x256xf32>
      %cst_64 = arith.constant 1.000000e+00 : f32
      %114 = vector.broadcast %cst_64 : f32 to vector<1x256xf32>
      %115 = arith.subf %114, %113 : vector<1x256xf32>
      %116 = math.sqrt %115 : vector<1x256xf32>
      %117 = arith.mulf %112, %102 : vector<1x256xf32>
      %118 = arith.mulf %116, %104 : vector<1x256xf32>
      %119 = arith.subf %117, %118 : vector<1x256xf32>
      %120 = arith.mulf %116, %102 : vector<1x256xf32>
      %121 = arith.mulf %112, %104 : vector<1x256xf32>
      %122 = arith.addf %120, %121 : vector<1x256xf32>
      %cst_65 = arith.constant 9.99999997E-7 : f32
      %123 = vector.broadcast %cst_65 : f32 to vector<1x256xf32>
      %124 = arith.maximumf %116, %123 : vector<1x256xf32>
      %125 = tpu.reciprocal %124 {approx = true} : vector<1x256xf32> -> vector<1x256xf32>
      %126 = arith.mulf %122, %125 : vector<1x256xf32>
      %127 = arith.mulf %106, %103 : vector<1x256xf32>
      %128 = arith.mulf %108, %105 : vector<1x256xf32>
      %129 = arith.subf %127, %128 : vector<1x256xf32>
      %130 = arith.mulf %126, %129 : vector<1x256xf32>
      %131 = arith.mulf %108, %103 : vector<1x256xf32>
      %132 = arith.mulf %106, %105 : vector<1x256xf32>
      %133 = arith.addf %131, %132 : vector<1x256xf32>
      %134 = arith.mulf %126, %133 : vector<1x256xf32>
      %135 = arith.mulf %130, %130 : vector<1x256xf32>
      %136 = arith.mulf %119, %119 : vector<1x256xf32>
      %137 = arith.addf %135, %136 : vector<1x256xf32>
      %138 = arith.mulf %134, %134 : vector<1x256xf32>
      %139 = arith.addf %137, %138 : vector<1x256xf32>
      %cst_66 = arith.constant 9.99999993E-9 : f32
      %140 = vector.broadcast %cst_66 : f32 to vector<1x256xf32>
      %141 = arith.addf %139, %140 : vector<1x256xf32>
      %142 = math.rsqrt %141 : vector<1x256xf32>
      %143 = arith.mulf %130, %142 : vector<1x256xf32>
      %144 = arith.mulf %119, %142 : vector<1x256xf32>
      %145 = arith.mulf %134, %142 : vector<1x256xf32>
      %146 = vector.extract_strided_slice %0 {offsets = [8, 0], sizes = [1, 256], strides = [1, 1]} : vector<16x256xf32> to vector<1x256xf32>
      %147 = vector.extract_strided_slice %0 {offsets = [9, 0], sizes = [1, 256], strides = [1, 1]} : vector<16x256xf32> to vector<1x256xf32>
      %148 = vector.extract_strided_slice %0 {offsets = [10, 0], sizes = [1, 256], strides = [1, 1]} : vector<16x256xf32> to vector<1x256xf32>
      %149 = arith.mulf %91, %91 : vector<1x256xf32>
      %150 = arith.mulf %149, %149 : vector<1x256xf32>
      %cst_67 = arith.constant 9.99999993E-9 : f32
      %151 = vector.broadcast %cst_67 : f32 to vector<1x256xf32>
      %152 = arith.addf %150, %151 : vector<1x256xf32>
      %153 = tpu.reciprocal %152 {approx = true} : vector<1x256xf32> -> vector<1x256xf32>
      %cst_68 = arith.constant 2.000000e+00 : f32
      %154 = vector.broadcast %cst_68 : f32 to vector<1x256xf32>
      %155 = arith.mulf %154, %153 : vector<1x256xf32>
      %cst_69 = arith.constant 0.318309873 : f32
      %156 = vector.broadcast %cst_69 : f32 to vector<1x256xf32>
      %157 = arith.mulf %153, %156 : vector<1x256xf32>
      %158 = arith.mulf %143, %146 : vector<1x256xf32>
      %159 = arith.mulf %144, %147 : vector<1x256xf32>
      %160 = arith.addf %158, %159 : vector<1x256xf32>
      %161 = arith.mulf %145, %148 : vector<1x256xf32>
      %162 = arith.addf %160, %161 : vector<1x256xf32>
      %cst_70 = arith.constant 0.000000e+00 : f32
      %163 = vector.broadcast %cst_70 : f32 to vector<1x256xf32>
      %164 = arith.maximumf %162, %163 : vector<1x256xf32>
      %cst_71 = arith.constant 2.000000e+00 : f32
      %165 = vector.broadcast %cst_71 : f32 to vector<1x256xf32>
      %166 = arith.mulf %165, %164 : vector<1x256xf32>
      %167 = arith.mulf %166, %143 : vector<1x256xf32>
      %168 = arith.subf %167, %146 : vector<1x256xf32>
      %cst_72 = arith.constant 2.000000e+00 : f32
      %169 = vector.broadcast %cst_72 : f32 to vector<1x256xf32>
      %170 = arith.mulf %169, %164 : vector<1x256xf32>
      %171 = arith.mulf %170, %144 : vector<1x256xf32>
      %172 = arith.subf %171, %147 : vector<1x256xf32>
      %cst_73 = arith.constant 2.000000e+00 : f32
      %173 = vector.broadcast %cst_73 : f32 to vector<1x256xf32>
      %174 = arith.mulf %173, %164 : vector<1x256xf32>
      %175 = arith.mulf %174, %145 : vector<1x256xf32>
      %176 = arith.subf %175, %148 : vector<1x256xf32>
      %177 = arith.mulf %168, %168 : vector<1x256xf32>
      %178 = arith.mulf %172, %172 : vector<1x256xf32>
      %179 = arith.addf %177, %178 : vector<1x256xf32>
      %180 = arith.mulf %176, %176 : vector<1x256xf32>
      %181 = arith.addf %179, %180 : vector<1x256xf32>
      %cst_74 = arith.constant 9.99999993E-9 : f32
      %182 = vector.broadcast %cst_74 : f32 to vector<1x256xf32>
      %183 = arith.addf %181, %182 : vector<1x256xf32>
      %184 = math.rsqrt %183 : vector<1x256xf32>
      %185 = arith.mulf %168, %184 : vector<1x256xf32>
      %186 = arith.mulf %172, %184 : vector<1x256xf32>
      %187 = arith.mulf %176, %184 : vector<1x256xf32>
      %cst_75 = arith.constant 4.000000e+00 : f32
      %188 = vector.broadcast %cst_75 : f32 to vector<1x256xf32>
      %189 = arith.mulf %188, %164 : vector<1x256xf32>
      %cst_76 = arith.constant 9.99999993E-9 : f32
      %190 = vector.broadcast %cst_76 : f32 to vector<1x256xf32>
      %191 = arith.addf %189, %190 : vector<1x256xf32>
      %192 = tpu.reciprocal %191 {approx = true} : vector<1x256xf32> -> vector<1x256xf32>
      %193 = arith.mulf %155, %192 : vector<1x256xf32>
      %194 = arith.addf %185, %146 : vector<1x256xf32>
      %195 = arith.addf %186, %147 : vector<1x256xf32>
      %196 = arith.addf %187, %148 : vector<1x256xf32>
      %197 = arith.mulf %194, %194 : vector<1x256xf32>
      %198 = arith.mulf %195, %195 : vector<1x256xf32>
      %199 = arith.addf %197, %198 : vector<1x256xf32>
      %200 = arith.mulf %196, %196 : vector<1x256xf32>
      %201 = arith.addf %199, %200 : vector<1x256xf32>
      %cst_77 = arith.constant 9.99999993E-9 : f32
      %202 = vector.broadcast %cst_77 : f32 to vector<1x256xf32>
      %203 = arith.addf %201, %202 : vector<1x256xf32>
      %204 = math.rsqrt %203 : vector<1x256xf32>
      %205 = arith.mulf %194, %204 : vector<1x256xf32>
      %206 = arith.mulf %195, %204 : vector<1x256xf32>
      %207 = arith.mulf %196, %204 : vector<1x256xf32>
      %208 = arith.mulf %146, %205 : vector<1x256xf32>
      %209 = arith.mulf %147, %206 : vector<1x256xf32>
      %210 = arith.addf %208, %209 : vector<1x256xf32>
      %211 = arith.mulf %148, %207 : vector<1x256xf32>
      %212 = arith.addf %210, %211 : vector<1x256xf32>
      %cst_78 = arith.constant 0.000000e+00 : f32
      %213 = vector.broadcast %cst_78 : f32 to vector<1x256xf32>
      %214 = arith.maximumf %212, %213 : vector<1x256xf32>
      %cst_79 = arith.constant 1.000000e+00 : f32
      %215 = vector.broadcast %cst_79 : f32 to vector<3x256xf32>
      %216 = arith.subf %215, %92 : vector<3x256xf32>
      %cst_80 = arith.constant 5.554730e+00 : f32
      %217 = vector.broadcast %cst_80 : f32 to vector<1x256xf32>
      %218 = arith.mulf %217, %214 : vector<1x256xf32>
      %cst_81 = arith.constant 6.831600e+00 : f32
      %219 = vector.broadcast %cst_81 : f32 to vector<1x256xf32>
      %220 = arith.addf %218, %219 : vector<1x256xf32>
      %cst_82 = arith.constant 0.000000e+00 : f32
      %221 = vector.broadcast %cst_82 : f32 to vector<1x256xf32>
      %222 = arith.subf %221, %220 : vector<1x256xf32>
      %223 = arith.mulf %222, %214 : vector<1x256xf32>
      %cst_83 = arith.constant 0.693147182 : f32
      %224 = vector.broadcast %cst_83 : f32 to vector<1x256xf32>
      %225 = arith.mulf %223, %224 : vector<1x256xf32>
      %226 = math.exp %225 : vector<1x256xf32>
      %227 = vector.broadcast %226 : vector<1x256xf32> to vector<3x256xf32>
      %228 = arith.mulf %216, %227 : vector<3x256xf32>
      %229 = arith.addf %92, %228 : vector<3x256xf32>
      %230 = arith.mulf %185, %143 : vector<1x256xf32>
      %231 = arith.mulf %186, %144 : vector<1x256xf32>
      %232 = arith.addf %230, %231 : vector<1x256xf32>
      %233 = arith.mulf %187, %145 : vector<1x256xf32>
      %234 = arith.addf %232, %233 : vector<1x256xf32>
      %cst_84 = arith.constant 0.000000e+00 : f32
      %235 = vector.broadcast %cst_84 : f32 to vector<1x256xf32>
      %236 = arith.maximumf %234, %235 : vector<1x256xf32>
      %cst_85 = arith.constant 1.000000e+00 : f32
      %237 = vector.broadcast %cst_85 : f32 to vector<1x256xf32>
      %238 = arith.addf %91, %237 : vector<1x256xf32>
      %cst_86 = arith.constant 1.000000e+00 : f32
      %239 = vector.broadcast %cst_86 : f32 to vector<1x256xf32>
      %240 = arith.addf %91, %239 : vector<1x256xf32>
      %241 = arith.mulf %238, %240 : vector<1x256xf32>
      %cst_87 = arith.constant 1.250000e-01 : f32
      %242 = vector.broadcast %cst_87 : f32 to vector<1x256xf32>
      %243 = arith.mulf %241, %242 : vector<1x256xf32>
      %cst_88 = arith.constant 1.000000e+00 : f32
      %244 = vector.broadcast %cst_88 : f32 to vector<1x256xf32>
      %245 = arith.subf %244, %243 : vector<1x256xf32>
      %246 = arith.mulf %236, %245 : vector<1x256xf32>
      %247 = arith.addf %246, %243 : vector<1x256xf32>
      %cst_89 = arith.constant 9.99999993E-9 : f32
      %248 = vector.broadcast %cst_89 : f32 to vector<1x256xf32>
      %249 = arith.addf %247, %248 : vector<1x256xf32>
      %250 = tpu.reciprocal %249 {approx = true} : vector<1x256xf32> -> vector<1x256xf32>
      %251 = arith.mulf %236, %250 : vector<1x256xf32>
      %252 = arith.mulf %164, %245 : vector<1x256xf32>
      %253 = arith.addf %252, %243 : vector<1x256xf32>
      %cst_90 = arith.constant 9.99999993E-9 : f32
      %254 = vector.broadcast %cst_90 : f32 to vector<1x256xf32>
      %255 = arith.addf %253, %254 : vector<1x256xf32>
      %256 = tpu.reciprocal %255 {approx = true} : vector<1x256xf32> -> vector<1x256xf32>
      %257 = arith.mulf %164, %256 : vector<1x256xf32>
      %258 = arith.mulf %251, %257 : vector<1x256xf32>
      %259 = arith.mulf %157, %258 : vector<1x256xf32>
      %cst_91 = arith.constant 4.000000e+00 : f32
      %260 = vector.broadcast %cst_91 : f32 to vector<1x256xf32>
      %261 = arith.mulf %260, %236 : vector<1x256xf32>
      %262 = arith.mulf %261, %164 : vector<1x256xf32>
      %cst_92 = arith.constant 9.99999993E-9 : f32
      %263 = vector.broadcast %cst_92 : f32 to vector<1x256xf32>
      %264 = arith.addf %262, %263 : vector<1x256xf32>
      %265 = tpu.reciprocal %264 {approx = true} : vector<1x256xf32> -> vector<1x256xf32>
      %266 = arith.mulf %259, %265 : vector<1x256xf32>
      %267 = vector.broadcast %266 : vector<1x256xf32> to vector<3x256xf32>
      %268 = arith.mulf %229, %267 : vector<3x256xf32>
      %cst_93 = arith.constant 9.99999993E-9 : f32
      %269 = vector.broadcast %cst_93 : f32 to vector<1x256xf32>
      %270 = arith.addf %193, %269 : vector<1x256xf32>
      %271 = tpu.reciprocal %270 {approx = true} : vector<1x256xf32> -> vector<1x256xf32>
      %c0_94 = arith.constant 0 : index
      %c0_95 = arith.constant 0 : index
      %272 = vector.load %arg3[%c0_94, %c0_95] : memref<8x16xf32, #tpu.memory_space<vmem>>, vector<8x16xf32>
      %273 = vector.extract_strided_slice %272 {offsets = [0, 0], sizes = [8, 1], strides = [1, 1]} : vector<8x16xf32> to vector<8x1xf32>
      %274 = vector.extract_strided_slice %272 {offsets = [0, 1], sizes = [8, 1], strides = [1, 1]} : vector<8x16xf32> to vector<8x1xf32>
      %275 = vector.extract_strided_slice %272 {offsets = [0, 2], sizes = [8, 1], strides = [1, 1]} : vector<8x16xf32> to vector<8x1xf32>
      %276 = vector.extract_strided_slice %272 {offsets = [0, 3], sizes = [8, 1], strides = [1, 1]} : vector<8x16xf32> to vector<8x1xf32>
      %277 = vector.extract_strided_slice %272 {offsets = [0, 4], sizes = [8, 1], strides = [1, 1]} : vector<8x16xf32> to vector<8x1xf32>
      %278 = vector.extract_strided_slice %272 {offsets = [0, 5], sizes = [8, 1], strides = [1, 1]} : vector<8x16xf32> to vector<8x1xf32>
      %279 = vector.extract_strided_slice %272 {offsets = [0, 6], sizes = [8, 1], strides = [1, 1]} : vector<8x16xf32> to vector<8x1xf32>
      %280 = vector.extract_strided_slice %272 {offsets = [0, 7], sizes = [8, 1], strides = [1, 1]} : vector<8x16xf32> to vector<8x1xf32>
      %281 = vector.extract_strided_slice %272 {offsets = [0, 8], sizes = [8, 1], strides = [1, 1]} : vector<8x16xf32> to vector<8x1xf32>
      %282 = vector.extract_strided_slice %272 {offsets = [0, 9], sizes = [8, 1], strides = [1, 1]} : vector<8x16xf32> to vector<8x1xf32>
      %283 = vector.broadcast %273 : vector<8x1xf32> to vector<8x256xf32>
      %284 = vector.broadcast %143 : vector<1x256xf32> to vector<8x256xf32>
      %285 = arith.mulf %283, %284 : vector<8x256xf32>
      %286 = vector.broadcast %274 : vector<8x1xf32> to vector<8x256xf32>
      %287 = vector.broadcast %144 : vector<1x256xf32> to vector<8x256xf32>
      %288 = arith.mulf %286, %287 : vector<8x256xf32>
      %289 = arith.addf %285, %288 : vector<8x256xf32>
      %290 = vector.broadcast %275 : vector<8x1xf32> to vector<8x256xf32>
      %291 = vector.broadcast %145 : vector<1x256xf32> to vector<8x256xf32>
      %292 = arith.mulf %290, %291 : vector<8x256xf32>
      %293 = arith.addf %289, %292 : vector<8x256xf32>
      %294 = arith.mulf %278, %278 : vector<8x1xf32>
      %cst_96 = arith.constant 1.000000e+00 : f32
      %295 = vector.broadcast %cst_96 : f32 to vector<8x1xf32>
      %296 = arith.addf %294, %295 : vector<8x1xf32>
      %cst_97 = arith.constant 2.000000e+00 : f32
      %297 = vector.broadcast %cst_97 : f32 to vector<8x1xf32>
      %298 = arith.mulf %297, %278 : vector<8x1xf32>
      %299 = vector.broadcast %298 : vector<8x1xf32> to vector<8x256xf32>
      %300 = arith.mulf %299, %293 : vector<8x256xf32>
      %301 = vector.broadcast %296 : vector<8x1xf32> to vector<8x256xf32>
      %302 = arith.addf %301, %300 : vector<8x256xf32>
      %cst_98 = arith.constant 9.99999993E-9 : f32
      %303 = vector.broadcast %cst_98 : f32 to vector<8x256xf32>
      %304 = arith.addf %302, %303 : vector<8x256xf32>
      %305 = math.rsqrt %304 : vector<8x256xf32>
      %306 = arith.mulf %302, %305 : vector<8x256xf32>
      %cst_99 = arith.constant 1.000000e+00 : f32
      %307 = vector.broadcast %cst_99 : f32 to vector<8x1xf32>
      %308 = arith.addf %278, %307 : vector<8x1xf32>
      %309 = vector.broadcast %308 : vector<8x1xf32> to vector<8x256xf32>
      %310 = arith.minimumf %306, %309 : vector<8x256xf32>
      %311 = vector.broadcast %276 : vector<8x1xf32> to vector<8x256xf32>
      %312 = arith.mulf %311, %310 : vector<8x256xf32>
      %313 = vector.broadcast %278 : vector<8x1xf32> to vector<8x256xf32>
      %314 = arith.subf %310, %313 : vector<8x256xf32>
      %cst_100 = arith.constant 1.000000e+00 : f32
      %315 = vector.broadcast %cst_100 : f32 to vector<8x256xf32>
      %316 = arith.subf %314, %315 : vector<8x256xf32>
      %317 = vector.broadcast %276 : vector<8x1xf32> to vector<8x256xf32>
      %318 = arith.mulf %317, %316 : vector<8x256xf32>
      %319 = math.exp %318 : vector<8x256xf32>
      %320 = vector.broadcast %278 : vector<8x1xf32> to vector<8x256xf32>
      %321 = arith.addf %320, %293 : vector<8x256xf32>
      %322 = arith.mulf %305, %321 : vector<8x256xf32>
      %cst_101 = arith.constant 3.270800e+01 : f32
      %323 = vector.broadcast %cst_101 : f32 to vector<8x256xf32>
      %324 = arith.mulf %323, %319 : vector<8x256xf32>
      %cst_102 = arith.constant 9.99999974E-5 : f32
      %325 = vector.broadcast %cst_102 : f32 to vector<8x256xf32>
      %326 = arith.maximumf %312, %325 : vector<8x256xf32>
      %327 = arith.mulf %326, %326 : vector<8x256xf32>
      %328 = math.sqrt %326 : vector<8x256xf32>
      %cst_103 = arith.constant 1.698800e+00 : f32
      %329 = vector.broadcast %cst_103 : f32 to vector<8x256xf32>
      %330 = arith.mulf %329, %327 : vector<8x256xf32>
      %cst_104 = arith.constant 1.084380e+01 : f32
      %331 = vector.broadcast %cst_104 : f32 to vector<8x256xf32>
      %332 = arith.mulf %331, %326 : vector<8x256xf32>
      %333 = arith.addf %330, %332 : vector<8x256xf32>
      %cst_105 = arith.constant 6.220100e+00 : f32
      %334 = vector.broadcast %cst_105 : f32 to vector<8x256xf32>
      %335 = arith.mulf %334, %326 : vector<8x256xf32>
      %336 = arith.addf %327, %335 : vector<8x256xf32>
      %cst_106 = arith.constant 1.024150e+01 : f32
      %337 = vector.broadcast %cst_106 : f32 to vector<8x256xf32>
      %338 = arith.addf %336, %337 : vector<8x256xf32>
      %339 = tpu.reciprocal %338 {approx = true} : vector<8x256xf32> -> vector<8x256xf32>
      %340 = arith.mulf %333, %339 : vector<8x256xf32>
      %341 = arith.mulf %328, %340 : vector<8x256xf32>
      %cst_107 = arith.constant 0.000000e+00 : f32
      %342 = vector.broadcast %cst_107 : f32 to vector<8x256xf32>
      %343 = arith.subf %342, %341 : vector<8x256xf32>
      %344 = math.exp %343 : vector<8x256xf32>
      %cst_108 = arith.constant 0.000000e+00 : f32
      %345 = vector.broadcast %cst_108 : f32 to vector<8x256xf32>
      %346 = arith.subf %345, %341 : vector<8x256xf32>
      %347 = math.absf %322 : vector<8x256xf32>
      %348 = arith.mulf %346, %347 : vector<8x256xf32>
      %349 = math.exp %348 : vector<8x256xf32>
      %cst_109 = arith.constant 0.000000e+00 : f32
      %350 = vector.broadcast %cst_109 : f32 to vector<8x256xf32>
      %351 = arith.cmpf oge, %322, %350 : vector<8x256xf32>
      %352 = arith.mulf %344, %349 : vector<8x256xf32>
      %cst_110 = arith.constant 1.000000e+00 : f32
      %353 = vector.broadcast %cst_110 : f32 to vector<8x256xf32>
      %354 = arith.subf %353, %352 : vector<8x256xf32>
      %355 = arith.subf %349, %344 : vector<8x256xf32>
      %356 = arith.select %351, %354, %355 : vector<8x256xi1>, vector<8x256xf32>
      %cst_111 = arith.constant 1.000000e+00 : f32
      %357 = vector.broadcast %cst_111 : f32 to vector<8x256xf32>
      %358 = arith.subf %357, %344 : vector<8x256xf32>
      %cst_112 = arith.constant 1.000000e+00 : f32
      %359 = vector.broadcast %cst_112 : f32 to vector<8x256xf32>
      %360 = arith.addf %359, %349 : vector<8x256xf32>
      %361 = arith.mulf %358, %360 : vector<8x256xf32>
      %cst_113 = arith.constant 9.99999993E-9 : f32
      %362 = vector.broadcast %cst_113 : f32 to vector<8x256xf32>
      %363 = arith.addf %361, %362 : vector<8x256xf32>
      %364 = tpu.reciprocal %363 {approx = true} : vector<8x256xf32> -> vector<8x256xf32>
      %365 = arith.mulf %356, %364 : vector<8x256xf32>
      %cst_114 = arith.constant 0.000000e+00 : f32
      %366 = vector.broadcast %cst_114 : f32 to vector<8x256xf32>
      %367 = arith.subf %366, %326 : vector<8x256xf32>
      %368 = math.exp %367 : vector<8x256xf32>
      %cst_115 = arith.constant 1.000000e+00 : f32
      %369 = vector.broadcast %cst_115 : f32 to vector<8x256xf32>
      %370 = arith.subf %369, %368 : vector<8x256xf32>
      %cst_116 = arith.constant 6.28318548 : f32
      %371 = vector.broadcast %cst_116 : f32 to vector<8x256xf32>
      %372 = arith.mulf %371, %370 : vector<8x256xf32>
      %373 = tpu.reciprocal %326 {approx = true} : vector<8x256xf32> -> vector<8x256xf32>
      %374 = arith.mulf %372, %373 : vector<8x256xf32>
      %cst_117 = arith.constant 1.000000e+00 : f32
      %375 = vector.broadcast %cst_117 : f32 to vector<8x256xf32>
      %376 = arith.subf %375, %368 : vector<8x256xf32>
      %377 = arith.mulf %365, %376 : vector<8x256xf32>
      %378 = arith.addf %368, %377 : vector<8x256xf32>
      %379 = arith.mulf %374, %378 : vector<8x256xf32>
      %380 = arith.mulf %324, %379 : vector<8x256xf32>
      %cst_118 = arith.constant 0.000000e+00 : f32
      %381 = vector.broadcast %cst_118 : f32 to vector<8x1xf32>
      %382 = arith.subf %381, %279 : vector<8x1xf32>
      %383 = math.absf %293 : vector<8x256xf32>
      %384 = vector.broadcast %382 : vector<8x1xf32> to vector<8x256xf32>
      %385 = arith.mulf %384, %383 : vector<8x256xf32>
      %386 = math.exp %385 : vector<8x256xf32>
      %cst_119 = arith.constant 0.000000e+00 : f32
      %387 = vector.broadcast %cst_119 : f32 to vector<8x256xf32>
      %388 = arith.cmpf oge, %293, %387 : vector<8x256xf32>
      %389 = vector.broadcast %280 : vector<8x1xf32> to vector<8x256xf32>
      %390 = arith.mulf %389, %386 : vector<8x256xf32>
      %cst_120 = arith.constant 1.000000e+00 : f32
      %391 = vector.broadcast %cst_120 : f32 to vector<8x256xf32>
      %392 = arith.subf %391, %390 : vector<8x256xf32>
      %393 = vector.broadcast %280 : vector<8x1xf32> to vector<8x256xf32>
      %394 = arith.subf %386, %393 : vector<8x256xf32>
      %395 = arith.select %388, %392, %394 : vector<8x256xi1>, vector<8x256xf32>
      %cst_121 = arith.constant 1.000000e+00 : f32
      %396 = vector.broadcast %cst_121 : f32 to vector<8x1xf32>
      %397 = arith.subf %396, %280 : vector<8x1xf32>
      %cst_122 = arith.constant 1.000000e+00 : f32
      %398 = vector.broadcast %cst_122 : f32 to vector<8x256xf32>
      %399 = arith.addf %398, %386 : vector<8x256xf32>
      %400 = vector.broadcast %397 : vector<8x1xf32> to vector<8x256xf32>
      %401 = arith.mulf %400, %399 : vector<8x256xf32>
      %cst_123 = arith.constant 9.99999993E-9 : f32
      %402 = vector.broadcast %cst_123 : f32 to vector<8x256xf32>
      %403 = arith.addf %401, %402 : vector<8x256xf32>
      %404 = tpu.reciprocal %403 {approx = true} : vector<8x256xf32> -> vector<8x256xf32>
      %405 = arith.mulf %395, %404 : vector<8x256xf32>
      %cst_124 = arith.constant 1.000000e+00 : f32
      %406 = vector.broadcast %cst_124 : f32 to vector<8x1xf32>
      %407 = arith.subf %406, %281 : vector<8x1xf32>
      %408 = vector.broadcast %407 : vector<8x1xf32> to vector<8x256xf32>
      %409 = arith.mulf %405, %408 : vector<8x256xf32>
      %410 = vector.broadcast %281 : vector<8x1xf32> to vector<8x256xf32>
      %411 = arith.addf %410, %409 : vector<8x256xf32>
      %412 = vector.broadcast %282 : vector<8x1xf32> to vector<8x256xf32>
      %413 = arith.mulf %412, %411 : vector<8x256xf32>
      %cst_125 = arith.constant 3.170030e+01 : f32
      %414 = vector.broadcast %cst_125 : f32 to vector<8x256xf32>
      %415 = arith.mulf %414, %413 : vector<8x256xf32>
      %416 = arith.subf %380, %415 : vector<8x256xf32>
      %417 = vector.broadcast %277 : vector<8x1xf32> to vector<8x256xf32>
      %418 = arith.mulf %417, %416 : vector<8x256xf32>
      %cst_126 = arith.constant dense<0.000000e+00> : vector<256xf32>
      %419 = vector.multi_reduction <add>, %418, %cst_126 [0] : vector<8x256xf32> to vector<256xf32>
      %420 = vector.shape_cast %419 : vector<256xf32> to vector<1x256xf32>
      %cst_127 = arith.constant 0.000000e+00 : f32
      %421 = vector.broadcast %cst_127 : f32 to vector<1x256xf32>
      %422 = arith.maximumf %420, %421 : vector<1x256xf32>
      %423 = vector.broadcast %273 : vector<8x1xf32> to vector<8x256xf32>
      %424 = vector.broadcast %185 : vector<1x256xf32> to vector<8x256xf32>
      %425 = arith.mulf %423, %424 : vector<8x256xf32>
      %426 = vector.broadcast %274 : vector<8x1xf32> to vector<8x256xf32>
      %427 = vector.broadcast %186 : vector<1x256xf32> to vector<8x256xf32>
      %428 = arith.mulf %426, %427 : vector<8x256xf32>
      %429 = arith.addf %425, %428 : vector<8x256xf32>
      %430 = vector.broadcast %275 : vector<8x1xf32> to vector<8x256xf32>
      %431 = vector.broadcast %187 : vector<1x256xf32> to vector<8x256xf32>
      %432 = arith.mulf %430, %431 : vector<8x256xf32>
      %433 = arith.addf %429, %432 : vector<8x256xf32>
      %434 = vector.broadcast %276 : vector<8x1xf32> to vector<8x256xf32>
      %435 = vector.broadcast %271 : vector<1x256xf32> to vector<8x256xf32>
      %436 = arith.mulf %434, %435 : vector<8x256xf32>
      %437 = arith.mulf %436, %436 : vector<8x256xf32>
      %cst_128 = arith.constant 1.000000e+00 : f32
      %438 = vector.broadcast %cst_128 : f32 to vector<8x256xf32>
      %439 = arith.addf %437, %438 : vector<8x256xf32>
      %cst_129 = arith.constant 2.000000e+00 : f32
      %440 = vector.broadcast %cst_129 : f32 to vector<8x256xf32>
      %441 = arith.mulf %440, %436 : vector<8x256xf32>
      %442 = arith.mulf %441, %433 : vector<8x256xf32>
      %443 = arith.addf %439, %442 : vector<8x256xf32>
      %cst_130 = arith.constant 9.99999993E-9 : f32
      %444 = vector.broadcast %cst_130 : f32 to vector<8x256xf32>
      %445 = arith.addf %443, %444 : vector<8x256xf32>
      %446 = math.rsqrt %445 : vector<8x256xf32>
      %447 = arith.mulf %443, %446 : vector<8x256xf32>
      %cst_131 = arith.constant 1.000000e+00 : f32
      %448 = vector.broadcast %cst_131 : f32 to vector<8x256xf32>
      %449 = arith.addf %436, %448 : vector<8x256xf32>
      %450 = arith.minimumf %447, %449 : vector<8x256xf32>
      %451 = vector.broadcast %193 : vector<1x256xf32> to vector<8x256xf32>
      %452 = arith.mulf %451, %450 : vector<8x256xf32>
      %cst_132 = arith.constant 9.99999974E-5 : f32
      %453 = vector.broadcast %cst_132 : f32 to vector<8x256xf32>
      %454 = arith.maximumf %452, %453 : vector<8x256xf32>
      %455 = arith.subf %450, %436 : vector<8x256xf32>
      %cst_133 = arith.constant 1.000000e+00 : f32
      %456 = vector.broadcast %cst_133 : f32 to vector<8x256xf32>
      %457 = arith.subf %455, %456 : vector<8x256xf32>
      %458 = vector.broadcast %193 : vector<1x256xf32> to vector<8x256xf32>
      %459 = arith.mulf %458, %457 : vector<8x256xf32>
      %460 = math.exp %459 : vector<8x256xf32>
      %461 = arith.mulf %436, %293 : vector<8x256xf32>
      %462 = vector.broadcast %234 : vector<1x256xf32> to vector<8x256xf32>
      %463 = arith.addf %461, %462 : vector<8x256xf32>
      %464 = arith.mulf %446, %463 : vector<8x256xf32>
      %465 = tpu.reciprocal %454 {approx = true} : vector<8x256xf32> -> vector<8x256xf32>
      %cst_134 = arith.constant 3.150000e-02 : f32
      %466 = vector.broadcast %cst_134 : f32 to vector<8x256xf32>
      %467 = arith.mulf %466, %465 : vector<8x256xf32>
      %468 = arith.mulf %467, %467 : vector<8x256xf32>
      %cst_135 = arith.constant 1.000000e+00 : f32
      %469 = vector.broadcast %cst_135 : f32 to vector<8x256xf32>
      %470 = arith.addf %468, %469 : vector<8x256xf32>
      %cst_136 = arith.constant 2.000000e+00 : f32
      %471 = vector.broadcast %cst_136 : f32 to vector<8x256xf32>
      %472 = arith.mulf %471, %467 : vector<8x256xf32>
      %473 = arith.mulf %472, %464 : vector<8x256xf32>
      %474 = arith.addf %470, %473 : vector<8x256xf32>
      %cst_137 = arith.constant 9.99999993E-9 : f32
      %475 = vector.broadcast %cst_137 : f32 to vector<8x256xf32>
      %476 = arith.addf %474, %475 : vector<8x256xf32>
      %477 = math.rsqrt %476 : vector<8x256xf32>
      %478 = arith.mulf %474, %477 : vector<8x256xf32>
      %cst_138 = arith.constant 1.000000e+00 : f32
      %479 = vector.broadcast %cst_138 : f32 to vector<8x256xf32>
      %480 = arith.addf %467, %479 : vector<8x256xf32>
      %481 = arith.minimumf %478, %480 : vector<8x256xf32>
      %482 = arith.mulf %454, %481 : vector<8x256xf32>
      %483 = arith.subf %481, %467 : vector<8x256xf32>
      %cst_139 = arith.constant 1.000000e+00 : f32
      %484 = vector.broadcast %cst_139 : f32 to vector<8x256xf32>
      %485 = arith.subf %483, %484 : vector<8x256xf32>
      %486 = arith.mulf %454, %485 : vector<8x256xf32>
      %487 = math.exp %486 : vector<8x256xf32>
      %488 = arith.addf %467, %464 : vector<8x256xf32>
      %489 = arith.mulf %477, %488 : vector<8x256xf32>
      %490 = vector.broadcast %277 : vector<8x1xf32> to vector<8x256xf32>
      %491 = arith.mulf %490, %460 : vector<8x256xf32>
      %cst_140 = arith.constant 3.270800e+01 : f32
      %492 = vector.broadcast %cst_140 : f32 to vector<8x256xf32>
      %493 = arith.mulf %492, %487 : vector<8x256xf32>
      %cst_141 = arith.constant 9.99999974E-5 : f32
      %494 = vector.broadcast %cst_141 : f32 to vector<8x256xf32>
      %495 = arith.maximumf %482, %494 : vector<8x256xf32>
      %496 = arith.mulf %495, %495 : vector<8x256xf32>
      %497 = math.sqrt %495 : vector<8x256xf32>
      %cst_142 = arith.constant 1.698800e+00 : f32
      %498 = vector.broadcast %cst_142 : f32 to vector<8x256xf32>
      %499 = arith.mulf %498, %496 : vector<8x256xf32>
      %cst_143 = arith.constant 1.084380e+01 : f32
      %500 = vector.broadcast %cst_143 : f32 to vector<8x256xf32>
      %501 = arith.mulf %500, %495 : vector<8x256xf32>
      %502 = arith.addf %499, %501 : vector<8x256xf32>
      %cst_144 = arith.constant 6.220100e+00 : f32
      %503 = vector.broadcast %cst_144 : f32 to vector<8x256xf32>
      %504 = arith.mulf %503, %495 : vector<8x256xf32>
      %505 = arith.addf %496, %504 : vector<8x256xf32>
      %cst_145 = arith.constant 1.024150e+01 : f32
      %506 = vector.broadcast %cst_145 : f32 to vector<8x256xf32>
      %507 = arith.addf %505, %506 : vector<8x256xf32>
      %508 = tpu.reciprocal %507 {approx = true} : vector<8x256xf32> -> vector<8x256xf32>
      %509 = arith.mulf %502, %508 : vector<8x256xf32>
      %510 = arith.mulf %497, %509 : vector<8x256xf32>
      %cst_146 = arith.constant 0.000000e+00 : f32
      %511 = vector.broadcast %cst_146 : f32 to vector<8x256xf32>
      %512 = arith.subf %511, %510 : vector<8x256xf32>
      %513 = math.exp %512 : vector<8x256xf32>
      %cst_147 = arith.constant 0.000000e+00 : f32
      %514 = vector.broadcast %cst_147 : f32 to vector<8x256xf32>
      %515 = arith.subf %514, %510 : vector<8x256xf32>
      %516 = math.absf %489 : vector<8x256xf32>
      %517 = arith.mulf %515, %516 : vector<8x256xf32>
      %518 = math.exp %517 : vector<8x256xf32>
      %cst_148 = arith.constant 0.000000e+00 : f32
      %519 = vector.broadcast %cst_148 : f32 to vector<8x256xf32>
      %520 = arith.cmpf oge, %489, %519 : vector<8x256xf32>
      %521 = arith.mulf %513, %518 : vector<8x256xf32>
      %cst_149 = arith.constant 1.000000e+00 : f32
      %522 = vector.broadcast %cst_149 : f32 to vector<8x256xf32>
      %523 = arith.subf %522, %521 : vector<8x256xf32>
      %524 = arith.subf %518, %513 : vector<8x256xf32>
      %525 = arith.select %520, %523, %524 : vector<8x256xi1>, vector<8x256xf32>
      %cst_150 = arith.constant 1.000000e+00 : f32
      %526 = vector.broadcast %cst_150 : f32 to vector<8x256xf32>
      %527 = arith.subf %526, %513 : vector<8x256xf32>
      %cst_151 = arith.constant 1.000000e+00 : f32
      %528 = vector.broadcast %cst_151 : f32 to vector<8x256xf32>
      %529 = arith.addf %528, %518 : vector<8x256xf32>
      %530 = arith.mulf %527, %529 : vector<8x256xf32>
      %cst_152 = arith.constant 9.99999993E-9 : f32
      %531 = vector.broadcast %cst_152 : f32 to vector<8x256xf32>
      %532 = arith.addf %530, %531 : vector<8x256xf32>
      %533 = tpu.reciprocal %532 {approx = true} : vector<8x256xf32> -> vector<8x256xf32>
      %534 = arith.mulf %525, %533 : vector<8x256xf32>
      %cst_153 = arith.constant 0.000000e+00 : f32
      %535 = vector.broadcast %cst_153 : f32 to vector<8x256xf32>
      %536 = arith.subf %535, %495 : vector<8x256xf32>
      %537 = math.exp %536 : vector<8x256xf32>
      %cst_154 = arith.constant 1.000000e+00 : f32
      %538 = vector.broadcast %cst_154 : f32 to vector<8x256xf32>
      %539 = arith.subf %538, %537 : vector<8x256xf32>
      %cst_155 = arith.constant 6.28318548 : f32
      %540 = vector.broadcast %cst_155 : f32 to vector<8x256xf32>
      %541 = arith.mulf %540, %539 : vector<8x256xf32>
      %542 = tpu.reciprocal %495 {approx = true} : vector<8x256xf32> -> vector<8x256xf32>
      %543 = arith.mulf %541, %542 : vector<8x256xf32>
      %cst_156 = arith.constant 1.000000e+00 : f32
      %544 = vector.broadcast %cst_156 : f32 to vector<8x256xf32>
      %545 = arith.subf %544, %537 : vector<8x256xf32>
      %546 = arith.mulf %534, %545 : vector<8x256xf32>
      %547 = arith.addf %537, %546 : vector<8x256xf32>
      %548 = arith.mulf %543, %547 : vector<8x256xf32>
      %549 = arith.mulf %493, %548 : vector<8x256xf32>
      %cst_157 = arith.constant 9.99999974E-5 : f32
      %550 = vector.broadcast %cst_157 : f32 to vector<8x256xf32>
      %551 = arith.maximumf %454, %550 : vector<8x256xf32>
      %552 = arith.mulf %551, %551 : vector<8x256xf32>
      %553 = math.sqrt %551 : vector<8x256xf32>
      %cst_158 = arith.constant 1.698800e+00 : f32
      %554 = vector.broadcast %cst_158 : f32 to vector<8x256xf32>
      %555 = arith.mulf %554, %552 : vector<8x256xf32>
      %cst_159 = arith.constant 1.084380e+01 : f32
      %556 = vector.broadcast %cst_159 : f32 to vector<8x256xf32>
      %557 = arith.mulf %556, %551 : vector<8x256xf32>
      %558 = arith.addf %555, %557 : vector<8x256xf32>
      %cst_160 = arith.constant 6.220100e+00 : f32
      %559 = vector.broadcast %cst_160 : f32 to vector<8x256xf32>
      %560 = arith.mulf %559, %551 : vector<8x256xf32>
      %561 = arith.addf %552, %560 : vector<8x256xf32>
      %cst_161 = arith.constant 1.024150e+01 : f32
      %562 = vector.broadcast %cst_161 : f32 to vector<8x256xf32>
      %563 = arith.addf %561, %562 : vector<8x256xf32>
      %564 = tpu.reciprocal %563 {approx = true} : vector<8x256xf32> -> vector<8x256xf32>
      %565 = arith.mulf %558, %564 : vector<8x256xf32>
      %566 = arith.mulf %553, %565 : vector<8x256xf32>
      %cst_162 = arith.constant 0.000000e+00 : f32
      %567 = vector.broadcast %cst_162 : f32 to vector<8x256xf32>
      %568 = arith.subf %567, %566 : vector<8x256xf32>
      %569 = math.exp %568 : vector<8x256xf32>
      %cst_163 = arith.constant 0.000000e+00 : f32
      %570 = vector.broadcast %cst_163 : f32 to vector<8x256xf32>
      %571 = arith.subf %570, %566 : vector<8x256xf32>
      %572 = math.absf %464 : vector<8x256xf32>
      %573 = arith.mulf %571, %572 : vector<8x256xf32>
      %574 = math.exp %573 : vector<8x256xf32>
      %cst_164 = arith.constant 0.000000e+00 : f32
      %575 = vector.broadcast %cst_164 : f32 to vector<8x256xf32>
      %576 = arith.cmpf oge, %464, %575 : vector<8x256xf32>
      %577 = arith.mulf %569, %574 : vector<8x256xf32>
      %cst_165 = arith.constant 1.000000e+00 : f32
      %578 = vector.broadcast %cst_165 : f32 to vector<8x256xf32>
      %579 = arith.subf %578, %577 : vector<8x256xf32>
      %580 = arith.subf %574, %569 : vector<8x256xf32>
      %581 = arith.select %576, %579, %580 : vector<8x256xi1>, vector<8x256xf32>
      %cst_166 = arith.constant 1.000000e+00 : f32
      %582 = vector.broadcast %cst_166 : f32 to vector<8x256xf32>
      %583 = arith.subf %582, %569 : vector<8x256xf32>
      %cst_167 = arith.constant 1.000000e+00 : f32
      %584 = vector.broadcast %cst_167 : f32 to vector<8x256xf32>
      %585 = arith.addf %584, %574 : vector<8x256xf32>
      %586 = arith.mulf %583, %585 : vector<8x256xf32>
      %cst_168 = arith.constant 9.99999993E-9 : f32
      %587 = vector.broadcast %cst_168 : f32 to vector<8x256xf32>
      %588 = arith.addf %586, %587 : vector<8x256xf32>
      %589 = tpu.reciprocal %588 {approx = true} : vector<8x256xf32> -> vector<8x256xf32>
      %590 = arith.mulf %581, %589 : vector<8x256xf32>
      %cst_169 = arith.constant 0.000000e+00 : f32
      %591 = vector.broadcast %cst_169 : f32 to vector<8x256xf32>
      %592 = arith.subf %591, %551 : vector<8x256xf32>
      %593 = math.exp %592 : vector<8x256xf32>
      %cst_170 = arith.constant 1.000000e+00 : f32
      %594 = vector.broadcast %cst_170 : f32 to vector<8x256xf32>
      %595 = arith.subf %594, %593 : vector<8x256xf32>
      %cst_171 = arith.constant 6.28318548 : f32
      %596 = vector.broadcast %cst_171 : f32 to vector<8x256xf32>
      %597 = arith.mulf %596, %595 : vector<8x256xf32>
      %598 = tpu.reciprocal %551 {approx = true} : vector<8x256xf32> -> vector<8x256xf32>
      %599 = arith.mulf %597, %598 : vector<8x256xf32>
      %cst_172 = arith.constant 1.000000e+00 : f32
      %600 = vector.broadcast %cst_172 : f32 to vector<8x256xf32>
      %601 = arith.subf %600, %593 : vector<8x256xf32>
      %602 = arith.mulf %590, %601 : vector<8x256xf32>
      %603 = arith.addf %593, %602 : vector<8x256xf32>
      %604 = arith.mulf %599, %603 : vector<8x256xf32>
      %cst_173 = arith.constant 3.170030e+01 : f32
      %605 = vector.broadcast %cst_173 : f32 to vector<8x256xf32>
      %606 = arith.mulf %605, %604 : vector<8x256xf32>
      %607 = arith.subf %549, %606 : vector<8x256xf32>
      %608 = arith.mulf %491, %607 : vector<8x256xf32>
      %cst_174 = arith.constant dense<0.000000e+00> : vector<256xf32>
      %609 = vector.multi_reduction <add>, %608, %cst_174 [0] : vector<8x256xf32> to vector<256xf32>
      %610 = vector.shape_cast %609 : vector<256xf32> to vector<1x256xf32>
      %cst_175 = arith.constant 0.000000e+00 : f32
      %611 = vector.broadcast %cst_175 : f32 to vector<1x256xf32>
      %612 = arith.maximumf %610, %611 : vector<1x256xf32>
      %613 = vector.broadcast %612 : vector<1x256xf32> to vector<3x256xf32>
      %614 = arith.mulf %268, %613 : vector<3x256xf32>
      %cst_176 = arith.constant 0.318309873 : f32
      %615 = vector.broadcast %cst_176 : f32 to vector<1x256xf32>
      %616 = arith.mulf %615, %422 : vector<1x256xf32>
      %617 = vector.broadcast %616 : vector<1x256xf32> to vector<3x256xf32>
      %618 = arith.mulf %90, %617 : vector<3x256xf32>
      %619 = arith.addf %614, %618 : vector<3x256xf32>
      %cst_177 = arith.constant 5.000000e-01 : f32
      %620 = vector.broadcast %cst_177 : f32 to vector<1x256xf32>
      %621 = arith.cmpf ogt, %1, %620 : vector<1x256xf32>
      %622 = vector.shape_cast %621 : vector<1x256xi1> to vector<1x256xi1>
      %623 = vector.broadcast %622 : vector<1x256xi1> to vector<3x256xi1>
      %624 = arith.select %623, %619, %2 : vector<3x256xi1>, vector<3x256xf32>
      %cst_178 = arith.constant 0.000000e+00 : f32
      %cst_179 = arith.constant 1.000000e+00 : f32
      %625 = vector.broadcast %cst_178 : f32 to vector<3x256xf32>
      %626 = arith.maximumf %625, %624 : vector<3x256xf32>
      %627 = vector.broadcast %cst_179 : f32 to vector<3x256xf32>
      %628 = arith.minimumf %627, %626 : vector<3x256xf32>
      %629 = tpu.concatenate %628, %1 in 0 : vector<3x256xf32>, vector<1x256xf32> -> vector<4x256xf32>
      %c0_180 = arith.constant 0 : index
      %c0_181 = arith.constant 0 : index
      %630 = vector.load %arg22[%c0_180, %c0_181] : memref<4x256xf32, #tpu.memory_space<vmem>>, vector<4x256xf32>
      tpu.vector_store %arg22[%c0_180, %c0_181], %629 {strides = array<i32>} : memref<4x256xf32, #tpu.memory_space<vmem>>, vector<4x256xf32>,
    } else {
    }
    return
  }
  func.func @transform_0(%arg0: i32, %arg1: memref<2xi32, #tpu.memory_space<smem>>) -> (i32, i32) {
    %c0_i32 = arith.constant 0 : i32
    %c0_i32_0 = arith.constant 0 : i32
    return %c0_i32, %arg0 : i32, i32
  }
  func.func @transform_1(%arg0: i32, %arg1: memref<2xi32, #tpu.memory_space<smem>>) -> (i32, i32) {
    %c0_i32 = arith.constant 0 : i32
    %c0_i32_0 = arith.constant 0 : i32
    %c0_i32_1 = arith.constant 0 : i32
    return %c0_i32, %c0_i32_0 : i32, i32
  }
  func.func @transform_2(%arg0: i32, %arg1: memref<2xi32, #tpu.memory_space<smem>>) -> (i32, i32) {
    %c0_i32 = arith.constant 0 : i32
    %c0_i32_0 = arith.constant 0 : i32
    %c0_i32_1 = arith.constant 0 : i32
    return %c0_i32, %c0_i32_0 : i32, i32
  }
  func.func @transform_3(%arg0: i32, %arg1: memref<2xi32, #tpu.memory_space<smem>>) -> (i32, i32) {
    %c0_i32 = arith.constant 0 : i32
    %c0_i32_0 = arith.constant 0 : i32
    %c0_i32_1 = arith.constant 0 : i32
    return %c0_i32, %c0_i32_0 : i32, i32
  }
  func.func @transform_4(%arg0: i32, %arg1: memref<2xi32, #tpu.memory_space<smem>>) -> (i32, i32) {
    %c0_i32 = arith.constant 0 : i32
    %c0_i32_0 = arith.constant 0 : i32
    %c0_i32_1 = arith.constant 0 : i32
    return %c0_i32, %c0_i32_0 : i32, i32
  }
  func.func @transform_5(%arg0: i32, %arg1: memref<2xi32, #tpu.memory_space<smem>>) -> (i32, i32) {
    %c0_i32 = arith.constant 0 : i32
    %c0_i32_0 = arith.constant 0 : i32
    %c0_i32_1 = arith.constant 0 : i32
    return %c0_i32, %c0_i32_0 : i32, i32
  }
  func.func @transform_6(%arg0: i32, %arg1: memref<2xi32, #tpu.memory_space<smem>>) -> (i32, i32) {
    %c0_i32 = arith.constant 0 : i32
    %c0_i32_0 = arith.constant 0 : i32
    %c0_i32_1 = arith.constant 0 : i32
    return %c0_i32, %c0_i32_0 : i32, i32
  }
  func.func @transform_7(%arg0: i32, %arg1: memref<2xi32, #tpu.memory_space<smem>>) -> (i32, i32) {
    %c0_i32 = arith.constant 0 : i32
    %c0_i32_0 = arith.constant 0 : i32
    %c0_i32_1 = arith.constant 0 : i32
    return %c0_i32, %c0_i32_0 : i32, i32
  }
  func.func @transform_8(%arg0: i32, %arg1: memref<2xi32, #tpu.memory_space<smem>>) -> (i32, i32) {
    %c0_i32 = arith.constant 0 : i32
    %c0_i32_0 = arith.constant 0 : i32
    %c0_i32_1 = arith.constant 0 : i32
    return %c0_i32, %c0_i32_0 : i32, i32
  }
  func.func @transform_9(%arg0: i32, %arg1: memref<2xi32, #tpu.memory_space<smem>>) -> (i32, i32) {
    %c0_i32 = arith.constant 0 : i32
    %c0_i32_0 = arith.constant 0 : i32
    %c0_i32_1 = arith.constant 0 : i32
    return %c0_i32, %c0_i32_0 : i32, i32
  }
  func.func @transform_10(%arg0: i32, %arg1: memref<2xi32, #tpu.memory_space<smem>>) -> (i32, i32) {
    %c0_i32 = arith.constant 0 : i32
    %c0_i32_0 = arith.constant 0 : i32
    %c0_i32_1 = arith.constant 0 : i32
    return %c0_i32, %c0_i32_0 : i32, i32
  }
  func.func @transform_11(%arg0: i32, %arg1: memref<2xi32, #tpu.memory_space<smem>>) -> (i32, i32) {
    %c0_i32 = arith.constant 0 : i32
    %c0_i32_0 = arith.constant 0 : i32
    %c0_i32_1 = arith.constant 0 : i32
    return %c0_i32, %c0_i32_0 : i32, i32
  }
  func.func @transform_12(%arg0: i32, %arg1: memref<2xi32, #tpu.memory_space<smem>>) -> (i32, i32) {
    %c0_i32 = arith.constant 0 : i32
    %c0_i32_0 = arith.constant 0 : i32
    %c0_i32_1 = arith.constant 0 : i32
    return %c0_i32, %c0_i32_0 : i32, i32
  }
  func.func @transform_13(%arg0: i32, %arg1: memref<2xi32, #tpu.memory_space<smem>>) -> (i32, i32) {
    %c0_i32 = arith.constant 0 : i32
    %c0_i32_0 = arith.constant 0 : i32
    %c0_i32_1 = arith.constant 0 : i32
    return %c0_i32, %c0_i32_0 : i32, i32
  }
  func.func @transform_14(%arg0: i32, %arg1: memref<2xi32, #tpu.memory_space<smem>>) -> (i32, i32) {
    %c0_i32 = arith.constant 0 : i32
    %c0_i32_0 = arith.constant 0 : i32
    %c0_i32_1 = arith.constant 0 : i32
    return %c0_i32, %c0_i32_0 : i32, i32
  }
  func.func @transform_15(%arg0: i32, %arg1: memref<2xi32, #tpu.memory_space<smem>>) -> (i32, i32) {
    %c0_i32 = arith.constant 0 : i32
    %c0_i32_0 = arith.constant 0 : i32
    %c0_i32_1 = arith.constant 0 : i32
    return %c0_i32, %c0_i32_0 : i32, i32
  }
  func.func @transform_16(%arg0: i32, %arg1: memref<2xi32, #tpu.memory_space<smem>>) -> (i32, i32) {
    %c0_i32 = arith.constant 0 : i32
    %c0_i32_0 = arith.constant 0 : i32
    %c0_i32_1 = arith.constant 0 : i32
    return %c0_i32, %c0_i32_0 : i32, i32
  }
  func.func @transform_17(%arg0: i32, %arg1: memref<2xi32, #tpu.memory_space<smem>>) -> (i32, i32) {
    %c0_i32 = arith.constant 0 : i32
    %c0_i32_0 = arith.constant 0 : i32
    %c0_i32_1 = arith.constant 0 : i32
    return %c0_i32, %c0_i32_0 : i32, i32
  }
  func.func @transform_18(%arg0: i32, %arg1: memref<2xi32, #tpu.memory_space<smem>>) -> (i32, i32) {
    %c0_i32 = arith.constant 0 : i32
    %c0_i32_0 = arith.constant 0 : i32
    %c0_i32_1 = arith.constant 0 : i32
    return %c0_i32, %c0_i32_0 : i32, i32
  }
  func.func @transform_19(%arg0: i32, %arg1: memref<2xi32, #tpu.memory_space<smem>>) -> (i32, i32) {
    %c0_i32 = arith.constant 0 : i32
    %c0_i32_0 = arith.constant 0 : i32
    %c0_i32_1 = arith.constant 0 : i32
    return %c0_i32, %c0_i32_0 : i32, i32
  }
  func.func @transform_20(%arg0: i32, %arg1: memref<2xi32, #tpu.memory_space<smem>>) -> (i32, i32) {
    %c0_i32 = arith.constant 0 : i32
    %c0_i32_0 = arith.constant 0 : i32
    return %c0_i32, %arg0 : i32, i32
  }
}

</mosaic_0001>

<bundles_post_ra>
// kernel: tpu_custom_call.1
= control target key start
LH: loop header
LB: loop body
LE: loop exit
PB: predicated region body
PF: predicated region fallthrough
CT: control target
= control target key end

     0   :  { %s8272_s27 = smov [#allocation3]   ;;  %s13398_s0 = inlined_call_operand.vmem [shape: s32[2], index: 0, kind: input, shape index: {}]   ;;  %s13399_s1 = inlined_call_operand.vmem [shape: f32[16,512], index: 1, kind: input, shape index: {}]   ;;  %s13400_s2 = inlined_call_operand.vmem [shape: f32[8,16], index: 2, kind: input, shape index: {}]   ;;  %s13401_s3 = inlined_call_operand.vmem [shape: f32[256,8], index: 3, kind: input, shape index: {}]   ;;  %s13402_s4 = inlined_call_operand.vmem [shape: f32[256,1], index: 4, kind: input, shape index: {}]   ;;  %s13403_s5 = inlined_call_operand.vmem [shape: bf16[256,256], index: 5, kind: input, shape index: {}]   ;;  %s13404_s6 = inlined_call_operand.vmem [shape: f32[256,1], index: 6, kind: input, shape index: {}]   ;;  %s13405_s7 = inlined_call_operand.vmem [shape: bf16[8,256], index: 7, kind: input, shape index: {}]   ;;  %s13406_s8 = inlined_call_operand.vmem [shape: f32[8,1], index: 8, kind: input, shape index: {}]   ;;  %s13407_s9 = inlined_call_operand.vmem [shape: f32[256,8], index: 9, kind: input, shape index: {}]   ;;  %s13408_s10 = inlined_call_operand.vmem [shape: f32[256,1], index: 10, kind: input, shape index: {}]   ;;  %s13409_s11 = inlined_call_operand.vmem [shape: bf16[256,256], index: 11, kind: input, shape index: {}]   ;;  %s13410_s12 = inlined_call_operand.vmem [shape: f32[256,1], index: 12, kind: input, shape index: {}]   ;;  %s13411_s13 = inlined_call_operand.vmem [shape: bf16[8,256], index: 13, kind: input, shape index: {}]   ;;  %s13412_s14 = inlined_call_operand.vmem [shape: f32[8,1], index: 14, kind: input, shape index: {}]   ;;  %s13413_s15 = inlined_call_operand.vmem [shape: f32[256,8], index: 15, kind: input, shape index: {}]   ;;  %s13414_s16 = inlined_call_operand.vmem [shape: f32[256,1], index: 16, kind: input, shape index: {}]   ;;  %s13415_s17 = inlined_call_operand.vmem [shape: bf16[256,256], index: 17, kind: input, shape index: {}]   ;;  %s13416_s18 = inlined_call_operand.vmem [shape: f32[256,1], index: 18, kind: input, shape index: {}]   ;;  %s13417_s19 = inlined_call_operand.vmem [shape: bf16[8,256], index: 19, kind: input, shape index: {}]   ;;  %s13418_s20 = inlined_call_operand.vmem [shape: f32[8,1], index: 20, kind: input, shape index: {}]   ;;  %s13419_s21 = inlined_call_operand.hbm [shape: f32[4,512], index: 21, kind: output, shape index: {}]  }
   0x1   :  { %13635 = sst [smem:[#allocation146_spill]] %s13398_s0 }
   0x2   :  { %13636 = sst [smem:[#allocation147_spill]] %s13399_s1 }
   0x3   :  { %13637 = sst [smem:[#allocation148_spill]] %s13400_s2 }
   0x4   :  { %13638 = sst [smem:[#allocation149_spill]] %s13401_s3 }
   0x5   :  { %13639 = sst [smem:[#allocation150_spill]] %s13402_s4 }
   0x6   :  { %13640 = sst [smem:[#allocation151_spill]] %s13403_s5 }
   0x7   :  { %13641 = sst [smem:[#allocation152_spill]] %s13404_s6 }
   0x8   :  { %13642 = sst [smem:[#allocation153_spill]] %s13405_s7 }
   0x9   :  { %13643 = sst [smem:[#allocation154_spill]] %s13406_s8 }
   0xa   :  { %13644 = sst [smem:[#allocation155_spill]] %s13408_s10 }
   0xb   :  { %13645 = sst [smem:[#allocation156_spill]] %s13413_s15 }
   0xc   :  { %s13646_s26 = sld [smem:[#allocation146_spill]] }
  0x12   :  { %s27_s15 = sshll.u32 %s13646_s26, 4  ;;  %s28_s15 = int_to_ptr.vmem [resolvable:$true] %s27_s15 }
  0x13   :  { %30 = dma.vmem_to_smem %s28_s15, 16, %s8272_s27, [#allocation2] }
  0x14   :  { %8250 = dma.done.wait [#allocation2], 16 }
  0x15   :  { %8251 = vsyncadd [#allocation2], 4294967280 }
  0x16   :  { %33 = sfence }
  0x17   :  { %34 = vsyncpa [#allocation6], 0 }
  0x18   :  { %36 = vsyncpa [#allocation6 + $0x1], 0  ;;  %s8402_s3 = smov 0   ;;  %s8404_s28 = smov 0  }
  0x19   :  { %s8406_s29 = smov 0   ;;  %s8408_s0 = smov 0  }
  0x1a LB: > { %13647 = sst [smem:[#allocation9_spill]] %s8258_s3  ;;  %s8423_s15 = sadd.s32 4294967295, %s8270_s0   ;;  %s8270_s0 = sphi %s8408_s0, %s14147_s0   ;;  %s8266_s29 = sphi %s8406_s29, %s14150_s29   ;;  %s8262_s28 = sphi %s8404_s28, %s14149_s28   ;;  %s8258_s3 = sphi %s8402_s3, %s14148_s3  }
  0x1b   : > { %13648 = sst [smem:[#allocation10_spill]] %s8262_s28  ;;  %s7222_s4 = sadd.s32 4294967294, %s8270_s0  }
  0x1c   : > { %13649 = sst [smem:[#allocation11_spill]] %s8266_s29  ;;  %s8427_s30 = sadd.s32 1, %s8270_s0  }
  0x1d   : > { %13650 = sst [smem:[#allocation12_spill]] %s8270_s0  ;;  %s49_s5 = sadd.s32 1, %s8266_s29 }
  0x1e   : > { %13651 = sst [smem:[#allocation13_spill]] %s8427_s30  ;;  %s46_s22 = ssub.s32 %s8270_s0, %s8427_s30 }
  0x1f   : > { %p56_p0 = scmp.ne.s32.totalorder %s8266_s29, %s8262_s28  ;;  %p47_p1 = scmp.eq.s32.totalorder %s46_s22, 0 }
  0x20   : > { %p57_p2 = scmp.eq.s32.totalorder %s8270_s0, 0  ;;  %p485_p3 = scmp.eq.s32.totalorder %s8423_s15, 1 }
  0x21   : > { %p490_p4 = scmp.ne.s32.totalorder %s8262_s28, %s8258_s3  ;;  %p491_p7 = scmp.eq.s32.totalorder %s7222_s4, 1 }
  0x22   : > { %s8439_s23 = scalar_select %p47_p1, %s8266_s29, %s49_s5  }
  0x23   : > { %p58_p5 = por %p57_p2, %p56_p0  ;;  %p8441_p6 = por %p485_p3, %p56_p0 }
  0x24   : > { %13652 = sst [smem:[#allocation14_spill]] %s8439_s23  ;;  %p8445_p8 = por %p491_p7, %p490_p4 }
  0x25   : > { %p7224_p9 = scmp.ge.s32.totalorder %s8270_s0, 2 }
  0x26   : > { %s13654_s24 = scalar_select %p8445_p8, 1, 0 }
  0x27   : > { %564 = sbr.rel (%p7224_p9) target bundleno = 58 (0x3a), region = 92 }
  0x28   : > { %13655 = sst [smem:[#allocation15_spill]] %s13654_s24 }
  0x2c   : > { %567 = sbr.rel (!%p58_p5) target bundleno = 58 (0x3a), region = 96  ;;  %s569_s2 = sand.u32 (%p58_p5), 1, %s8266_s29  }
  0x2d   : > { %s7834_s25 = sshll.u32 (%p58_p5), %s8270_s0, 4  ;;  %s7225_s26 = sshll.u32 (%p58_p5), %s569_s2, 5 }
  0x2e   : > { %s13656_s22 = sld [smem:[#allocation147_spill]] (%p58_p5)  ;;  %s571_s4 = scalar_lea.vmem (%p58_p5), [#allocation4], %s7225_s26 }
  0x34   : > { %s574_s23 = scalar_lea.vmem %s13656_s22, %s7834_s25 }
  0x35   : > { %v587_v0 = vld [vmem:[%s574_s23] sm:$0xff]  ;;  %v589_v1 = vld [vmem:[%s574_s23 + $0x8] sm:$0xff] }
  0x36   : > { %v591_v2 = vld [vmem:[%s574_s23 + $0x20] sm:$0xff]  ;;  %588 = vst [vmem:[%s571_s4] sm:$0xff] %v587_v0  ;;  %v593_v3 = vld [vmem:[%s574_s23 + $0x28] sm:$0xff] }
  0x37   : > { %590 = vst [vmem:[%s571_s4 + $0x8] sm:$0xff] %v589_v1 }
  0x38   : > { %592 = vst [vmem:[%s571_s4 + $0x10] sm:$0xff] %v591_v2 }
  0x39   : > { %594 = vst [vmem:[%s571_s4 + $0x18] sm:$0xff] %v593_v3 }
  0x3a PF: > { %p7228_p10 = scmp.ge.s32.totalorder %s8270_s0, 1  ;;  %p599_p11 = scmp.lt.s32.totalorder %s8270_s0, 3 }
  0x3c   : > { %p600_p12 = pnand %p7228_p10, %p599_p11 }
  0x3e   : > { %603 = sbr.rel (%p600_p12) target bundleno = 2963 (0xb93), region = 119 }
  0x43   : > { %s8460_s2 = sand.u32 1, %s8262_s28   ;;  %s669_s25 = sld [smem:[#allocation3 + %s8423_s15]] }
  0x44   : > { %s7229_s26 = sshll.u32 %s8460_s2, 5  ;;  %s7230_s23 = sshll.u32 %s8460_s2, 3 }
  0x45   : > { %s608_s27 = scalar_lea.vmem [#allocation4], %s7229_s26  ;;  %s8473_s5 = scalar_lea.vmem [#allocation5], %s7230_s23 }
  0x46   : > { %v8465_v4 = vld [vmem:[%s608_s27] sm:$0xff]  ;;  %v8467_v5 = vld [vmem:[%s608_s27 + $0x8] sm:$0xff]  ;;  %v8469_v6 = vld [vmem:[%s608_s27 + $0x10] sm:$0xff] }
  0x47   : > { %13657 = vst [vmem:[#allocation16_spill] sm:$0xff] %v8465_v4  ;;  %v8471_v7 = vld [vmem:[%s608_s27 + $0x18] sm:$0xff] }
  0x48   : > { %13658 = vst [vmem:[#allocation17_spill] sm:$0xff] %v8467_v5 }
  0x49   : > { %13659 = vst [vmem:[#allocation18_spill] sm:$0xff] %v8469_v6  ;;  %p7231_p13 = scmp.ne.s32.totalorder %s669_s25, 0 }
  0x4a   : > { %13660 = vst [vmem:[#allocation19_spill] sm:$0xff] %v8471_v7 }
  0x4b   : > { %673 = sbr.rel (%p7231_p13) target bundleno = 91 (0x5b), region = 127 }
  0x50   : > { %v674_v8 = vmax.f32 %v8469_v6, 0.0  ;;  %v675_v9 = vmax.f32 %v8471_v7, 0.0  ;;  %v686_v12 = vrot.slane %v8465_v4, 3  ;;  %v687_v13 = vrot.slane %v8467_v5, 3 }
  0x51   : > { %vm690_vm0 = vcmask 1042432   ;;  %vm696_vm1 = vcmask 1043456  }
  0x52   : > { %v676_v10 = vmin.f32 %v674_v8, 1.0  ;;  %v677_v11 = vmin.f32 %v675_v9, 1.0 }
  0x54   : > { %v680_v14 = vrot.slane %v676_v10, 3  ;;  %v681_v15 = vrot.slane %v677_v11, 3 }
  0x56   : > { %v691_v16 = vsel %vm690_vm0, %v680_v14, %v686_v12  ;;  %v692_v17 = vsel %vm690_vm0, %v681_v15, %v687_v13 }
  0x57   : > { %v695_v18 = vrot.slane %v692_v17, 4 }
  0x59   : > { %v697_v19 = vsel %vm696_vm1, %v691_v16, %v695_v18 }
  0x5a   : > { %699 = vst [vmem:[%s8473_s5] sm:$0xff] %v697_v19 }
  0x5b PF: > { %p7232_p0 = scmp.eq.s32.totalorder %s669_s25, 0 }
  0x5d   : > { %703 = sbr.rel (%p7232_p0) target bundleno = 2948 (0xb84), region = 131 }
  0x62   : > { %1040 = vmatpush.msra.mxu0 %v8465_v4  ;;  %7932 = vmatpush.msra.mxu2 %v8465_v4  ;;  %s13661_s26 = sld [smem:[#allocation149_spill]]  ;;  %vm928_vm2 = vcmask 64512   ;;  %v13432_v22 = vmov 0  }
  0x63   : > { %1153 = vmatpush.msra.mxu1 %v8467_v5  ;;  %7933 = vmatpush.msra.mxu3 %v8467_v5  ;;  %s13662_s28 = sld [smem:[#allocation150_spill]] }
  0x64   : > { %7992 = vset.pattern.permute.xlu2 %v13432_v22  ;;  %7991 = vset.pattern.permute.xlu1 %v13432_v22  ;;  %s13664_s6 = sld [smem:[#allocation152_spill]] }
  0x65   : > { %7990 = vset.pattern.permute.xlu0 %v13432_v22  ;;  %s13678_s10 = sld [smem:[#allocation155_spill]] }
  0x66   : > { %s13704_s0 = sld [smem:[#allocation151_spill]] }
  0x67   : > { %s13722_s8 = sld [smem:[#allocation154_spill]] }
  0x68   : > { %v704_v20 = vld [vmem:[%s13661_s26] sm:$0xff]  ;;  %v8495_v23 = vld [vmem:[%s13661_s26 + $0x98] sm:$0xff]  ;;  %v705_v27 = vld [vmem:[%s13661_s26 + $0x8] sm:$0xff]  ;;  %s13740_s7 = sld [smem:[#allocation153_spill]] }
  0x69   : > { %v724_v21 = vld [vmem:[%s13661_s26 + $0xa0] sm:$0xff]  ;;  %s13663_s30 = smov %s13662_s28  ;;  %v766_v24 = vld [vmem:[%s13662_s28 + $0xf0] sm:$0xff]  ;;  %7233 = vmatmul.msk.f32.vlgmr.msra.gmra.mxu0 %vm928_vm2, %v704_v20  ;;  %7265 = vmatmul.msk.f32.vlgmr.msra.gmra.mxu1 %vm928_vm2, %v704_v20  ;;  %v725_v28 = vld [vmem:[%s13661_s26 + $0xa8] sm:$0xff]  ;;  %s14039_s28 = sld [smem:[#allocation156_spill]] }
  0x6a   : > { %v750_v25 = vld [vmem:[%s13663_s30 + $0x70] sm:$0xff]  ;;  %v748_v26 = vld [vmem:[%s13663_s30 + $0x60] sm:$0xff]  ;;  %7253 = vmatmul.msk.f32.vlgmr.msra.gmra.mxu2 %vm928_vm2, %v724_v21  ;;  %7284 = vmatmul.msk.f32.vlgmr.msra.gmra.mxu3 %vm928_vm2, %v8495_v23  ;;  %v767_v29 = vld [vmem:[%s13663_s30 + $0xf8] sm:$0xff] }
  0x6b   : > { %920 = vperm.xlu1 %7991, %v766_v24   ;;  %840 = vperm.xlu0 %7990, %v750_v25   ;;  %v751_v30 = vld [vmem:[%s13663_s30 + $0x78] sm:$0xff]  ;;  %v749_v31 = vld [vmem:[%s13663_s30 + $0x68] sm:$0xff]  ;;  %v706_v32 = vld [vmem:[%s13661_s26 + $0x10] sm:$0xff] }
  0x6c   : > { %830 = vperm.xlu2 %7992, %v748_v26   ;;  %v726_v33 = vld [vmem:[%s13661_s26 + $0xb0] sm:$0xff]  ;;  %v765_v34 = vld [vmem:[%s13663_s30 + $0xe8] sm:$0xff]  ;;  %v764_v35 = vld [vmem:[%s13663_s30 + $0xe0] sm:$0xff]  ;;  %s13705_s24 = smov %s13704_s0 }
  0x6d   : > { %v746_v36 = vld [vmem:[%s13663_s30 + $0x50] sm:$0xff]  ;;  %v707_v37 = vld [vmem:[%s13661_s26 + $0x18] sm:$0xff]  ;;  %v708_v42 = vld [vmem:[%s13661_s26 + $0x20] sm:$0xff] }
  0x6e   : > { %v727_v38 = vld [vmem:[%s13661_s26 + $0xb8] sm:$0xff]  ;;  %v762_v39 = vld [vmem:[%s13663_s30 + $0xd0] sm:$0xff]  ;;  %v728_v43 = vld [vmem:[%s13661_s26 + $0xc0] sm:$0xff] }
  0x6f   : > { %v747_v40 = vld [vmem:[%s13663_s30 + $0x58] sm:$0xff]  ;;  %v745_v44 = vld [vmem:[%s13663_s30 + $0x48] sm:$0xff]  ;;  %v760_v45 = vld [vmem:[%s13663_s30 + $0xc0] sm:$0xff] }
  0x70   : > { %v763_v41 = vld [vmem:[%s13663_s30 + $0xd8] sm:$0xff]  ;;  %v744_v46 = vld [vmem:[%s13663_s30 + $0x40] sm:$0xff]  ;;  %v709_v47 = vld [vmem:[%s13661_s26 + $0x28] sm:$0xff] }
  0x71   : > { %7234 = vmatmul.msk.f32.gmra.mxu0 %vm928_vm2, %v705_v27  ;;  %7266 = vmatmul.msk.f32.gmra.mxu1 %vm928_vm2, %v705_v27  ;;  %v729_v48 = vld [vmem:[%s13661_s26 + $0xc8] sm:$0xff]  ;;  %v742_v49 = vld [vmem:[%s13663_s30 + $0x30] sm:$0xff]  ;;  %v743_v51 = vld [vmem:[%s13663_s30 + $0x38] sm:$0xff] }
  0x72   : > { %7254 = vmatmul.msk.f32.gmra.mxu2 %vm928_vm2, %v725_v28  ;;  %7285 = vmatmul.msk.f32.gmra.mxu3 %vm928_vm2, %v724_v21  ;;  %v761_v50 = vld [vmem:[%s13663_s30 + $0xc8] sm:$0xff]  ;;  %v710_v52 = vld [vmem:[%s13661_s26 + $0x30] sm:$0xff]  ;;  %v759_v54 = vld [vmem:[%s13663_s30 + $0xb8] sm:$0xff] }
  0x73   : > { %925 = vperm.xlu1 %7991, %v767_v29   ;;  %845 = vperm.xlu0 %7990, %v751_v30   ;;  %v730_v53 = vld [vmem:[%s13661_s26 + $0xd0] sm:$0xff]  ;;  %v740_v56 = vld [vmem:[%s13663_s30 + $0x20] sm:$0xff]  ;;  %v711_v57 = vld [vmem:[%s13661_s26 + $0x38] sm:$0xff] }
  0x74   : > { %835 = vperm.xlu2 %7992, %v749_v31   ;;  %v758_v55 = vld [vmem:[%s13663_s30 + $0xb0] sm:$0xff]  ;;  %v731_v58 = vld [vmem:[%s13661_s26 + $0xd8] sm:$0xff]  ;;  %v756_v59 = vld [vmem:[%s13663_s30 + $0xa0] sm:$0xff] }
  0x75   : > { %v741_v60 = vld [vmem:[%s13663_s30 + $0x28] sm:$0xff]  ;;  %v712_v62 = vld [vmem:[%s13661_s26 + $0x40] sm:$0xff]  ;;  %v739_v0 = vld [vmem:[%s13663_s30 + $0x18] sm:$0xff] }
  0x76   : > { %v757_v61 = vld [vmem:[%s13663_s30 + $0xa8] sm:$0xff]  ;;  %v732_v63 = vld [vmem:[%s13661_s26 + $0xe0] sm:$0xff]  ;;  %v754_v1 = vld [vmem:[%s13663_s30 + $0x90] sm:$0xff] }
  0x77   : > { %v738_v2 = vld [vmem:[%s13663_s30 + $0x10] sm:$0xff]  ;;  %v713_v3 = vld [vmem:[%s13661_s26 + $0x48] sm:$0xff]  ;;  %v736_v9 = vld [vmem:[%s13663_s30] sm:$0xff] }
  0x78   : > { %v733_v8 = vld [vmem:[%s13661_s26 + $0xe8] sm:$0xff]  ;;  %v755_v10 = vld [vmem:[%s13663_s30 + $0x98] sm:$0xff]  ;;  %v714_v12 = vld [vmem:[%s13661_s26 + $0x50] sm:$0xff] }
  0x79   : > { %7235 = vmatmul.msk.f32.gmra.mxu0 %vm928_vm2, %v706_v32  ;;  %7267 = vmatmul.msk.f32.gmra.mxu1 %vm928_vm2, %v706_v32  ;;  %v737_v11 = vld [vmem:[%s13663_s30 + $0x8] sm:$0xff]  ;;  %v734_v13 = vld [vmem:[%s13661_s26 + $0xf0] sm:$0xff]  ;;  %v752_v15 = vld [vmem:[%s13663_s30 + $0x80] sm:$0xff] }
  0x7a   : > { %7255 = vmatmul.msk.f32.gmra.mxu2 %vm928_vm2, %v726_v33  ;;  %7286 = vmatmul.msk.f32.gmra.mxu3 %vm928_vm2, %v725_v28  ;;  %v753_v14 = vld [vmem:[%s13663_s30 + $0x88] sm:$0xff]  ;;  %v1393_v16 = vld [vmem:[%s13664_s6 + $0x70] sm:$0xff]  ;;  %v715_v17 = vld [vmem:[%s13661_s26 + $0x58] sm:$0xff] }
  0x7b   : > { %915 = vperm.xlu1 %7991, %v765_v34   ;;  %910 = vperm.xlu0 %7990, %v764_v35   ;;  %v735_v18 = vld [vmem:[%s13661_s26 + $0xf8] sm:$0xff]  ;;  %v1391_v19 = vld [vmem:[%s13664_s6 + $0x60] sm:$0xff]  ;;  %v1392_v21 = vld [vmem:[%s13664_s6 + $0x68] sm:$0xff] }
  0x7c   : > { %820 = vperm.xlu2 %7992, %v746_v36   ;;  %v1394_v20 = vld [vmem:[%s13664_s6 + $0x78] sm:$0xff]  ;;  %v716_v24 = vld [vmem:[%s13661_s26 + $0x60] sm:$0xff]  ;;  %v1389_v26 = vld [vmem:[%s13664_s6 + $0x50] sm:$0xff] }
  0x7d   : > { %v1390_v25 = vld [vmem:[%s13664_s6 + $0x58] sm:$0xff]  ;;  %v1409_v27 = vld [vmem:[%s13664_s6 + $0xf0] sm:$0xff]  ;;  %v717_v28 = vld [vmem:[%s13661_s26 + $0x68] sm:$0xff] }
  0x7e   : > { %v1387_v29 = vld [vmem:[%s13664_s6 + $0x40] sm:$0xff]  ;;  %v1410_v30 = vld [vmem:[%s13664_s6 + $0xf8] sm:$0xff]  ;;  %v1388_v31 = vld [vmem:[%s13664_s6 + $0x48] sm:$0xff] }
  0x7f   : > { %v718_v32 = vld [vmem:[%s13661_s26 + $0x70] sm:$0xff]  ;;  %v1407_v34 = vld [vmem:[%s13664_s6 + $0xe0] sm:$0xff]  ;;  %v719_v36 = vld [vmem:[%s13661_s26 + $0x78] sm:$0xff] }
  0x80   : > { %v1385_v35 = vld [vmem:[%s13664_s6 + $0x30] sm:$0xff]  ;;  %v2306_v22 = vld [vmem:[%s13678_s10 + $0xc8] sm:$0xff] }
  0x81   : > { %7236 = vmatmul.msk.f32.gmra.mxu0 %vm928_vm2, %v707_v37  ;;  %7268 = vmatmul.msk.f32.gmra.mxu1 %vm928_vm2, %v707_v37  ;;  %v1405_v37 = vld [vmem:[%s13664_s6 + $0xd0] sm:$0xff] }
  0x82   : > { %7256 = vmatmul.msk.f32.gmra.mxu2 %vm928_vm2, %v727_v38  ;;  %7287 = vmatmul.msk.f32.gmra.mxu3 %vm928_vm2, %v726_v33  ;;  %v1408_v33 = vld [vmem:[%s13664_s6 + $0xe8] sm:$0xff] }
  0x83   : > { %900 = vperm.xlu1 %7991, %v762_v39   ;;  %825 = vperm.xlu0 %7990, %v747_v40   ;;  %v1406_v39 = vld [vmem:[%s13664_s6 + $0xd8] sm:$0xff]  ;;  %v720_v40 = vld [vmem:[%s13661_s26 + $0x80] sm:$0xff] }
  0x84   : > { %905 = vperm.xlu2 %7992, %v763_v41  }
  0x89   : > { %7237 = vmatmul.msk.f32.gmra.mxu0 %vm928_vm2, %v708_v42  ;;  %7269 = vmatmul.msk.f32.gmra.mxu1 %vm928_vm2, %v708_v42 }
  0x8a   : > { %7257 = vmatmul.msk.f32.gmra.mxu2 %vm928_vm2, %v728_v43  ;;  %7288 = vmatmul.msk.f32.gmra.mxu3 %vm928_vm2, %v727_v38  ;;  %v1386_v38 = vld [vmem:[%s13664_s6 + $0x38] sm:$0xff] }
  0x8b   : > { %815 = vperm.xlu1 %7991, %v745_v44   ;;  %810 = vperm.xlu0 %7990, %v744_v46   ;;  %v1383_v44 = vld [vmem:[%s13664_s6 + $0x20] sm:$0xff] }
  0x8c   : > { %890 = vperm.xlu2 %7992, %v760_v45   ;;  %v1403_v45 = vld [vmem:[%s13664_s6 + $0xc0] sm:$0xff] }
  0x91   : > { %7238 = vmatmul.msk.f32.gmra.mxu0 %vm928_vm2, %v709_v47  ;;  %7270 = vmatmul.msk.f32.gmra.mxu1 %vm928_vm2, %v709_v47  ;;  %v721_v47 = vld [vmem:[%s13661_s26 + $0x88] sm:$0xff] }
  0x92   : > { %7258 = vmatmul.msk.f32.gmra.mxu2 %vm928_vm2, %v729_v48  ;;  %7289 = vmatmul.msk.f32.gmra.mxu3 %vm928_vm2, %v728_v43  ;;  %v1384_v43 = vld [vmem:[%s13664_s6 + $0x28] sm:$0xff] }
  0x93   : > { %800 = vperm.xlu1 %7991, %v742_v49   ;;  %895 = vperm.xlu0 %7990, %v761_v50  }
  0x94   : > { %805 = vperm.xlu2 %7992, %v743_v51   ;;  %v1381_v51 = vld [vmem:[%s13664_s6 + $0x10] sm:$0xff] }
  0x99   : > { %7239 = vmatmul.msk.f32.gmra.mxu0 %vm928_vm2, %v710_v52  ;;  %7271 = vmatmul.msk.f32.gmra.mxu1 %vm928_vm2, %v710_v52  ;;  %v1404_v52 = vld [vmem:[%s13664_s6 + $0xc8] sm:$0xff] }
  0x9a   : > { %7259 = vmatmul.msk.f32.gmra.mxu2 %vm928_vm2, %v730_v53  ;;  %7290 = vmatmul.msk.f32.gmra.mxu3 %vm928_vm2, %v729_v48 }
  0x9b   : > { %885 = vperm.xlu1 %7991, %v759_v54   ;;  %880 = vperm.xlu0 %7990, %v758_v55   ;;  %v722_v55 = vld [vmem:[%s13661_s26 + $0x90] sm:$0xff] }
  0x9c   : > { %790 = vperm.xlu2 %7992, %v740_v56  }
  0xa1   : > { %7240 = vmatmul.msk.f32.gmra.mxu0 %vm928_vm2, %v711_v57  ;;  %7272 = vmatmul.msk.f32.gmra.mxu1 %vm928_vm2, %v711_v57 }
  0xa2   : > { %7260 = vmatmul.msk.f32.gmra.mxu2 %vm928_vm2, %v731_v58  ;;  %7291 = vmatmul.msk.f32.gmra.mxu3 %vm928_vm2, %v730_v53  ;;  %v1382_v53 = vld [vmem:[%s13664_s6 + $0x18] sm:$0xff] }
  0xa3   : > { %870 = vperm.xlu1 %7991, %v756_v59   ;;  %795 = vperm.xlu0 %7990, %v741_v60   ;;  %v1402_v59 = vld [vmem:[%s13664_s6 + $0xb8] sm:$0xff]  ;;  %v1401_v60 = vld [vmem:[%s13664_s6 + $0xb0] sm:$0xff] }
  0xa4   : > { %875 = vperm.xlu2 %7992, %v757_v61   ;;  %v1379_v61 = vld [vmem:[%s13664_s6] sm:$0xff] }
  0xa9   : > { %7241 = vmatmul.msk.f32.gmra.mxu0 %vm928_vm2, %v712_v62  ;;  %7273 = vmatmul.msk.f32.gmra.mxu1 %vm928_vm2, %v712_v62 }
  0xaa   : > { %7261 = vmatmul.msk.f32.gmra.mxu2 %vm928_vm2, %v732_v63  ;;  %7292 = vmatmul.msk.f32.gmra.mxu3 %vm928_vm2, %v731_v58 }
  0xab   : > { %785 = vperm.xlu1 %7991, %v739_v0   ;;  %780 = vperm.xlu0 %7990, %v738_v2   ;;  %v1399_v2 = vld [vmem:[%s13664_s6 + $0xa0] sm:$0xff] }
  0xac   : > { %860 = vperm.xlu2 %7992, %v754_v1  }
  0xb1   : > { %7242 = vmatmul.msk.f32.gmra.mxu0 %vm928_vm2, %v713_v3  ;;  %7274 = vmatmul.msk.f32.gmra.mxu1 %vm928_vm2, %v713_v3  ;;  %v1380_v3 = vld [vmem:[%s13664_s6 + $0x8] sm:$0xff] }
  0xb2   : > { %7262 = vmatmul.msk.f32.gmra.mxu2 %vm928_vm2, %v733_v8  ;;  %7293 = vmatmul.msk.f32.gmra.mxu3 %vm928_vm2, %v732_v63 }
  0xb3   : > { %770 = vperm.xlu1 %7991, %v736_v9   ;;  %865 = vperm.xlu0 %7990, %v755_v10  }
  0xb4   : > { %775 = vperm.xlu2 %7992, %v737_v11  }
  0xb9   : > { %7243 = vmatmul.msk.f32.gmra.mxu0 %vm928_vm2, %v714_v12  ;;  %7275 = vmatmul.msk.f32.gmra.mxu1 %vm928_vm2, %v714_v12 }
  0xba   : > { %7263 = vmatmul.msk.f32.gmra.mxu2 %vm928_vm2, %v734_v13  ;;  %7294 = vmatmul.msk.f32.gmra.mxu3 %vm928_vm2, %v733_v8  ;;  %v1400_v8 = vld [vmem:[%s13664_s6 + $0xa8] sm:$0xff] }
  0xbb   : > { %855 = vperm.xlu1 %7991, %v753_v14   ;;  %850 = vperm.xlu0 %7990, %v752_v15   ;;  %v1395_v14 = vld [vmem:[%s13664_s6 + $0x80] sm:$0xff] }
  0xbc   : > { %1483 = vperm.xlu2 %7992, %v1393_v16  }
  0xc1   : > { %7244 = vmatmul.msk.f32.gmra.mxu0 %vm928_vm2, %v715_v17  ;;  %7276 = vmatmul.msk.f32.gmra.mxu1 %vm928_vm2, %v715_v17 }
  0xc2   : > { %7264 = vmatmul.msk.f32.gmra.mxu2 %vm928_vm2, %v735_v18  ;;  %7295 = vmatmul.msk.f32.gmra.mxu3 %vm928_vm2, %v734_v13  ;;  %v1397_v13 = vld [vmem:[%s13664_s6 + $0x90] sm:$0xff] }
  0xc3   : > { %1473 = vperm.xlu1 %7991, %v1391_v19   ;;  %1488 = vperm.xlu0 %7990, %v1394_v20  }
  0xc4   : > { %1478 = vperm.xlu2 %7992, %v1392_v21   ;;  %v2295_v21 = vld [vmem:[%s13678_s10 + $0x70] sm:$0xff] }
  0xc6   : > { %v8876_v15 = vpop.permute.xlu2 %830 }
  0xc9   : > { %7245 = vmatmul.msk.f32.gmra.mxu0 %vm928_vm2, %v716_v24  ;;  %7277 = vmatmul.msk.f32.gmra.mxu1 %vm928_vm2, %v716_v24  ;;  %v1396_v24 = vld [vmem:[%s13664_s6 + $0x88] sm:$0xff] }
  0xca   : > { %7296 = vmatmul.msk.f32.gmra.mxu3 %vm928_vm2, %v735_v18 }
  0xcb   : > { %1468 = vperm.xlu1 %7991, %v1390_v25   ;;  %1463 = vperm.xlu0 %7990, %v1389_v26   ;;  %v2296_v25 = vld [vmem:[%s13678_s10 + $0x78] sm:$0xff] }
  0xcc   : > { %1563 = vperm.xlu2 %7992, %v1409_v27  }
  0xce   : > { %v8899_v27 = vpop.permute.xlu2 %835 }
  0xd1   : > { %7246 = vmatmul.msk.f32.gmra.mxu0 %vm928_vm2, %v717_v28  ;;  %7278 = vmatmul.msk.f32.gmra.mxu1 %vm928_vm2, %v717_v28 }
  0xd3   : > { %1453 = vperm.xlu1 %7991, %v1387_v29   ;;  %1568 = vperm.xlu0 %7990, %v1410_v30  }
  0xd4   : > { %1458 = vperm.xlu2 %7992, %v1388_v31  }
  0xd9   : > { %7247 = vmatmul.msk.f32.gmra.mxu0 %vm928_vm2, %v718_v32  ;;  %7279 = vmatmul.msk.f32.gmra.mxu1 %vm928_vm2, %v718_v32 }
  0xdb   : > { %1558 = vperm.xlu1 %7991, %v1408_v33   ;;  %1553 = vperm.xlu0 %7990, %v1407_v34   ;;  %v2312_v33 = vld [vmem:[%s13678_s10 + $0xf8] sm:$0xff]  ;;  %v2311_v34 = vld [vmem:[%s13678_s10 + $0xf0] sm:$0xff] }
  0xdc   : > { %1443 = vperm.xlu2 %7992, %v1385_v35   ;;  %v2293_v35 = vld [vmem:[%s13678_s10 + $0x60] sm:$0xff] }
  0xdd   : > { %v8880_v17 = vpop.permute.xlu1 %920  ;;  %v8901_v28 = vpop.permute.xlu0 %840 }
  0xe1   : > { %7248 = vmatmul.msk.f32.gmra.mxu0 %vm928_vm2, %v719_v36  ;;  %7280 = vmatmul.msk.f32.gmra.mxu1 %vm928_vm2, %v719_v36 }
  0xe3   : > { %1543 = vperm.xlu1 %7991, %v1405_v37   ;;  %1448 = vperm.xlu0 %7990, %v1386_v38  }
  0xe4   : > { %1548 = vperm.xlu2 %7992, %v1406_v39  }
  0xe5   : > { %v8907_v31 = vpop.permute.xlu1 %925  ;;  %v8926_v39 = vpop.permute.xlu0 %845 }
  0xe6   : > { %v8781_v41 = vpop.f32.mrf.mxu0  ;;  %v8783_v42 = vpop.f32.mrf.mxu1 }
  0xe7   : > { %13665 = vst [vmem:[#allocation20_spill] sm:$0xff] %v8781_v41 }
  0xe8   : > { %13666 = vst [vmem:[#allocation21_spill] sm:$0xff] %v8783_v42 }
  0xe9   : > { %7249 = vmatmul.msk.f32.gmra.mxu0 %vm928_vm2, %v720_v40  ;;  %7281 = vmatmul.msk.f32.gmra.mxu1 %vm928_vm2, %v720_v40 }
  0xeb   : > { %1438 = vperm.xlu1 %7991, %v1384_v43   ;;  %1433 = vperm.xlu0 %7990, %v1383_v44   ;;  %v2309_v43 = vld [vmem:[%s13678_s10 + $0xe0] sm:$0xff]  ;;  %v2294_v44 = vld [vmem:[%s13678_s10 + $0x68] sm:$0xff] }
  0xec   : > { %1533 = vperm.xlu2 %7992, %v1403_v45   ;;  %v2310_v45 = vld [vmem:[%s13678_s10 + $0xe8] sm:$0xff] }
  0xed   : > { %v8796_v46 = vpop.f32.mrf.mxu2  ;;  %v8801_v48 = vpop.f32.mrf.mxu3 }
  0xee   : > { %13667 = vst [vmem:[#allocation22_spill] sm:$0xff] %v8801_v48  ;;  %v8803_v49 = vpop.f32.mrf.mxu0  ;;  %v8805_v50 = vpop.f32.mrf.mxu1 }
  0xef   : > { %13668 = vst [vmem:[#allocation23_spill] sm:$0xff] %v8803_v49  ;;  %v2303_v49 = vld [vmem:[%s13678_s10 + $0xb0] sm:$0xff] }
  0xf0   : > { %13669 = vst [vmem:[#allocation24_spill] sm:$0xff] %v8805_v50 }
  0xf1   : > { %7250 = vmatmul.msk.f32.gmra.mxu0 %vm928_vm2, %v721_v47  ;;  %7282 = vmatmul.msk.f32.gmra.mxu1 %vm928_vm2, %v721_v47  ;;  %v8939_v47 = vpop.permute.xlu2 %820 }
  0xf3   : > { %1423 = vperm.xlu1 %7991, %v1381_v51   ;;  %1538 = vperm.xlu0 %7990, %v1404_v52   ;;  %v8941_v51 = vpop.permute.xlu1 %915 }
  0xf4   : > { %1428 = vperm.xlu2 %7992, %v1382_v53  }
  0xf5   : > { %v8818_v54 = vpop.f32.mrf.mxu2  ;;  %v8823_v56 = vpop.f32.mrf.mxu3 }
  0xf6   : > { %v8825_v57 = vpop.f32.mrf.mxu0  ;;  %v8827_v58 = vpop.f32.mrf.mxu1 }
  0xf7   : > { %13670 = vst [vmem:[#allocation25_spill] sm:$0xff] %v8825_v57 }
  0xf8   : > { %13671 = vst [vmem:[#allocation26_spill] sm:$0xff] %v8827_v58 }
  0xf9   : > { %7251 = vmatmul.msk.f32.gmra.mxu0 %vm928_vm2, %v722_v55  ;;  %7283 = vmatmul.msk.f32.gmra.mxu1 %vm928_vm2, %v722_v55 }
  0xfb   : > { %1528 = vperm.xlu1 %7991, %v1402_v59   ;;  %1523 = vperm.xlu0 %7990, %v1401_v60   ;;  %v2292_v60 = vld [vmem:[%s13678_s10 + $0x58] sm:$0xff] }
  0xfc   : > { %1413 = vperm.xlu2 %7992, %v1379_v61   ;;  %v2291_v61 = vld [vmem:[%s13678_s10 + $0x50] sm:$0xff] }
  0xfd   : > { %v8840_v62 = vpop.f32.mrf.mxu2  ;;  %v8842_v63 = vpop.f32.mrf.mxu3 }
  0xfe   : > { %v8844_v0 = vpop.f32.mrf.mxu0  ;;  %v8846_v1 = vpop.f32.mrf.mxu1 }
  0xff   : > { %13672 = vst [vmem:[#allocation27_spill] sm:$0xff] %v8844_v0 }
 0x100   : > { %13673 = vst [vmem:[#allocation28_spill] sm:$0xff] %v8846_v1 }
 0x101   : > { %7252 = vmatmul.msk.f32.gmra.mxu0 %vm928_vm2, %v8495_v23  ;;  %v1398_v23 = vld [vmem:[%s13664_s6 + $0x98] sm:$0xff]  ;;  %s13723_s6 = sld [smem:[#allocation148_spill]] }
 0x103   : > { %1513 = vperm.xlu1 %7991, %v1399_v2   ;;  %1418 = vperm.xlu0 %7990, %v1380_v3   ;;  %v2307_v2 = vld [vmem:[%s13678_s10 + $0xd0] sm:$0xff]  ;;  %v8960_v3 = vpop.permute.xlu0 %910 }
 0x104   : > { %1518 = vperm.xlu2 %7992, %v1400_v8   ;;  %v8962_v8 = vpop.permute.xlu2 %905 }
 0x105   : > { %v8859_v9 = vpop.f32.mrf.mxu2  ;;  %v8861_v10 = vpop.f32.mrf.mxu3 }
 0x106   : > { %v8863_v11 = vpop.f32.mrf.mxu0  ;;  %v8865_v12 = vpop.f32.mrf.mxu1 }
 0x107   : > { %13674 = vst [vmem:[#allocation29_spill] sm:$0xff] %v8863_v11 }
 0x108   : > { %13675 = vst [vmem:[#allocation30_spill] sm:$0xff] %v8865_v12 }
 0x10b   : > { %1508 = vperm.xlu1 %7991, %v1398_v23   ;;  %1503 = vperm.xlu0 %7990, %v1397_v13   ;;  %v8964_v23 = vpop.permute.xlu1 %900 }
 0x10c   : > { %1493 = vperm.xlu2 %7992, %v1395_v14  }
 0x10d   : > { %v8878_v16 = vpop.f32.mrf.mxu2  ;;  %v8882_v18 = vpop.f32.mrf.mxu3 }
 0x10e   : > { %v8884_v19 = vpop.f32.mrf.mxu0  ;;  %v8886_v20 = vpop.f32.mrf.mxu1 }
 0x10f   : > { %13676 = vst [vmem:[#allocation31_spill] sm:$0xff] %v8884_v19 }
 0x110   : > { %13677 = vst [vmem:[#allocation32_spill] sm:$0xff] %v8886_v20 }
 0x113   : > { %2385 = vperm.xlu1 %7991, %v2295_v21   ;;  %1498 = vperm.xlu0 %7990, %v1396_v24  }
 0x114   : > { %2390 = vperm.xlu2 %7992, %v2296_v25   ;;  %v2289_v25 = vld [vmem:[%s13678_s10 + $0x40] sm:$0xff] }
 0x115   : > { %v8897_v26 = vpop.f32.mrf.mxu2  ;;  %v8903_v29 = vpop.f32.mrf.mxu3 }
 0x116   : > { %v8905_v30 = vpop.f32.mrf.mxu0  ;;  %v8909_v32 = vpop.f32.mrf.mxu1 }
 0x117   : > { %13679 = vst [vmem:[#allocation33_spill] sm:$0xff] %v8905_v30 }
 0x118   : > { %13680 = vst [vmem:[#allocation34_spill] sm:$0xff] %v8909_v32 }
 0x11b   : > { %2470 = vperm.xlu1 %7991, %v2312_v33   ;;  %2465 = vperm.xlu0 %7990, %v2311_v34   ;;  %v2308_v33 = vld [vmem:[%s13678_s10 + $0xd8] sm:$0xff]  ;;  %v2290_v34 = vld [vmem:[%s13678_s10 + $0x48] sm:$0xff] }
 0x11c   : > { %2375 = vperm.xlu2 %7992, %v2293_v35   ;;  %v8981_v35 = vpop.permute.xlu0 %825 }
 0x11d   : > { %v8920_v36 = vpop.f32.mrf.mxu2  ;;  %v8922_v37 = vpop.f32.mrf.mxu3 }
 0x11e   : > { %v8924_v38 = vpop.f32.mrf.mxu0  ;;  %v8928_v40 = vpop.f32.mrf.mxu1 }
 0x11f   : > { %13681 = vst [vmem:[#allocation35_spill] sm:$0xff] %v8924_v38 }
 0x120   : > { %13682 = vst [vmem:[#allocation36_spill] sm:$0xff] %v8928_v40 }
 0x123   : > { %2455 = vperm.xlu1 %7991, %v2309_v43   ;;  %2380 = vperm.xlu0 %7990, %v2294_v44   ;;  %v8983_v44 = vpop.permute.xlu2 %890 }
 0x124   : > { %2460 = vperm.xlu2 %7992, %v2310_v45   ;;  %v8985_v45 = vpop.permute.xlu1 %815  ;;  %v9002_v7 = vpop.permute.xlu0 %810  ;;  %v1115_v40 = vadd.f32 %v8878_v16, %v8983_v44  ;;  %v2283_v16 = vld [vmem:[%s13678_s10 + $0x10] sm:$0xff] }
 0x125   : > { %v8943_v52 = vpop.f32.mrf.mxu2  ;;  %v8945_v53 = vpop.f32.mrf.mxu3 }
 0x126   : > { %v8947_v55 = vpop.f32.mrf.mxu0  ;;  %v8949_v59 = vpop.f32.mrf.mxu1  ;;  %v1124_v12 = vadd.f32 %v8943_v52, %v8962_v8 }
 0x12b   : > { %2370 = vperm.xlu1 %7991, %v2292_v60   ;;  %2365 = vperm.xlu0 %7990, %v2291_v61   ;;  %v9013_v42 = vpop.permute.xlu2 %805 }
 0x12c   : > { %2445 = vperm.xlu2 %7992, %v2307_v2   ;;  %v9006_v4 = vpop.permute.xlu1 %800  ;;  %13683 = vst [vmem:[#allocation37_spill] sm:$0xff] %v9013_v42  ;;  %v896_v0 = vpop.permute.xlu0 %895 }
 0x12d   : > { %v1126_v13 = vpop.f32.mrf.mxu2  ;;  %v8966_v14 = vpop.f32.mrf.mxu3 }
 0x12e   : > { %v8968_v21 = vpop.f32.mrf.mxu0  ;;  %v8970_v24 = vpop.f32.mrf.mxu1 }
 0x133   : > { %2355 = vperm.xlu1 %7991, %v2289_v25   ;;  %2450 = vperm.xlu0 %7990, %v2308_v33   ;;  %v2305_v25 = vld [vmem:[%s13678_s10 + $0xc0] sm:$0xff]  ;;  %v2287_v33 = vld [vmem:[%s13678_s10 + $0x30] sm:$0xff] }
 0x134   : > { %2360 = vperm.xlu2 %7992, %v2290_v34  }
 0x135   : > { %v1129_v43 = vpop.f32.mrf.mxu2  ;;  %v8987_v60 = vpop.f32.mrf.mxu3 }
 0x136   : > { %v8989_v61 = vpop.f32.mrf.mxu0  ;;  %v8991_v2 = vpop.f32.mrf.mxu1  ;;  %v1130_v1 = vadd.f32 %v1129_v43, %v8941_v51  ;;  %v2301_v43 = vld [vmem:[%s13678_s10 + $0xa0] sm:$0xff] }
 0x13b   : > { %2440 = vperm.xlu1 %7991, %v2306_v22   ;;  %2435 = vperm.xlu0 %7990, %v2305_v25   ;;  %v2288_v22 = vld [vmem:[%s13678_s10 + $0x38] sm:$0xff] }
 0x13c   : > { %2345 = vperm.xlu2 %7992, %v2287_v33   ;;  %v2304_v25 = vld [vmem:[%s13678_s10 + $0xb8] sm:$0xff] }
 0x13d   : > { %v1132_v34 = vpop.f32.mrf.mxu2  ;;  %v1242_v6 = vpop.f32.mrf.mxu3 }
 0x13e   : > { %v9004_v5 = vpop.f32.mrf.mxu0  ;;  %v9008_v50 = vpop.f32.mrf.mxu1  ;;  %v1133_v33 = vadd.f32 %v1132_v34, %v8880_v17  ;;  %v1127_v34 = vadd.f32 %v1126_v13, %v8960_v3  ;;  %v1309_v13 = vmax.f32 %v1130_v1, 0.0  ;;  %v1243_v1 = vadd.f32 %v1242_v6, %v8941_v51 }
 0x140   : > { %v1311_v11 = vmax.f32 %v1133_v33, 0.0  ;;  %v1121_v33 = vadd.f32 %v8920_v36, %v8964_v23  ;;  %v1307_v30 = vmax.f32 %v1127_v34, 0.0 }
 0x142   : > { %v1343_v32 = vpack.c.bf16 %v1309_v13, %v1307_v30 }
 0x143   : > { %2425 = vperm.xlu1 %7991, %v2303_v49   ;;  %2350 = vperm.xlu0 %7990, %v2288_v22   ;;  %v2286_v49 = vld [vmem:[%s13678_s10 + $0x28] sm:$0xff]  ;;  %v9038_v22 = vpop.permute.xlu1 %885 }
 0x144   : > { %2430 = vperm.xlu2 %7992, %v2304_v25   ;;  %v1112_v6 = vadd.f32 %v8859_v9, %v9038_v22 }
 0x145   : > { %v1135_v41 = vpop.f32.mrf.mxu2  ;;  %v1245_v58 = vpop.f32.mrf.mxu3 }
 0x146   : > { %v1136_v48 = vadd.f32 %v1135_v41, %v8907_v31  ;;  %v9024_v57 = vpop.f32.mrf.mxu0  ;;  %v9026_v19 = vpop.f32.mrf.mxu1  ;;  %v2285_v41 = vld [vmem:[%s13678_s10 + $0x20] sm:$0xff]  ;;  %v1246_v38 = vadd.f32 %v1245_v58, %v8880_v17  ;;  %v2302_v58 = vld [vmem:[%s13678_s10 + $0xa8] sm:$0xff] }
 0x147   : > { %v881_v17 = vpop.permute.xlu0 %880 }
 0x148   : > { %v1313_v20 = vmax.f32 %v1136_v48, 0.0  ;;  %v9040_v48 = vpop.permute.xlu2 %790 }
 0x149   : > { %13684 = vst [vmem:[#allocation38_spill] sm:$0xff] %v9040_v48  ;;  %v1305_v48 = vmax.f32 %v1124_v12, 0.0  ;;  %v2284_v12 = vld [vmem:[%s13678_s10 + $0x18] sm:$0xff] }
 0x14a   : > { %v1345_v25 = vpack.c.bf16 %v1313_v20, %v1311_v11  ;;  %v1118_v11 = vadd.f32 %v8897_v26, %v896_v0  ;;  %v1303_v20 = vmax.f32 %v1121_v33, 0.0  ;;  %v1312_v26 = vmax.f32 %v1246_v38, 0.0 }
 0x14b   : > { %2340 = vperm.xlu1 %7991, %v2286_v49   ;;  %2335 = vperm.xlu0 %7990, %v2285_v41   ;;  %v871_v41 = vpop.permute.xlu1 %870  ;;  %v1310_v33 = vmax.f32 %v1243_v1, 0.0 }
 0x14c   : > { %2415 = vperm.xlu2 %7992, %v2301_v43   ;;  %1820 = vmatpush.bf16.msrb.mxu3 %v1345_v25  ;;  %v1301_v51 = vmax.f32 %v1118_v11, 0.0  ;;  %v1341_v34 = vpack.c.bf16 %v1305_v48, %v1303_v20  ;;  %v1234_v43 = vadd.f32 %v8945_v53, %v8964_v23  ;;  %v1237_v25 = vadd.f32 %v8966_v14, %v8962_v8 }
 0x14d   : > { %v1248_v42 = vpop.f32.mrf.mxu3  ;;  %v1228_v48 = vadd.f32 %v8903_v29, %v8983_v44  ;;  %v1231_v8 = vadd.f32 %v8922_v37, %v896_v0  ;;  %v2281_v29 = vld [vmem:[%s13678_s10] sm:$0xff]  ;;  %v1225_v0 = vadd.f32 %v8882_v18, %v9038_v22  ;;  %v1216_v22 = vadd.f32 %v8823_v56, %v871_v41 }
 0x14e   : > { %v9050_v36 = vpop.f32.mrf.mxu0  ;;  %v1249_v52 = vadd.f32 %v1248_v42, %v8907_v31  ;;  %v9054_v49 = vpop.f32.mrf.mxu1  ;;  %v1240_v42 = vadd.f32 %v8987_v60, %v8960_v3  ;;  %v1109_v31 = vadd.f32 %v8840_v62, %v881_v17  ;;  %v1103_v60 = vadd.f32 %v8796_v46, %v871_v41  ;;  %v2299_v46 = vld [vmem:[%s13678_s10 + $0x90] sm:$0xff] }
 0x14f   : > { %v1304_v14 = vmax.f32 %v1234_v43, 0.0  ;;  %v1306_v11 = vmax.f32 %v1237_v25, 0.0  ;;  %v1298_v18 = vmax.f32 %v1225_v0, 0.0 }
 0x150   : > { %1821 = vmatpush.bf16.msrb.mxu3 %v1343_v32  ;;  %v1314_v30 = vmax.f32 %v1249_v52, 0.0  ;;  %v1299_v32 = vmax.f32 %v1115_v40, 0.0  ;;  %v876_v3 = vpop.permute.xlu2 %875  ;;  %v1308_v62 = vmax.f32 %v1240_v42, 0.0  ;;  %v1297_v40 = vmax.f32 %v1112_v6, 0.0 }
 0x151   : > { %v1106_v38 = vadd.f32 %v8818_v54, %v876_v3  ;;  %v1295_v13 = vmax.f32 %v1109_v31, 0.0  ;;  %v2300_v54 = vld [vmem:[%s13678_s10 + $0x98] sm:$0xff]  ;;  %v1291_v44 = vmax.f32 %v1103_v60, 0.0  ;;  %v1302_v6 = vmax.f32 %v1231_v8, 0.0 }
 0x152   : > { %v1346_v9 = vpack.c.bf16 %v1314_v30, %v1312_v26  ;;  %v1339_v23 = vpack.c.bf16 %v1301_v51, %v1299_v32  ;;  %v1344_v1 = vpack.c.bf16 %v1310_v33, %v1308_v62  ;;  %v1342_v42 = vpack.c.bf16 %v1306_v11, %v1304_v14 }
 0x153   : > { %2325 = vperm.xlu1 %7991, %v2283_v16   ;;  %2420 = vperm.xlu0 %7990, %v2302_v58   ;;  %v1337_v37 = vpack.c.bf16 %v1297_v40, %v1295_v13  ;;  %v1293_v52 = vmax.f32 %v1106_v38, 0.0  ;;  %v1222_v16 = vadd.f32 %v8861_v10, %v881_v17  ;;  %v9091_v58 = vpop.permute.xlu0 %795  ;;  %v1219_v26 = vadd.f32 %v8842_v63, %v876_v3  ;;  %v2297_v63 = vld [vmem:[%s13678_s10 + $0x80] sm:$0xff]  ;;  %v9116_v40 = vpop.permute.xlu1 %785 }
 0x154   : > { %2330 = vperm.xlu2 %7992, %v2284_v12   ;;  %1822 = vmatpush.bf16.msrb.mxu3 %v1341_v34  ;;  %v1300_v12 = vmax.f32 %v1228_v48, 0.0  ;;  %v1082_v17 = vadd.f32 %v9050_v36, %v8899_v27  ;;  %v1195_v33 = vadd.f32 %v9054_v49, %v8899_v27  ;;  %v2298_v36 = vld [vmem:[%s13678_s10 + $0x88] sm:$0xff]  ;;  %v1192_v27 = vadd.f32 %v9026_v19, %v8876_v15 }
 0x155   : > { %1998 = vmatpush.bf16.msrb.mxu1 %v1346_v9  ;;  %v1335_v10 = vpack.c.bf16 %v1293_v52, %v1291_v44  ;;  %v1296_v25 = vmax.f32 %v1222_v16, 0.0  ;;  %v1294_v41 = vmax.f32 %v1219_v26, 0.0  ;;  %v1079_v9 = vadd.f32 %v9024_v57, %v8876_v15  ;;  %v13686_v16 = vld [vmem:[#allocation37_spill] sm:$0xff] }
 0x156   : > { %v1084_v53 = vpop.f32.mrf.mxu0  ;;  %v1197_v20 = vpop.f32.mrf.mxu1  ;;  %v1340_v43 = vpack.c.bf16 %v1302_v6, %v1300_v12  ;;  %v1292_v62 = vmax.f32 %v1216_v22, 0.0  ;;  %v1076_v60 = vadd.f32 %v9004_v5, %v8981_v35  ;;  %v1277_v48 = vmax.f32 %v1082_v17, 0.0  ;;  %v13687_v12 = vld [vmem:[#allocation35_spill] sm:$0xff] }
 0x157   : > { %v1085_v30 = vadd.f32 %v1084_v53, %v8901_v28  ;;  %v1198_v31 = vadd.f32 %v1197_v20, %v8901_v28  ;;  %v2282_v28 = vld [vmem:[%s13678_s10 + $0x8] sm:$0xff]  ;;  %v1338_v53 = vpack.c.bf16 %v1298_v18, %v1296_v25  ;;  %v1278_v13 = vmax.f32 %v1195_v33, 0.0  ;;  %s14040_s10 = smov %s14039_s28 }
 0x158   : > { %1823 = vmatpush.bf16.msrb.mxu3 %v1339_v23  ;;  %v1189_v23 = vadd.f32 %v9008_v50, %v8981_v35  ;;  %v1073_v19 = vadd.f32 %v8989_v61, %v8939_v47  ;;  %v1275_v14 = vmax.f32 %v1079_v9, 0.0  ;;  %v1186_v5 = vadd.f32 %v8991_v2, %v8939_v47  ;;  %v2938_v61 = vld [vmem:[%s13410_s12 + $0x78] sm:$0xff]  ;;  %v13692_v25 = vld [vmem:[#allocation31_spill] sm:$0xff] }
 0x159   : > { %1999 = vmatpush.bf16.msrb.mxu1 %v1344_v1  ;;  %v1279_v3 = vmax.f32 %v1085_v30, 0.0  ;;  %v1276_v11 = vmax.f32 %v1192_v27, 0.0  ;;  %v1070_v50 = vadd.f32 %v8968_v21, %v8985_v45  ;;  %v1273_v35 = vmax.f32 %v1076_v60, 0.0  ;;  %v2937_v21 = vld [vmem:[%s13410_s12 + $0x70] sm:$0xff]  ;;  %v9153_v30 = vpop.permute.xlu2 %860  ;;  %v13694_v27 = vld [vmem:[#allocation29_spill] sm:$0xff] }
 0x15a   : > { %v1183_v47 = vadd.f32 %v8970_v24, %v8985_v45  ;;  %v1274_v2 = vmax.f32 %v1189_v23, 0.0  ;;  %v1067_v44 = vadd.f32 %v8947_v55, %v9002_v7  ;;  %v1271_v52 = vmax.f32 %v1073_v19, 0.0  ;;  %v13685_v24 = vld [vmem:[#allocation34_spill] sm:$0xff]  ;;  %v13695_v23 = vld [vmem:[#allocation27_spill] sm:$0xff] }
 0x15b   : > { %2410 = vperm.xlu1 %7991, %v2300_v54   ;;  %2405 = vperm.xlu0 %7990, %v2299_v46   ;;  %v9122_v15 = vpop.permute.xlu0 %780  ;;  %v1336_v54 = vpack.c.bf16 %v1294_v41, %v1292_v62  ;;  %v1327_v46 = vpack.c.bf16 %v1277_v48, %v1275_v14  ;;  %v1328_v0 = vpack.c.bf16 %v1278_v13, %v1276_v11  ;;  %v771_v17 = vpop.permute.xlu1 %770  ;;  %v2934_v48 = vld [vmem:[%s13410_s12 + $0x58] sm:$0xff]  ;;  %v13697_v11 = vld [vmem:[#allocation26_spill] sm:$0xff] }
 0x15c   : > { %2315 = vperm.xlu2 %7992, %v2281_v29   ;;  %1824 = vmatpush.bf16.msrb.mxu3 %v1337_v37  ;;  %v1180_v29 = vadd.f32 %v8949_v59, %v9002_v7  ;;  %v2935_v37 = vld [vmem:[%s13410_s12 + $0x60] sm:$0xff]  ;;  %v1272_v59 = vmax.f32 %v1186_v5, 0.0  ;;  %v1174_v45 = vadd.f32 %v13685_v24, %v9006_v4  ;;  %v1064_v6 = vadd.f32 %v13687_v12, %v13686_v16  ;;  %v13688_v7 = vld [vmem:[#allocation36_spill] sm:$0xff]  ;;  %v13696_v14 = vld [vmem:[#allocation25_spill] sm:$0xff] }
 0x15d   : > { %2000 = vmatpush.bf16.msrb.mxu1 %v1342_v42  ;;  %v1269_v42 = vmax.f32 %v1070_v50, 0.0  ;;  %v1325_v26 = vpack.c.bf16 %v1273_v35, %v1271_v52  ;;  %v1177_v55 = vadd.f32 %v13688_v7, %v13686_v16  ;;  %v1270_v22 = vmax.f32 %v1183_v47, 0.0  ;;  %v13700_v52 = vld [vmem:[#allocation20_spill] sm:$0xff] }
 0x15e   : > { %v1087_v32 = vpop.f32.mrf.mxu0  ;;  %v1200_v34 = vpop.f32.mrf.mxu1  ;;  %v1268_v18 = vmax.f32 %v1180_v29, 0.0  ;;  %v1058_v33 = vadd.f32 %v13692_v25, %v9091_v58  ;;  %v1265_v41 = vmax.f32 %v1064_v6, 0.0  ;;  %v1052_v13 = vadd.f32 %v13695_v23, %v9116_v40  ;;  %v13701_v6 = vld [vmem:[#allocation21_spill] sm:$0xff] }
 0x15f   : > { %v1088_v51 = vadd.f32 %v1087_v32, %v8926_v39  ;;  %v1201_v56 = vadd.f32 %v1200_v34, %v8926_v39  ;;  %v1280_v39 = vmax.f32 %v1198_v31, 0.0  ;;  %v1326_v31 = vpack.c.bf16 %v1274_v2, %v1272_v59  ;;  %v13689_v32 = vld [vmem:[#allocation33_spill] sm:$0xff]  ;;  %v13690_v34 = vld [vmem:[#allocation38_spill] sm:$0xff] }
 0x160   : > { %1825 = vmatpush.bf16.msrb.mxu3 %v1335_v10  ;;  %v1061_v10 = vadd.f32 %v13689_v32, %v9006_v4  ;;  %v1266_v62 = vmax.f32 %v1177_v55, 0.0  ;;  %v1324_v60 = vpack.c.bf16 %v1270_v22, %v1268_v18  ;;  %v1049_v5 = vadd.f32 %v13696_v14, %v9122_v15  ;;  %v13699_v2 = vld [vmem:[#allocation22_spill] sm:$0xff]  ;;  %v2929_v18 = vld [vmem:[%s13410_s12 + $0x30] sm:$0xff] }
 0x161   : > { %v1281_v38 = vmax.f32 %v1088_v51, 0.0  ;;  %2001 = vmatpush.bf16.msrb.mxu1 %v1340_v43  ;;  %v1282_v49 = vmax.f32 %v1201_v56, 0.0  ;;  %v1267_v51 = vmax.f32 %v1067_v44, 0.0  ;;  %v13691_v43 = vld [vmem:[#allocation30_spill] sm:$0xff]  ;;  %v13693_v56 = vld [vmem:[#allocation32_spill] sm:$0xff]  ;;  %v1162_v50 = vadd.f32 %v13697_v11, %v9122_v15  ;;  %v776_v47 = vpop.permute.xlu2 %775 }
 0x162   : > { %v1043_v59 = vadd.f32 %v13700_v52, %v771_v17  ;;  %v1255_v16 = vmax.f32 %v1049_v5, 0.0  ;;  %v2931_v55 = vld [vmem:[%s13410_s12 + $0x40] sm:$0xff] }
 0x163   : > { %2395 = vperm.xlu1 %7991, %v2297_v63   ;;  %2320 = vperm.xlu0 %7990, %v2282_v28   ;;  %v1329_v57 = vpack.c.bf16 %v1281_v38, %v1279_v3  ;;  %v1330_v8 = vpack.c.bf16 %v1282_v49, %v1280_v39  ;;  %v1168_v63 = vadd.f32 %v13691_v43, %v13690_v34  ;;  %v9167_v9 = vpop.permute.xlu0 %865  ;;  %v2933_v38 = vld [vmem:[%s13410_s12 + $0x50] sm:$0xff]  ;;  %v1264_v49 = vmax.f32 %v1174_v45, 0.0  ;;  %v856_v15 = vpop.permute.xlu1 %855  ;;  %v2932_v45 = vld [vmem:[%s13410_s12 + $0x48] sm:$0xff]  ;;  %v2927_v5 = vld [vmem:[%s13410_s12 + $0x20] sm:$0xff] }
 0x164   : > { %2400 = vperm.xlu2 %7992, %v2298_v36   ;;  %v1171_v28 = vadd.f32 %v13693_v56, %v9091_v58  ;;  %v1323_v4 = vpack.c.bf16 %v1269_v42, %v1267_v51  ;;  %v1055_v39 = vadd.f32 %v13694_v27, %v13690_v34  ;;  %v2936_v58 = vld [vmem:[%s13410_s12 + $0x68] sm:$0xff]  ;;  %v1256_v12 = vmax.f32 %v1162_v50, 0.0  ;;  %v13703_v51 = vld [vmem:[#allocation24_spill] sm:$0xff] }
 0x165   : > { %2002 = vmatpush.bf16.msrb.mxu1 %v1338_v53  ;;  %1731 = vmatpush.bf16.msrb.mxu2 %v1329_v57  ;;  %v1263_v53 = vmax.f32 %v1061_v10, 0.0  ;;  %v1260_v57 = vmax.f32 %v1168_v63, 0.0  ;;  %v1322_v29 = vpack.c.bf16 %v1266_v62, %v1264_v49  ;;  %v1156_v42 = vadd.f32 %v13701_v6, %v771_v17  ;;  %v7836_v27 = vld [vmem:[%s13705_s24 + $0x4] sm:$0xf0] }
 0x166   : > { %1909 = vmatpush.bf16.msrb.mxu0 %v1330_v8  ;;  %v9128_v20 = vpop.f32.mrf.mxu0  ;;  %v9132_v1 = vpop.f32.mrf.mxu1  ;;  %v1261_v8 = vmax.f32 %v1058_v33, 0.0  ;;  %v1262_v19 = vmax.f32 %v1171_v28, 0.0  ;;  %v1159_v34 = vadd.f32 %v13703_v51, %v776_v47  ;;  %v1251_v33 = vmax.f32 %v1043_v59, 0.0  ;;  %v2951_v59 = vld [vmem:[%s13410_s12 + $0xe0] sm:$0xff]  ;;  %v7840_v6 = vld [vmem:[%s13705_s24 + $0x24] sm:$0xf0] }
 0x167   : > { %v1321_v35 = vpack.c.bf16 %v1265_v41, %v1263_v53  ;;  %v7301_v53 = vld [vmem:[%s13705_s24 + $0x8] sm:$0xf0]  ;;  %v2943_v51 = vld [vmem:[%s13410_s12 + $0xa0] sm:$0xff] }
 0x168   : > { %v1320_v44 = vpack.c.bf16 %v1262_v19, %v1260_v57  ;;  %v1254_v62 = vmax.f32 %v1159_v34, 0.0  ;;  %v2946_v34 = vld [vmem:[%s13410_s12 + $0xb8] sm:$0xff] }
 0x169   : > { %2003 = vmatpush.bf16.msrb.mxu1 %v1336_v54  ;;  %1732 = vmatpush.bf16.msrb.mxu2 %v1327_v46  ;;  %v1259_v54 = vmax.f32 %v1055_v39, 0.0  ;;  %v13698_v46 = vld [vmem:[#allocation28_spill] sm:$0xff] }
 0x16a   : > { %1910 = vmatpush.bf16.msrb.mxu0 %v1328_v0  ;;  %v1213_v0 = vadd.f32 %v13699_v2, %v9167_v9  ;;  %v7838_v2 = vld [vmem:[%s13705_s24 + $0x14] sm:$0xf0] }
 0x16b   : > { %3032 = vperm.xlu1 %7991, %v2938_v61   ;;  %3027 = vperm.xlu0 %7990, %v2937_v21   ;;  %v1165_v61 = vadd.f32 %v13698_v46, %v9116_v40  ;;  %v1257_v40 = vmax.f32 %v1052_v13, 0.0  ;;  %v851_v10 = vpop.permute.xlu0 %850  ;;  %v2930_v13 = vld [vmem:[%s13410_s12 + $0x38] sm:$0xff]  ;;  %v2953_v46 = vld [vmem:[%s13410_s12 + $0xf0] sm:$0xff] }
 0x16c   : > { %3017 = vperm.xlu2 %7992, %v2935_v37   ;;  %v1319_v37 = vpack.c.bf16 %v1261_v8, %v1259_v54  ;;  %v1204_v17 = vadd.f32 %v9132_v1, %v851_v10  ;;  %v1290_v63 = vmax.f32 %v1213_v0, 0.0  ;;  %v7299_v1 = vld [vmem:[%s13704_s0] sm:$0xf]  ;;  %v1091_v8 = vadd.f32 %v9128_v20, %v851_v10  ;;  %v7837_v0 = vld [vmem:[%s13705_s24 + $0x14] sm:$0xf] }
 0x16d   : > { %1733 = vmatpush.bf16.msrb.mxu2 %v1325_v26  ;;  %v1258_v22 = vmax.f32 %v1165_v61, 0.0  ;;  %v1317_v25 = vpack.c.bf16 %v1257_v40, %v1255_v16  ;;  %v2925_v61 = vld [vmem:[%s13410_s12 + $0x10] sm:$0xff]  ;;  %v2924_v16 = vld [vmem:[%s13410_s12 + $0x8] sm:$0xff] }
 0x16e   : > { %1911 = vmatpush.bf16.msrb.mxu0 %v1326_v31  ;;  %v9165_v36 = vpop.f32.mrf.mxu0  ;;  %v1206_v3 = vpop.f32.mrf.mxu1  ;;  %v13702_v31 = vld [vmem:[#allocation23_spill] sm:$0xff]  ;;  %v1284_v39 = vmax.f32 %v1204_v17, 0.0  ;;  %v1283_v54 = vmax.f32 %v1091_v8, 0.0  ;;  %v2945_v10 = vld [vmem:[%s13410_s12 + $0xb0] sm:$0xff] }
 0x16f   : > { %v1207_v26 = vadd.f32 %v1206_v3, %v856_v15  ;;  %v1046_v32 = vadd.f32 %v13702_v31, %v776_v47  ;;  %v1318_v28 = vpack.c.bf16 %v1258_v22, %v1256_v12  ;;  %v1252_v3 = vmax.f32 %v1156_v42, 0.0  ;;  %v7307_v47 = vld [vmem:[%s13705_s24 + $0x10] sm:$0xf]  ;;  %v7315_v12 = vld [vmem:[%s13705_s24 + $0x20] sm:$0xf] }
 0x170   : > { %v7308_v52 = vor.u32 %v7838_v2, %v7307_v47  ;;  %v7839_v42 = vld [vmem:[%s13705_s24 + $0x24] sm:$0xf]  ;;  %v7323_v17 = vld [vmem:[%s13705_s24 + $0x30] sm:$0xf] }
 0x171   : > { %1734 = vmatpush.bf16.msrb.mxu2 %v1323_v4  ;;  %v1286_v56 = vmax.f32 %v1207_v26, 0.0  ;;  %v1316_v57 = vpack.c.bf16 %v1254_v62, %v1252_v3  ;;  %v7317_v26 = vld [vmem:[%s13705_s24 + $0x28] sm:$0xf0]  ;;  %v2947_v22 = vld [vmem:[%s13410_s12 + $0xc0] sm:$0xff]  ;;  %v2941_v3 = vld [vmem:[%s13410_s12 + $0x90] sm:$0xff] }
 0x172   : > { %1912 = vmatpush.bf16.msrb.mxu0 %v1324_v60  ;;  %v1094_v60 = vadd.f32 %v9165_v36, %v856_v15  ;;  %v2928_v36 = vld [vmem:[%s13410_s12 + $0x28] sm:$0xff]  ;;  %v7320_v31 = vor.u32 %v7839_v42, %v7317_v26  ;;  %v3835_v2 = vld [vmem:[%s13414_s16 + $0x50] sm:$0xff] }
 0x173   : > { %3007 = vperm.xlu1 %7991, %v2933_v38   ;;  %3022 = vperm.xlu0 %7990, %v2936_v58   ;;  %v1253_v38 = vmax.f32 %v1046_v32, 0.0  ;;  %v1332_v23 = vpack.c.bf16 %v1286_v56, %v1284_v39  ;;  %v9269_v40 = vpop.permute.xlu0 %1488  ;;  %v2944_v56 = vld [vmem:[%s13410_s12 + $0xa8] sm:$0xff] }
 0x174   : > { %3012 = vperm.xlu2 %7992, %v2934_v48   ;;  %v7835_v48 = vld [vmem:[%s13705_s24 + $0x4] sm:$0xf]  ;;  %v1285_v50 = vmax.f32 %v1094_v60, 0.0  ;;  %v2940_v39 = vld [vmem:[%s13410_s12 + $0x88] sm:$0xff]  ;;  %v7331_v60 = vld [vmem:[%s13705_s24 + $0x40] sm:$0xf] }
 0x175   : > { %1735 = vmatpush.bf16.msrb.mxu2 %v1321_v35  ;;  %v7304_v11 = vor.u32 %v7835_v48, %v7301_v53  ;;  %v7333_v48 = vld [vmem:[%s13705_s24 + $0x48] sm:$0xf0]  ;;  %v3840_v53 = vld [vmem:[%s13414_s16 + $0x78] sm:$0xff] }
 0x176   : > { %1913 = vmatpush.bf16.msrb.mxu0 %v1322_v29  ;;  %v1096_v21 = vpop.f32.mrf.mxu0  ;;  %v1209_v24 = vpop.f32.mrf.mxu1  ;;  %v1331_v20 = vpack.c.bf16 %v1285_v50, %v1283_v54  ;;  %v2954_v29 = vld [vmem:[%s13410_s12 + $0xf8] sm:$0xff]  ;;  %v7845_v54 = vld [vmem:[%s13705_s24 + $0x54] sm:$0xf]  ;;  %v3834_v42 = vld [vmem:[%s13414_s16 + $0x48] sm:$0xff] }
 0x177   : > { %v1210_v7 = vadd.f32 %v1209_v24, %v9153_v30  ;;  %v1097_v4 = vadd.f32 %v1096_v21, %v9153_v30  ;;  %v1315_v30 = vpack.c.bf16 %v1253_v38, %v1251_v33  ;;  %v7309_v21 = vld [vmem:[%s13705_s24 + $0x18] sm:$0xf0]  ;;  %v2923_v24 = vld [vmem:[%s13410_s12] sm:$0xff]  ;;  %v7846_v50 = vld [vmem:[%s13705_s24 + $0x54] sm:$0xf0] }
 0x178   : > { %v7312_v15 = vor.u32 %v7837_v0, %v7309_v21  ;;  %v9400_v21 = vpop.permute.xlu1 %1473  ;;  %v3850_v26 = vld [vmem:[%s13414_s16 + $0xc8] sm:$0xff] }
 0x179   : > { %1736 = vmatpush.bf16.msrb.mxu2 %v1319_v37  ;;  %v1288_v43 = vmax.f32 %v1210_v7, 0.0  ;;  %v1287_v19 = vmax.f32 %v1097_v4, 0.0  ;;  %v2926_v37 = vld [vmem:[%s13410_s12 + $0x18] sm:$0xff]  ;;  %v9326_v4 = vpop.permute.xlu2 %1483 }
 0x17a   : > { %1914 = vmatpush.bf16.msrb.mxu0 %v1320_v44  ;;  %v2952_v44 = vld [vmem:[%s13410_s12 + $0xe8] sm:$0xff]  ;;  %v2950_v7 = vld [vmem:[%s13410_s12 + $0xd8] sm:$0xff] }
 0x17b   : > { %3002 = vperm.xlu1 %7991, %v2932_v45   ;;  %2997 = vperm.xlu0 %7990, %v2931_v55   ;;  %v1334_v41 = vpack.c.bf16 %v1290_v63, %v1288_v43  ;;  %v2949_v45 = vld [vmem:[%s13410_s12 + $0xd0] sm:$0xff]  ;;  %v2948_v55 = vld [vmem:[%s13410_s12 + $0xc8] sm:$0xff]  ;;  %v9292_v32 = vpop.permute.xlu0 %1463  ;;  %v7842_v43 = vld [vmem:[%s13705_s24 + $0x34] sm:$0xf0] }
 0x17c   : > { %2987 = vperm.xlu2 %7992, %v2929_v18   ;;  %v7316_v18 = vor.u32 %v7840_v6, %v7315_v12  ;;  %v7841_v63 = vld [vmem:[%s13705_s24 + $0x34] sm:$0xf]  ;;  %v7349_v12 = vld [vmem:[%s13705_s24 + $0x68] sm:$0xf0] }
 0x17d   : > { %1737 = vmatpush.bf16.msrb.mxu2 %v1317_v25  ;;  %2004 = vmatpush.bf16.msrb.mxu1 %v1334_v41  ;;  %v7325_v25 = vld [vmem:[%s13705_s24 + $0x38] sm:$0xf0]  ;;  %v7324_v41 = vor.u32 %v7842_v43, %v7323_v17 }
 0x17e   : > { %1915 = vmatpush.bf16.msrb.mxu0 %v1318_v28  ;;  %v1099_v49 = vpop.f32.mrf.mxu0  ;;  %v2942_v28 = vld [vmem:[%s13410_s12 + $0x98] sm:$0xff]  ;;  %v7328_v38 = vor.u32 %v7841_v63, %v7325_v25  ;;  %v7355_v63 = vld [vmem:[%s13705_s24 + $0x70] sm:$0xf] }
 0x17f   : > { %v1100_v58 = vadd.f32 %v1099_v49, %v9167_v9  ;;  %v7300_v9 = vor.u32 %v7836_v27, %v7299_v1  ;;  %v2939_v1 = vld [vmem:[%s13410_s12 + $0x80] sm:$0xff]  ;;  %v3839_v27 = vld [vmem:[%s13414_s16 + $0x70] sm:$0xff]  ;;  %v7850_v25 = vld [vmem:[%s13705_s24 + $0x74] sm:$0xf0] }
 0x180   : > { %v9427_v6 = vpop.permute.xlu1 %1468 }
 0x181   : > { %v1289_v14 = vmax.f32 %v1100_v58, 0.0  ;;  %1738 = vmatpush.bf16.msrb.mxu2 %v1315_v30  ;;  %2005 = vmatpush.bf16.msrb.mxu1 %v1332_v23  ;;  %v9339_v62 = vpop.permute.xlu2 %1478  ;;  %v7844_v58 = vld [vmem:[%s13705_s24 + $0x44] sm:$0xf0]  ;;  %v7843_v30 = vld [vmem:[%s13705_s24 + $0x44] sm:$0xf] }
 0x182   : > { %1916 = vmatpush.bf16.msrb.mxu0 %v1316_v57  ;;  %v3856_v57 = vld [vmem:[%s13414_s16 + $0xf8] sm:$0xff]  ;;  %v7332_v23 = vor.u32 %v7844_v58, %v7331_v60 }
 0x183   : > { %2992 = vperm.xlu0 %7990, %v2930_v13   ;;  %v1333_v35 = vpack.c.bf16 %v1289_v14, %v1287_v19  ;;  %2977 = vperm.xlu1 %7991, %v2927_v5   ;;  %v9315_v33 = vpop.permute.xlu0 %1568  ;;  %v3855_v13 = vld [vmem:[%s13414_s16 + $0xf0] sm:$0xff]  ;;  %v3837_v19 = vld [vmem:[%s13414_s16 + $0x60] sm:$0xff]  ;;  %v3838_v5 = vld [vmem:[%s13414_s16 + $0x68] sm:$0xff] }
 0x184   : > { %2982 = vperm.xlu2 %7992, %v2928_v36   ;;  %1739 = vmatmul.bf16.vlgmr.msrb.gmra.mxu2 %v7300_v9  ;;  %13706 = vst [vmem:[#allocation34_spill] sm:$0xff] %v9315_v33  ;;  %v7336_v36 = vor.u32 %v7843_v30, %v7333_v48  ;;  %v3853_v14 = vld [vmem:[%s13414_s16 + $0xe0] sm:$0xff] }
 0x185   : > { %1917 = vmatmul.bf16.vlgmr.msrb.gmra.mxu0 %v7300_v9  ;;  %1826 = vmatpush.bf16.msrb.mxu3 %v1333_v35  ;;  %v3845_v48 = vld [vmem:[%s13414_s16 + $0xa0] sm:$0xff] }
 0x186   : > { %2006 = vmatmul.bf16.vlgmr.msrb.gmra.mxu1 %v7304_v11 }
 0x188   : > { %v9451_v17 = vpop.permute.xlu1 %1453 }
 0x189   : > { %1827 = vmatpush.bf16.msrb.mxu3 %v1331_v20  ;;  %v9364_v8 = vpop.permute.xlu2 %1563  ;;  %v7341_v20 = vld [vmem:[%s13705_s24 + $0x58] sm:$0xf0] }
 0x18a   : > { %v7344_v0 = vor.u32 %v7845_v54, %v7341_v20  ;;  %v3843_v20 = vld [vmem:[%s13414_s16 + $0x90] sm:$0xff] }
 0x18b   : > { %3107 = vperm.xlu0 %7990, %v2953_v46   ;;  %3112 = vperm.xlu1 %7991, %v2954_v29   ;;  %v9337_v49 = vpop.permute.xlu0 %1553  ;;  %v3836_v29 = vld [vmem:[%s13414_s16 + $0x58] sm:$0xff] }
 0x18c   : > { %2967 = vperm.xlu2 %7992, %v2925_v61   ;;  %1828 = vmatmul.bf16.vlgmr.msrb.gmra.mxu3 %v7304_v11  ;;  %13707 = vst [vmem:[#allocation37_spill] sm:$0xff] %v9337_v49  ;;  %v7339_v11 = vld [vmem:[%s13705_s24 + $0x50] sm:$0xf]  ;;  %v3854_v61 = vld [vmem:[%s13414_s16 + $0xe8] sm:$0xff] }
 0x18d   : > { %v7340_v47 = vor.u32 %v7846_v50, %v7339_v11  ;;  %v3828_v11 = vld [vmem:[%s13414_s16 + $0x18] sm:$0xff] }
 0x18e   : > { %v3844_v50 = vld [vmem:[%s13414_s16 + $0x98] sm:$0xff] }
 0x190   : > { %v9478_v60 = vpop.permute.xlu1 %1558 }
 0x191   : > { %v9389_v46 = vpop.permute.xlu2 %1458 }
 0x193   : > { %2972 = vperm.xlu0 %7990, %v2926_v37   ;;  %3097 = vperm.xlu1 %7991, %v2951_v59   ;;  %v9362_v9 = vpop.permute.xlu0 %1448  ;;  %v3852_v59 = vld [vmem:[%s13414_s16 + $0xd8] sm:$0xff] }
 0x194   : > { %3102 = vperm.xlu2 %7992, %v2952_v44   ;;  %1744 = vmatmul.bf16.gmra.mxu2 %v7308_v52  ;;  %v3851_v44 = vld [vmem:[%s13414_s16 + $0xd0] sm:$0xff] }
 0x195   : > { %1922 = vmatmul.bf16.gmra.mxu0 %v7308_v52  ;;  %v3833_v52 = vld [vmem:[%s13414_s16 + $0x40] sm:$0xff] }
 0x196   : > { %2011 = vmatmul.bf16.gmra.mxu1 %v7312_v15 }
 0x19b   : > { %2957 = vperm.xlu0 %7990, %v2923_v24   ;;  %2962 = vperm.xlu1 %7991, %v2924_v16   ;;  %v9381_v35 = vpop.permute.xlu0 %1433  ;;  %v7347_v24 = vld [vmem:[%s13705_s24 + $0x60] sm:$0xf]  ;;  %v7847_v16 = vld [vmem:[%s13705_s24 + $0x64] sm:$0xf] }
 0x19c   : > { %3087 = vperm.xlu2 %7992, %v2949_v45   ;;  %1833 = vmatmul.bf16.gmra.mxu3 %v7312_v15  ;;  %v9413_v15 = vpop.permute.xlu2 %1443  ;;  %v7848_v45 = vld [vmem:[%s13705_s24 + $0x64] sm:$0xf0] }
 0x1a3   : > { %3092 = vperm.xlu0 %7990, %v2950_v7   ;;  %3077 = vperm.xlu1 %7991, %v2947_v22   ;;  %v9402_v37 = vpop.permute.xlu0 %1538  ;;  %v7348_v7 = vor.u32 %v7848_v45, %v7347_v24  ;;  %v7352_v22 = vor.u32 %v7847_v16, %v7349_v12  ;;  %v3825_v24 = vld [vmem:[%s13414_s16] sm:$0xff]  ;;  %v3826_v16 = vld [vmem:[%s13414_s16 + $0x8] sm:$0xff] }
 0x1a4   : > { %3082 = vperm.xlu2 %7992, %v2948_v55   ;;  %1749 = vmatmul.bf16.gmra.mxu2 %v7316_v18  ;;  %13708 = vst [vmem:[#allocation35_spill] sm:$0xff] %v9402_v37  ;;  %v3849_v55 = vld [vmem:[%s13414_s16 + $0xc0] sm:$0xff] }
 0x1a5   : > { %1927 = vmatmul.bf16.gmra.mxu0 %v7316_v18  ;;  %v3841_v45 = vld [vmem:[%s13414_s16 + $0x80] sm:$0xff] }
 0x1a6   : > { %2016 = vmatmul.bf16.gmra.mxu1 %v7320_v31 }
 0x1ab   : > { %3067 = vperm.xlu0 %7990, %v2945_v10   ;;  %3072 = vperm.xlu1 %7991, %v2946_v34   ;;  %v9438_v18 = vpop.permute.xlu0 %1523  ;;  %v3831_v10 = vld [vmem:[%s13414_s16 + $0x30] sm:$0xff]  ;;  %v3832_v34 = vld [vmem:[%s13414_s16 + $0x38] sm:$0xff] }
 0x1ac   : > { %3057 = vperm.xlu2 %7992, %v2943_v51   ;;  %1838 = vmatmul.bf16.gmra.mxu3 %v7320_v31  ;;  %v9440_v31 = vpop.permute.xlu2 %1548  ;;  %v3847_v51 = vld [vmem:[%s13414_s16 + $0xb0] sm:$0xff] }
 0x1ad   : > { %13709 = vst [vmem:[#allocation36_spill] sm:$0xff] %v9440_v31 }
 0x1b3   : > { %3062 = vperm.xlu0 %7990, %v2944_v56   ;;  %3047 = vperm.xlu1 %7991, %v2941_v3   ;;  %v9453_v43 = vpop.permute.xlu0 %1418  ;;  %v3848_v3 = vld [vmem:[%s13414_s16 + $0xb8] sm:$0xff] }
 0x1b4   : > { %3052 = vperm.xlu2 %7992, %v2942_v28   ;;  %1754 = vmatmul.bf16.gmra.mxu2 %v7324_v41  ;;  %v9461_v56 = vpop.permute.xlu2 %1533  ;;  %v7849_v28 = vld [vmem:[%s13705_s24 + $0x74] sm:$0xf] }
 0x1b5   : > { %1932 = vmatmul.bf16.gmra.mxu0 %v7324_v41  ;;  %v7357_v41 = vld [vmem:[%s13705_s24 + $0x78] sm:$0xf0] }
 0x1b6   : > { %2021 = vmatmul.bf16.gmra.mxu1 %v7328_v38 }
 0x1bb   : > { %3037 = vperm.xlu0 %7990, %v2939_v1   ;;  %3042 = vperm.xlu1 %7991, %v2940_v39   ;;  %v7356_v1 = vor.u32 %v7850_v25, %v7355_v63  ;;  %v7360_v39 = vor.u32 %v7849_v28, %v7357_v41  ;;  %v9480_v58 = vpop.permute.xlu0 %1503  ;;  %v7853_v41 = vld [vmem:[%s13705_s24 + $0x94] sm:$0xf] }
 0x1bc   : > { %3929 = vperm.xlu2 %7992, %v3839_v27   ;;  %1843 = vmatmul.bf16.gmra.mxu3 %v7328_v38  ;;  %v3830_v38 = vld [vmem:[%s13414_s16 + $0x28] sm:$0xff]  ;;  %v3829_v27 = vld [vmem:[%s13414_s16 + $0x20] sm:$0xff]  ;;  %v9482_v30 = vpop.permute.xlu2 %1428 }
 0x1c3   : > { %3934 = vperm.xlu0 %7990, %v3840_v53   ;;  %4009 = vperm.xlu1 %7991, %v3855_v13   ;;  %v3827_v53 = vld [vmem:[%s13414_s16 + $0x10] sm:$0xff]  ;;  %v7852_v13 = vld [vmem:[%s13705_s24 + $0x84] sm:$0xf0] }
 0x1c4   : > { %4014 = vperm.xlu2 %7992, %v3856_v57   ;;  %1759 = vmatmul.bf16.gmra.mxu2 %v7332_v23  ;;  %v3846_v57 = vld [vmem:[%s13414_s16 + $0xa8] sm:$0xff] }
 0x1c5   : > { %1937 = vmatmul.bf16.gmra.mxu0 %v7332_v23  ;;  %v7363_v23 = vld [vmem:[%s13705_s24 + $0x80] sm:$0xf] }
 0x1c6   : > { %2026 = vmatmul.bf16.gmra.mxu1 %v7336_v36  ;;  %v7364_v54 = vor.u32 %v7852_v13, %v7363_v23 }
 0x1cb   : > { %3919 = vperm.xlu0 %7990, %v3837_v19   ;;  %3924 = vperm.xlu1 %7991, %v3838_v5   ;;  %v7851_v19 = vld [vmem:[%s13705_s24 + $0x84] sm:$0xf]  ;;  %v9507_v5 = vpop.permute.xlu0 %1498 }
 0x1cc   : > { %3999 = vperm.xlu2 %7992, %v3853_v14   ;;  %1848 = vmatmul.bf16.gmra.mxu3 %v7336_v36  ;;  %v9499_v36 = vpop.permute.xlu1 %1543  ;;  %v7365_v14 = vld [vmem:[%s13705_s24 + $0x88] sm:$0xf0]  ;;  %13711 = vst [vmem:[#allocation38_spill] sm:$0xff] %v9507_v5 }
 0x1cd   : > { %13710 = vst [vmem:[#allocation33_spill] sm:$0xff] %v9499_v36 }
 0x1d3   : > { %4004 = vperm.xlu0 %7990, %v3854_v61   ;;  %3909 = vperm.xlu1 %7991, %v3835_v2   ;;  %v1414_v61 = vpop.permute.xlu2 %1413  ;;  %v9529_v12 = vpop.permute.xlu0 %2465 }
 0x1d4   : > { %3914 = vperm.xlu2 %7992, %v3836_v29   ;;  %1764 = vmatmul.bf16.gmra.mxu2 %v7340_v47  ;;  %13712 = vst [vmem:[#allocation30_spill] sm:$0xff] %v9529_v12 }
 0x1d5   : > { %1942 = vmatmul.bf16.gmra.mxu0 %v7340_v47  ;;  %v7368_v47 = vor.u32 %v7851_v19, %v7365_v14 }
 0x1d6   : > { %2031 = vmatmul.bf16.gmra.mxu1 %v7344_v0 }
 0x1db   : > { %3989 = vperm.xlu0 %7990, %v3851_v44   ;;  %3994 = vperm.xlu1 %7991, %v3852_v59   ;;  %v9518_v59 = vpop.permute.xlu1 %1438  ;;  %v9814_v12 = vpop.permute.xlu2 %1518 }
 0x1dc   : > { %3899 = vperm.xlu2 %7992, %v3833_v52   ;;  %1853 = vmatmul.bf16.gmra.mxu3 %v7344_v0  ;;  %13726 = vst [vmem:[#allocation24_spill] sm:$0xff] %v9814_v12 }
 0x1e3   : > { %3904 = vperm.xlu0 %7990, %v3834_v42   ;;  %3979 = vperm.xlu1 %7991, %v3849_v55  }
 0x1e4   : > { %3984 = vperm.xlu2 %7992, %v3850_v26   ;;  %1769 = vmatmul.bf16.gmra.mxu2 %v7348_v7 }
 0x1e5   : > { %1947 = vmatmul.bf16.gmra.mxu0 %v7348_v7 }
 0x1e6   : > { %2036 = vmatmul.bf16.gmra.mxu1 %v7352_v22 }
 0x1eb   : > { %3889 = vperm.xlu0 %7990, %v3831_v10   ;;  %3894 = vperm.xlu1 %7991, %v3832_v34   ;;  %v7854_v10 = vld [vmem:[%s13705_s24 + $0x94] sm:$0xf0] }
 0x1ec   : > { %3969 = vperm.xlu2 %7992, %v3847_v51   ;;  %1858 = vmatmul.bf16.gmra.mxu3 %v7352_v22  ;;  %v7371_v22 = vld [vmem:[%s13705_s24 + $0x90] sm:$0xf] }
 0x1f3   : > { %3974 = vperm.xlu0 %7990, %v3848_v3   ;;  %3879 = vperm.xlu1 %7991, %v3829_v27   ;;  %v7373_v3 = vld [vmem:[%s13705_s24 + $0x98] sm:$0xf0] }
 0x1f4   : > { %3884 = vperm.xlu2 %7992, %v3830_v38   ;;  %1774 = vmatmul.bf16.gmra.mxu2 %v7356_v1  ;;  %v4482_v27 = vld [vmem:[%s13416_s18 + $0x78] sm:$0xff]  ;;  %v7376_v13 = vor.u32 %v7853_v41, %v7373_v3  ;;  %v4480_v3 = vld [vmem:[%s13416_s18 + $0x68] sm:$0xff] }
 0x1f5   : > { %1952 = vmatmul.bf16.gmra.mxu0 %v7356_v1  ;;  %v3842_v1 = vld [vmem:[%s13414_s16 + $0x88] sm:$0xff] }
 0x1f6   : > { %2041 = vmatmul.bf16.gmra.mxu1 %v7360_v39 }
 0x1fb   : > { %3959 = vperm.xlu0 %7990, %v3845_v48   ;;  %3964 = vperm.xlu1 %7991, %v3846_v57   ;;  %v4481_v48 = vld [vmem:[%s13416_s18 + $0x70] sm:$0xff]  ;;  %v1424_v57 = vpop.permute.xlu1 %1423 }
 0x1fc   : > { %3869 = vperm.xlu2 %7992, %v3827_v53   ;;  %1863 = vmatmul.bf16.gmra.mxu3 %v7360_v39  ;;  %v7372_v39 = vor.u32 %v7854_v10, %v7371_v22 }
 0x202   : > { %v1918_v29 = vpop.f32.mrf.mxu0 }
 0x203   : > { %v1919_v2 = vadd.f32 %v1918_v29, %v1414_v61  ;;  %3874 = vperm.xlu0 %7990, %v3828_v11   ;;  %v2007_v0 = vpop.f32.mrf.mxu1  ;;  %3949 = vperm.xlu1 %7991, %v3843_v20   ;;  %v9555_v11 = vpop.permute.xlu0 %2380 }
 0x204   : > { %3954 = vperm.xlu2 %7992, %v3844_v50   ;;  %1779 = vmatmul.bf16.gmra.mxu2 %v7364_v54  ;;  %13713 = vst [vmem:[#allocation31_spill] sm:$0xff] %v9555_v11 }
 0x205   : > { %v2008_v44 = vadd.f32 %v2007_v0, %v1919_v2  ;;  %1957 = vmatmul.bf16.gmra.mxu0 %v7364_v54  ;;  %v4479_v2 = vld [vmem:[%s13416_s18 + $0x60] sm:$0xff]  ;;  %v4498_v0 = vld [vmem:[%s13416_s18 + $0xf8] sm:$0xff] }
 0x206   : > { %2046 = vmatmul.bf16.gmra.mxu1 %v7368_v47 }
 0x207   : > { %v1740_v52 = vpop.f32.mrf.mxu2  ;;  %v2088_v34 = vmax.f32 %v2008_v44, 0.0 }
 0x208   : > { %v1741_v51 = vadd.f32 %v1740_v52, %v1414_v61 }
 0x20a   : > { %v1920_v42 = vpop.f32.mrf.mxu0 }
 0x20b   : > { %v1921_v26 = vadd.f32 %v1920_v42, %v9453_v43  ;;  %3859 = vperm.xlu0 %7990, %v3825_v24   ;;  %v2009_v7 = vpop.f32.mrf.mxu1  ;;  %3864 = vperm.xlu1 %7991, %v3826_v16  }
 0x20c   : > { %3939 = vperm.xlu2 %7992, %v3841_v45   ;;  %1868 = vmatmul.bf16.gmra.mxu3 %v7368_v47  ;;  %v4497_v47 = vld [vmem:[%s13416_s18 + $0xf0] sm:$0xff] }
 0x20d   : > { %v2010_v55 = vadd.f32 %v2009_v7, %v1921_v26  ;;  %v7379_v26 = vld [vmem:[%s13705_s24 + $0xa0] sm:$0xf]  ;;  %v7856_v7 = vld [vmem:[%s13705_s24 + $0xa4] sm:$0xf0] }
 0x20f   : > { %v2090_v63 = vmax.f32 %v2010_v55, 0.0  ;;  %v1742_v25 = vpop.f32.mrf.mxu2  ;;  %v1829_v28 = vpop.f32.mrf.mxu3 }
 0x210   : > { %v1830_v38 = vadd.f32 %v1829_v28, %v1741_v51  ;;  %v1743_v54 = vadd.f32 %v1742_v25, %v9453_v43  ;;  %v9576_v55 = vpop.permute.xlu0 %2365  ;;  %v7855_v25 = vld [vmem:[%s13705_s24 + $0xa4] sm:$0xf]  ;;  %v7381_v28 = vld [vmem:[%s13705_s24 + $0xa8] sm:$0xf0] }
 0x211   : > { %v9553_v53 = vpack.c.bf16 %v2090_v63, %v2088_v34  ;;  %13714 = vst [vmem:[#allocation32_spill] sm:$0xff] %v9576_v55 }
 0x212   : > { %v1923_v23 = vpop.f32.mrf.mxu0  ;;  %v2087_v44 = vmax.f32 %v1830_v38, 0.0  ;;  %v4496_v38 = vld [vmem:[%s13416_s18 + $0xe8] sm:$0xff] }
 0x213   : > { %v1924_v19 = vadd.f32 %v1923_v23, %v1424_v57  ;;  %3944 = vperm.xlu0 %7990, %v3842_v1   ;;  %v2012_v14 = vpop.f32.mrf.mxu1  ;;  %4571 = vperm.xlu1 %7991, %v4481_v48   ;;  %v7380_v1 = vor.u32 %v7856_v7, %v7379_v26  ;;  %v7858_v26 = vld [vmem:[%s13705_s24 + $0xb4] sm:$0xf0] }
 0x214   : > { %4576 = vperm.xlu2 %7992, %v4482_v27   ;;  %1784 = vmatmul.bf16.gmra.mxu2 %v7372_v39  ;;  %v4495_v27 = vld [vmem:[%s13416_s18 + $0xe0] sm:$0xff] }
 0x215   : > { %v2013_v50 = vadd.f32 %v2012_v14, %v1924_v19  ;;  %1962 = vmatmul.bf16.gmra.mxu0 %v7372_v39 }
 0x216   : > { %2051 = vmatmul.bf16.gmra.mxu1 %v7376_v13 }
 0x217   : > { %v1745_v20 = vpop.f32.mrf.mxu2  ;;  %v1831_v61 = vpop.f32.mrf.mxu3  ;;  %v2092_v10 = vmax.f32 %v2013_v50, 0.0 }
 0x218   : > { %v1832_v29 = vadd.f32 %v1831_v61, %v1743_v54  ;;  %v1746_v22 = vadd.f32 %v1745_v20, %v1424_v57  ;;  %v7384_v57 = vor.u32 %v7855_v25, %v7381_v28  ;;  %v9597_v20 = vpop.permute.xlu0 %2450  ;;  %v7389_v25 = vld [vmem:[%s13705_s24 + $0xb8] sm:$0xf0] }
 0x219   : > { %13715 = vst [vmem:[#allocation29_spill] sm:$0xff] %v9597_v20 }
 0x21a   : > { %v2089_v52 = vmax.f32 %v1832_v29, 0.0  ;;  %v1925_v24 = vpop.f32.mrf.mxu0  ;;  %v4477_v29 = vld [vmem:[%s13416_s18 + $0x50] sm:$0xff] }
 0x21b   : > { %v1926_v43 = vadd.f32 %v1925_v24, %v9482_v30  ;;  %4651 = vperm.xlu0 %7990, %v4497_v47   ;;  %v2014_v45 = vpop.f32.mrf.mxu1  ;;  %4656 = vperm.xlu1 %7991, %v4498_v0   ;;  %v4493_v47 = vld [vmem:[%s13416_s18 + $0xd0] sm:$0xff] }
 0x21c   : > { %4561 = vperm.xlu2 %7992, %v4479_v2   ;;  %1873 = vmatmul.bf16.gmra.mxu3 %v7376_v13  ;;  %v9568_v16 = vpack.c.bf16 %v2089_v52, %v2087_v44  ;;  %v4478_v2 = vld [vmem:[%s13416_s18 + $0x58] sm:$0xff] }
 0x21d   : > { %v2015_v42 = vadd.f32 %v2014_v45, %v1926_v43 }
 0x21f   : > { %v2094_v51 = vmax.f32 %v2015_v42, 0.0  ;;  %v1747_v34 = vpop.f32.mrf.mxu2  ;;  %v1834_v63 = vpop.f32.mrf.mxu3  ;;  %v7387_v42 = vld [vmem:[%s13705_s24 + $0xb0] sm:$0xf] }
 0x220   : > { %v1835_v41 = vadd.f32 %v1834_v63, %v1746_v22  ;;  %v1748_v14 = vadd.f32 %v1747_v34, %v9482_v30  ;;  %v7857_v63 = vld [vmem:[%s13705_s24 + $0xb4] sm:$0xf] }
 0x221   : > { %v9593_v39 = vpack.c.bf16 %v2094_v51, %v2092_v10 }
 0x222   : > { %v1928_v48 = vpop.f32.mrf.mxu0  ;;  %v2091_v0 = vmax.f32 %v1835_v41, 0.0  ;;  %v4494_v41 = vld [vmem:[%s13416_s18 + $0xd8] sm:$0xff] }
 0x223   : > { %v1929_v23 = vadd.f32 %v1928_v48, %v9381_v35  ;;  %4566 = vperm.xlu0 %7990, %v4480_v3   ;;  %v2017_v13 = vpop.f32.mrf.mxu1  ;;  %4641 = vperm.xlu1 %7991, %v4495_v27   ;;  %v7388_v3 = vor.u32 %v7858_v26, %v7387_v42  ;;  %v9635_v27 = vpop.permute.xlu0 %2435  ;;  %v7395_v26 = vld [vmem:[%s13705_s24 + $0xc0] sm:$0xf] }
 0x224   : > { %4646 = vperm.xlu2 %7992, %v4496_v38   ;;  %1789 = vmatmul.bf16.gmra.mxu2 %v7380_v1  ;;  %v4475_v38 = vld [vmem:[%s13416_s18 + $0x40] sm:$0xff]  ;;  %13716 = vst [vmem:[#allocation27_spill] sm:$0xff] %v9635_v27 }
 0x225   : > { %v2018_v19 = vadd.f32 %v2017_v13, %v1929_v23  ;;  %1967 = vmatmul.bf16.gmra.mxu0 %v7380_v1 }
 0x226   : > { %2056 = vmatmul.bf16.gmra.mxu1 %v7384_v57 }
 0x227   : > { %v1750_v50 = vpop.f32.mrf.mxu2  ;;  %v1836_v54 = vpop.f32.mrf.mxu3  ;;  %v2096_v22 = vmax.f32 %v2018_v19, 0.0 }
 0x228   : > { %v1837_v61 = vadd.f32 %v1836_v54, %v1748_v14  ;;  %v1751_v7 = vadd.f32 %v1750_v50, %v9381_v35  ;;  %v4476_v35 = vld [vmem:[%s13416_s18 + $0x48] sm:$0xff] }
 0x22a   : > { %v2093_v30 = vmax.f32 %v1837_v61, 0.0  ;;  %v1930_v44 = vpop.f32.mrf.mxu0 }
 0x22b   : > { %v1931_v52 = vadd.f32 %v1930_v44, %v9518_v59  ;;  %4551 = vperm.xlu0 %7990, %v4477_v29   ;;  %v2019_v24 = vpop.f32.mrf.mxu1  ;;  %4556 = vperm.xlu1 %7991, %v4478_v2   ;;  %v4491_v29 = vld [vmem:[%s13416_s18 + $0xc0] sm:$0xff]  ;;  %v4492_v2 = vld [vmem:[%s13416_s18 + $0xc8] sm:$0xff] }
 0x22c   : > { %4631 = vperm.xlu2 %7992, %v4493_v47   ;;  %1878 = vmatmul.bf16.gmra.mxu3 %v7384_v57  ;;  %v9609_v43 = vpack.c.bf16 %v2093_v30, %v2091_v0  ;;  %v7392_v57 = vor.u32 %v7857_v63, %v7389_v25  ;;  %v4473_v47 = vld [vmem:[%s13416_s18 + $0x30] sm:$0xff]  ;;  %v7859_v25 = vld [vmem:[%s13705_s24 + $0xc4] sm:$0xf] }
 0x22d   : > { %v2020_v45 = vadd.f32 %v2019_v24, %v1931_v52  ;;  %v9649_v24 = vpop.permute.xlu0 %2350 }
 0x22e   : > { %13717 = vst [vmem:[#allocation25_spill] sm:$0xff] %v9649_v24 }
 0x22f   : > { %v2098_v10 = vmax.f32 %v2020_v45, 0.0  ;;  %v1752_v51 = vpop.f32.mrf.mxu2  ;;  %v1839_v34 = vpop.f32.mrf.mxu3 }
 0x230   : > { %v1840_v28 = vadd.f32 %v1839_v34, %v1751_v7  ;;  %v1753_v14 = vadd.f32 %v1752_v51, %v9518_v59  ;;  %v7860_v7 = vld [vmem:[%s13705_s24 + $0xc4] sm:$0xf0] }
 0x231   : > { %v9633_v1 = vpack.c.bf16 %v2098_v10, %v2096_v22 }
 0x232   : > { %v1933_v48 = vpop.f32.mrf.mxu0  ;;  %v2095_v0 = vmax.f32 %v1840_v28, 0.0  ;;  %v7397_v28 = vld [vmem:[%s13705_s24 + $0xc8] sm:$0xf0] }
 0x233   : > { %v1934_v23 = vadd.f32 %v1933_v48, %v9413_v15  ;;  %4636 = vperm.xlu0 %7990, %v4494_v41   ;;  %v2022_v13 = vpop.f32.mrf.mxu1  ;;  %4541 = vperm.xlu1 %7991, %v4475_v38   ;;  %v4489_v38 = vld [vmem:[%s13416_s18 + $0xb0] sm:$0xff] }
 0x234   : > { %4546 = vperm.xlu2 %7992, %v4476_v35   ;;  %1794 = vmatmul.bf16.gmra.mxu2 %v7388_v3  ;;  %v4474_v35 = vld [vmem:[%s13416_s18 + $0x38] sm:$0xff] }
 0x235   : > { %v2023_v19 = vadd.f32 %v2022_v13, %v1934_v23  ;;  %1972 = vmatmul.bf16.gmra.mxu0 %v7388_v3  ;;  %v7396_v3 = vor.u32 %v7860_v7, %v7395_v26  ;;  %v7400_v23 = vor.u32 %v7859_v25, %v7397_v28  ;;  %v7403_v26 = vld [vmem:[%s13705_s24 + $0xd0] sm:$0xf]  ;;  %v7862_v7 = vld [vmem:[%s13705_s24 + $0xd4] sm:$0xf0] }
 0x236   : > { %2061 = vmatmul.bf16.gmra.mxu1 %v7392_v57 }
 0x237   : > { %v1755_v50 = vpop.f32.mrf.mxu2  ;;  %v1841_v54 = vpop.f32.mrf.mxu3  ;;  %v2100_v10 = vmax.f32 %v2023_v19, 0.0 }
 0x238   : > { %v1842_v61 = vadd.f32 %v1841_v54, %v1753_v14  ;;  %v1756_v22 = vadd.f32 %v1755_v50, %v9413_v15  ;;  %v4490_v15 = vld [vmem:[%s13416_s18 + $0xb8] sm:$0xff]  ;;  %v9680_v50 = vpop.permute.xlu0 %2335 }
 0x239   : > { %13718 = vst [vmem:[#allocation26_spill] sm:$0xff] %v9680_v50 }
 0x23a   : > { %v2097_v30 = vmax.f32 %v1842_v61, 0.0  ;;  %v1935_v44 = vpop.f32.mrf.mxu0 }
 0x23b   : > { %v1936_v59 = vadd.f32 %v1935_v44, %v9362_v9  ;;  %4621 = vperm.xlu0 %7990, %v4491_v29   ;;  %v2024_v52 = vpop.f32.mrf.mxu1  ;;  %4626 = vperm.xlu1 %7991, %v4492_v2   ;;  %v4471_v2 = vld [vmem:[%s13416_s18 + $0x20] sm:$0xff] }
 0x23c   : > { %4531 = vperm.xlu2 %7992, %v4473_v47   ;;  %1883 = vmatmul.bf16.gmra.mxu3 %v7392_v57  ;;  %v9651_v45 = vpack.c.bf16 %v2097_v30, %v2095_v0  ;;  %v4487_v0 = vld [vmem:[%s13416_s18 + $0xa0] sm:$0xff]  ;;  %v4472_v30 = vld [vmem:[%s13416_s18 + $0x28] sm:$0xff] }
 0x23d   : > { %v2025_v42 = vadd.f32 %v2024_v52, %v1936_v59 }
 0x23f   : > { %v2102_v51 = vmax.f32 %v2025_v42, 0.0  ;;  %v1757_v34 = vpop.f32.mrf.mxu2  ;;  %v1844_v63 = vpop.f32.mrf.mxu3 }
 0x240   : > { %v1845_v41 = vadd.f32 %v1844_v63, %v1756_v22  ;;  %v1758_v54 = vadd.f32 %v1757_v34, %v9362_v9  ;;  %v7861_v34 = vld [vmem:[%s13705_s24 + $0xd4] sm:$0xf]  ;;  %v7405_v63 = vld [vmem:[%s13705_s24 + $0xd8] sm:$0xf0]  ;;  %v9713_v25 = vpop.permute.xlu0 %2420 }
 0x241   : > { %v9675_v48 = vpack.c.bf16 %v2102_v51, %v2100_v10  ;;  %13719 = vst [vmem:[#allocation28_spill] sm:$0xff] %v9713_v25 }
 0x242   : > { %v1938_v57 = vpop.f32.mrf.mxu0  ;;  %v2099_v44 = vmax.f32 %v1845_v41, 0.0  ;;  %v4488_v41 = vld [vmem:[%s13416_s18 + $0xa8] sm:$0xff] }
 0x243   : > { %v1939_v13 = vadd.f32 %v1938_v57, %v9451_v17  ;;  %4536 = vperm.xlu0 %7990, %v4474_v35   ;;  %v2027_v19 = vpop.f32.mrf.mxu1  ;;  %4611 = vperm.xlu1 %7991, %v4489_v38   ;;  %v7404_v35 = vor.u32 %v7862_v7, %v7403_v26  ;;  %v7408_v38 = vor.u32 %v7861_v34, %v7405_v63  ;;  %v7863_v26 = vld [vmem:[%s13705_s24 + $0xe4] sm:$0xf]  ;;  %v7413_v7 = vld [vmem:[%s13705_s24 + $0xe8] sm:$0xf0] }
 0x244   : > { %4616 = vperm.xlu2 %7992, %v4490_v15   ;;  %1799 = vmatmul.bf16.gmra.mxu2 %v7396_v3  ;;  %v4469_v15 = vld [vmem:[%s13416_s18 + $0x10] sm:$0xff]  ;;  %v4483_v63 = vld [vmem:[%s13416_s18 + $0x80] sm:$0xff] }
 0x245   : > { %v9678_v14 = vadd.f32 %v2027_v19, %v1939_v13  ;;  %1977 = vmatmul.bf16.gmra.mxu0 %v7396_v3  ;;  %v4485_v19 = vld [vmem:[%s13416_s18 + $0x90] sm:$0xff] }
 0x246   : > { %2066 = vmatmul.bf16.gmra.mxu1 %v7400_v23 }
 0x247   : > { %v1760_v61 = vpop.f32.mrf.mxu2  ;;  %v1846_v29 = vpop.f32.mrf.mxu3 }
 0x248   : > { %v1847_v47 = vadd.f32 %v1846_v29, %v1758_v54  ;;  %v1761_v22 = vadd.f32 %v1760_v61, %v9451_v17  ;;  %v4470_v17 = vld [vmem:[%s13416_s18 + $0x18] sm:$0xff]  ;;  %v4467_v54 = vld [vmem:[%s13416_s18] sm:$0xff]  ;;  %v9743_v29 = vpop.permute.xlu0 %2405 }
 0x249   : > { %v4486_v61 = vld [vmem:[%s13416_s18 + $0x98] sm:$0xff]  ;;  %13720 = vst [vmem:[#allocation22_spill] sm:$0xff] %v9743_v29 }
 0x24a   : > { %v2101_v59 = vmax.f32 %v1847_v47, 0.0  ;;  %v9692_v52 = vpop.f32.mrf.mxu0 }
 0x24b   : > { %4521 = vperm.xlu0 %7990, %v4471_v2   ;;  %v9694_v9 = vpop.f32.mrf.mxu1  ;;  %4526 = vperm.xlu1 %7991, %v4472_v30   ;;  %v7864_v30 = vld [vmem:[%s13705_s24 + $0xe4] sm:$0xf0] }
 0x24c   : > { %4601 = vperm.xlu2 %7992, %v4487_v0   ;;  %1888 = vmatmul.bf16.gmra.mxu3 %v7400_v23  ;;  %v9696_v42 = vpack.c.bf16 %v2101_v59, %v2099_v44  ;;  %v7411_v0 = vld [vmem:[%s13705_s24 + $0xe0] sm:$0xf] }
 0x24d   : > { %v7412_v34 = vor.u32 %v7864_v30, %v7411_v0  ;;  %v5272_v0 = vld [vmem:[%s13418_s20] sm:$0xff] }
 0x24f   : > { %v9705_v10 = vpop.f32.mrf.mxu2  ;;  %v1849_v51 = vpop.f32.mrf.mxu3 }
 0x250   : > { %v9715_v28 = vadd.f32 %v1849_v51, %v1761_v22  ;;  %v4468_v22 = vld [vmem:[%s13416_s18 + $0x8] sm:$0xff] }
 0x251   : > { %v4484_v51 = vld [vmem:[%s13416_s18 + $0x88] sm:$0xff] }
 0x252   : > { %v9726_v3 = vpop.f32.mrf.mxu0 }
 0x253   : > { %4606 = vperm.xlu0 %7990, %v4488_v41   ;;  %v9728_v57 = vpop.f32.mrf.mxu1  ;;  %4511 = vperm.xlu1 %7991, %v4469_v15   ;;  %v9778_v15 = vpop.permute.xlu0 %2320 }
 0x254   : > { %4516 = vperm.xlu2 %7992, %v4470_v17   ;;  %1804 = vmatmul.bf16.gmra.mxu2 %v7404_v35  ;;  %v7416_v17 = vor.u32 %v7863_v26, %v7413_v7  ;;  %13721 = vst [vmem:[#allocation20_spill] sm:$0xff] %v9778_v15  ;;  %v7419_v7 = vld [vmem:[%s13705_s24 + $0xf0] sm:$0xf] }
 0x255   : > { %1982 = vmatmul.bf16.gmra.mxu0 %v7404_v35 }
 0x256   : > { %2071 = vmatmul.bf16.gmra.mxu1 %v7408_v38 }
 0x257   : > { %v9730_v23 = vpop.f32.mrf.mxu2  ;;  %v9732_v13 = vpop.f32.mrf.mxu3 }
 0x25a   : > { %v9745_v47 = vpop.f32.mrf.mxu0 }
 0x25b   : > { %4591 = vperm.xlu0 %7990, %v4485_v19   ;;  %v9747_v2 = vpop.f32.mrf.mxu1  ;;  %4596 = vperm.xlu1 %7991, %v4486_v61   ;;  %v9786_v61 = vld [vmem:[%s13723_s6] sm:$0xff] }
 0x25c   : > { %4501 = vperm.xlu2 %7992, %v4467_v54   ;;  %1893 = vmatmul.bf16.gmra.mxu3 %v7408_v38  ;;  %v2184_v54 = vld [vmem:[%s13722_s8] sm:$0xff]  ;;  %13724 = vst [vmem:[#allocation21_spill] sm:$0xff] %v9786_v61 }
 0x25f   : > { %v9755_v44 = vpop.f32.mrf.mxu2  ;;  %v9757_v59 = vpop.f32.mrf.mxu3 }
 0x262   : > { %v9774_v41 = vpop.f32.mrf.mxu0 }
 0x263   : > { %4506 = vperm.xlu0 %7990, %v4468_v22   ;;  %v9776_v35 = vpop.f32.mrf.mxu1  ;;  %4581 = vperm.xlu1 %7991, %v4483_v63   ;;  %v7866_v22 = vld [vmem:[%s13705_s24 + $0xf4] sm:$0xf0] }
 0x264   : > { %4586 = vperm.xlu2 %7992, %v4484_v51   ;;  %1809 = vmatmul.bf16.gmra.mxu2 %v7412_v34  ;;  %v9802_v51 = vpop.permute.xlu0 %3027 }
 0x265   : > { %1987 = vmatmul.bf16.gmra.mxu0 %v7412_v34  ;;  %13725 = vst [vmem:[#allocation23_spill] sm:$0xff] %v9802_v51 }
 0x266   : > { %2076 = vmatmul.bf16.gmra.mxu1 %v7416_v17 }
 0x267   : > { %v1770_v38 = vpop.f32.mrf.mxu2  ;;  %v1856_v19 = vpop.f32.mrf.mxu3 }
 0x268   : > { %v1771_v31 = vadd.f32 %v1770_v38, %v9400_v21 }
 0x26a   : > { %v9791_v30 = vpop.f32.mrf.mxu0 }
 0x26b   : > { %2187 = vperm.xlu0 %7990, %v2184_v54   ;;  %v9794_v26 = vpop.f32.mrf.mxu1  ;;  %5275 = vperm.xlu1 %7991, %v5272_v0   ;;  %v7865_v54 = vld [vmem:[%s13705_s24 + $0xf4] sm:$0xf]  ;;  %v7420_v0 = vor.u32 %v7866_v22, %v7419_v7  ;;  %v9820_v22 = vpop.permute.xlu1 %1528 }
 0x26c   : > { %6424 = vperm.xlu2 %7992, %v9786_v61   ;;  %1898 = vmatmul.bf16.gmra.mxu3 %v7416_v17  ;;  %v7421_v17 = vld [vmem:[%s13705_s24 + $0xf8] sm:$0xf0]  ;;  %v9816_v55 = vpop.permute.xlu0 %3022  ;;  %13728 = vst [vmem:[#allocation40_spill] sm:$0xff] %v9820_v22 }
 0x26d   : > { %v7424_v25 = vor.u32 %v7865_v54, %v7421_v17  ;;  %13727 = vst [vmem:[#allocation39_spill] sm:$0xff] %v9816_v55  ;;  %v9822_v54 = vpop.permute.xlu2 %1493 }
 0x26f   : > { %v1772_v34 = vpop.f32.mrf.mxu2  ;;  %v1859_v63 = vpop.f32.mrf.mxu3 }
 0x270   : > { %v1773_v55 = vadd.f32 %v1772_v34, %v9339_v62 }
 0x272   : > { %v9810_v29 = vpop.f32.mrf.mxu0 }
 0x273   : > { %v9812_v27 = vpop.f32.mrf.mxu1  ;;  %v9835_v33 = vpop.permute.xlu1 %1513 }
 0x274   : > { %1814 = vmatmul.bf16.gmra.mxu2 %v7420_v0  ;;  %v9824_v17 = vpop.permute.xlu0 %2997 }
 0x275   : > { %1992 = vmatmul.bf16.gmra.mxu0 %v7420_v0  ;;  %13729 = vst [vmem:[#allocation41_spill] sm:$0xff] %v9824_v17 }
 0x276   : > { %2081 = vmatmul.bf16.gmra.mxu1 %v7424_v25 }
 0x277   : > { %v1775_v51 = vpop.f32.mrf.mxu2  ;;  %v1861_v20 = vpop.f32.mrf.mxu3 }
 0x278   : > { %v1776_v5 = vadd.f32 %v1775_v51, %v9326_v4  ;;  %v1862_v49 = vadd.f32 %v1861_v20, %v1773_v55  ;;  %v1860_v51 = vadd.f32 %v1859_v63, %v1771_v31 }
 0x27a   : > { %v1955_v11 = vpop.f32.mrf.mxu0  ;;  %v2113_v55 = vmax.f32 %v1862_v49, 0.0  ;;  %v2111_v31 = vmax.f32 %v1860_v51, 0.0 }
 0x27b   : > { %v9818_v61 = vpop.f32.mrf.mxu1 }
 0x27c   : > { %1903 = vmatmul.bf16.gmra.mxu3 %v7424_v25 }
 0x27f   : > { %v1777_v24 = vpop.f32.mrf.mxu2  ;;  %v1864_v7 = vpop.f32.mrf.mxu3 }
 0x280   : > { %v1778_v25 = vadd.f32 %v1777_v24, %v9269_v40  ;;  %v1865_v37 = vadd.f32 %v1864_v7, %v1776_v5  ;;  %v9843_v5 = vpop.permute.xlu0 %2992  ;;  %v1766_v24 = vadd.f32 %v9730_v23, %v9292_v32  ;;  %v1763_v7 = vadd.f32 %v9705_v10, %v9389_v46 }
 0x281   : > { %13733 = vst [vmem:[#allocation45_spill] sm:$0xff] %v9843_v5 }
 0x282   : > { %v1958_v0 = vpop.f32.mrf.mxu0 }
 0x283   : > { %v1959_v50 = vadd.f32 %v1958_v0, %v9822_v54  ;;  %v2047_v15 = vpop.f32.mrf.mxu1  ;;  %v1768_v0 = vadd.f32 %v9755_v44, %v9427_v6  ;;  %v1855_v44 = vadd.f32 %v9757_v59, %v1766_v24 }
 0x285   : > { %v9828_v12 = vadd.f32 %v2047_v15, %v1959_v50  ;;  %v2115_v50 = vmax.f32 %v1865_v37, 0.0  ;;  %v1857_v38 = vadd.f32 %v1856_v19, %v1768_v0  ;;  %v2107_v5 = vmax.f32 %v1855_v44, 0.0  ;;  %v9856_v0 = vpop.permute.xlu1 %1508 }
 0x287   : > { %13730 = vst [vmem:[#allocation42_spill] sm:$0xff] %v9828_v12  ;;  %v9832_v36 = vpop.f32.mrf.mxu2  ;;  %v1866_v22 = vpop.f32.mrf.mxu3 }
 0x288   : > { %v1867_v17 = vadd.f32 %v1866_v22, %v1778_v25  ;;  %v1852_v22 = vadd.f32 %v9732_v13, %v1763_v7  ;;  %v2163_v25 = vpack.c.bf16 %v2113_v55, %v2111_v31  ;;  %v1956_v7 = vadd.f32 %v1955_v11, %v9269_v40  ;;  %v9890_v40 = vld [vmem:[%s13740_s7] sm:$0xff] }
 0x28a   : > { %v2117_v15 = vmax.f32 %v1867_v17, 0.0  ;;  %v9839_v12 = vpop.f32.mrf.mxu0  ;;  %v2109_v17 = vmax.f32 %v1857_v38, 0.0  ;;  %v2105_v10 = vmax.f32 %v1852_v22, 0.0 }
 0x28b   : > { %13731 = vst [vmem:[#allocation43_spill] sm:$0xff] %v9839_v12  ;;  %v9841_v34 = vpop.f32.mrf.mxu1 }
 0x28c   : > { %13732 = vst [vmem:[#allocation44_spill] sm:$0xff] %v9841_v34  ;;  %v2165_v20 = vpack.c.bf16 %v2117_v15, %v2115_v50  ;;  %v2161_v59 = vpack.c.bf16 %v2109_v17, %v2107_v5  ;;  %v9860_v50 = vpop.permute.xlu0 %3107  ;;  %v2103_v15 = vmax.f32 %v9715_v28, 0.0  ;;  %v1954_v28 = vadd.f32 %v9810_v29, %v9326_v4 }
 0x28d   : > { %13735 = vst [vmem:[#allocation47_spill] sm:$0xff] %v9860_v50  ;;  %v9872_v5 = vpop.permute.xlu1 %2385  ;;  %v1951_v17 = vadd.f32 %v9791_v30, %v9339_v62  ;;  %v1949_v4 = vadd.f32 %v9774_v41, %v9400_v21  ;;  %v1946_v62 = vadd.f32 %v9745_v47, %v9427_v6  ;;  %v1944_v21 = vadd.f32 %v9726_v3, %v9292_v32 }
 0x28e   : > { %2197 = vmatpush.bf16.msra.mxu2 %v2165_v20  ;;  %v2159_v38 = vpack.c.bf16 %v2105_v10, %v2103_v15  ;;  %13738 = vst [vmem:[#allocation50_spill] sm:$0xff] %v9872_v5  ;;  %v2043_v11 = vadd.f32 %v9812_v27, %v1954_v28  ;;  %v1941_v47 = vadd.f32 %v9692_v52, %v9389_v46 }
 0x28f   : > { %v9850_v37 = vpop.f32.mrf.mxu2  ;;  %v9852_v63 = vpop.f32.mrf.mxu3  ;;  %v2038_v27 = vadd.f32 %v9776_v35, %v1949_v4  ;;  %v2033_v3 = vadd.f32 %v9728_v57, %v1944_v21 }
 0x290   : > { %v2116_v41 = vmax.f32 %v2043_v11, 0.0 }
 0x291   : > { %v2112_v35 = vmax.f32 %v2038_v27, 0.0 }
 0x292   : > { %v1963_v23 = vpop.f32.mrf.mxu0  ;;  %2198 = vmatpush.bf16.msra.mxu2 %v2163_v25  ;;  %v2045_v25 = vadd.f32 %v9818_v61, %v1956_v7 }
 0x293   : > { %v1964_v49 = vadd.f32 %v1963_v23, %v9480_v58  ;;  %v2052_v19 = vpop.f32.mrf.mxu1 }
 0x294   : > { %v9881_v22 = vpop.permute.xlu0 %2972  ;;  %v2118_v61 = vmax.f32 %v2045_v25, 0.0  ;;  %v2108_v25 = vmax.f32 %v2033_v3, 0.0 }
 0x295   : > { %v9858_v51 = vadd.f32 %v2052_v19, %v1964_v49  ;;  %13739 = vst [vmem:[#allocation51_spill] sm:$0xff] %v9881_v22  ;;  %v9896_v49 = vpop.permute.xlu2 %2390  ;;  %v2191_v19 = vunpack.c.l.b16 %v9890_v40  ;;  %v9912_v6 = vpop.permute.xlu1 %2470 }
 0x296   : > { %2199 = vmatpush.bf16.msra.mxu2 %v2161_v59  ;;  %13741 = vst [vmem:[#allocation52_spill] sm:$0xff] %v9896_v49 }
 0x297   : > { %13734 = vst [vmem:[#allocation46_spill] sm:$0xff] %v9858_v51  ;;  %v9863_v13 = vpop.f32.mrf.mxu2  ;;  %v9865_v24 = vpop.f32.mrf.mxu3 }
 0x298   : > { %13743 = vst [vmem:[#allocation54_spill] sm:$0xff] %v9912_v6 }
 0x29a   : > { %v9867_v55 = vpop.f32.mrf.mxu0  ;;  %2200 = vmatpush.bf16.msra.mxu2 %v2159_v38  ;;  %v2166_v38 = vpack.c.bf16 %v2118_v61, %v2116_v41 }
 0x29b   : > { %13736 = vst [vmem:[#allocation48_spill] sm:$0xff] %v9867_v55  ;;  %v9869_v20 = vpop.f32.mrf.mxu1 }
 0x29c   : > { %13737 = vst [vmem:[#allocation49_spill] sm:$0xff] %v9869_v20  ;;  %v9917_v7 = vpop.permute.xlu0 %2957 }
 0x29d   : > { %13744 = vst [vmem:[#allocation55_spill] sm:$0xff] %v9917_v7  ;;  %v9932_v57 = vpop.permute.xlu1 %2455 }
 0x29e   : > { %2201 = vmatpush.bf16.msra.mxu2 %v9696_v42  ;;  %13748 = vst [vmem:[#allocation59_spill] sm:$0xff] %v9932_v57  ;;  %v10023_v57 = vld [vmem:[%s13407_s9 + $0x10] sm:$0xff] }
 0x29f   : > { %v9877_v44 = vpop.f32.mrf.mxu2  ;;  %v9879_v31 = vpop.f32.mrf.mxu3  ;;  %13773 = vst [vmem:[#allocation83_spill] sm:$0xff] %v10023_v57 }
 0x2a2   : > { %v1968_v23 = vpop.f32.mrf.mxu0  ;;  %2202 = vmatpush.bf16.msra.mxu2 %v9651_v45  ;;  %v2040_v45 = vadd.f32 %v9794_v26, %v1951_v17  ;;  %v2035_v26 = vadd.f32 %v9747_v2, %v1946_v62  ;;  %v2030_v17 = vadd.f32 %v9694_v9, %v1941_v47  ;;  %v9926_v2 = vpop.permute.xlu2 %2375 }
 0x2a3   : > { %v1969_v42 = vadd.f32 %v1968_v23, %v9835_v33  ;;  %v2057_v29 = vpop.f32.mrf.mxu1  ;;  %13747 = vst [vmem:[#allocation58_spill] sm:$0xff] %v9926_v2 }
 0x2a4   : > { %v2114_v15 = vmax.f32 %v2040_v45, 0.0  ;;  %v2110_v46 = vmax.f32 %v2035_v26, 0.0  ;;  %v9936_v45 = vpop.permute.xlu0 %3092 }
 0x2a5   : > { %v9901_v30 = vadd.f32 %v2057_v29, %v1969_v42  ;;  %v2104_v29 = vmax.f32 %v9678_v14, 0.0  ;;  %13749 = vst [vmem:[#allocation60_spill] sm:$0xff] %v9936_v45  ;;  %v9951_v14 = vpop.permute.xlu1 %2370 }
 0x2a6   : > { %2203 = vmatpush.bf16.msra.mxu2 %v9609_v43  ;;  %v2193_v43 = vpack.c.b16 %v2191_v19, %v2191_v19  ;;  %v2164_v52 = vpack.c.bf16 %v2114_v15, %v2112_v35  ;;  %v2162_v11 = vpack.c.bf16 %v2110_v46, %v2108_v25  ;;  %13754 = vst [vmem:[#allocation65_spill] sm:$0xff] %v9951_v14 }
 0x2a7   : > { %13742 = vst [vmem:[#allocation53_spill] sm:$0xff] %v9901_v30  ;;  %v9908_v10 = vpop.f32.mrf.mxu2  ;;  %v9910_v59 = vpop.f32.mrf.mxu3  ;;  %v13787_v30 = vld [vmem:[#allocation34_spill] sm:$0xff] }
 0x2aa   : > { %v9919_v32 = vpop.f32.mrf.mxu0  ;;  %2204 = vmatpush.bf16.msra.mxu2 %v9568_v16  ;;  %v2106_v16 = vmax.f32 %v2030_v17, 0.0  ;;  %v9944_v41 = vpop.permute.xlu2 %2460 }
 0x2ab   : > { %13745 = vst [vmem:[#allocation56_spill] sm:$0xff] %v9919_v32  ;;  %v9923_v28 = vpop.f32.mrf.mxu1 }
 0x2ac   : > { %13746 = vst [vmem:[#allocation57_spill] sm:$0xff] %v9923_v28  ;;  %v2160_v19 = vpack.c.bf16 %v2106_v16, %v2104_v29  ;;  %v9953_v15 = vpop.permute.xlu0 %3067 }
 0x2ad   : > { %2205 = vmatmul.bf16.vlgmr.msra.gmra.mxu2 %v2193_v43  ;;  %13751 = vst [vmem:[#allocation62_spill] sm:$0xff] %v9944_v41 }
 0x2ae   : > { %2223 = vmatpush.bf16.msrb.mxu2 %v2166_v38  ;;  %13755 = vst [vmem:[#allocation66_spill] sm:$0xff] %v9953_v15 }
 0x2af   : > { %v9928_v23 = vpop.f32.mrf.mxu2  ;;  %v9930_v4 = vpop.f32.mrf.mxu3 }
 0x2b2   : > { %2224 = vmatpush.bf16.msrb.mxu2 %v2164_v52  ;;  %v1973_v42 = vpop.f32.mrf.mxu0  ;;  %v9960_v35 = vpop.permute.xlu2 %2445 }
 0x2b3   : > { %v1974_v9 = vadd.f32 %v1973_v42, %v9438_v18  ;;  %v2062_v62 = vpop.f32.mrf.mxu1  ;;  %13756 = vst [vmem:[#allocation67_spill] sm:$0xff] %v9960_v35 }
 0x2b4   : > { %v9973_v42 = vpop.permute.xlu0 %3062 }
 0x2b5   : > { %v9938_v61 = vadd.f32 %v2062_v62, %v1974_v9  ;;  %13759 = vst [vmem:[#allocation70_spill] sm:$0xff] %v9973_v42 }
 0x2b6   : > { %2225 = vmatpush.bf16.msrb.mxu2 %v2162_v11 }
 0x2b7   : > { %13750 = vst [vmem:[#allocation61_spill] sm:$0xff] %v9938_v61  ;;  %v9940_v21 = vpop.f32.mrf.mxu2  ;;  %v9942_v27 = vpop.f32.mrf.mxu3 }
 0x2ba   : > { %2226 = vmatpush.bf16.msrb.mxu2 %v2160_v19  ;;  %v9946_v47 = vpop.f32.mrf.mxu0  ;;  %v9976_v29 = vpop.permute.xlu2 %2360 }
 0x2bb   : > { %13752 = vst [vmem:[#allocation63_spill] sm:$0xff] %v9946_v47  ;;  %v9948_v26 = vpop.f32.mrf.mxu1 }
 0x2bc   : > { %13753 = vst [vmem:[#allocation64_spill] sm:$0xff] %v9948_v26  ;;  %v9984_v19 = vpop.permute.xlu0 %3037 }
 0x2bd   : > { %13761 = vst [vmem:[#allocation71_spill] sm:$0xff] %v9976_v29  ;;  %v10038_v29 = vld [vmem:[%s13407_s9 + $0x18] sm:$0xff] }
 0x2be   : > { %2227 = vmatpush.bf16.msrb.mxu2 %v9675_v48  ;;  %v9966_v48 = vpop.permute.xlu1 %2355  ;;  %13763 = vst [vmem:[#allocation73_spill] sm:$0xff] %v9984_v19  ;;  %v10008_v19 = vld [vmem:[%s13407_s9 + $0x8] sm:$0xff] }
 0x2bf   : > { %v9955_v38 = vpop.f32.mrf.mxu2  ;;  %v9957_v3 = vpop.f32.mrf.mxu3  ;;  %13758 = vst [vmem:[#allocation69_spill] sm:$0xff] %v9966_v48 }
 0x2c0   : > { %13768 = vst [vmem:[#allocation78_spill] sm:$0xff] %v10008_v19 }
 0x2c1   : > { %13777 = vst [vmem:[#allocation87_spill] sm:$0xff] %v10038_v29 }
 0x2c2   : > { %2228 = vmatpush.bf16.msrb.mxu2 %v9633_v1  ;;  %v1978_v17 = vpop.f32.mrf.mxu0  ;;  %v13760_v1 = vld [vmem:[#allocation16_spill] sm:$0xff] }
 0x2c3   : > { %v1979_v46 = vadd.f32 %v1978_v17, %v9461_v56  ;;  %v2067_v52 = vpop.f32.mrf.mxu1  ;;  %v9986_v17 = vpop.permute.xlu2 %2345 }
 0x2c4   : > { %13764 = vst [vmem:[#allocation74_spill] sm:$0xff] %v9986_v17  ;;  %v10001_v42 = vpop.permute.xlu0 %3934  ;;  %v10053_v17 = vld [vmem:[%s13407_s9 + $0x20] sm:$0xff] }
 0x2c5   : > { %v9964_v25 = vadd.f32 %v2067_v52, %v1979_v46  ;;  %13767 = vst [vmem:[#allocation77_spill] sm:$0xff] %v10001_v42 }
 0x2c6   : > { %2229 = vmatpush.bf16.msrb.mxu2 %v9593_v39  ;;  %v9982_v62 = vpop.permute.xlu1 %2440  ;;  %13780 = vst [vmem:[#allocation90_spill] sm:$0xff] %v10053_v17 }
 0x2c7   : > { %13757 = vst [vmem:[#allocation68_spill] sm:$0xff] %v9964_v25  ;;  %v9968_v16 = vpop.f32.mrf.mxu2  ;;  %v9970_v11 = vpop.f32.mrf.mxu3 }
 0x2c8   : > { %13762 = vst [vmem:[#allocation72_spill] sm:$0xff] %v9982_v62 }
 0x2ca   : > { %2230 = vmatpush.bf16.msrb.mxu2 %v9553_v53  ;;  %v10003_v15 = vpop.f32.mrf.mxu0 }
 0x2cb   : > { %v10010_v22 = vpop.permute.xlu2 %2430  ;;  %v10012_v7 = vpop.f32.mrf.mxu1 }
 0x2cc   : > { %13769 = vst [vmem:[#allocation79_spill] sm:$0xff] %v10010_v22  ;;  %v10018_v6 = vpop.permute.xlu0 %3919 }
 0x2cd   : > { %2231 = vmatmul.bf16.vlgmr.msrb.gmra.mxu2 %v2193_v43  ;;  %v9995_v43 = vld [vmem:[%s13407_s9] sm:$0xff]  ;;  %13770 = vst [vmem:[#allocation80_spill] sm:$0xff] %v10012_v7 }
 0x2ce   : > { %2584 = vmatpush.msra.mxu2 %v13760_v1  ;;  %13765 = vst [vmem:[#allocation75_spill] sm:$0xff] %v9995_v43  ;;  %v9997_v52 = vpop.permute.xlu1 %2425 }
 0x2cf   : > { %v9978_v9 = vpop.f32.mrf.mxu2  ;;  %v9980_v39 = vpop.f32.mrf.mxu3  ;;  %13766 = vst [vmem:[#allocation76_spill] sm:$0xff] %v9997_v52 }
 0x2d0   : > { %13772 = vst [vmem:[#allocation82_spill] sm:$0xff] %v10018_v6 }
 0x2d2   : > { %v10025_v35 = vpop.f32.mrf.mxu0 }
 0x2d3   : > { %v10027_v62 = vpop.permute.xlu2 %2415  ;;  %v10031_v22 = vpop.f32.mrf.mxu1 }
 0x2d4   : > { %13774 = vst [vmem:[#allocation84_spill] sm:$0xff] %v10027_v62  ;;  %v10040_v49 = vpop.permute.xlu0 %4004 }
 0x2d5   : > { %13775 = vst [vmem:[#allocation85_spill] sm:$0xff] %v10031_v22 }
 0x2d6   : > { %v10016_v52 = vpop.permute.xlu1 %2340  ;;  %13778 = vst [vmem:[#allocation88_spill] sm:$0xff] %v10040_v49 }
 0x2d7   : > { %v9988_v46 = vpop.f32.mrf.mxu2  ;;  %v9990_v53 = vpop.f32.mrf.mxu3  ;;  %13771 = vst [vmem:[#allocation81_spill] sm:$0xff] %v10016_v52 }
 0x2da   : > { %v10042_v5 = vpop.f32.mrf.mxu0 }
 0x2db   : > { %v10046_v62 = vpop.permute.xlu2 %2330  ;;  %v10048_v2 = vpop.f32.mrf.mxu1 }
 0x2dc   : > { %13779 = vst [vmem:[#allocation89_spill] sm:$0xff] %v10046_v62 }
 0x2dd   : > { %7425 = vmatmul.msk.f32.vlgmr.msra.gmra.mxu2 %vm928_vm2, %v9995_v43 }
 0x2de   : > { %v10033_v1 = vpop.permute.xlu1 %2325 }
 0x2df   : > { %v1807_v45 = vpop.f32.mrf.mxu2  ;;  %v1894_v50 = vpop.f32.mrf.mxu3  ;;  %13776 = vst [vmem:[#allocation86_spill] sm:$0xff] %v10033_v1 }
 0x2e2   : > { %v10061_v49 = vpop.f32.mrf.mxu0 }
 0x2e3   : > { %v10070_v43 = vpop.f32.mrf.mxu1 }
 0x2e5   : > { %7426 = vmatmul.msk.f32.gmra.mxu2 %vm928_vm2, %v10008_v19  ;;  %v10068_v19 = vld [vmem:[%s13407_s9 + $0x28] sm:$0xff] }
 0x2e6   : > { %v10055_v52 = vpop.permute.xlu1 %2410  ;;  %13784 = vst [vmem:[#allocation94_spill] sm:$0xff] %v10068_v19 }
 0x2e7   : > { %v1810_v42 = vpop.f32.mrf.mxu2  ;;  %v1896_v41 = vpop.f32.mrf.mxu3  ;;  %13781 = vst [vmem:[#allocation91_spill] sm:$0xff] %v10055_v52 }
 0x2ea   : > { %v10079_v34 = vpop.f32.mrf.mxu0 }
 0x2eb   : > { %v10092_v32 = vpop.f32.mrf.mxu1 }
 0x2ed   : > { %7427 = vmatmul.msk.f32.gmra.mxu2 %vm928_vm2, %v10023_v57  ;;  %v10057_v57 = vpop.permute.xlu0 %3989 }
 0x2ee   : > { %13782 = vst [vmem:[#allocation92_spill] sm:$0xff] %v10057_v57  ;;  %v10072_v51 = vpop.permute.xlu1 %2395 }
 0x2ef   : > { %v1812_v48 = vpop.f32.mrf.mxu2  ;;  %v1899_v6 = vpop.f32.mrf.mxu3  ;;  %13785 = vst [vmem:[#allocation95_spill] sm:$0xff] %v10072_v51  ;;  %v10086_v51 = vld [vmem:[%s13407_s9 + $0x30] sm:$0xff] }
 0x2f5   : > { %7428 = vmatmul.msk.f32.gmra.mxu2 %vm928_vm2, %v10038_v29  ;;  %v10063_v29 = vpop.permute.xlu2 %2315  ;;  %v10076_v52 = vpop.permute.xlu0 %3904 }
 0x2f6   : > { %13783 = vst [vmem:[#allocation93_spill] sm:$0xff] %v10063_v29  ;;  %v1813_v29 = vadd.f32 %v1812_v48, %v9478_v60 }
 0x2f7   : > { %v1901_v14 = vpop.f32.mrf.mxu3  ;;  %v1815_v1 = vpop.f32.mrf.mxu2  ;;  %13786 = vst [vmem:[#allocation96_spill] sm:$0xff] %v10076_v52 }
 0x2f8   : > { %v1902_v52 = vadd.f32 %v1901_v14, %v1813_v29 }
 0x2fa   : > { %v2145_v22 = vmax.f32 %v1902_v52, 0.0 }
 0x2fd   : > { %7429 = vmatmul.msk.f32.gmra.mxu2 %vm928_vm2, %v10053_v17  ;;  %v1816_v17 = vadd.f32 %v1815_v1, %v9364_v8  ;;  %v10088_v28 = vpop.permute.xlu2 %2400  ;;  %v13790_v1 = vld [vmem:[#allocation36_spill] sm:$0xff]  ;;  %v10100_v14 = vpop.permute.xlu0 %3889 }
 0x2fe   : > { %13788 = vst [vmem:[#allocation34_spill] sm:$0xff] %v10088_v28  ;;  %v1808_v26 = vadd.f32 %v1807_v45, %v13790_v1 }
 0x2ff   : > { %v1904_v62 = vpop.f32.mrf.mxu3  ;;  %v1817_v57 = vpop.f32.mrf.mxu2  ;;  %13793 = vst [vmem:[#allocation36_spill] sm:$0xff] %v10100_v14 }
 0x300   : > { %v1818_v20 = vadd.f32 %v1817_v57, %v13787_v30  ;;  %v1905_v12 = vadd.f32 %v1904_v62, %v1816_v17  ;;  %v10096_v62 = vpop.permute.xlu1 %3032  ;;  %v13792_v17 = vld [vmem:[#allocation33_spill] sm:$0xff]  ;;  %v1897_v28 = vadd.f32 %v1896_v41, %v1808_v26 }
 0x301   : > { %v1806_v47 = vadd.f32 %v9988_v46, %v13792_v17  ;;  %v13796_v46 = vld [vmem:[#allocation40_spill] sm:$0xff] }
 0x302   : > { %v2147_v7 = vmax.f32 %v1905_v12, 0.0  ;;  %v10107_v12 = vld [vmem:[%s13407_s9 + $0x38] sm:$0xff]  ;;  %v2141_v26 = vmax.f32 %v1897_v28, 0.0 }
 0x305   : > { %7430 = vmatmul.msk.f32.gmra.mxu2 %vm928_vm2, %v10068_v19  ;;  %v13789_v19 = vld [vmem:[#allocation37_spill] sm:$0xff]  ;;  %v10112_v29 = vpop.permute.xlu2 %3017 }
 0x306   : > { %v1811_v55 = vadd.f32 %v1810_v42, %v13789_v19  ;;  %13791 = vst [vmem:[#allocation37_spill] sm:$0xff] %v10096_v62 }
 0x307   : > { %v1906_v61 = vpop.f32.mrf.mxu3  ;;  %13795 = vst [vmem:[#allocation33_spill] sm:$0xff] %v10112_v29 }
 0x308   : > { %v1907_v25 = vadd.f32 %v1906_v61, %v1818_v20  ;;  %v1900_v48 = vadd.f32 %v1899_v6, %v1811_v55  ;;  %v13794_v20 = vld [vmem:[#allocation35_spill] sm:$0xff]  ;;  %v1895_v61 = vadd.f32 %v1894_v50, %v1806_v47  ;;  %v1801_v6 = vadd.f32 %v9968_v16, %v9461_v56  ;;  %v10122_v52 = vpop.permute.xlu1 %3007 }
 0x309   : > { %v1803_v45 = vadd.f32 %v9978_v9, %v13794_v20  ;;  %v1798_v50 = vadd.f32 %v9955_v38, %v13796_v46  ;;  %v1796_v56 = vadd.f32 %v9940_v21, %v9438_v18  ;;  %13797 = vst [vmem:[#allocation35_spill] sm:$0xff] %v10122_v52  ;;  %v10132_v18 = vpop.permute.xlu0 %3974  ;;  %v1791_v21 = vadd.f32 %v9908_v10, %v9835_v33 }
 0x30a   : > { %v2149_v57 = vmax.f32 %v1907_v25, 0.0  ;;  %v2143_v55 = vmax.f32 %v1900_v48, 0.0  ;;  %v1890_v47 = vadd.f32 %v9980_v39, %v1801_v6  ;;  %v2139_v9 = vmax.f32 %v1895_v61, 0.0  ;;  %v13798_v48 = vld [vmem:[#allocation24_spill] sm:$0xff]  ;;  %13799 = vst [vmem:[#allocation40_spill] sm:$0xff] %v10132_v18 }
 0x30b   : > { %v1892_v41 = vadd.f32 %v9990_v53, %v1803_v45  ;;  %v1887_v16 = vadd.f32 %v9970_v11, %v1798_v50  ;;  %v2082_v53 = vpop.f32.mrf.mxu1  ;;  %v1793_v38 = vadd.f32 %v9928_v23, %v13798_v48  ;;  %v1885_v39 = vadd.f32 %v9957_v3, %v1796_v56 }
 0x30c   : > { %v2181_v42 = vpack.c.bf16 %v2149_v57, %v2147_v7  ;;  %v1993_v7 = vpop.f32.mrf.mxu0  ;;  %v2179_v25 = vpack.c.bf16 %v2145_v22, %v2143_v55  ;;  %v2177_v22 = vpack.c.bf16 %v2141_v26, %v2139_v9  ;;  %v2135_v57 = vmax.f32 %v1890_v47, 0.0 }
 0x30d   : > { %7431 = vmatmul.msk.f32.gmra.mxu2 %vm928_vm2, %v10086_v51  ;;  %v2137_v28 = vmax.f32 %v1892_v41, 0.0  ;;  %v1882_v11 = vadd.f32 %v9942_v27, %v1793_v38  ;;  %v2133_v45 = vmax.f32 %v1887_v16, 0.0  ;;  %v1788_v23 = vadd.f32 %v9877_v44, %v9856_v0  ;;  %v10142_v41 = vpop.permute.xlu2 %3012  ;;  %v13801_v44 = vld [vmem:[#allocation38_spill] sm:$0xff] }
 0x30e   : > { %2210 = vmatpush.bf16.msra.mxu3 %v2181_v42  ;;  %v10130_v42 = vld [vmem:[%s13407_s9 + $0x40] sm:$0xff]  ;;  %v1880_v3 = vadd.f32 %v9930_v4, %v1791_v21  ;;  %v2131_v55 = vmax.f32 %v1885_v39, 0.0  ;;  %13800 = vst [vmem:[#allocation24_spill] sm:$0xff] %v10142_v41  ;;  %v1786_v33 = vadd.f32 %v9863_v13, %v9480_v58  ;;  %v1783_v4 = vadd.f32 %v9850_v37, %v13801_v44  ;;  %v10155_v58 = vld [vmem:[%s13407_s9 + $0x48] sm:$0xff] }
 0x30f   : > { %v2175_v61 = vpack.c.bf16 %v2137_v28, %v2135_v57  ;;  %v1877_v10 = vadd.f32 %v9910_v59, %v1788_v23  ;;  %v2129_v27 = vmax.f32 %v1882_v11, 0.0  ;;  %v1994_v56 = vadd.f32 %v1993_v7, %v9364_v8 }
 0x310   : > { %v2173_v26 = vpack.c.bf16 %v2133_v45, %v2131_v55  ;;  %v1875_v50 = vadd.f32 %v9879_v31, %v1786_v33  ;;  %v2127_v47 = vmax.f32 %v1880_v3, 0.0  ;;  %v10157_v13 = vpop.permute.xlu1 %3002  ;;  %v1872_v59 = vadd.f32 %v9865_v24, %v1783_v4  ;;  %v13809_v55 = vld [vmem:[#allocation80_spill] sm:$0xff] }
 0x311   : > { %13802 = vst [vmem:[#allocation38_spill] sm:$0xff] %v10157_v13  ;;  %v2125_v37 = vmax.f32 %v1877_v10, 0.0  ;;  %v1991_v31 = vadd.f32 %v10079_v34, %v9478_v60  ;;  %v1986_v39 = vadd.f32 %v10042_v5, %v13790_v1  ;;  %v2192_v57 = vunpack.c.h.b16 %v9890_v40  ;;  %v13811_v4 = vld [vmem:[#allocation56_spill] sm:$0xff] }
 0x312   : > { %2211 = vmatpush.bf16.msra.mxu3 %v2179_v25  ;;  %v2171_v16 = vpack.c.bf16 %v2129_v27, %v2127_v47  ;;  %v2123_v7 = vmax.f32 %v1875_v50, 0.0  ;;  %v2121_v24 = vmax.f32 %v1872_v59, 0.0  ;;  %v1984_v11 = vadd.f32 %v10025_v35, %v13792_v17  ;;  %v13806_v35 = vld [vmem:[#allocation85_spill] sm:$0xff] }
 0x313   : > { %v2084_v9 = vpop.f32.mrf.mxu1  ;;  %v2080_v60 = vadd.f32 %v10092_v32, %v1991_v31  ;;  %v1981_v5 = vadd.f32 %v10003_v15, %v13794_v20  ;;  %v2075_v40 = vadd.f32 %v10048_v2, %v1986_v39  ;;  %v13808_v15 = vld [vmem:[#allocation63_spill] sm:$0xff]  ;;  %v10201_v27 = vld [vmem:[%s13407_s9 + $0x58] sm:$0xff]  ;;  %v1971_v50 = vadd.f32 %v13811_v4, %v13798_v48  ;;  %v10253_v4 = vld [vmem:[%s13407_s9 + $0x70] sm:$0xff] }
 0x314   : > { %v1995_v6 = vpop.f32.mrf.mxu0  ;;  %v2169_v38 = vpack.c.bf16 %v2125_v37, %v2123_v7  ;;  %v1976_v20 = vadd.f32 %v13808_v15, %v13796_v46  ;;  %v13812_v46 = vld [vmem:[#allocation64_spill] sm:$0xff] }
 0x315   : > { %7432 = vmatmul.msk.f32.gmra.mxu2 %vm928_vm2, %v10107_v12  ;;  %v1996_v25 = vadd.f32 %v1995_v6, %v13787_v30  ;;  %v1781_v30 = vadd.f32 %v9832_v36, %v9822_v54  ;;  %v1989_v36 = vadd.f32 %v10061_v49, %v13789_v19  ;;  %v2083_v54 = vadd.f32 %v2082_v53, %v1994_v56  ;;  %v10183_v53 = vld [vmem:[%s13407_s9 + $0x50] sm:$0xff] }
 0x316   : > { %2212 = vmatpush.bf16.msra.mxu3 %v2177_v22  ;;  %v10164_v22 = vpop.permute.xlu0 %3959  ;;  %v2146_v1 = vmax.f32 %v2080_v60, 0.0  ;;  %v2070_v2 = vadd.f32 %v13809_v55, %v1981_v5  ;;  %v2142_v6 = vmax.f32 %v2075_v40, 0.0  ;;  %v2065_v47 = vadd.f32 %v13812_v46, %v1976_v20  ;;  %v13819_v60 = vld [vmem:[#allocation43_spill] sm:$0xff]  ;;  %v13830_v46 = vld [vmem:[#allocation17_spill] sm:$0xff] }
 0x317   : > { %v2085_v28 = vadd.f32 %v2084_v9, %v1996_v25  ;;  %13803 = vst [vmem:[#allocation97_spill] sm:$0xff] %v10164_v22  ;;  %v1870_v8 = vadd.f32 %v9852_v63, %v1781_v30  ;;  %v10175_v63 = vpop.permute.xlu2 %2987  ;;  %v2078_v49 = vadd.f32 %v10070_v43, %v1989_v36  ;;  %v2148_v19 = vmax.f32 %v2083_v54, 0.0  ;;  %v13813_v30 = vld [vmem:[#allocation68_spill] sm:$0xff]  ;;  %v13818_v54 = vld [vmem:[#allocation61_spill] sm:$0xff] }
 0x318   : > { %13804 = vst [vmem:[#allocation98_spill] sm:$0xff] %v10175_v63  ;;  %v10188_v23 = vpop.permute.xlu1 %2977  ;;  %v2073_v43 = vadd.f32 %v13806_v35, %v1984_v11  ;;  %v2138_v9 = vmax.f32 %v2070_v2, 0.0  ;;  %v2136_v59 = vmax.f32 %v13813_v30, 0.0  ;;  %v2134_v7 = vmax.f32 %v2065_v47, 0.0  ;;  %v13827_v2 = vld [vmem:[#allocation42_spill] sm:$0xff]  ;;  %v10269_v30 = vld [vmem:[%s13407_s9 + $0x78] sm:$0xff] }
 0x319   : > { %v2150_v34 = vmax.f32 %v2085_v28, 0.0  ;;  %v2119_v21 = vmax.f32 %v1870_v8, 0.0  ;;  %13805 = vst [vmem:[#allocation99_spill] sm:$0xff] %v10188_v23  ;;  %v2144_v17 = vmax.f32 %v2078_v49, 0.0  ;;  %v13816_v28 = vld [vmem:[#allocation57_spill] sm:$0xff]  ;;  %v13889_v23 = vld [vmem:[#allocation50_spill] sm:$0xff] }
 0x31a   : > { %2213 = vmatpush.bf16.msra.mxu3 %v2175_v61  ;;  %v2194_v61 = vpack.c.b16 %v2192_v57, %v2192_v57  ;;  %v2140_v10 = vmax.f32 %v2073_v43, 0.0  ;;  %v2060_v8 = vadd.f32 %v13816_v28, %v1971_v50  ;;  %v2176_v36 = vpack.c.bf16 %v2138_v9, %v2136_v59  ;;  %v13820_v57 = vld [vmem:[#allocation49_spill] sm:$0xff]  ;;  %v13825_v43 = vld [vmem:[#allocation46_spill] sm:$0xff] }
 0x31b   : > { %v2167_v32 = vpack.c.bf16 %v2121_v24, %v2119_v21  ;;  %v2182_v45 = vpack.c.bf16 %v2150_v34, %v2148_v19  ;;  %v2180_v33 = vpack.c.bf16 %v2146_v1, %v2144_v17  ;;  %v2132_v24 = vmax.f32 %v13818_v54, 0.0  ;;  %v13822_v19 = vld [vmem:[#allocation53_spill] sm:$0xff]  ;;  %v10241_v17 = vld [vmem:[%s13407_s9 + $0x68] sm:$0xff] }
 0x31c   : > { %v2178_v56 = vpack.c.bf16 %v2142_v6, %v2140_v10  ;;  %v1961_v34 = vadd.f32 %v13819_v60, %v13801_v44  ;;  %v2130_v21 = vmax.f32 %v2060_v8, 0.0  ;;  %v2128_v5 = vmax.f32 %v13822_v19, 0.0  ;;  %v13836_v8 = vld [vmem:[#allocation75_spill] sm:$0xff]  ;;  %v13840_v60 = vld [vmem:[#allocation78_spill] sm:$0xff] }
 0x31d   : > { %7433 = vmatmul.msk.f32.gmra.mxu2 %vm928_vm2, %v10130_v42  ;;  %v2174_v11 = vpack.c.bf16 %v2134_v7, %v2132_v24  ;;  %v2124_v44 = vmax.f32 %v13825_v43, 0.0  ;;  %v2120_v6 = vmax.f32 %v13827_v2, 0.0  ;;  %v10295_v24 = vld [vmem:[%s13407_s9 + $0x88] sm:$0xff] }
 0x31e   : > { %2214 = vmatpush.bf16.msra.mxu3 %v2173_v26  ;;  %v10193_v3 = vpop.permute.xlu0 %3874 }
 0x31f   : > { %13807 = vst [vmem:[#allocation85_spill] sm:$0xff] %v10193_v3  ;;  %v10203_v26 = vpop.permute.xlu2 %2982 }
 0x320   : > { %13810 = vst [vmem:[#allocation63_spill] sm:$0xff] %v10203_v26  ;;  %v10213_v37 = vpop.permute.xlu1 %3112 }
 0x321   : > { %13814 = vst [vmem:[#allocation80_spill] sm:$0xff] %v10213_v37  ;;  %v13568_v37 = vmov 1326507024  }
 0x322   : > { %2215 = vmatpush.bf16.msra.mxu3 %v2171_v16  ;;  %v13815_v16 = vld [vmem:[#allocation48_spill] sm:$0xff] }
 0x323   : > { %v1966_v31 = vadd.f32 %v13815_v16, %v9856_v0 }
 0x325   : > { %7434 = vmatmul.msk.f32.gmra.mxu2 %vm928_vm2, %v10155_v58  ;;  %v2055_v0 = vadd.f32 %v13820_v57, %v1966_v31  ;;  %v10280_v31 = vld [vmem:[%s13407_s9 + $0x80] sm:$0xff] }
 0x326   : > { %2216 = vmatpush.bf16.msra.mxu3 %v2169_v38  ;;  %v10218_v48 = vpop.permute.xlu0 %3859  ;;  %v10224_v38 = vld [vmem:[%s13407_s9 + $0x60] sm:$0xff] }
 0x327   : > { %13817 = vst [vmem:[#allocation56_spill] sm:$0xff] %v10218_v48  ;;  %v10229_v49 = vpop.permute.xlu2 %2967  ;;  %v2126_v1 = vmax.f32 %v2055_v0, 0.0  ;;  %v10404_v48 = vld [vmem:[%s13407_s9 + $0xc0] sm:$0xff] }
 0x328   : > { %13821 = vst [vmem:[#allocation64_spill] sm:$0xff] %v10229_v49  ;;  %v10235_v35 = vpop.permute.xlu1 %3097 }
 0x329   : > { %13824 = vst [vmem:[#allocation68_spill] sm:$0xff] %v10235_v35  ;;  %v2170_v55 = vpack.c.bf16 %v2126_v1, %v2124_v44  ;;  %v13560_v35 = vmov 2131351028  }
 0x32a   : > { %2217 = vmatpush.bf16.msra.mxu3 %v2167_v32  ;;  %v13823_v32 = vld [vmem:[#allocation44_spill] sm:$0xff] }
 0x32b   : > { %v2050_v40 = vadd.f32 %v13823_v32, %v1961_v34  ;;  %v13841_v34 = vld [vmem:[#allocation93_spill] sm:$0xff] }
 0x32d   : > { %7435 = vmatmul.msk.f32.gmra.mxu2 %vm928_vm2, %v10183_v53  ;;  %2218 = vmatmul.bf16.vlgmr.msra.gmra.mxu3 %v2194_v61  ;;  %v2122_v20 = vmax.f32 %v2050_v40, 0.0 }
 0x32e   : > { %2236 = vmatpush.bf16.msrb.mxu3 %v2182_v45  ;;  %v2172_v45 = vpack.c.bf16 %v2130_v21, %v2128_v5  ;;  %v10243_v15 = vpop.permute.xlu0 %3944  ;;  %v10310_v5 = vld [vmem:[%s13407_s9 + $0x90] sm:$0xff] }
 0x32f   : > { %13826 = vst [vmem:[#allocation48_spill] sm:$0xff] %v10243_v15  ;;  %v2168_v10 = vpack.c.bf16 %v2122_v20, %v2120_v6  ;;  %v10374_v15 = vld [vmem:[%s13407_s9 + $0xb0] sm:$0xff] }
 0x330   : > { %v10205_v25 = vpop.f32.mrf.mxu2  ;;  %v10255_v50 = vpop.permute.xlu1 %2962 }
 0x331   : > { %13829 = vst [vmem:[#allocation61_spill] sm:$0xff] %v10255_v50 }
 0x332   : > { %2237 = vmatpush.bf16.msrb.mxu3 %v2180_v33  ;;  %v10248_v33 = vpop.permute.xlu2 %3102 }
 0x333   : > { %13828 = vst [vmem:[#allocation57_spill] sm:$0xff] %v10248_v33 }
 0x335   : > { %7436 = vmatmul.msk.f32.gmra.mxu2 %vm928_vm2, %v10201_v27 }
 0x336   : > { %2238 = vmatpush.bf16.msrb.mxu3 %v2178_v56  ;;  %v10258_v47 = vpop.permute.xlu0 %4651 }
 0x337   : > { %13831 = vst [vmem:[#allocation43_spill] sm:$0xff] %v10258_v47  ;;  %v10357_v47 = vld [vmem:[%s13407_s9 + $0xa8] sm:$0xff] }
 0x338   : > { %v2208_v39 = vpop.f32.mrf.mxu2  ;;  %v10271_v59 = vpop.permute.xlu1 %3077 }
 0x339   : > { %13833 = vst [vmem:[#allocation53_spill] sm:$0xff] %v10271_v59 }
 0x33a   : > { %2239 = vmatpush.bf16.msrb.mxu3 %v2176_v36  ;;  %v10264_v56 = vpop.permute.xlu2 %3087 }
 0x33b   : > { %13832 = vst [vmem:[#allocation49_spill] sm:$0xff] %v10264_v56 }
 0x33d   : > { %7437 = vmatmul.msk.f32.gmra.mxu2 %vm928_vm2, %v10224_v38 }
 0x33e   : > { %2240 = vmatpush.bf16.msrb.mxu3 %v2174_v11  ;;  %v10275_v16 = vpop.permute.xlu0 %4566  ;;  %v13843_v11 = vld [vmem:[#allocation20_spill] sm:$0xff] }
 0x33f   : > { %13834 = vst [vmem:[#allocation44_spill] sm:$0xff] %v10275_v16  ;;  %v13861_v16 = vld [vmem:[#allocation81_spill] sm:$0xff] }
 0x340   : > { %v10288_v7 = vpop.permute.xlu1 %3072 }
 0x341   : > { %13837 = vst [vmem:[#allocation42_spill] sm:$0xff] %v10288_v7  ;;  %v13553_v7 = vmov 683565275  }
 0x342   : > { %2241 = vmatpush.bf16.msrb.mxu3 %v2172_v45  ;;  %v10282_v28 = vpop.permute.xlu2 %3082  ;;  %v13845_v45 = vld [vmem:[#allocation83_spill] sm:$0xff] }
 0x343   : > { %13835 = vst [vmem:[#allocation46_spill] sm:$0xff] %v10282_v28  ;;  %v13556_v28 = vmov 2475754826  }
 0x345   : > { %7438 = vmatmul.msk.f32.gmra.mxu2 %vm928_vm2, %v10241_v17 }
 0x346   : > { %2242 = vmatpush.bf16.msrb.mxu3 %v2170_v55  ;;  %v10290_v54 = vpop.permute.xlu0 %4551  ;;  %v10325_v55 = vld [vmem:[%s13407_s9 + $0x98] sm:$0xff] }
 0x347   : > { %13838 = vst [vmem:[#allocation75_spill] sm:$0xff] %v10290_v54 }
 0x348   : > { %v10304_v21 = vpop.permute.xlu1 %3047 }
 0x349   : > { %13842 = vst [vmem:[#allocation78_spill] sm:$0xff] %v10304_v21 }
 0x34a   : > { %2243 = vmatpush.bf16.msrb.mxu3 %v2168_v10  ;;  %v10297_v39 = vpop.permute.xlu2 %3057  ;;  %v13849_v10 = vld [vmem:[#allocation87_spill] sm:$0xff] }
 0x34b   : > { %13839 = vst [vmem:[#allocation100_spill] sm:$0xff] %v10297_v39 }
 0x34d   : > { %2244 = vmatmul.bf16.vlgmr.msrb.gmra.mxu3 %v2194_v61  ;;  %7439 = vmatmul.msk.f32.gmra.mxu2 %vm928_vm2, %v10253_v4 }
 0x34e   : > { %2697 = vmatpush.msra.mxu3 %v13830_v46  ;;  %v10312_v32 = vpop.permute.xlu0 %4636 }
 0x34f   : > { %13844 = vst [vmem:[#allocation93_spill] sm:$0xff] %v10312_v32 }
 0x350   : > { %v10262_v9 = vpop.f32.mrf.mxu2  ;;  %v10327_v2 = vpop.permute.xlu1 %3042 }
 0x351   : > { %13847 = vst [vmem:[#allocation83_spill] sm:$0xff] %v10327_v2 }
 0x352   : > { %v10320_v44 = vpop.permute.xlu2 %3052 }
 0x353   : > { %13846 = vst [vmem:[#allocation20_spill] sm:$0xff] %v10320_v44 }
 0x355   : > { %7440 = vmatmul.msk.f32.gmra.mxu2 %vm928_vm2, %v10269_v30 }
 0x356   : > { %v10329_v6 = vpop.permute.xlu0 %4621 }
 0x357   : > { %13848 = vst [vmem:[#allocation101_spill] sm:$0xff] %v10329_v6 }
 0x358   : > { %v2234_v61 = vpop.f32.mrf.mxu2 }
 0x359   : > { %v13850_v61 = vld [vmem:[#allocation86_spill] sm:$0xff] }
 0x35d   : > { %7441 = vmatmul.msk.f32.gmra.mxu2 %vm928_vm2, %v10280_v31  ;;  %7457 = vmatmul.msk.f32.vlgmr.msra.gmra.mxu3 %vm928_vm2, %v13836_v8 }
 0x35e   : > { %v10352_v32 = vpop.permute.xlu0 %4536 }
 0x360   : > { %v2586_v36 = vpop.f32.mrf.mxu2 }
 0x361   : > { %v2587_v57 = vadd.f32 %v2586_v36, %v13841_v34 }
 0x363   : > { %v2795_v40 = vmax.f32 %v2587_v57, 0.0  ;;  %v13852_v57 = vld [vmem:[#allocation89_spill] sm:$0xff] }
 0x364   : > { %13855 = vst [vmem:[#allocation89_spill] sm:$0xff] %v10352_v32 }
 0x365   : > { %7442 = vmatmul.msk.f32.gmra.mxu2 %vm928_vm2, %v10295_v24  ;;  %7458 = vmatmul.msk.f32.gmra.mxu3 %vm928_vm2, %v13840_v60  ;;  %v10336_v60 = vpop.permute.xlu2 %3929 }
 0x366   : > { %13851 = vst [vmem:[#allocation87_spill] sm:$0xff] %v10336_v60  ;;  %v10368_v54 = vpop.permute.xlu0 %4521 }
 0x368   : > { %v2589_v0 = vpop.f32.mrf.mxu2 }
 0x369   : > { %v2590_v19 = vadd.f32 %v2589_v0, %v13843_v11 }
 0x36b   : > { %v2797_v1 = vmax.f32 %v2590_v19, 0.0  ;;  %v10342_v19 = vld [vmem:[%s13407_s9 + $0xa0] sm:$0xff] }
 0x36d   : > { %7443 = vmatmul.msk.f32.gmra.mxu2 %vm928_vm2, %v10310_v5  ;;  %7459 = vmatmul.msk.f32.gmra.mxu3 %vm928_vm2, %v13845_v45  ;;  %v10318_v43 = vpack.c.bf16 %v2797_v1, %v2795_v40  ;;  %v10344_v45 = vpop.permute.xlu1 %4009 }
 0x36e   : > { %13853 = vst [vmem:[#allocation86_spill] sm:$0xff] %v10344_v45 }
 0x370   : > { %v2592_v20 = vpop.f32.mrf.mxu2 }
 0x371   : > { %v2593_v8 = vadd.f32 %v2592_v20, %v13850_v61 }
 0x373   : > { %v2799_v40 = vmax.f32 %v2593_v8, 0.0  ;;  %v10359_v8 = vpop.permute.xlu2 %4014 }
 0x375   : > { %7444 = vmatmul.msk.f32.gmra.mxu2 %vm928_vm2, %v10325_v55  ;;  %7460 = vmatmul.msk.f32.gmra.mxu3 %vm928_vm2, %v13849_v10  ;;  %v13854_v10 = vld [vmem:[#allocation90_spill] sm:$0xff]  ;;  %v10365_v6 = vpop.permute.xlu1 %3924 }
 0x376   : > { %13856 = vst [vmem:[#allocation90_spill] sm:$0xff] %v10359_v8 }
 0x378   : > { %v2595_v36 = vpop.f32.mrf.mxu2 }
 0x379   : > { %v2596_v0 = vadd.f32 %v2595_v36, %v13852_v57 }
 0x37b   : > { %v2801_v1 = vmax.f32 %v2596_v0, 0.0  ;;  %v13857_v0 = vld [vmem:[#allocation94_spill] sm:$0xff]  ;;  %v10376_v8 = vpop.permute.xlu2 %3999 }
 0x37c   : > { %13858 = vst [vmem:[#allocation94_spill] sm:$0xff] %v10365_v6 }
 0x37d   : > { %7445 = vmatmul.msk.f32.gmra.mxu2 %vm928_vm2, %v10342_v19  ;;  %7461 = vmatmul.msk.f32.gmra.mxu3 %vm928_vm2, %v13854_v10  ;;  %v10350_v20 = vpack.c.bf16 %v2801_v1, %v2799_v40  ;;  %v13859_v40 = vld [vmem:[#allocation26_spill] sm:$0xff]  ;;  %13862 = vst [vmem:[#allocation81_spill] sm:$0xff] %v10376_v8  ;;  %v13867_v8 = vld [vmem:[#allocation25_spill] sm:$0xff] }
 0x37e   : > { %13860 = vst [vmem:[#allocation26_spill] sm:$0xff] %v10368_v54  ;;  %v10384_v54 = vpop.permute.xlu1 %3909 }
 0x37f   : > { %13863 = vst [vmem:[#allocation102_spill] sm:$0xff] %v10384_v54 }
 0x380   : > { %v2598_v36 = vpop.f32.mrf.mxu2 }
 0x381   : > { %v2599_v1 = vadd.f32 %v2598_v36, %v13859_v40 }
 0x383   : > { %v2803_v22 = vmax.f32 %v2599_v1, 0.0  ;;  %v10391_v1 = vpop.permute.xlu0 %4606 }
 0x384   : > { %13864 = vst [vmem:[#allocation103_spill] sm:$0xff] %v10391_v1 }
 0x385   : > { %7446 = vmatmul.msk.f32.gmra.mxu2 %vm928_vm2, %v10357_v47  ;;  %7462 = vmatmul.msk.f32.gmra.mxu3 %vm928_vm2, %v13857_v0 }
 0x386   : > { %v10406_v3 = vpop.permute.xlu1 %3994 }
 0x387   : > { %13868 = vst [vmem:[#allocation105_spill] sm:$0xff] %v10406_v3  ;;  %v10423_v3 = vld [vmem:[%s13407_s9 + $0xc8] sm:$0xff] }
 0x388   : > { %v2601_v10 = vpop.f32.mrf.mxu2  ;;  %13871 = vst [vmem:[#allocation108_spill] sm:$0xff] %v10423_v3 }
 0x389   : > { %v2602_v32 = vadd.f32 %v2601_v10, %v13861_v16  ;;  %v10389_v10 = vld [vmem:[%s13407_s9 + $0xb8] sm:$0xff] }
 0x38b   : > { %v2805_v18 = vmax.f32 %v2602_v32, 0.0  ;;  %v10397_v32 = vpop.permute.xlu2 %3914  ;;  %v10408_v54 = vpop.permute.xlu0 %4591 }
 0x38c   : > { %13865 = vst [vmem:[#allocation104_spill] sm:$0xff] %v10397_v32 }
 0x38d   : > { %7447 = vmatmul.msk.f32.gmra.mxu2 %vm928_vm2, %v10374_v15  ;;  %7463 = vmatmul.msk.f32.gmra.mxu3 %vm928_vm2, %v10086_v51  ;;  %v10382_v36 = vpack.c.bf16 %v2805_v18, %v2803_v22  ;;  %v13866_v51 = vld [vmem:[#allocation74_spill] sm:$0xff]  ;;  %13869 = vst [vmem:[#allocation106_spill] sm:$0xff] %v10408_v54  ;;  %v8274_v54 = vmov 2  }
 0x38e   : > { %7994 = vset.pattern.permute.xlu1 %v8274_v54 }
 0x390   : > { %v2604_v0 = vpop.f32.mrf.mxu2 }
 0x391   : > { %v2605_v18 = vadd.f32 %v2604_v0, %v13866_v51  ;;  %v13891_v51 = vmov 0  }
 0x393   : > { %v2807_v1 = vmax.f32 %v2605_v18, 0.0 }
 0x395   : > { %7448 = vmatmul.msk.f32.gmra.mxu2 %vm928_vm2, %v10389_v10  ;;  %7464 = vmatmul.msk.f32.gmra.mxu3 %vm928_vm2, %v10107_v12 }
 0x398   : > { %v2607_v22 = vpop.f32.mrf.mxu2 }
 0x399   : > { %v2608_v45 = vadd.f32 %v2607_v22, %v13867_v8  ;;  %v10418_v22 = vpop.permute.xlu2 %3899 }
 0x39a   : > { %13870 = vst [vmem:[#allocation107_spill] sm:$0xff] %v10418_v22 }
 0x39b   : > { %v2809_v14 = vmax.f32 %v2608_v45, 0.0  ;;  %v10425_v45 = vpop.permute.xlu1 %3979 }
 0x39c   : > { %13872 = vst [vmem:[#allocation109_spill] sm:$0xff] %v10425_v45 }
 0x39d   : > { %7449 = vmatmul.msk.f32.gmra.mxu2 %vm928_vm2, %v10404_v48  ;;  %7465 = vmatmul.msk.f32.gmra.mxu3 %vm928_vm2, %v10130_v42  ;;  %v10414_v12 = vpack.c.bf16 %v2809_v14, %v2807_v1  ;;  %v10431_v42 = vpop.permute.xlu0 %4506  ;;  %v10438_v1 = vld [vmem:[%s13407_s9 + $0xd0] sm:$0xff] }
 0x39e   : > { %13873 = vst [vmem:[#allocation110_spill] sm:$0xff] %v10431_v42  ;;  %v13877_v42 = vld [vmem:[#allocation21_spill] sm:$0xff] }
 0x39f   : > { %13874 = vst [vmem:[#allocation111_spill] sm:$0xff] %v10438_v1  ;;  %6442 = vperm.xlu1 %7994, %v13877_v42  }
 0x3a0   : > { %v10416_v0 = vpop.f32.mrf.mxu2 }
 0x3a1   : > { %v10440_v18 = vpop.permute.xlu2 %3984 }
 0x3a2   : > { %13875 = vst [vmem:[#allocation112_spill] sm:$0xff] %v10440_v18  ;;  %v2276_v18 = vld [vmem:[%s13407_s9 + $0xd8] sm:$0xff] }
 0x3a5   : > { %7450 = vmatmul.msk.f32.gmra.mxu2 %vm928_vm2, %v10423_v3  ;;  %7466 = vmatmul.msk.f32.gmra.mxu3 %vm928_vm2, %v10155_v58  ;;  %v10446_v58 = vpop.permute.xlu1 %3894  ;;  %v2188_v22 = vpop.permute.xlu0 %2187 }
 0x3a6   : > { %13876 = vst [vmem:[#allocation113_spill] sm:$0xff] %v10446_v58  ;;  %v2207_v32 = vadd.f32 %v10205_v25, %v2188_v22  ;;  %v2277_v25 = vld [vmem:[%s13407_s9 + $0xe0] sm:$0xff] }
 0x3a8   : > { %v10433_v14 = vpop.f32.mrf.mxu2 }
 0x3a9   : > { %v10455_v2 = vpop.permute.xlu2 %3969 }
 0x3aa   : > { %13878 = vst [vmem:[#allocation21_spill] sm:$0xff] %v10455_v2 }
 0x3ad   : > { %7451 = vmatmul.msk.f32.gmra.mxu2 %vm928_vm2, %v10438_v1  ;;  %7467 = vmatmul.msk.f32.gmra.mxu3 %vm928_vm2, %v10183_v53  ;;  %v10462_v54 = vpop.permute.xlu1 %3879  ;;  %v13890_v1 = vmov 5  }
 0x3ae   : > { %13879 = vst [vmem:[#allocation114_spill] sm:$0xff] %v10462_v54 }
 0x3b0   : > { %v10449_v45 = vpop.f32.mrf.mxu2  ;;  %v2219_v6 = vpop.f32.mrf.mxu3 }
 0x3b1   : > { %v2220_v60 = vadd.f32 %v2219_v6, %v2207_v32  ;;  %v10472_v6 = vpop.permute.xlu2 %3884 }
 0x3b2   : > { %13880 = vst [vmem:[#allocation115_spill] sm:$0xff] %v10472_v6 }
 0x3b3   : > { %8008 = vtanh.f32 %v2220_v60 }
 0x3b5   : > { %7452 = vmatmul.msk.f32.gmra.mxu2 %vm928_vm2, %v2276_v18  ;;  %7468 = vmatmul.msk.f32.gmra.mxu3 %vm928_vm2, %v10201_v27  ;;  %v2278_v18 = vld [vmem:[%s13407_s9 + $0xe8] sm:$0xff] }
 0x3b8   : > { %v10460_v53 = vpop.f32.mrf.mxu2  ;;  %v2221_v42 = vpop.f32.mrf.mxu3 }
 0x3b9   : > { %v8009_v58 = vpop.eup %8008  ;;  %v10480_v42 = vpop.permute.xlu1 %3964 }
 0x3ba   : > { %v10467_v44 = vmul.f32 1.5707964, %v8009_v58  ;;  %13881 = vst [vmem:[#allocation116_spill] sm:$0xff] %v10480_v42  ;;  %v10490_v6 = vpop.permute.xlu2 %3869  ;;  %v2233_v42 = vadd.f32 %v10262_v9, %v2188_v22  ;;  %v13564_v22 = vmov 2102212464  }
 0x3bb   : > { %13882 = vst [vmem:[#allocation117_spill] sm:$0xff] %v10490_v6 }
 0x3bc   : > { %v5360_v27 = vand.u32 2139095040, %v10467_v44  ;;  %v13542_v58 = vand.u32 2147483647, %v10467_v44 }
 0x3bd   : > { %7453 = vmatmul.msk.f32.gmra.mxu2 %vm928_vm2, %v2277_v25  ;;  %7469 = vmatmul.msk.f32.gmra.mxu3 %vm928_vm2, %v10224_v38 }
 0x3be   : > { %v5361_v32 = vshrl.u32 %v5360_v27, 23  ;;  %v5364_v38 = vand.u32 8388607, %v13542_v58 }
 0x3c0   : > { %v10475_v60 = vpop.f32.mrf.mxu2  ;;  %v7809_v2 = vadd.s32 4294967169, %v5361_v32  ;;  %v2279_v32 = vld [vmem:[%s13407_s9 + $0xf0] sm:$0xff] }
 0x3c1   : > { %v10509_v21 = vpop.permute.xlu1 %3949 }
 0x3c2   : > { %v5367_v25 = vadd.s32 1, %v7809_v2  ;;  %v13548_v2 = vmov 5   ;;  %13883 = vst [vmem:[#allocation118_spill] sm:$0xff] %v10509_v21 }
 0x3c3   : > { %7996 = vset.pattern.permute.xlu1 %v13548_v2 }
 0x3c4   : > { %vm5368_vm3 = vcmp.gt.s32.totalorder %v5367_v25, 0 }
 0x3c5   : > { %7454 = vmatmul.msk.f32.gmra.mxu2 %vm928_vm2, %v2278_v18  ;;  %7470 = vmatmul.msk.f32.gmra.mxu3 %vm928_vm2, %v10241_v17  ;;  %v5369_v27 = vsel %vm5368_vm3, %v5367_v25, 0  ;;  %v10499_v17 = vld [vmem:[%s13723_s6] sm:$0xff]  ;;  %v5365_v25 = vor.u32 8388608, %v5364_v38 }
 0x3c6   : > { %v5371_v39 = vand.u32 31, %v5369_v27  ;;  %v6453_v18 = vmul.f32 2.0, %v10499_v17  ;;  %v10505_v6 = vshrl.u32 %v5369_v27, 5 }
 0x3c7   : > { %v10531_v52 = vshll.u32 %v5365_v25, 8 }
 0x3c8   : > { %v10488_v54 = vpop.f32.mrf.mxu2  ;;  %v10502_v58 = vsub.s32 32, %v5371_v39  ;;  %v5374_v59 = vshll.u32 %v13553_v7, %v5371_v39  ;;  %v5377_v2 = vshll.u32 %v13556_v28, %v5371_v39  ;;  %6456 = vperm.xlu1 %7996, %v6453_v18   ;;  %v5380_v9 = vshll.u32 %v13560_v35, %v5371_v39 }
 0x3c9   : > { %v5383_v7 = vshll.u32 %v13564_v22, %v5371_v39  ;;  %v13569_v18 = vmov 920167782   ;;  %vm5389_vm4 = vcmp.lt.s32.totalorder %v10505_v6, 1  ;;  %vm5392_vm5 = vcmp.lt.s32.totalorder %v10505_v6, 4 }
 0x3ca   : > { %v5375_v56 = vshrl.u32 %v13556_v28, %v10502_v58  ;;  %v5378_v38 = vshrl.u32 %v13560_v35, %v10502_v58  ;;  %v5381_v27 = vshrl.u32 %v13564_v22, %v10502_v58  ;;  %v5384_v21 = vshrl.u32 %v13569_v18, %v10502_v58 }
 0x3cb   : > { %v5386_v28 = vshll.u32 %v13569_v18, %v5371_v39  ;;  %v5387_v33 = vshrl.u32 %v13568_v37, %v10502_v58  ;;  %vm5391_vm6 = vcmp.lt.s32.totalorder %v10505_v6, 3  ;;  %vm5390_vm7 = vcmp.lt.s32.totalorder %v10505_v6, 2 }
 0x3cc   : > { %v10527_v35 = vor.u32 %v5375_v56, %v5374_v59  ;;  %v10529_v13 = vor.u32 %v5378_v38, %v5377_v2  ;;  %v5385_v22 = vor.u32 %v5384_v21, %v5383_v7  ;;  %v8282_v59 = vmov 1   ;;  %v2280_v21 = vld [vmem:[%s13407_s9 + $0xf8] sm:$0xff]  ;;  %v10551_v2 = vpop.permute.xlu2 %3954 }
 0x3cd   : > { %7455 = vmatmul.msk.f32.gmra.mxu2 %vm928_vm2, %v2279_v32  ;;  %7471 = vmatmul.msk.f32.gmra.mxu3 %vm928_vm2, %v10253_v4  ;;  %v5382_v32 = vor.u32 %v5381_v27, %v5380_v9  ;;  %v5388_v41 = vor.u32 %v5387_v33, %v5386_v28  ;;  %13884 = vst [vmem:[#allocation119_spill] sm:$0xff] %v10551_v2  ;;  %v5406_v9 = vand.u32 65535, %v10531_v52 }
 0x3ce   : > { %v5397_v4 = vsel %vm5389_vm4, %v10527_v35, %v10529_v13  ;;  %7993 = vset.pattern.permute.xlu0 %v8282_v59  ;;  %v5398_v33 = vsel %vm5392_vm5, %v5385_v22, 920167782 }
 0x3cf   : > { %v5401_v56 = vsel %vm5389_vm4, %v10529_v13, %v5382_v32  ;;  %v5402_v28 = vsel %vm5392_vm5, %v5388_v41, 1326507024  ;;  %6432 = vperm.xlu0 %7993, %v10499_v17   ;;  %v5399_v25 = vsel %vm5391_vm6, %v5382_v32, %v5398_v33 }
 0x3d0   : > { %v2245_v29 = vpop.f32.mrf.mxu3  ;;  %v2628_v39 = vpop.f32.mrf.mxu2  ;;  %v5403_v38 = vsel %vm5391_vm6, %v5385_v22, %v5402_v28  ;;  %6507 = vperm.xlu1 %7996, %v10499_v17  }
 0x3d1   : > { %v2246_v7 = vadd.f32 %v2245_v29, %v2233_v42  ;;  %v5400_v29 = vsel %vm5390_vm7, %v5397_v4, %v5399_v25  ;;  %v5404_v41 = vsel %vm5390_vm7, %v5401_v56, %v5403_v38  ;;  %v5407_v42 = vshrl.u32 %v10531_v52, 16  ;;  %v10568_v22 = vpop.permute.xlu1 %3864  ;;  %v13886_v25 = vld [vmem:[#allocation65_spill] sm:$0xff] }
 0x3d2   : > { %v5408_v27 = vand.u32 65535, %v5404_v41  ;;  %v5409_v59 = vshrl.u32 %v5404_v41, 16  ;;  %v5430_v37 = vand.u32 65535, %v5400_v29  ;;  %v5431_v33 = vshrl.u32 %v5400_v29, 16  ;;  %13885 = vst [vmem:[#allocation120_spill] sm:$0xff] %v10568_v22 }
 0x3d3   : > { %8010 = vtanh.f32 %v2246_v7  ;;  %v10572_v56 = vadd.f32 %v10460_v53, %v13886_v25  ;;  %v13887_v7 = vld [vmem:[#allocation58_spill] sm:$0xff]  ;;  %v13888_v41 = vmov 683565275   ;;  %v2629_v53 = vadd.f32 %v2628_v39, %v13889_v23 }
 0x3d4   : > { %v5411_v4 = vmul.u32 %v5409_v59, %v5406_v9  ;;  %v5412_v28 = vmul.u32 %v5408_v27, %v5407_v42  ;;  %v10576_v38 = vadd.f32 %v10475_v60, %v13887_v7  ;;  %v5373_v29 = vshrl.u32 %v13888_v41, %v10502_v58 }
 0x3d5   : > { %7456 = vmatmul.msk.f32.gmra.mxu2 %vm928_vm2, %v2280_v21  ;;  %7472 = vmatmul.msk.f32.gmra.mxu3 %vm928_vm2, %v10269_v30  ;;  %v5394_v21 = vsel %vm5392_vm5, %v5382_v32, 2102212464  ;;  %v5433_v18 = vmul.u32 %v5431_v33, %v5406_v9  ;;  %v5434_v30 = vmul.u32 %v5430_v37, %v5407_v42  ;;  %v5410_v62 = vmul.u32 %v5408_v27, %v5406_v9 }
 0x3d6   : > { %v5413_v63 = vmul.u32 %v5409_v59, %v5407_v42  ;;  %v5414_v26 = vshll.u32 %v5411_v4, 16  ;;  %v5416_v50 = vshll.u32 %v5412_v28, 16  ;;  %v5432_v25 = vmul.u32 %v5430_v37, %v5406_v9  ;;  %v10587_v59 = vpop.permute.xlu2 %3939  ;;  %v13893_v37 = vld [vmem:[#allocation52_spill] sm:$0xff] }
 0x3d7   : > { %v5435_v60 = vmul.u32 %v5431_v33, %v5407_v42  ;;  %v5436_v7 = vshll.u32 %v5433_v18, 16  ;;  %7998 = vset.pattern.permute.xlu0 %v13890_v1  ;;  %v5438_v8 = vshll.u32 %v5434_v30, 16  ;;  %13892 = vst [vmem:[#allocation50_spill] sm:$0xff] %v10587_v59  ;;  %v8283_v42 = vmov 3  }
 0x3d8   : > { %v2247_v2 = vpop.f32.mrf.mxu3  ;;  %v2631_v22 = vpop.f32.mrf.mxu2  ;;  %vm5418_vm8 = vc.u32 %v5410_v62, %v5414_v26  ;;  %v5420_v58 = vadd.s32 %v5414_v26, %v5410_v62  ;;  %7995 = vset.pattern.permute.xlu2 %v8283_v42  ;;  %v13894_v26 = vld [vmem:[#allocation31_spill] sm:$0xff]  ;;  %v5417_v42 = vshrl.u32 %v5412_v28, 16  ;;  %v2817_v6 = vmax.f32 %v10572_v56, 0.0 }
 0x3d9   : > { %v8011_v49 = vpop.eup %8010  ;;  %v5419_v2 = vsel %vm5418_vm8, 1, %v13891_v51  ;;  %vm5440_vm9 = vc.u32 %v5432_v25, %v5436_v7  ;;  %v5442_v27 = vadd.s32 %v5436_v7, %v5432_v25  ;;  %v2632_v9 = vadd.f32 %v2631_v22, %v13893_v37  ;;  %6501 = vperm.xlu2 %7995, %v10499_v17  }
 0x3da   : > { %v10584_v32 = vmul.f32 1.5707964, %v8011_v49  ;;  %v5421_v3 = vadd.s32 %v5419_v2, %v5413_v63  ;;  %vm5422_vm10 = vc.u32 %v5420_v58, %v5416_v50  ;;  %v5441_v39 = vsel %vm5440_vm9, 1, %v13891_v51 }
 0x3db   : > { %v5423_v33 = vsel %vm5422_vm10, 1, %v13891_v51  ;;  %v5443_v62 = vadd.s32 %v5441_v39, %v5435_v60  ;;  %vm5444_vm11 = vc.u32 %v5442_v27, %v5438_v8  ;;  %v2626_v49 = vadd.f32 %v10488_v54, %v13894_v26  ;;  %v10609_v39 = vpop.permute.xlu1 %4571 }
 0x3dc   : > { %v5393_v63 = vsel %vm5389_vm4, %v5373_v29, %v10527_v35  ;;  %v5415_v50 = vshrl.u32 %v5411_v4, 16  ;;  %v5425_v22 = vadd.s32 %v5423_v33, %v5421_v3  ;;  %v5445_v25 = vsel %vm5444_vm11, 1, %v13891_v51  ;;  %13896 = vst [vmem:[#allocation121_spill] sm:$0xff] %v10609_v39 }
 0x3dd   : > { %7473 = vmatmul.msk.f32.gmra.mxu3 %vm928_vm2, %v10280_v31  ;;  %v5395_v7 = vsel %vm5391_vm6, %v10529_v13, %v5394_v21  ;;  %v5437_v60 = vshrl.u32 %v5433_v18, 16  ;;  %v5447_v58 = vadd.s32 %v5445_v25, %v5443_v62  ;;  %v5514_v54 = vand.u32 2139095040, %v10584_v32  ;;  %v13897_v25 = vld [vmem:[#allocation32_spill] sm:$0xff] }
 0x3de   : > { %v5426_v35 = vadd.s32 %v5425_v22, %v5415_v50  ;;  %v2823_v4 = vmax.f32 %v2629_v53, 0.0  ;;  %v2825_v3 = vmax.f32 %v2632_v9, 0.0  ;;  %v5439_v29 = vshrl.u32 %v5434_v30, 16 }
 0x3df   : > { %v5448_v33 = vadd.s32 %v5447_v58, %v5437_v60  ;;  %v5515_v59 = vshrl.u32 %v5514_v54, 23  ;;  %v10613_v13 = vadd.s32 %v5442_v27, %v5438_v8  ;;  %v2821_v18 = vmax.f32 %v2626_v49, 0.0  ;;  %v13898_v49 = vld [vmem:[#allocation71_spill] sm:$0xff]  ;;  %v13900_v60 = vld [vmem:[#allocation69_spill] sm:$0xff] }
 0x3e0   : > { %v10605_v2 = vpop.f32.mrf.mxu2  ;;  %v10607_v31 = vpop.f32.mrf.mxu3  ;;  %v10611_v26 = vadd.s32 %v5426_v35, %v5417_v42  ;;  %v2873_v21 = vpack.c.bf16 %v2825_v3, %v2823_v4  ;;  %v13583_v62 = vmov 7   ;;  %v5396_v28 = vsel %vm5390_vm7, %v5393_v63, %v5395_v7 }
 0x3e1   : > { %13895 = vst [vmem:[#allocation52_spill] sm:$0xff] %v10605_v2  ;;  %8000 = vset.pattern.permute.xlu1 %v13583_v62  ;;  %v2617_v2 = vadd.f32 %v10449_v45, %v13897_v25  ;;  %v5449_v53 = vadd.s32 %v5448_v33, %v5439_v29  ;;  %v7812_v9 = vadd.s32 4294967169, %v5515_v59  ;;  %v2819_v30 = vmax.f32 %v10576_v38, 0.0  ;;  %7997 = vset.pattern.permute.xlu2 %v13890_v1  ;;  %v10632_v59 = vpop.permute.xlu2 %4576 }
 0x3e2   : > { %vm5452_vm12 = vc.u32 %v10611_v26, %v10613_v13  ;;  %3275 = vmatpush.bf16.msra.mxu0 %v2873_v21  ;;  %v13584_v8 = vsub.f32 1.0, %v10499_v17  ;;  %v6451_v27 = vmul.f32 %v10499_v17, %v10499_v17  ;;  %v2614_v50 = vadd.f32 %v10433_v14, %v13898_v49  ;;  %13899 = vst [vmem:[#allocation32_spill] sm:$0xff] %v10632_v59  ;;  %v13903_v21 = vld [vmem:[#allocation16_spill] sm:$0xff] }
 0x3e3   : > { %v5453_v45 = vadd.s32 1, %v5449_v53  ;;  %v5521_v63 = vadd.s32 1, %v7812_v9  ;;  %v5450_v38 = vmul.u32 %v10531_v52, %v5396_v28  ;;  %v2871_v22 = vpack.c.bf16 %v2821_v18, %v2819_v30 }
 0x3e4   : > { %6663 = vperm.xlu1 %8000, %v13584_v8   ;;  %v6452_v7 = vadd.f32 1.0, %v6451_v27  ;;  %v6492_v14 = vadd.f32 1.0, %v10499_v17  ;;  %v2611_v56 = vadd.f32 %v10416_v0, %v13900_v60  ;;  %v13582_v1 = vand.u32 2147483647, %v10584_v32  ;;  %v10648_v0 = vpop.permute.xlu1 %4656 }
 0x3e5   : > { %7474 = vmatmul.msk.f32.gmra.mxu3 %vm928_vm2, %v10295_v24  ;;  %v5454_v24 = vsel %vm5452_vm12, %v5453_v45, %v5449_v53  ;;  %vm5522_vm13 = vcmp.gt.s32.totalorder %v5521_v63, 0  ;;  %v2815_v54 = vmax.f32 %v2617_v2, 0.0  ;;  %v2813_v4 = vmax.f32 %v2614_v50, 0.0  ;;  %13902 = vst [vmem:[#allocation69_spill] sm:$0xff] %v10648_v0 }
 0x3e6   : > { %v5455_v42 = vadd.s32 %v5454_v24, %v5450_v38  ;;  %v5523_v35 = vsel %vm5522_vm13, %v5521_v63, 0  ;;  %3276 = vmatpush.bf16.msra.mxu0 %v2871_v22  ;;  %6463 = vperm.xlu2 %7997, %v6452_v7   ;;  %v2811_v18 = vmax.f32 %v2611_v56, 0.0  ;;  %v10651_v28 = vclamps-f32 %v13903_v21, 0.999999 }
 0x3e7   : > { %v5525_v3 = vand.u32 31, %v5523_v35  ;;  %6495 = vperm.xlu0 %7998, %v6492_v14   ;;  %v2869_v33 = vpack.c.bf16 %v2817_v6, %v2815_v54  ;;  %v5518_v53 = vand.u32 8388607, %v13582_v1  ;;  %v13904_v30 = vmov 2131351028  }
 0x3e8   : > { %v10644_v58 = vpop.f32.mrf.mxu2  ;;  %v10646_v52 = vpop.f32.mrf.mxu3  ;;  %v5456_v29 = vadd.s32 536870912, %v5455_v42  ;;  %v13905_v50 = vmov 2102212464   ;;  %v2867_v63 = vpack.c.bf16 %v2813_v4, %v2811_v18  ;;  %v13906_v38 = vmov 920167782  }
 0x3e9   : > { %13901 = vst [vmem:[#allocation71_spill] sm:$0xff] %v10644_v58  ;;  %v10655_v9 = vsub.s32 32, %v5525_v3  ;;  %v13907_v7 = vmov 1326507024   ;;  %v5979_v56 = vmul.f32 %v10651_v28, %v10651_v28  ;;  %v5519_v24 = vor.u32 8388608, %v5518_v53 }
 0x3ea   : > { %v10657_v2 = vshrl.u32 %v5456_v29, 30  ;;  %3277 = vmatpush.bf16.msra.mxu0 %v2869_v33  ;;  %v13908_v54 = vmov 2475754826   ;;  %v5534_v33 = vshll.u32 %v13904_v30, %v5525_v3  ;;  %v5540_v8 = vshll.u32 %v13906_v38, %v5525_v3 }
 0x3eb   : > { %v5532_v27 = vshrl.u32 %v13904_v30, %v10655_v9  ;;  %v5535_v45 = vshrl.u32 %v13905_v50, %v10655_v9  ;;  %v5538_v22 = vshrl.u32 %v13906_v38, %v10655_v9  ;;  %v5541_v14 = vshrl.u32 %v13907_v7, %v10655_v9 }
 0x3ec   : > { %v5458_v6 = vshll.u32 %v10657_v2, 30  ;;  %v5531_v29 = vshll.u32 %v13908_v54, %v5525_v3  ;;  %v5529_v62 = vshrl.u32 %v13908_v54, %v10655_v9  ;;  %v5537_v7 = vshll.u32 %v13905_v50, %v5525_v3  ;;  %v10697_v38 = vpop.permute.xlu1 %4641 }
 0x3ed   : > { %7475 = vmatmul.msk.f32.gmra.mxu3 %vm928_vm2, %v10310_v5  ;;  %v10678_v5 = vpop.permute.xlu2 %4561  ;;  %v10686_v53 = vshrl.u32 %v5523_v35, 5  ;;  %v5528_v30 = vshll.u32 %v13888_v41, %v5525_v3  ;;  %v10691_v59 = vor.u32 %v5535_v45, %v5534_v33  ;;  %v8285_v39 = vmov 6   ;;  %13911 = vst [vmem:[#allocation124_spill] sm:$0xff] %v10697_v38 }
 0x3ee   : > { %13910 = vst [vmem:[#allocation123_spill] sm:$0xff] %v10678_v5  ;;  %v10680_v1 = vsub.s32 %v5455_v42, %v5458_v6  ;;  %3278 = vmatpush.bf16.msra.mxu0 %v2867_v63  ;;  %v10689_v0 = vor.u32 %v5532_v27, %v5531_v29  ;;  %7999 = vset.pattern.permute.xlu2 %v8285_v39  ;;  %v10695_v50 = vsub.f32 1.0, %v5979_v56  ;;  %v10705_v39 = vshll.u32 %v5519_v24, 8 }
 0x3ef   : > { %v5539_v6 = vor.u32 %v5538_v22, %v5537_v7  ;;  %v5542_v54 = vor.u32 %v5541_v14, %v5540_v8  ;;  %v10700_v63 = vor.u32 %v5529_v62, %v5528_v30  ;;  %vm5543_vm15 = vcmp.lt.s32.totalorder %v10686_v53, 1 }
 0x3f0   : > { %v10674_v4 = vpop.f32.mrf.mxu2  ;;  %v10676_v18 = vpop.f32.mrf.mxu3  ;;  %vm5460_vm14 = vcmp.lt.s32.totalorder %v10680_v1, 0  ;;  %v5461_v42 = vsub.s32 0, %v10680_v1  ;;  %vm5546_vm0 = vcmp.lt.s32.totalorder %v10686_v53, 4  ;;  %v5555_v62 = vsel %vm5543_vm15, %v10689_v0, %v10691_v59 }
 0x3f1   : > { %13909 = vst [vmem:[#allocation122_spill] sm:$0xff] %v10674_v4  ;;  %v5552_v8 = vsel %vm5546_vm0, %v5539_v6, 920167782  ;;  %8012 = vrsqrt.f32 %v10695_v50  ;;  %vm5545_vm1 = vcmp.lt.s32.totalorder %v10686_v53, 3  ;;  %vm5544_vm3 = vcmp.lt.s32.totalorder %v10686_v53, 2 }
 0x3f2   : > { %v5462_v35 = vsel %vm5460_vm14, %v5461_v42, %v10680_v1  ;;  %3279 = vmatpush.bf16.msra.mxu0 %v10414_v12  ;;  %v5556_v12 = vsel %vm5546_vm0, %v5542_v54, 1326507024  ;;  %v5553_v14 = vsel %vm5545_vm1, %v10691_v59, %v5552_v8  ;;  %v5451_v24 = vadd.s32 %v10613_v13, %v10611_v26 }
 0x3f3   : > { %v5463_v3 = vclz %v5462_v35  ;;  %v5557_v56 = vsel %vm5545_vm1, %v5539_v6, %v5556_v12  ;;  %v5560_v33 = vand.u32 65535, %v10705_v39  ;;  %v5481_v42 = vsub.s32 4, %v10657_v2 }
 0x3f4   : > { %v5558_v29 = vsel %vm5544_vm3, %v5555_v62, %v5557_v56  ;;  %v5561_v26 = vshrl.u32 %v10705_v39, 16  ;;  %vm5359_vm5 = vcmp.lt.s32.totalorder %v10467_v44, 0 }
 0x3f5   : > { %7476 = vmatmul.msk.f32.gmra.mxu3 %vm928_vm2, %v10325_v55  ;;  %v7810_v27 = vadd.s32 4294967294, %v5463_v3  ;;  %v5551_v55 = vsel %vm5543_vm15, %v10700_v63, %v10689_v0  ;;  %v10739_v7 = vpop.permute.xlu2 %4646  ;;  %v5562_v54 = vand.u32 65535, %v5558_v29  ;;  %v5563_v35 = vshrl.u32 %v5558_v29, 16  ;;  %v10754_v29 = vpop.permute.xlu1 %4556 }
 0x3f6   : > { %3280 = vmatpush.bf16.msra.mxu0 %v10382_v36  ;;  %13913 = vst [vmem:[#allocation126_spill] sm:$0xff] %v10739_v7  ;;  %v5554_v36 = vsel %vm5544_vm3, %v5551_v55, %v5553_v14  ;;  %v5482_v55 = vsel %vm5359_vm5, %v5481_v42, %v10657_v2  ;;  %v5527_v2 = vshrl.u32 %v13888_v41, %v10655_v9 }
 0x3f7   : > { %vm7811_vm4 = vcmp.lt.s32.totalorder %v7810_v27, 0  ;;  %v10748_v8 = vpop.eup %8012  ;;  %v10750_v56 = vmul.u32 %v5562_v54, %v5561_v26  ;;  %13914 = vst [vmem:[#allocation127_spill] sm:$0xff] %v10754_v29  ;;  %v5584_v14 = vand.u32 65535, %v5554_v36  ;;  %v5564_v38 = vmul.u32 %v5562_v54, %v5560_v33 }
 0x3f8   : > { %v10719_v45 = vpop.f32.mrf.mxu2  ;;  %v10721_v22 = vpop.f32.mrf.mxu3  ;;  %v5466_v30 = vsel %vm7811_vm4, 0, %v7810_v27  ;;  %v5565_v27 = vmul.u32 %v5563_v35, %v5560_v33  ;;  %v5984_v29 = vmul.f32 %v10748_v8, %v10695_v50  ;;  %v5567_v42 = vmul.u32 %v5563_v35, %v5561_v26 }
 0x3f9   : > { %13912 = vst [vmem:[#allocation125_spill] sm:$0xff] %v10719_v45  ;;  %v5467_v3 = vsub.s32 32, %v5466_v30  ;;  %v5471_v6 = vsub.s32 4294967266, %v5466_v30  ;;  %v5468_v13 = vshll.u32 %v10680_v1, %v5466_v30  ;;  %v5585_v1 = vshrl.u32 %v5554_v36, 16 }
 0x3fa   : > { %3281 = vmatpush.bf16.msra.mxu0 %v10350_v20  ;;  %v5568_v7 = vshll.u32 %v5565_v27, 16  ;;  %v5570_v36 = vshll.u32 %v10750_v56, 16  ;;  %v10780_v5 = vmul.u32 %v5584_v14, %v5561_v26  ;;  %vm5992_vm4 = vcmp.eq.f32.partialorder %v10695_v50, 0.0 }
 0x3fb   : > { %v5469_v62 = vshrl.u32 %v5451_v24, %v5467_v3  ;;  %v5472_v12 = vadd.s32 127, %v5471_v6  ;;  %v13916_v6 = vand.u32 2147483647, %v10467_v44 }
 0x3fc   : > { %vm5572_vm7 = vc.u32 %v5564_v38, %v5568_v7 }
 0x3fd   : > { %7477 = vmatmul.msk.f32.gmra.mxu3 %vm928_vm2, %v10342_v19  ;;  %v5470_v30 = vor.u32 %v5469_v62, %v5468_v13  ;;  %v5473_v20 = vshll.u32 %v5472_v12, 23  ;;  %vm10765_vm6 = vcmp.le.f32.partialorder %v13916_v6, 0.7853982  ;;  %v5574_v13 = vadd.s32 %v5568_v7, %v5564_v38  ;;  %v10782_v9 = vpop.permute.xlu2 %4631 }
 0x3fe   : > { %3282 = vmatpush.bf16.msra.mxu0 %v10318_v43  ;;  %v10777_v62 = vsel %vm10765_vm6, 0, %v5482_v55  ;;  %v5573_v12 = vsel %vm5572_vm7, 1, %v13891_v51  ;;  %v5587_v6 = vmul.u32 %v5585_v1, %v5560_v33  ;;  %13919 = vst [vmem:[#allocation129_spill] sm:$0xff] %v10782_v9  ;;  %v5569_v43 = vshrl.u32 %v5565_v27, 16 }
 0x3ff   : > { %v5474_v54 = vor.u32 4788187, %v5473_v20  ;;  %v5477_v58 = vcvt.s32.f32 %v5470_v30  ;;  %v5575_v41 = vadd.s32 %v5573_v12, %v5567_v42  ;;  %vm5576_vm8 = vc.u32 %v5574_v13, %v5570_v36 }
 0x400   : > { %v10759_v24 = vpop.f32.mrf.mxu2  ;;  %v10761_v3 = vpop.f32.mrf.mxu3  ;;  %v5577_v35 = vsel %vm5576_vm8, 1, %v13891_v51  ;;  %v5586_v20 = vmul.u32 %v5584_v14, %v5560_v33  ;;  %v5590_v38 = vshll.u32 %v5587_v6, 16  ;;  %v5589_v55 = vmul.u32 %v5585_v1, %v5561_v26 }
 0x401   : > { %13915 = vst [vmem:[#allocation128_spill] sm:$0xff] %v10759_v24  ;;  %v5475_v4 = vand.u32 2147483647, %v5474_v54  ;;  %v5579_v45 = vadd.s32 %v5577_v35, %v5575_v41  ;;  %v5592_v24 = vshll.u32 %v10780_v5, 16  ;;  %v6630_v30 = vsub.f32 0.0, %v10499_v17  ;;  %v10799_v14 = vpop.permute.xlu1 %4541 }
 0x402   : > { %vm5594_vm9 = vc.u32 %v5586_v20, %v5590_v38  ;;  %v5596_v54 = vadd.s32 %v5590_v38, %v5586_v20  ;;  %v5985_v36 = vmul.f32 %v10748_v8, %v5984_v29  ;;  %v8286_v33 = vmov 8   ;;  %13920 = vst [vmem:[#allocation130_spill] sm:$0xff] %v10799_v14 }
 0x403   : > { %v5478_v7 = vmul.f32 %v5477_v58, %v5475_v4  ;;  %v5580_v27 = vadd.s32 %v5579_v45, %v5569_v43  ;;  %v5595_v13 = vsel %vm5594_vm9, 1, %v13891_v51  ;;  %8002 = vset.pattern.permute.xlu0 %v8286_v33  ;;  %8003 = vset.pattern.permute.xlu1 %v8286_v33  ;;  %v7491_v58 = vld [vmem:[%s13409_s11] sm:$0xf]  ;;  %v5547_v45 = vsel %vm5543_vm15, %v5527_v2, %v10700_v63 }
 0x404   : > { %v5548_v29 = vsel %vm5546_vm0, %v10691_v59, 2102212464  ;;  %v5597_v1 = vadd.s32 %v5595_v13, %v5589_v55  ;;  %vm5598_vm10 = vc.u32 %v5596_v54, %v5592_v24  ;;  %6635 = vperm.xlu2 %7999, %v6630_v30   ;;  %v13921_v12 = vsub.f32 1.0, %v10499_v17  ;;  %6681 = vperm.xlu1 %8003, %v10499_v17  }
 0x405   : > { %7478 = vmatmul.msk.f32.gmra.mxu3 %vm928_vm2, %v10357_v47  ;;  %v5479_v42 = vxor.u32 2147483648, %v5478_v7  ;;  %v7868_v47 = vld [vmem:[%s13409_s11 + $0x4] sm:$0xf0]  ;;  %v5571_v43 = vshrl.u32 %v10750_v56, 16  ;;  %v5591_v35 = vshrl.u32 %v5587_v6, 16  ;;  %v5599_v20 = vsel %vm5598_vm10, 1, %v13891_v51 }
 0x406   : > { %6675 = vperm.xlu0 %8002, %v13921_v12   ;;  %v5601_v63 = vadd.s32 %v5599_v20, %v5597_v1  ;;  %v2709_v2 = vadd.f32 %v10721_v22, %v13852_v57  ;;  %v10821_v38 = vor.u32 %v7868_v47, %v7491_v58  ;;  %v5549_v56 = vsel %vm5545_vm1, %v10689_v0, %v5548_v29  ;;  %v10840_v0 = vpop.permute.xlu2 %4546 }
 0x407   : > { %v5480_v41 = vsel %vm5359_vm5, %v5479_v42, %v5478_v7  ;;  %v10828_v6 = vadd.s32 %v5580_v27, %v5571_v43  ;;  %v2706_v19 = vadd.f32 %v10676_v18, %v13850_v61  ;;  %v5986_v55 = vmul.f32 0.5, %v5985_v36  ;;  %13922 = vst [vmem:[#allocation131_spill] sm:$0xff] %v10840_v0 }
 0x408   : > { %v10797_v4 = vpop.f32.mrf.mxu2  ;;  %v2714_v26 = vpop.f32.mrf.mxu3  ;;  %v10817_v59 = vsel %vm10765_vm6, %v10467_v44, %v5480_v41  ;;  %v5593_v30 = vshrl.u32 %v10780_v5, 16  ;;  %v5602_v42 = vadd.s32 %v5601_v63, %v5591_v35  ;;  %v2703_v57 = vadd.f32 %v10646_v52, %v13843_v11  ;;  %3283 = vmatmul.bf16.vlgmr.msra.gmra.mxu0 %v10821_v38 }
 0x409   : > { %v5485_v7 = vmul.f32 %v10817_v59, %v10817_v59  ;;  %v10836_v33 = vadd.s32 %v5596_v54, %v5592_v24  ;;  %v2802_v58 = vmax.f32 %v2709_v2, 0.0  ;;  %v5809_v61 = vadd.s32 3, %v10777_v62  ;;  %v10861_v41 = vpop.permute.xlu1 %4626 }
 0x40a   : > { %v5550_v18 = vsel %vm5544_vm3, %v5547_v45, %v5549_v56  ;;  %v5603_v5 = vadd.s32 %v5602_v42, %v5593_v30  ;;  %v2700_v11 = vadd.f32 %v10607_v31, %v13841_v34  ;;  %v2800_v24 = vmax.f32 %v2706_v19, 0.0  ;;  %13924 = vst [vmem:[#allocation132_spill] sm:$0xff] %v10861_v41 }
 0x40b   : > { %v5486_v22 = vmul.f32 -0.001358992, %v5485_v7  ;;  %v5493_v13 = vmul.f32 -0.00019511016, %v5485_v7  ;;  %vm5606_vm11 = vc.u32 %v10828_v6, %v10836_v33  ;;  %v10854_v27 = vand.u32 3, %v10777_v62 }
 0x40c   : > { %v5987_v47 = vsub.f32 1.5, %v5986_v55  ;;  %v5607_v53 = vadd.s32 1, %v5603_v5  ;;  %v2798_v45 = vmax.f32 %v2703_v57, 0.0  ;;  %v13923_v29 = vmov 7  }
 0x40d   : > { %7479 = vmatmul.msk.f32.gmra.mxu3 %vm928_vm2, %v10374_v15  ;;  %v5487_v52 = vadd.f32 0.041655596, %v5486_v22  ;;  %v5494_v36 = vadd.f32 0.008332121, %v5493_v13  ;;  %8001 = vset.pattern.permute.xlu2 %v13923_v29  ;;  %v5604_v31 = vmul.u32 %v10705_v39, %v5550_v18  ;;  %v10859_v12 = vpack.c.bf16 %v2802_v58, %v2800_v24  ;;  %v7499_v22 = vld [vmem:[%s13409_s11 + $0x10] sm:$0xf] }
 0x40e   : > { %6647 = vperm.xlu2 %8001, %v10499_v17   ;;  %v5608_v43 = vsel %vm5606_vm11, %v5607_v53, %v5603_v5  ;;  %v2796_v35 = vmax.f32 %v2700_v11, 0.0  ;;  %v5810_v63 = vand.u32 3, %v5809_v61  ;;  %v5988_v56 = vmul.f32 %v10748_v8, %v5987_v47  ;;  %v7870_v8 = vld [vmem:[%s13409_s11 + $0x14] sm:$0xf0]  ;;  %v10891_v5 = vpop.permute.xlu2 %4531 }
 0x40f   : > { %v5488_v1 = vmul.f32 %v5487_v52, %v5485_v7  ;;  %v5495_v34 = vmul.f32 %v5494_v36, %v5485_v7  ;;  %v5609_v2 = vadd.s32 %v5608_v43, %v5604_v31  ;;  %v10865_v19 = vclamps-f32 %v13830_v46, 0.999999  ;;  %13925 = vst [vmem:[#allocation133_spill] sm:$0xff] %v10891_v5 }
 0x410   : > { %v10849_v54 = vpop.f32.mrf.mxu2  ;;  %v10851_v15 = vpop.f32.mrf.mxu3  ;;  %v2715_v55 = vadd.f32 %v2714_v26, %v13861_v16  ;;  %v10868_v39 = vpack.c.bf16 %v2798_v45, %v2796_v35  ;;  %vm5502_vm12 = vcmp.lt.s32.totalorder %v10854_v27, 2  ;;  %vm5503_vm13 = vcmp.eq.s32.totalorder %v10854_v27, 0 }
 0x411   : > { %v5489_v20 = vadd.f32 -0.4999988, %v5488_v1  ;;  %v5496_v62 = vadd.f32 -0.16666654, %v5495_v34  ;;  %v5610_v57 = vadd.s32 536870912, %v5609_v2  ;;  %vm5506_vm14 = vcmp.eq.s32.totalorder %v10854_v27, 2 }
 0x412   : > { %v2712_v16 = vadd.f32 %v10761_v3, %v13859_v40  ;;  %v5980_v58 = vmul.f32 %v10865_v19, %v10865_v19  ;;  %vm5811_vm15 = vcmp.lt.s32.totalorder %v5810_v63, 2  ;;  %v2806_v11 = vmax.f32 %v2715_v55, 0.0 }
 0x413   : > { %v5490_v30 = vmul.f32 %v5489_v20, %v5485_v7  ;;  %v5497_v42 = vmul.f32 %v5496_v62, %v5485_v7  ;;  %v10883_v13 = vshrl.u32 %v5610_v57, 30  ;;  %v10894_v52 = vor.u32 %v7870_v8, %v7499_v22 }
 0x414   : > { %vm5990_vm0 = vcmp.eq.f32.partialorder %v10695_v50, inf  ;;  %v8287_v24 = vmov 9   ;;  %vm5812_vm1 = vcmp.eq.s32.totalorder %v5810_v63, 0  ;;  %vm5815_vm3 = vcmp.eq.s32.totalorder %v5810_v63, 2 }
 0x415   : > { %7480 = vmatmul.msk.f32.gmra.mxu3 %vm928_vm2, %v10389_v10  ;;  %v5491_v26 = vadd.f32 1.0, %v5490_v30  ;;  %v5498_v7 = vadd.f32 1.0, %v5497_v42  ;;  %v5989_v10 = vmul.f32 %v5988_v56, %v10695_v50  ;;  %v5612_v36 = vshll.u32 %v10883_v13, 30 }
 0x416   : > { %8004 = vset.pattern.permute.xlu2 %v8287_v24  ;;  %v2804_v47 = vmax.f32 %v2712_v16, 0.0  ;;  %v5993_v45 = vand.u32 2147483648, %v10695_v50  ;;  %v10902_v1 = vsub.f32 1.0, %v5980_v58  ;;  %vm5500_vm6 = vweird.f32 %v10467_v44  ;;  %v10930_v44 = vpop.permute.xlu2 %4616  ;;  %v7507_v58 = vld [vmem:[%s13409_s11 + $0x20] sm:$0xf] }
 0x417   : > { %v5499_v40 = vmul.f32 %v5498_v7, %v10817_v59  ;;  %v5507_v3 = vxor.u32 2147483648, %v5491_v26  ;;  %6687 = vperm.xlu2 %8004, %v10499_v17   ;;  %v5613_v29 = vsub.s32 %v5609_v2, %v5612_v36  ;;  %v10904_v59 = vpop.permute.xlu1 %4611  ;;  %v5991_v43 = vsel %vm5990_vm0, %v10695_v50, %v5989_v10  ;;  %13927 = vst [vmem:[#allocation135_spill] sm:$0xff] %v10930_v44  ;;  %v7872_v10 = vld [vmem:[%s13409_s11 + $0x24] sm:$0xf0] }
 0x418   : > { %v10887_v61 = vpop.f32.mrf.mxu2  ;;  %v10889_v18 = vpop.f32.mrf.mxu3  ;;  %13926 = vst [vmem:[#allocation134_spill] sm:$0xff] %v10904_v59  ;;  %3288 = vmatmul.bf16.gmra.mxu0 %v10894_v52  ;;  %v10912_v35 = vpack.c.bf16 %v2806_v11, %v2804_v47  ;;  %v5994_v42 = vsel %vm5992_vm4, %v5993_v45, %v5991_v43  ;;  %8014 = vrsqrt.f32 %v10902_v1  ;;  %v5605_v24 = vadd.s32 %v10836_v33, %v10828_v6  ;;  %v13928_v47 = vld [vmem:[#allocation108_spill] sm:$0xff] }
 0x419   : > { %v5504_v53 = vxor.u32 2147483648, %v5499_v40  ;;  %v5508_v34 = vsel %vm5506_vm14, %v5507_v3, %v5499_v40  ;;  %v5817_v31 = vsel %vm5815_vm3, %v5507_v3, %v5499_v40  ;;  %vm5614_vm5 = vcmp.lt.s32.totalorder %v5613_v29, 0 }
 0x41a   : > { %v5615_v2 = vsub.s32 0, %v5613_v29  ;;  %v6031_v27 = vmax.f32 %v5994_v42, 1e-06  ;;  %v10950_v43 = vor.u32 %v7872_v10, %v7507_v58  ;;  %vm5513_vm9 = vcmp.lt.s32.totalorder %v10584_v32, 0 }
 0x41b   : > { %v5505_v20 = vsel %vm5503_vm13, %v5491_v26, %v5504_v53  ;;  %v5814_v62 = vsel %vm5812_vm1, %v5491_v26, %v5504_v53  ;;  %vm6002_vm10 = vcmp.eq.f32.partialorder %v10902_v1, inf  ;;  %vm6004_vm11 = vcmp.eq.f32.partialorder %v10902_v1, 0.0 }
 0x41c   : > { %v5509_v56 = vsel %vm5502_vm12, %v5505_v20, %v5508_v34  ;;  %v5818_v55 = vsel %vm5811_vm15, %v5814_v62, %v5817_v31  ;;  %v5616_v57 = vsel %vm5614_vm5, %v5615_v2, %v5613_v29  ;;  %v13930_v34 = vld [vmem:[#allocation74_spill] sm:$0xff]  ;;  %8016 = vrcp.f32 %v6031_v27 }
 0x41d   : > { %7481 = vmatmul.msk.f32.gmra.mxu3 %vm928_vm2, %v10404_v48  ;;  %v5819_v30 = vsel %vm5500_vm6, nan, %v5818_v55  ;;  %v5510_v16 = vsel %vm5500_vm6, nan, %v5509_v56  ;;  %v5617_v26 = vclz %v5616_v57  ;;  %v2718_v31 = vadd.f32 %v10851_v15, %v13930_v34  ;;  %v13931_v56 = vld [vmem:[#allocation25_spill] sm:$0xff] }
 0x41e   : > { %v6017_v48 = vrot.slane %v5819_v30, 4  ;;  %v6037_v63 = vrot.slane %v5510_v16, 6  ;;  %v6009_v11 = vrot.slane %v5510_v16, 4  ;;  %v6063_v40 = vrot.slane %v5819_v30, 6  ;;  %v10940_v3 = vpop.eup %8014  ;;  %v10963_v34 = vpop.permute.xlu2 %4601 }
 0x41f   : > { %8006 = vset.pattern.permute.xlu2 %v13891_v51  ;;  %v7813_v50 = vadd.s32 4294967294, %v5617_v26  ;;  %v10946_v53 = vpop.permute.xlu1 %4526  ;;  %v2721_v6 = vadd.f32 %v10889_v18, %v13931_v56  ;;  %v5996_v15 = vmul.f32 %v10940_v3, %v10902_v1  ;;  %v2808_v10 = vmax.f32 %v2718_v31, 0.0  ;;  %13932 = vst [vmem:[#allocation74_spill] sm:$0xff] %v10963_v34 }
 0x420   : > { %v10926_v22 = vpop.f32.mrf.mxu2  ;;  %v10928_v8 = vpop.f32.mrf.mxu3  ;;  %v6043_v7 = vmul.f32 %v6017_v48, %v13903_v21  ;;  %13929 = vst [vmem:[#allocation108_spill] sm:$0xff] %v10946_v53  ;;  %v6041_v20 = vmul.f32 %v6037_v63, %v13903_v21  ;;  %v6025_v30 = vmul.f32 %v6009_v11, %v5994_v42  ;;  %v6027_v57 = vmul.f32 %v10651_v28, %v6017_v48 }
 0x421   : > { %vm7814_vm7 = vcmp.lt.s32.totalorder %v7813_v50, 0  ;;  %v6067_v16 = vmul.f32 %v6063_v40, %v13903_v21  ;;  %v2810_v18 = vmax.f32 %v2721_v6, 0.0  ;;  %v6013_v56 = vmul.f32 %v10651_v28, %v6009_v11 }
 0x422   : > { %v6047_v36 = vrot.slane %v6043_v7, 2  ;;  %v5620_v45 = vsel %vm7814_vm7, 0, %v7813_v50  ;;  %v6021_v51 = vmul.f32 %v6017_v48, %v5994_v42  ;;  %v5997_v40 = vmul.f32 %v10940_v3, %v5996_v15 }
 0x423   : > { %v5621_v62 = vsub.s32 32, %v5620_v45  ;;  %v5625_v2 = vsub.s32 4294967266, %v5620_v45  ;;  %v5622_v27 = vshll.u32 %v5613_v29, %v5620_v45  ;;  %v6071_v41 = vrot.slane %v6067_v16, 6  ;;  %v13933_v29 = vld [vmem:[#allocation111_spill] sm:$0xff] }
 0x424   : > { %v6051_v26 = vsub.f32 %v6041_v20, %v6047_v36  ;;  %v8288_v45 = vmov 4   ;;  %v6061_v31 = vmul.f32 %v6009_v11, %v13903_v21  ;;  %v10976_v48 = vpack.c.bf16 %v2810_v18, %v2808_v10  ;;  %v7874_v10 = vld [vmem:[%s13409_s11 + $0x34] sm:$0xf0]  ;;  %v13952_v21 = vld [vmem:[#allocation30_spill] sm:$0xff] }
 0x425   : > { %7482 = vmatmul.msk.f32.gmra.mxu3 %vm928_vm2, %v13928_v47  ;;  %v5623_v63 = vshrl.u32 %v5605_v24, %v5621_v62  ;;  %v5626_v7 = vadd.s32 127, %v5625_v2  ;;  %v8017_v47 = vpop.eup %8016  ;;  %v6029_v24 = vadd.f32 %v6027_v57, %v6025_v30  ;;  %8005 = vset.pattern.permute.xlu1 %v8288_v45  ;;  %v5998_v57 = vmul.f32 0.5, %v5997_v40  ;;  %v8189_v18 = vld [vmem:[%s13407_s9 + $0xd8] sm:$0xff] }
 0x426   : > { %v6055_v9 = vrot.slane %v6051_v26, 7  ;;  %6697 = vperm.xlu1 %8005, %v10499_v17   ;;  %8007 = vset.pattern.permute.xlu0 %v8288_v45  ;;  %v6075_v6 = vadd.f32 %v6071_v41, %v6061_v31  ;;  %v10980_v15 = vsub.f32 %v6013_v56, %v6021_v51  ;;  %v13935_v17 = vand.u32 2147483647, %v10584_v32  ;;  %v11010_v56 = vpop.permute.xlu2 %4516 }
 0x427   : > { %v5624_v50 = vor.u32 %v5623_v63, %v5622_v27  ;;  %v5627_v58 = vshll.u32 %v5626_v7, 23  ;;  %v6035_v42 = vmul.f32 %v8017_v47, %v6029_v24  ;;  %v10978_v16 = vpop.permute.xlu1 %4511  ;;  %v5635_v41 = vsub.s32 4, %v10883_v13  ;;  %13938 = vst [vmem:[#allocation111_spill] sm:$0xff] %v11010_v56  ;;  %v13948_v56 = vld [vmem:[#allocation29_spill] sm:$0xff] }
 0x428   : > { %v10955_v33 = vpop.f32.mrf.mxu2  ;;  %v10957_v55 = vpop.f32.mrf.mxu3  ;;  %3293 = vmatmul.bf16.gmra.mxu0 %v10950_v43  ;;  %13934 = vst [vmem:[#allocation25_spill] sm:$0xff] %v10978_v16  ;;  %v6079_v26 = vrot.slane %v6075_v6, 1  ;;  %vm10988_vm8 = vcmp.le.f32.partialorder %v13935_v17, 0.7853982  ;;  %v6087_v47 = vmul.f32 %v10980_v15, %v10980_v15  ;;  %vm5654_vm12 = vweird.f32 %v10584_v32 }
 0x429   : > { %v5628_v36 = vor.u32 4788187, %v5627_v58  ;;  %v5631_v62 = vcvt.s32.f32 %v5624_v50  ;;  %v10982_v11 = vmul.f32 %v6055_v9, %v6035_v42  ;;  %v5999_v9 = vsub.f32 1.5, %v5998_v57  ;;  %v7515_v58 = vld [vmem:[%s13409_s11 + $0x30] sm:$0xf] }
 0x42a   : > { %v10994_v50 = vmul.f32 %v6079_v26, %v6035_v42 }
 0x42b   : > { %v5629_v20 = vand.u32 2147483647, %v5628_v36  ;;  %v6085_v63 = vmul.f32 %v10982_v11, %v10982_v11 }
 0x42c   : > { %v6091_v31 = vmul.f32 %v10994_v50, %v10994_v50 }
 0x42d   : > { %7483 = vmatmul.msk.f32.gmra.mxu3 %vm928_vm2, %v13933_v29  ;;  %v5632_v30 = vmul.f32 %v5631_v62, %v5629_v20  ;;  %v6089_v45 = vadd.f32 %v6087_v47, %v6085_v63  ;;  %v5636_v20 = vsel %vm5513_vm9, %v5635_v41, %v10883_v13  ;;  %v11024_v62 = vor.u32 %v7874_v10, %v7515_v58 }
 0x42e   : > { %v5638_v63 = vsel %vm10988_vm8, 0, %v5636_v20 }
 0x42f   : > { %v5633_v27 = vxor.u32 2147483648, %v5632_v30  ;;  %v6093_v57 = vadd.f32 %v6091_v31, %v6089_v45  ;;  %v11027_v26 = vpop.permute.xlu1 %4596  ;;  %v5964_v7 = vadd.s32 3, %v5638_v63  ;;  %v6005_v45 = vand.u32 2147483648, %v10902_v1  ;;  %v11046_v31 = vpop.permute.xlu2 %4501 }
 0x430   : > { %v10971_v2 = vpop.f32.mrf.mxu2  ;;  %v10973_v28 = vpop.f32.mrf.mxu3  ;;  %13939 = vst [vmem:[#allocation136_spill] sm:$0xff] %v11027_v26 }
 0x431   : > { %v5634_v51 = vsel %vm5513_vm9, %v5633_v27, %v5632_v30  ;;  %v6000_v30 = vmul.f32 %v10940_v3, %v5999_v9  ;;  %v8190_v3 = vld [vmem:[%s13407_s9 + $0xe0] sm:$0xff]  ;;  %13940 = vst [vmem:[#allocation137_spill] sm:$0xff] %v11046_v31  ;;  %v8193_v31 = vld [vmem:[%s13407_s9 + $0xf8] sm:$0xff] }
 0x432   : > { %v5637_v40 = vsel %vm10988_vm8, %v10584_v32, %v5634_v51  ;;  %v11029_v51 = vadd.f32 1e-08, %v6093_v57  ;;  %v8192_v32 = vld [vmem:[%s13407_s9 + $0xf0] sm:$0xff] }
 0x433   : > { %v5639_v36 = vmul.f32 %v5637_v40, %v5637_v40  ;;  %v6001_v41 = vmul.f32 %v6000_v30, %v10902_v1  ;;  %v5655_v30 = vand.u32 3, %v5638_v63  ;;  %v8191_v63 = vld [vmem:[%s13407_s9 + $0xe8] sm:$0xff] }
 0x434   : > { %8018 = vrsqrt.f32 %v11029_v51  ;;  %vm6103_vm5 = vweird.f32 %v11029_v51 }
 0x435   : > { %7484 = vmatmul.msk.f32.gmra.mxu3 %vm928_vm2, %v8189_v18  ;;  %v5640_v42 = vmul.f32 -0.001358992, %v5639_v36  ;;  %v5647_v6 = vmul.f32 -0.00019511016, %v5639_v36  ;;  %vm5656_vm13 = vcmp.lt.s32.totalorder %v5655_v30, 2  ;;  %vm5657_vm14 = vcmp.eq.s32.totalorder %v5655_v30, 0 }
 0x436   : > { %vm5660_vm15 = vcmp.eq.s32.totalorder %v5655_v30, 2 }
 0x437   : > { %v5641_v27 = vadd.f32 0.041655596, %v5640_v42  ;;  %v5648_v17 = vadd.f32 0.008332121, %v5647_v6  ;;  %v6003_v6 = vsel %vm6002_vm10, %v10902_v1, %v6001_v41  ;;  %v11054_v44 = vpop.permute.xlu1 %4581  ;;  %v7876_v1 = vld [vmem:[%s13409_s11 + $0x44] sm:$0xf0]  ;;  %v11079_v5 = vpop.permute.xlu2 %4586 }
 0x438   : > { %v11015_v29 = vpop.f32.mrf.mxu2  ;;  %v11017_v24 = vpop.f32.mrf.mxu3  ;;  %3298 = vmatmul.bf16.gmra.mxu0 %v11024_v62  ;;  %13941 = vst [vmem:[#allocation138_spill] sm:$0xff] %v11054_v44  ;;  %v13943_v44 = vld [vmem:[#allocation72_spill] sm:$0xff] }
 0x439   : > { %v5642_v18 = vmul.f32 %v5641_v27, %v5639_v36  ;;  %v5649_v13 = vmul.f32 %v5648_v17, %v5639_v36  ;;  %v11077_v0 = vadd.f32 %v10955_v33, %v13943_v44  ;;  %13944 = vst [vmem:[#allocation140_spill] sm:$0xff] %v11079_v5  ;;  %v13945_v33 = vld [vmem:[#allocation67_spill] sm:$0xff]  ;;  %v11125_v16 = vadd.f32 %v11015_v29, %v13948_v56  ;;  %v7531_v29 = vld [vmem:[%s13409_s11 + $0x50] sm:$0xf] }
 0x43a   : > { %v11050_v57 = vpop.eup %8018 }
 0x43b   : > { %v5643_v9 = vadd.f32 -0.4999988, %v5642_v18  ;;  %v5650_v58 = vadd.f32 -0.16666654, %v5649_v13  ;;  %v5965_v18 = vand.u32 3, %v5964_v7  ;;  %v6006_v13 = vsel %vm6004_vm11, %v6005_v45, %v6003_v6 }
 0x43c   : > { %vm6104_vm4 = vweird.f32 %v11050_v57 }
 0x43d   : > { %7485 = vmatmul.msk.f32.gmra.mxu3 %vm928_vm2, %v8190_v3  ;;  %v5644_v20 = vmul.f32 %v5643_v9, %v5639_v36  ;;  %v5651_v42 = vmul.f32 %v5650_v58, %v5639_v36  ;;  %v6098_v3 = vmul.f32 %v11050_v57, %v11029_v51  ;;  %v7523_v36 = vld [vmem:[%s13409_s11 + $0x40] sm:$0xf]  ;;  %vm5966_vm0 = vcmp.lt.s32.totalorder %v5965_v18, 2  ;;  %vm6105_vm6 = vmor %vm6103_vm5, %vm6104_vm4 }
 0x43e   : > { %v6032_v9 = vmax.f32 %v6006_v13, 1e-06  ;;  %vm5967_vm1 = vcmp.eq.s32.totalorder %v5965_v18, 0  ;;  %vm5970_vm3 = vcmp.eq.s32.totalorder %v5965_v18, 2 }
 0x43f   : > { %v5645_v27 = vadd.f32 1.0, %v5644_v20  ;;  %v5652_v17 = vadd.f32 1.0, %v5651_v42  ;;  %v11072_v20 = vor.u32 %v7876_v1, %v7523_v36  ;;  %v11089_v1 = vadd.f32 %v10971_v2, %v13945_v33  ;;  %v13954_v33 = vld [vmem:[#allocation62_spill] sm:$0xff] }
 0x440   : > { %v11041_v10 = vpop.f32.mrf.mxu2  ;;  %v11043_v47 = vpop.f32.mrf.mxu3  ;;  %8020 = vrcp.f32 %v6032_v9 }
 0x441   : > { %v5653_v59 = vmul.f32 %v5652_v17, %v5637_v40  ;;  %v5661_v34 = vxor.u32 2147483648, %v5645_v27  ;;  %v6099_v40 = vmul.f32 %v11050_v57, %v6098_v3  ;;  %13942 = vst [vmem:[#allocation139_spill] sm:$0xff] %v11072_v20 }
 0x443   : > { %v5658_v41 = vxor.u32 2147483648, %v5653_v59  ;;  %v6100_v45 = vmul.f32 0.5, %v6099_v40  ;;  %v5662_v6 = vsel %vm5660_vm15, %v5661_v34, %v5653_v59  ;;  %v13946_v40 = vld [vmem:[#allocation18_spill] sm:$0xff] }
 0x444   : > { %v11107_v51 = vrot.slane %v13946_v40, 5 }
 0x445   : > { %7486 = vmatmul.msk.f32.gmra.mxu3 %vm928_vm2, %v8191_v63  ;;  %v5659_v42 = vsel %vm5657_vm14, %v5645_v27, %v5658_v41  ;;  %v5969_v17 = vsel %vm5967_vm1, %v5645_v27, %v5658_v41  ;;  %v5972_v63 = vsel %vm5970_vm3, %v5661_v34, %v5653_v59  ;;  %v6101_v14 = vsub.f32 1.5, %v6100_v45 }
 0x446   : > { %v5663_v26 = vsel %vm5656_vm13, %v5659_v42, %v5662_v6  ;;  %v5973_v3 = vsel %vm5966_vm0, %v5969_v17, %v5972_v63  ;;  %v11092_v41 = vrot.slane %v13946_v40, 4  ;;  %v11102_v6 = vpop.permute.xlu1 %5275  ;;  %v11110_v63 = vrot.slane %v13946_v40, 6 }
 0x447   : > { %v5664_v18 = vsel %vm5654_vm12, nan, %v5663_v26  ;;  %v5974_v36 = vsel %vm5654_vm12, nan, %v5973_v3  ;;  %v6102_v26 = vmul.f32 %v11050_v57, %v6101_v14  ;;  %13947 = vst [vmem:[#allocation141_spill] sm:$0xff] %v11102_v6 }
 0x448   : > { %v11068_v58 = vpop.f32.mrf.mxu2  ;;  %v11070_v7 = vpop.f32.mrf.mxu3  ;;  %v6010_v59 = vrot.slane %v5664_v18, 4  ;;  %v6018_v34 = vrot.slane %v5974_v36, 4  ;;  %v6038_v30 = vrot.slane %v5664_v18, 6  ;;  %v6064_v27 = vrot.slane %v5974_v36, 6  ;;  %3303 = vmatmul.bf16.gmra.mxu0 %v11072_v20 }
 0x449   : > { %v6106_v36 = vsel %vm6105_vm6, %v11050_v57, %v6102_v26  ;;  %v13949_v57 = vld [vmem:[#allocation59_spill] sm:$0xff]  ;;  %v2674_v56 = vadd.f32 %v11068_v58, %v13954_v33 }
 0x44a   : > { %v6014_v9 = vmul.f32 %v10865_v19, %v6010_v59  ;;  %v6022_v45 = vmul.f32 %v6018_v34, %v6006_v13  ;;  %v6026_v42 = vmul.f32 %v6010_v59, %v6006_v13  ;;  %v6028_v2 = vmul.f32 %v10865_v19, %v6018_v34 }
 0x44b   : > { %v6044_v17 = vmul.f32 %v6018_v34, %v13830_v46  ;;  %v6068_v14 = vmul.f32 %v6064_v27, %v13830_v46  ;;  %v6042_v13 = vmul.f32 %v6038_v30, %v13830_v46  ;;  %v6062_v19 = vmul.f32 %v6010_v59, %v13830_v46 }
 0x44c   : > { %v6030_v18 = vadd.f32 %v6028_v2, %v6026_v42  ;;  %v11118_v5 = vmul.f32 %v6106_v36, %v10982_v11  ;;  %v11121_v53 = vmul.f32 %v6106_v36, %v10980_v15  ;;  %v11127_v30 = vsub.f32 %v6014_v9, %v6022_v45 }
 0x44d   : > { %7487 = vmatmul.msk.f32.gmra.mxu3 %vm928_vm2, %v8192_v32  ;;  %v8021_v32 = vpop.eup %8020  ;;  %v6048_v27 = vrot.slane %v6044_v17, 2  ;;  %v6072_v6 = vrot.slane %v6068_v14, 6  ;;  %v11130_v59 = vmul.f32 %v6106_v36, %v10994_v50  ;;  %v11134_v26 = vadd.f32 %v11041_v10, %v13949_v57  ;;  %v11140_v17 = vpop.permute.xlu0 %6432  ;;  %v7878_v50 = vld [vmem:[%s13409_s11 + $0x54] sm:$0xf0] }
 0x44e   : > { %v6141_v11 = vmul.f32 %v11092_v41, %v11118_v5  ;;  %v6147_v15 = vmul.f32 %v11107_v51, %v11121_v53  ;;  %13950 = vst [vmem:[#allocation142_spill] sm:$0xff] %v11140_v17  ;;  %v6036_v10 = vmul.f32 %v8021_v32, %v6030_v18  ;;  %v6427_v45 = vperm.slane %v11118_v5, 4  ;;  %v11151_v14 = vpop.permute.xlu2 %6424 }
 0x44f   : > { %v6052_v42 = vsub.f32 %v6042_v13, %v6048_v27  ;;  %v6076_v2 = vadd.f32 %v6072_v6, %v6062_v19  ;;  %v6445_v9 = vperm.slane %v11130_v59, 4  ;;  %v6435_v6 = vperm.slane %v11121_v53, 4  ;;  %13951 = vst [vmem:[#allocation143_spill] sm:$0xff] %v11151_v14 }
 0x450   : > { %v2676_v3 = vpop.f32.mrf.mxu2  ;;  %v2741_v34 = vpop.f32.mrf.mxu3  ;;  %v6149_v36 = vadd.f32 %v6147_v15, %v6141_v11  ;;  %v6155_v27 = vmul.f32 %v11110_v63, %v11130_v59  ;;  %v6429_v18 = vmul.f32 %v6427_v45, %v11151_v14  ;;  %v11161_v46 = vor.u32 %v7878_v50, %v7531_v29  ;;  %v13955_v29 = vld [vmem:[#allocation54_spill] sm:$0xff] }
 0x451   : > { %v6056_v13 = vrot.slane %v6052_v42, 7  ;;  %v6080_v19 = vrot.slane %v6076_v2, 1  ;;  %v6437_v32 = vmul.f32 %v6435_v6, %v11140_v17  ;;  %v2677_v44 = vadd.f32 %v2676_v3, %v13952_v21  ;;  %v11164_v42 = vpop.permute.xlu1 %6442 }
 0x452   : > { %13953 = vst [vmem:[#allocation30_spill] sm:$0xff] %v11164_v42  ;;  %v6157_v15 = vadd.f32 %v6155_v27, %v6149_v36  ;;  %v2742_v6 = vadd.f32 %v2741_v34, %v13889_v23  ;;  %v13958_v36 = vld [vmem:[#allocation31_spill] sm:$0xff]  ;;  %v2853_v33 = vmax.f32 %v2674_v56, 0.0 }
 0x453   : > { %v11166_v2 = vmul.f32 %v6056_v13, %v6036_v10  ;;  %v11168_v11 = vmul.f32 %v6080_v19, %v6036_v10  ;;  %v6439_v45 = vadd.f32 %v6437_v32, %v6429_v18  ;;  %v6088_v10 = vmul.f32 %v11127_v30, %v11127_v30 }
 0x454   : > { %v11179_v13 = vmax.f32 %v6157_v15, 0.0  ;;  %v2855_v27 = vmax.f32 %v2677_v44, 0.0 }
 0x455   : > { %7488 = vmatmul.msk.f32.gmra.mxu3 %vm928_vm2, %v8193_v31  ;;  %v6447_v31 = vmul.f32 %v6445_v9, %v11164_v42  ;;  %v6086_v3 = vmul.f32 %v11166_v2, %v11166_v2  ;;  %v2739_v9 = vadd.f32 %v11070_v7, %v13958_v36 }
 0x456   : > { %13956 = vst [vmem:[#allocation144_spill] sm:$0xff] %v11179_v13  ;;  %v6161_v18 = vmul.f32 2.0, %v11179_v13 }
 0x457   : > { %v11182_v58 = vadd.f32 %v6447_v31, %v6439_v45  ;;  %v6090_v34 = vadd.f32 %v6088_v10, %v6086_v3  ;;  %v2851_v10 = vmax.f32 %v11134_v26, 0.0 }
 0x458   : > { %v2679_v57 = vpop.f32.mrf.mxu2  ;;  %v2744_v20 = vpop.f32.mrf.mxu3  ;;  %3308 = vmatmul.bf16.gmra.mxu0 %v11161_v46  ;;  %v6163_v7 = vmul.f32 %v6161_v18, %v11118_v5  ;;  %v6167_v44 = vmul.f32 %v6161_v18, %v11121_v53  ;;  %v6171_v45 = vmul.f32 %v6161_v18, %v11130_v59 }
 0x459   : > { %v2680_v50 = vadd.f32 %v2679_v57, %v13955_v29  ;;  %v2745_v19 = vadd.f32 %v2744_v20, %v13893_v37  ;;  %13957 = vst [vmem:[#allocation145_spill] sm:$0xff] %v11182_v58  ;;  %v6092_v57 = vmul.f32 %v11168_v11, %v11168_v11  ;;  %v13959_v29 = vld [vmem:[#allocation58_spill] sm:$0xff]  ;;  %v2824_v37 = vmax.f32 %v2742_v6, 0.0 }
 0x45a   : > { %v2736_v15 = vadd.f32 %v11043_v47, %v13959_v29  ;;  %v11201_v47 = vsub.f32 %v6163_v7, %v11092_v41  ;;  %v11204_v6 = vsub.f32 %v6167_v44, %v11107_v51  ;;  %v11207_v29 = vsub.f32 %v6171_v45, %v11110_v63  ;;  %v13963_v44 = vld [vmem:[#allocation76_spill] sm:$0xff] }
 0x45b   : > { %v2857_v23 = vmax.f32 %v2680_v50, 0.0  ;;  %v2826_v32 = vmax.f32 %v2745_v19, 0.0  ;;  %v6094_v31 = vadd.f32 %v6092_v57, %v6090_v34  ;;  %v13960_v50 = vld [vmem:[#allocation65_spill] sm:$0xff]  ;;  %v2822_v19 = vmax.f32 %v2739_v9, 0.0 }
 0x45c   : > { %v2733_v3 = vadd.f32 %v11017_v24, %v13960_v50  ;;  %v2849_v24 = vmax.f32 %v11125_v16, 0.0  ;;  %v2820_v26 = vmax.f32 %v2736_v15, 0.0  ;;  %v2887_v9 = vpack.c.bf16 %v2853_v33, %v2851_v10  ;;  %v13962_v33 = vld [vmem:[#allocation79_spill] sm:$0xff] }
 0x45d   : > { %v2889_v20 = vpack.c.bf16 %v2857_v23, %v2855_v27  ;;  %v2874_v36 = vpack.c.bf16 %v2826_v32, %v2824_v37  ;;  %v11198_v56 = vadd.f32 1e-08, %v6094_v31  ;;  %v2730_v27 = vadd.f32 %v10973_v28, %v13897_v25  ;;  %v13961_v23 = vld [vmem:[#allocation27_spill] sm:$0xff] }
 0x45e   : > { %v2659_v34 = vadd.f32 %v10926_v22, %v13961_v23  ;;  %v6175_v57 = vmul.f32 %v11201_v47, %v11201_v47  ;;  %v6177_v18 = vmul.f32 %v11204_v6, %v11204_v6  ;;  %v2727_v32 = vadd.f32 %v10957_v55, %v13898_v49 }
 0x45f   : > { %3364 = vmatpush.bf16.msra.mxu1 %v2889_v20  ;;  %3453 = vmatpush.bf16.msrb.mxu2 %v2874_v36  ;;  %8022 = vrsqrt.f32 %v11198_v56  ;;  %v2847_v25 = vmax.f32 %v11089_v1, 0.0  ;;  %v2818_v28 = vmax.f32 %v2733_v3, 0.0  ;;  %v2872_v16 = vpack.c.bf16 %v2822_v19, %v2820_v26  ;;  %v7539_v1 = vld [vmem:[%s13409_s11 + $0x60] sm:$0xf] }
 0x460   : > { %v2656_v15 = vadd.f32 %v10887_v61, %v13962_v33  ;;  %v6179_v22 = vadd.f32 %v6177_v18, %v6175_v57  ;;  %v6181_v37 = vmul.f32 %v11207_v29, %v11207_v29  ;;  %v2724_v20 = vadd.f32 %v10928_v8, %v13900_v60  ;;  %v7880_v61 = vld [vmem:[%s13409_s11 + $0x64] sm:$0xf0]  ;;  %v13964_v8 = vld [vmem:[#allocation28_spill] sm:$0xff] }
 0x461   : > { %v2845_v31 = vmax.f32 %v11077_v0, 0.0  ;;  %v2816_v7 = vmax.f32 %v2730_v27, 0.0  ;;  %v2885_v49 = vpack.c.bf16 %v2849_v24, %v2847_v25  ;;  %v2653_v45 = vadd.f32 %v10849_v54, %v13963_v44  ;;  %v13965_v54 = vld [vmem:[#allocation84_spill] sm:$0xff] }
 0x462   : > { %v6183_v55 = vadd.f32 %v6181_v37, %v6179_v22  ;;  %v2843_v50 = vmax.f32 %v2659_v34, 0.0  ;;  %v2814_v3 = vmax.f32 %v2727_v32, 0.0  ;;  %v2650_v10 = vadd.f32 %v10797_v4, %v13964_v8  ;;  %v13966_v34 = vld [vmem:[#allocation128_spill] sm:$0xff]  ;;  %v13967_v4 = vld [vmem:[#allocation91_spill] sm:$0xff] }
 0x463   : > { %3365 = vmatpush.bf16.msra.mxu1 %v2887_v9  ;;  %3454 = vmatpush.bf16.msrb.mxu2 %v2872_v16  ;;  %v2870_v60 = vpack.c.bf16 %v2818_v28, %v2816_v7  ;;  %v2841_v19 = vmax.f32 %v2656_v15, 0.0  ;;  %v2812_v27 = vmax.f32 %v2724_v20, 0.0  ;;  %v11242_v26 = vor.u32 %v7880_v61, %v7539_v1  ;;  %v13968_v28 = vld [vmem:[#allocation125_spill] sm:$0xff]  ;;  %v11249_v15 = vpop.f32.mrf.mxu3  ;;  %v13970_v7 = vld [vmem:[#allocation71_spill] sm:$0xff]  ;;  %v13972_v1 = vld [vmem:[#allocation122_spill] sm:$0xff] }
 0x464   : > { %v11239_v36 = vadd.f32 1e-08, %v6183_v55  ;;  %v2883_v9 = vpack.c.bf16 %v2845_v31, %v2843_v50  ;;  %v2647_v57 = vadd.f32 %v13966_v34, %v13965_v54  ;;  %v2839_v18 = vmax.f32 %v2653_v45, 0.0  ;;  %v13969_v31 = vld [vmem:[#allocation34_spill] sm:$0xff] }
 0x465   : > { %v8023_v0 = vpop.eup %8022  ;;  %v2868_v25 = vpack.c.bf16 %v2814_v3, %v2812_v27  ;;  %v2644_v16 = vadd.f32 %v13968_v28, %v13967_v4  ;;  %v2837_v22 = vmax.f32 %v2650_v10, 0.0  ;;  %v13971_v55 = vld [vmem:[#allocation22_spill] sm:$0xff]  ;;  %vm6113_vm8 = vweird.f32 %v11198_v56 }
 0x466   : > { %v6108_v24 = vmul.f32 %v8023_v0, %v11198_v56  ;;  %8024 = vrsqrt.f32 %v11239_v36  ;;  %v2881_v20 = vpack.c.bf16 %v2841_v19, %v2839_v18  ;;  %v2641_v61 = vadd.f32 %v13972_v1, %v13971_v55  ;;  %v13975_v18 = vld [vmem:[#allocation19_spill] sm:$0xff] }
 0x467   : > { %3366 = vmatpush.bf16.msra.mxu1 %v2885_v49  ;;  %3455 = vmatpush.bf16.msrb.mxu2 %v2870_v60  ;;  %v2638_v49 = vadd.f32 %v13970_v7, %v13969_v31  ;;  %v2835_v45 = vmax.f32 %v2647_v57, 0.0  ;;  %vm6114_vm7 = vweird.f32 %v8023_v0  ;;  %v2833_v60 = vmax.f32 %v2644_v16, 0.0 }
 0x468   : > { %v6109_v32 = vmul.f32 %v8023_v0, %v6108_v24  ;;  %3313 = vmatmul.bf16.gmra.mxu0 %v11242_v26  ;;  %v13973_v24 = vld [vmem:[#allocation95_spill] sm:$0xff]  ;;  %v11265_v57 = vrot.slane %v13975_v18, 5  ;;  %vm6115_vm9 = vmor %vm6113_vm8, %vm6114_vm7  ;;  %v2831_v28 = vmax.f32 %v2641_v61, 0.0  ;;  %v11268_v56 = vrot.slane %v13975_v18, 6 }
 0x469   : > { %v2879_v19 = vpack.c.bf16 %v2837_v22, %v2835_v45  ;;  %vm6193_vm11 = vweird.f32 %v11239_v36 }
 0x46a   : > { %v6110_v37 = vmul.f32 0.5, %v6109_v32  ;;  %v11262_v32 = vrot.slane %v13975_v18, 4 }
 0x46b   : > { %3367 = vmatpush.bf16.msra.mxu1 %v2883_v9  ;;  %3456 = vmatpush.bf16.msrb.mxu2 %v2868_v25  ;;  %v13974_v9 = vld [vmem:[#allocation52_spill] sm:$0xff]  ;;  %v2829_v25 = vmax.f32 %v2638_v49, 0.0  ;;  %v2877_v49 = vpack.c.bf16 %v2833_v60, %v2831_v28 }
 0x46c   : > { %v6111_v50 = vsub.f32 1.5, %v6110_v37  ;;  %v8025_v3 = vpop.eup %8024  ;;  %v2635_v34 = vadd.f32 %v13974_v9, %v13973_v24 }
 0x46d   : > { %v6188_v10 = vmul.f32 %v8025_v3, %v11239_v36  ;;  %vm6194_vm10 = vweird.f32 %v8025_v3  ;;  %v7882_v36 = vld [vmem:[%s13409_s11 + $0x74] sm:$0xf0] }
 0x46e   : > { %v6112_v27 = vmul.f32 %v8023_v0, %v6111_v50  ;;  %v2827_v1 = vmax.f32 %v2635_v34, 0.0  ;;  %vm6195_vm12 = vmor %vm6193_vm11, %vm6194_vm10 }
 0x46f   : > { %3368 = vmatpush.bf16.msra.mxu1 %v2881_v20  ;;  %3457 = vmatpush.bf16.msrb.mxu2 %v10976_v48  ;;  %v6189_v37 = vmul.f32 %v8025_v3, %v6188_v10 }
 0x470   : > { %v6116_v16 = vsel %vm6115_vm9, %v8023_v0, %v6112_v27  ;;  %v2875_v27 = vpack.c.bf16 %v2829_v25, %v2827_v1  ;;  %v7547_v25 = vld [vmem:[%s13409_s11 + $0x70] sm:$0xf] }
 0x471   : > { %v11271_v48 = vmul.f32 %v6116_v16, %v11166_v2  ;;  %v11274_v22 = vmul.f32 %v6116_v16, %v11127_v30  ;;  %v11277_v20 = vmul.f32 %v6116_v16, %v11168_v11  ;;  %v6190_v7 = vmul.f32 0.5, %v6189_v37  ;;  %v11284_v2 = vpop.f32.mrf.mxu3 }
 0x473   : > { %3369 = vmatpush.bf16.msra.mxu1 %v2879_v19  ;;  %3458 = vmatpush.bf16.msrb.mxu2 %v10912_v35  ;;  %v6142_v0 = vmul.f32 %v11262_v32, %v11271_v48  ;;  %v6148_v61 = vmul.f32 %v11265_v57, %v11274_v22  ;;  %v6191_v45 = vsub.f32 1.5, %v6190_v7  ;;  %v6446_v30 = vperm.slane %v11277_v20, 4 }
 0x474   : > { %v6428_v11 = vperm.slane %v11271_v48, 4  ;;  %v6436_v50 = vperm.slane %v11274_v22, 4  ;;  %v6156_v60 = vmul.f32 %v11268_v56, %v11277_v20 }
 0x475   : > { %v6150_v35 = vadd.f32 %v6148_v61, %v6142_v0  ;;  %v6192_v10 = vmul.f32 %v8025_v3, %v6191_v45  ;;  %v6448_v16 = vmul.f32 %v6446_v30, %v11164_v42  ;;  %v11316_v0 = vor.u32 %v7882_v36, %v7547_v25 }
 0x476   : > { %v6430_v19 = vmul.f32 %v6428_v11, %v11151_v14  ;;  %v6438_v9 = vmul.f32 %v6436_v50, %v11140_v17 }
 0x477   : > { %3370 = vmatpush.bf16.msra.mxu1 %v2877_v49  ;;  %3459 = vmatpush.bf16.msrb.mxu2 %v10859_v12  ;;  %v6158_v34 = vadd.f32 %v6156_v60, %v6150_v35  ;;  %v6196_v28 = vsel %vm6195_vm12, %v8025_v3, %v6192_v10 }
 0x478   : > { %v6440_v37 = vadd.f32 %v6438_v9, %v6430_v19  ;;  %v11306_v12 = vmul.f32 %v6196_v28, %v11207_v29  ;;  %v11309_v49 = vmul.f32 %v6196_v28, %v11201_v47  ;;  %v11312_v3 = vmul.f32 %v6196_v28, %v11204_v6  ;;  %3318 = vmatmul.bf16.gmra.mxu0 %v11316_v0 }
 0x479   : > { %v11303_v7 = vmax.f32 %v6158_v34, 0.0  ;;  %v11336_v50 = vpop.f32.mrf.mxu3 }
 0x47a   : > { %13977 = vst [vmem:[#allocation58_spill] sm:$0xff] %v11306_v12  ;;  %v11314_v1 = vadd.f32 %v6448_v16, %v6440_v37  ;;  %v11322_v45 = vadd.f32 %v11306_v12, %v11110_v63  ;;  %v6227_v29 = vadd.f32 %v11309_v49, %v11092_v41  ;;  %v6229_v47 = vadd.f32 %v11312_v3, %v11107_v51 }
 0x47b   : > { %3371 = vmatpush.bf16.msra.mxu1 %v2875_v27  ;;  %13976 = vst [vmem:[#allocation31_spill] sm:$0xff] %v11303_v7  ;;  %3460 = vmatpush.bf16.msrb.mxu2 %v10868_v39  ;;  %v6162_v61 = vmul.f32 2.0, %v11303_v7  ;;  %v6335_v6 = vmul.f32 %v11309_v49, %v11118_v5  ;;  %v6337_v30 = vmul.f32 %v11312_v3, %v11121_v53 }
 0x47c   : > { %13978 = vst [vmem:[#allocation65_spill] sm:$0xff] %v11309_v49  ;;  %v6341_v41 = vmul.f32 %v11306_v12, %v11130_v59  ;;  %v6233_v51 = vmul.f32 %v6227_v29, %v6227_v29  ;;  %v6235_v5 = vmul.f32 %v6229_v47, %v6229_v47  ;;  %v6239_v10 = vmul.f32 %v11322_v45, %v11322_v45 }
 0x47d   : > { %13979 = vst [vmem:[#allocation27_spill] sm:$0xff] %v11312_v3  ;;  %v6164_v39 = vmul.f32 %v6162_v61, %v11271_v48  ;;  %v6168_v11 = vmul.f32 %v6162_v61, %v11274_v22  ;;  %v6172_v63 = vmul.f32 %v6162_v61, %v11277_v20  ;;  %v6339_v35 = vadd.f32 %v6337_v30, %v6335_v6 }
 0x47e   : > { %13980 = vst [vmem:[#allocation79_spill] sm:$0xff] %v11314_v1  ;;  %3461 = vmatmul.bf16.vlgmr.msrb.gmra.mxu2 %v10821_v38  ;;  %v6237_v19 = vadd.f32 %v6235_v5, %v6233_v51 }
 0x47f   : > { %v6166_v53 = vsub.f32 %v6164_v39, %v11262_v32  ;;  %v6170_v60 = vsub.f32 %v6168_v11, %v11265_v57  ;;  %v6174_v27 = vsub.f32 %v6172_v63, %v11268_v56  ;;  %v11346_v9 = vadd.f32 %v6341_v41, %v6339_v35 }
 0x480   : > { %v6241_v28 = vadd.f32 %v6239_v10, %v6237_v19  ;;  %v7555_v19 = vld [vmem:[%s13409_s11 + $0x80] sm:$0xf] }
 0x481   : > { %13981 = vst [vmem:[#allocation76_spill] sm:$0xff] %v11346_v9  ;;  %v6176_v34 = vmul.f32 %v6166_v53, %v6166_v53  ;;  %v6178_v38 = vmul.f32 %v6170_v60, %v6170_v60  ;;  %v6182_v59 = vmul.f32 %v6174_v27, %v6174_v27  ;;  %v11348_v36 = vpop.f32.mrf.mxu3 }
 0x482   : > { %v6243_v37 = vadd.f32 1e-08, %v6241_v28 }
 0x483   : > { %v6180_v16 = vadd.f32 %v6178_v38, %v6176_v34  ;;  %v7884_v34 = vld [vmem:[%s13409_s11 + $0x84] sm:$0xf0] }
 0x484   : > { %8026 = vrsqrt.f32 %v6243_v37  ;;  %vm6251_vm14 = vweird.f32 %v6243_v37 }
 0x485   : > { %v6184_v25 = vadd.f32 %v6182_v59, %v6180_v16  ;;  %v11363_v59 = vor.u32 %v7884_v34, %v7555_v19 }
 0x487   : > { %v6186_v61 = vadd.f32 1e-08, %v6184_v25  ;;  %v7867_v25 = vld [vmem:[%s13409_s11 + $0x4] sm:$0xf] }
 0x488   : > { %3323 = vmatmul.bf16.gmra.mxu0 %v11363_v59 }
 0x489   : > { %8028 = vrsqrt.f32 %v6186_v61  ;;  %v11350_v39 = vpop.f32.mrf.mxu3  ;;  %vm6203_vm1 = vweird.f32 %v6186_v61 }
 0x48a   : > { %v8027_v6 = vpop.eup %8026 }
 0x48b   : > { %v6246_v30 = vmul.f32 %v8027_v6, %v6243_v37  ;;  %vm6252_vm13 = vweird.f32 %v8027_v6 }
 0x48c   : > { %vm6253_vm0 = vmor %vm6251_vm14, %vm6252_vm13 }
 0x48d   : > { %v6247_v63 = vmul.f32 %v8027_v6, %v6246_v30  ;;  %v7493_v30 = vld [vmem:[%s13409_s11 + $0x8] sm:$0xf0] }
 0x48e   : > { %3466 = vmatmul.bf16.gmra.mxu2 %v10894_v52 }
 0x48f   : > { %v8029_v11 = vpop.eup %8028  ;;  %v6248_v51 = vmul.f32 0.5, %v6247_v63 }
 0x490   : > { %v6198_v41 = vmul.f32 %v8029_v11, %v6186_v61  ;;  %vm6204_vm15 = vweird.f32 %v8029_v11 }
 0x491   : > { %v6249_v35 = vsub.f32 1.5, %v6248_v51  ;;  %v11359_v28 = vpop.f32.mrf.mxu3  ;;  %vm6205_vm3 = vmor %vm6203_vm1, %vm6204_vm15 }
 0x492   : > { %v6199_v5 = vmul.f32 %v8029_v11, %v6198_v41 }
 0x493   : > { %v6250_v38 = vmul.f32 %v8027_v6, %v6249_v35  ;;  %v11374_v35 = vor.u32 %v7867_v25, %v7493_v30 }
 0x494   : > { %v6200_v10 = vmul.f32 0.5, %v6199_v5 }
 0x495   : > { %v11361_v16 = vsel %vm6253_vm0, %v8027_v6, %v6250_v38  ;;  %3372 = vmatmul.bf16.vlgmr.msra.gmra.mxu1 %v11374_v35 }
 0x496   : > { %v6201_v52 = vsub.f32 1.5, %v6200_v10  ;;  %v6265_v37 = vmul.f32 %v11361_v16, %v6227_v29  ;;  %v6267_v41 = vmul.f32 %v11361_v16, %v6229_v47 }
 0x498   : > { %v6202_v63 = vmul.f32 %v8029_v11, %v6201_v52  ;;  %v6273_v51 = vrot.slane %v6265_v37, 4  ;;  %v6281_v5 = vrot.slane %v6267_v41, 3 }
 0x499   : > { %v11391_v38 = vpop.f32.mrf.mxu3 }
 0x49a   : > { %v6206_v6 = vsel %vm6205_vm3, %v8029_v11, %v6202_v63  ;;  %v6285_v61 = vmul.f32 %v6281_v5, %v13946_v40  ;;  %v6277_v11 = vmul.f32 %v6273_v51, %v13946_v40  ;;  %v7869_v51 = vld [vmem:[%s13409_s11 + $0x14] sm:$0xf]  ;;  %v7501_v5 = vld [vmem:[%s13409_s11 + $0x18] sm:$0xf0] }
 0x49b   : > { %v11376_v10 = vmul.f32 %v6206_v6, %v6174_v27  ;;  %v11378_v19 = vmul.f32 %v6206_v6, %v6166_v53  ;;  %v11380_v34 = vmul.f32 %v6206_v6, %v6170_v60 }
 0x49c   : > { %v6289_v60 = vrot.slane %v6285_v61, 1 }
 0x49d   : > { %13982 = vst [vmem:[#allocation28_spill] sm:$0xff] %v11376_v10  ;;  %v11386_v29 = vadd.f32 %v11376_v10, %v11268_v56  ;;  %v6228_v47 = vadd.f32 %v11378_v19, %v11262_v32  ;;  %v6230_v53 = vadd.f32 %v11380_v34, %v11265_v57  ;;  %v6336_v27 = vmul.f32 %v11378_v19, %v11271_v48 }
 0x49e   : > { %13983 = vst [vmem:[#allocation84_spill] sm:$0xff] %v11378_v19  ;;  %3471 = vmatmul.bf16.gmra.mxu2 %v10950_v43  ;;  %v6338_v56 = vmul.f32 %v11380_v34, %v11274_v22  ;;  %v6342_v32 = vmul.f32 %v11376_v10, %v11277_v20  ;;  %v11402_v30 = vadd.f32 %v6289_v60, %v6277_v11  ;;  %v7563_v22 = vld [vmem:[%s13409_s11 + $0x90] sm:$0xf]  ;;  %v7886_v20 = vld [vmem:[%s13409_s11 + $0x94] sm:$0xf0] }
 0x49f   : > { %13984 = vst [vmem:[#allocation128_spill] sm:$0xff] %v11380_v34  ;;  %v6234_v52 = vmul.f32 %v6228_v47, %v6228_v47  ;;  %v6236_v25 = vmul.f32 %v6230_v53, %v6230_v53  ;;  %v6240_v43 = vmul.f32 %v11386_v29, %v11386_v29 }
 0x4a0   : > { %v6340_v63 = vadd.f32 %v6338_v56, %v6336_v27  ;;  %v11425_v27 = vor.u32 %v7886_v20, %v7563_v22  ;;  %v11427_v56 = vor.u32 %v7869_v51, %v7501_v5  ;;  %v7571_v22 = vld [vmem:[%s13409_s11 + $0xa0] sm:$0xf]  ;;  %v7888_v20 = vld [vmem:[%s13409_s11 + $0xa4] sm:$0xf0]  ;;  %v7871_v51 = vld [vmem:[%s13409_s11 + $0x24] sm:$0xf] }
 0x4a1   : > { %v6238_v37 = vadd.f32 %v6236_v25, %v6234_v52  ;;  %v11408_v6 = vpop.f32.mrf.mxu3 }
 0x4a2   : > { %v11406_v57 = vadd.f32 %v6342_v32, %v6340_v63  ;;  %3328 = vmatmul.bf16.gmra.mxu0 %v11425_v27 }
 0x4a3   : > { %v6242_v41 = vadd.f32 %v6240_v43, %v6238_v37 }
 0x4a4   : > { %13985 = vst [vmem:[#allocation91_spill] sm:$0xff] %v11406_v57 }
 0x4a5   : > { %v6244_v48 = vadd.f32 1e-08, %v6242_v41  ;;  %3377 = vmatmul.bf16.gmra.mxu1 %v11427_v56 }
 0x4a7   : > { %8030 = vrsqrt.f32 %v6244_v48  ;;  %vm6261_vm5 = vweird.f32 %v6244_v48 }
 0x4a9   : > { %v11422_v61 = vpop.f32.mrf.mxu3 }
 0x4ad   : > { %v8031_v11 = vpop.eup %8030 }
 0x4ae   : > { %3476 = vmatmul.bf16.gmra.mxu2 %v11024_v62  ;;  %v6256_v60 = vmul.f32 %v8031_v11, %v6244_v48  ;;  %vm6262_vm4 = vweird.f32 %v8031_v11  ;;  %v7509_v48 = vld [vmem:[%s13409_s11 + $0x28] sm:$0xf0] }
 0x4af   : > { %vm6263_vm6 = vmor %vm6261_vm5, %vm6262_vm4 }
 0x4b0   : > { %v6257_v52 = vmul.f32 %v8031_v11, %v6256_v60  ;;  %v13986_v60 = vld [vmem:[#allocation139_spill] sm:$0xff] }
 0x4b1   : > { %v11431_v63 = vpop.f32.mrf.mxu3 }
 0x4b2   : > { %v6258_v32 = vmul.f32 0.5, %v6257_v52 }
 0x4b4   : > { %v6259_v25 = vsub.f32 1.5, %v6258_v32  ;;  %v11453_v32 = vor.u32 %v7871_v51, %v7509_v48  ;;  %v7873_v51 = vld [vmem:[%s13409_s11 + $0x34] sm:$0xf]  ;;  %v7517_v48 = vld [vmem:[%s13409_s11 + $0x38] sm:$0xf0] }
 0x4b6   : > { %v6260_v43 = vmul.f32 %v8031_v11, %v6259_v25  ;;  %3382 = vmatmul.bf16.gmra.mxu1 %v11453_v32 }
 0x4b8   : > { %v11433_v62 = vsel %vm6263_vm6, %v8031_v11, %v6260_v43  ;;  %v11449_v11 = vor.u32 %v7888_v20, %v7571_v22  ;;  %v7890_v22 = vld [vmem:[%s13409_s11 + $0xb4] sm:$0xf0]  ;;  %v11466_v20 = vpop.f32.mrf.mxu0 }
 0x4b9   : > { %v6266_v37 = vmul.f32 %v11433_v62, %v6228_v47  ;;  %v6268_v41 = vmul.f32 %v11433_v62, %v6230_v53  ;;  %v2777_v53 = vpop.f32.mrf.mxu3 }
 0x4ba   : > { %3333 = vmatmul.bf16.gmra.mxu0 %v11449_v11 }
 0x4bb   : > { %v6274_v5 = vrot.slane %v6266_v37, 4  ;;  %v6282_v47 = vrot.slane %v6268_v41, 3  ;;  %v7579_v41 = vld [vmem:[%s13409_s11 + $0xb0] sm:$0xf] }
 0x4bd   : > { %v6286_v52 = vmul.f32 %v6282_v47, %v13975_v18  ;;  %v6278_v25 = vmul.f32 %v6274_v5, %v13975_v18  ;;  %v11474_v5 = vor.u32 %v7890_v22, %v7579_v41  ;;  %v7892_v41 = vld [vmem:[%s13409_s11 + $0xc4] sm:$0xf0]  ;;  %v7525_v22 = vld [vmem:[%s13409_s11 + $0x48] sm:$0xf0] }
 0x4be   : > { %3481 = vmatmul.bf16.gmra.mxu2 %v13986_v60  ;;  %v11477_v60 = vor.u32 %v7873_v51, %v7517_v48  ;;  %v6269_v51 = vmul.f32 %v11361_v16, %v11322_v45 }
 0x4bf   : > { %v6290_v43 = vrot.slane %v6286_v52, 1 }
 0x4c0   : > { %v11481_v52 = vpop.f32.mrf.mxu0  ;;  %v6297_v19 = vrot.slane %v6269_v51, 2 }
 0x4c1   : > { %v11457_v10 = vadd.f32 %v6290_v43, %v6278_v25  ;;  %v2780_v37 = vpop.f32.mrf.mxu3  ;;  %v7587_v43 = vld [vmem:[%s13409_s11 + $0xc0] sm:$0xf] }
 0x4c2   : > { %v11497_v48 = vor.u32 %v7892_v41, %v7587_v43  ;;  %v6301_v1 = vmul.f32 %v6297_v19, %v13946_v40  ;;  %v13988_v43 = vld [vmem:[#allocation62_spill] sm:$0xff]  ;;  %v13991_v40 = vld [vmem:[#allocation29_spill] sm:$0xff] }
 0x4c3   : > { %v13989_v41 = vld [vmem:[#allocation54_spill] sm:$0xff]  ;;  %v2781_v14 = vadd.f32 %v2780_v37, %v13991_v40 }
 0x4c4   : > { %v6305_v58 = vrot.slane %v6301_v1, 2 }
 0x4c6   : > { %3387 = vmatmul.bf16.gmra.mxu1 %v11477_v60  ;;  %v11509_v16 = vadd.f32 %v6305_v58, %v11402_v30  ;;  %v7894_v58 = vld [vmem:[%s13409_s11 + $0xd4] sm:$0xf0]  ;;  %v13992_v30 = vld [vmem:[#allocation67_spill] sm:$0xff] }
 0x4c7   : > { %v2778_v40 = vadd.f32 %v2777_v53, %v13992_v30  ;;  %v2769_v53 = vadd.f32 %v11408_v6, %v13962_v33  ;;  %v6270_v6 = vmul.f32 %v11433_v62, %v11386_v29 }
 0x4c8   : > { %v11502_v7 = vpop.f32.mrf.mxu0  ;;  %13987 = vst [vmem:[#allocation125_spill] sm:$0xff] %v11509_v16 }
 0x4c9   : > { %v2783_v47 = vpop.f32.mrf.mxu3 }
 0x4ca   : > { %3338 = vmatmul.bf16.gmra.mxu0 %v11474_v5 }
 0x4ce   : > { %3486 = vmatmul.bf16.gmra.mxu2 %v11161_v46  ;;  %v7875_v46 = vld [vmem:[%s13409_s11 + $0x44] sm:$0xf] }
 0x4cf   : > { %v11500_v57 = vor.u32 %v7875_v46, %v7525_v22  ;;  %v13990_v22 = vld [vmem:[#allocation59_spill] sm:$0xff] }
 0x4d0   : > { %v2784_v51 = vadd.f32 %v2783_v47, %v13990_v22  ;;  %v11514_v19 = vpop.f32.mrf.mxu0 }
 0x4d1   : > { %v2786_v25 = vpop.f32.mrf.mxu3 }
 0x4d2   : > { %v2852_v37 = vmax.f32 %v2784_v51, 0.0  ;;  %v2760_v51 = vadd.f32 %v11350_v39, %v13965_v54  ;;  %v7879_v54 = vld [vmem:[%s13409_s11 + $0x64] sm:$0xf]  ;;  %v7541_v39 = vld [vmem:[%s13409_s11 + $0x68] sm:$0xf0] }
 0x4d3   : > { %v11577_v30 = vor.u32 %v7879_v54, %v7541_v39 }
 0x4d6   : > { %3392 = vmatmul.bf16.gmra.mxu1 %v11500_v57 }
 0x4d8   : > { %v11543_v22 = vpop.f32.mrf.mxu0 }
 0x4d9   : > { %v2789_v34 = vpop.f32.mrf.mxu3 }
 0x4da   : > { %3343 = vmatmul.bf16.gmra.mxu0 %v11497_v48  ;;  %v2790_v42 = vadd.f32 %v2789_v34, %v13952_v21  ;;  %v7595_v21 = vld [vmem:[%s13409_s11 + $0xd0] sm:$0xf]  ;;  %v7877_v34 = vld [vmem:[%s13409_s11 + $0x54] sm:$0xf] }
 0x4db   : > { %v11530_v47 = vor.u32 %v7894_v58, %v7595_v21  ;;  %v2757_v21 = vadd.f32 %v11348_v36, %v13967_v4  ;;  %v2754_v4 = vadd.f32 %v11336_v50, %v13971_v55  ;;  %v2836_v36 = vmax.f32 %v2760_v51, 0.0  ;;  %v7565_v51 = vld [vmem:[%s13409_s11 + $0x98] sm:$0xf0] }
 0x4dc   : > { %v2856_v12 = vmax.f32 %v2790_v42, 0.0  ;;  %v7533_v42 = vld [vmem:[%s13409_s11 + $0x58] sm:$0xf0]  ;;  %v2748_v55 = vadd.f32 %v11249_v15, %v13973_v24  ;;  %v7611_v15 = vld [vmem:[%s13409_s11 + $0xf0] sm:$0xf] }
 0x4dd   : > { %v2832_v50 = vmax.f32 %v2754_v4, 0.0  ;;  %v7898_v24 = vld [vmem:[%s13409_s11 + $0xf4] sm:$0xf0] }
 0x4de   : > { %3491 = vmatmul.bf16.gmra.mxu2 %v11242_v26  ;;  %v2787_v26 = vadd.f32 %v2786_v25, %v13988_v43  ;;  %v13993_v25 = vld [vmem:[#allocation72_spill] sm:$0xff] }
 0x4e0   : > { %v2854_v3 = vmax.f32 %v2787_v26, 0.0  ;;  %v2772_v26 = vadd.f32 %v11422_v61, %v13961_v23  ;;  %v2763_v23 = vadd.f32 %v11359_v28, %v13964_v8  ;;  %v2842_v61 = vmax.f32 %v2769_v53, 0.0  ;;  %v7896_v8 = vld [vmem:[%s13409_s11 + $0xe4] sm:$0xf0]  ;;  %v11570_v62 = vpop.f32.mrf.mxu0 }
 0x4e1   : > { %v2792_v45 = vpop.f32.mrf.mxu3 }
 0x4e2   : > { %v2793_v46 = vadd.f32 %v2792_v45, %v13989_v41  ;;  %v2775_v45 = vadd.f32 %v11431_v63, %v13993_v25  ;;  %v2888_v43 = vpack.c.bf16 %v2854_v3, %v2852_v37  ;;  %v2848_v41 = vmax.f32 %v2778_v40, 0.0 }
 0x4e3   : > { %v2844_v3 = vmax.f32 %v2772_v26, 0.0  ;;  %v2838_v58 = vmax.f32 %v2763_v23, 0.0  ;;  %v11601_v26 = vor.u32 %v7898_v24, %v7611_v15  ;;  %v7581_v24 = vld [vmem:[%s13409_s11 + $0xb8] sm:$0xf0] }
 0x4e4   : > { %v2858_v17 = vmax.f32 %v2793_v46, 0.0  ;;  %v2846_v46 = vmax.f32 %v2775_v45, 0.0 }
 0x4e5   : > { %v2880_v40 = vpack.c.bf16 %v2838_v58, %v2836_v36  ;;  %v7573_v36 = vld [vmem:[%s13409_s11 + $0xa8] sm:$0xf0] }
 0x4e6   : > { %v2890_v1 = vpack.c.bf16 %v2858_v17, %v2856_v12  ;;  %v2850_v17 = vmax.f32 %v2781_v14, 0.0  ;;  %v11535_v12 = vor.u32 %v7877_v34, %v7533_v42  ;;  %v2766_v14 = vadd.f32 %v11391_v38, %v13963_v44  ;;  %v7603_v44 = vld [vmem:[%s13409_s11 + $0xe0] sm:$0xf] }
 0x4e7   : > { %v2884_v63 = vpack.c.bf16 %v2846_v46, %v2844_v3  ;;  %v6298_v38 = vrot.slane %v6270_v6, 2  ;;  %v2751_v34 = vadd.f32 %v11284_v2, %v13969_v31  ;;  %v2834_v42 = vmax.f32 %v2757_v21, 0.0  ;;  %v13995_v46 = vld [vmem:[#allocation55_spill] sm:$0xff]  ;;  %v13997_v6 = vld [vmem:[#allocation64_spill] sm:$0xff] }
 0x4e8   : > { %3542 = vmatpush.bf16.msrb.mxu3 %v2890_v1  ;;  %3397 = vmatmul.bf16.gmra.mxu1 %v11535_v12  ;;  %v2840_v33 = vmax.f32 %v2766_v14, 0.0  ;;  %v11572_v1 = vor.u32 %v7896_v8, %v7603_v44  ;;  %v2828_v31 = vmax.f32 %v2748_v55, 0.0  ;;  %v3290_v21 = vadd.f32 %v11502_v7, %v13997_v6  ;;  %v7887_v7 = vld [vmem:[%s13409_s11 + $0xa4] sm:$0xf] }
 0x4e9   : > { %v6302_v29 = vmul.f32 %v6298_v38, %v13975_v18  ;;  %v2830_v25 = vmax.f32 %v2751_v34, 0.0  ;;  %v2878_v45 = vpack.c.bf16 %v2834_v42, %v2832_v50  ;;  %v13999_v42 = vld [vmem:[#allocation99_spill] sm:$0xff]  ;;  %v11660_v55 = vor.u32 %v7887_v7, %v7573_v36 }
 0x4ea   : > { %3348 = vmatmul.bf16.gmra.mxu0 %v11530_v47  ;;  %v2882_v28 = vpack.c.bf16 %v2842_v61, %v2840_v33 }
 0x4eb   : > { %v6306_v37 = vrot.slane %v6302_v29, 2  ;;  %v2876_v2 = vpack.c.bf16 %v2830_v25, %v2828_v31  ;;  %v13998_v29 = vld [vmem:[#allocation51_spill] sm:$0xff] }
 0x4ec   : > { %3543 = vmatpush.bf16.msrb.mxu3 %v2888_v43  ;;  %v7881_v43 = vld [vmem:[%s13409_s11 + $0x74] sm:$0xf]  ;;  %v3292_v34 = vadd.f32 %v11514_v19, %v13998_v29 }
 0x4ee   : > { %3496 = vmatmul.bf16.gmra.mxu2 %v11316_v0  ;;  %v2886_v0 = vpack.c.bf16 %v2850_v17, %v2848_v41  ;;  %v11586_v17 = vpop.f32.mrf.mxu0 }
 0x4f0   : > { %3544 = vmatpush.bf16.msrb.mxu3 %v2886_v0  ;;  %v3285_v0 = vadd.f32 %v11466_v20, %v13995_v46 }
 0x4f4   : > { %3545 = vmatpush.bf16.msrb.mxu3 %v2884_v63  ;;  %v7885_v63 = vld [vmem:[%s13409_s11 + $0x94] sm:$0xf] }
 0x4f5   : > { %v11637_v58 = vor.u32 %v7885_v63, %v7565_v51 }
 0x4f6   : > { %v11606_v53 = vpop.f32.mrf.mxu0 }
 0x4f8   : > { %3546 = vmatpush.bf16.msrb.mxu3 %v2882_v28  ;;  %3402 = vmatmul.bf16.gmra.mxu1 %v11577_v30 }
 0x4fa   : > { %3353 = vmatmul.bf16.gmra.mxu0 %v11572_v1 }
 0x4fc   : > { %3547 = vmatpush.bf16.msrb.mxu3 %v2880_v40  ;;  %v3295_v40 = vadd.f32 %v11543_v22, %v13999_v42  ;;  %v7889_v22 = vld [vmem:[%s13409_s11 + $0xb4] sm:$0xf] }
 0x4fe   : > { %3501 = vmatmul.bf16.gmra.mxu2 %v11363_v59  ;;  %v11584_v59 = vadd.f32 %v6306_v37, %v11457_v10  ;;  %v7549_v10 = vld [vmem:[%s13409_s11 + $0x78] sm:$0xf0] }
 0x4ff   : > { %v11604_v41 = vor.u32 %v7881_v43, %v7549_v10  ;;  %v14000_v43 = vld [vmem:[#allocation63_spill] sm:$0xff] }
 0x500   : > { %13994 = vst [vmem:[#allocation34_spill] sm:$0xff] %v11584_v59  ;;  %3548 = vmatpush.bf16.msrb.mxu3 %v2878_v45  ;;  %v3297_v10 = vadd.f32 %v11570_v62, %v14000_v43  ;;  %v7891_v62 = vld [vmem:[%s13409_s11 + $0xc4] sm:$0xf]  ;;  %v14010_v59 = vld [vmem:[#allocation24_spill] sm:$0xff] }
 0x501   : > { %v11623_v20 = vpop.f32.mrf.mxu2 }
 0x504   : > { %3549 = vmatpush.bf16.msrb.mxu3 %v2876_v2 }
 0x507   : > { %3550 = vmatmul.bf16.vlgmr.msrb.gmra.mxu3 %v11374_v35  ;;  %v7883_v35 = vld [vmem:[%s13409_s11 + $0x84] sm:$0xf] }
 0x508   : > { %3407 = vmatmul.bf16.gmra.mxu1 %v11604_v41 }
 0x509   : > { %v11639_v38 = vpop.f32.mrf.mxu2 }
 0x50a   : > { %3358 = vmatmul.bf16.gmra.mxu0 %v11601_v26 }
 0x50e   : > { %3506 = vmatmul.bf16.gmra.mxu2 %v11425_v27  ;;  %v7557_v27 = vld [vmem:[%s13409_s11 + $0x88] sm:$0xf0] }
 0x50f   : > { %v11620_v23 = vor.u32 %v7883_v35, %v7557_v27 }
 0x512   : > { %v3373_v14 = vpop.f32.mrf.mxu1 }
 0x513   : > { %v3374_v3 = vadd.f32 %v3373_v14, %v3285_v0  ;;  %v14001_v0 = vld [vmem:[#allocation98_spill] sm:$0xff] }
 0x514   : > { %v3300_v14 = vadd.f32 %v11586_v17, %v14001_v0  ;;  %v7589_v17 = vld [vmem:[%s13409_s11 + $0xc8] sm:$0xf0] }
 0x517   : > { %3555 = vmatmul.bf16.gmra.mxu3 %v11427_v56  ;;  %v3304_v56 = vpop.f32.mrf.mxu0 }
 0x518   : > { %3412 = vmatmul.bf16.gmra.mxu1 %v11620_v23 }
 0x51a   : > { %v3375_v61 = vpop.f32.mrf.mxu1 }
 0x51e   : > { %3511 = vmatmul.bf16.gmra.mxu2 %v11449_v11  ;;  %v13996_v11 = vld [vmem:[#allocation61_spill] sm:$0xff] }
 0x51f   : > { %v3287_v33 = vadd.f32 %v11481_v52, %v13996_v11  ;;  %v11642_v39 = vpop.f32.mrf.mxu0  ;;  %v11646_v52 = vpop.f32.mrf.mxu2 }
 0x521   : > { %v3376_v8 = vadd.f32 %v3375_v61, %v3287_v33 }
 0x522   : > { %v3378_v44 = vpop.f32.mrf.mxu1 }
 0x523   : > { %v3379_v28 = vadd.f32 %v3378_v44, %v3290_v21  ;;  %v3633_v54 = vmax.f32 %v3376_v8, 0.0  ;;  %v14002_v8 = vld [vmem:[#allocation45_spill] sm:$0xff] }
 0x527   : > { %3560 = vmatmul.bf16.gmra.mxu3 %v11453_v32  ;;  %v3631_v32 = vmax.f32 %v3374_v3, 0.0  ;;  %v11662_v45 = vpop.f32.mrf.mxu0  ;;  %v11665_v2 = vpop.f32.mrf.mxu2  ;;  %v11683_v3 = vor.u32 %v7889_v22, %v7581_v24 }
 0x528   : > { %3417 = vmatmul.bf16.gmra.mxu1 %v11637_v58 }
 0x529   : > { %v11644_v4 = vpack.c.bf16 %v3633_v54, %v3631_v32  ;;  %v14003_v54 = vld [vmem:[#allocation41_spill] sm:$0xff] }
 0x52a   : > { %v3305_v32 = vadd.f32 %v3304_v56, %v14003_v54  ;;  %v7597_v56 = vld [vmem:[%s13409_s11 + $0xd8] sm:$0xf0] }
 0x52e   : > { %3516 = vmatmul.bf16.gmra.mxu2 %v11474_v5  ;;  %v3380_v5 = vpop.f32.mrf.mxu1 }
 0x52f   : > { %v3381_v37 = vadd.f32 %v3380_v5, %v3292_v34  ;;  %v11669_v19 = vpop.f32.mrf.mxu0  ;;  %v11685_v35 = vpop.f32.mrf.mxu2  ;;  %v11703_v5 = vor.u32 %v7891_v62, %v7589_v17 }
 0x530   : > { %v3312_v49 = vadd.f32 %v11669_v19, %v14010_v59 }
 0x531   : > { %v3637_v31 = vmax.f32 %v3381_v37, 0.0 }
 0x536   : > { %v3383_v50 = vpop.f32.mrf.mxu1 }
 0x537   : > { %3565 = vmatmul.bf16.gmra.mxu3 %v11477_v60  ;;  %v3384_v25 = vadd.f32 %v3383_v50, %v3295_v40  ;;  %v3635_v60 = vmax.f32 %v3379_v28, 0.0  ;;  %v3314_v33 = vpop.f32.mrf.mxu0  ;;  %v11690_v44 = vpop.f32.mrf.mxu2  ;;  %v3302_v28 = vadd.f32 %v11606_v53, %v14002_v8  ;;  %v7893_v53 = vld [vmem:[%s13409_s11 + $0xd4] sm:$0xf] }
 0x538   : > { %3422 = vmatmul.bf16.gmra.mxu1 %v11660_v55 }
 0x539   : > { %v11667_v15 = vpack.c.bf16 %v3637_v31, %v3635_v60 }
 0x53e   : > { %3521 = vmatmul.bf16.gmra.mxu2 %v11497_v48  ;;  %v3385_v48 = vpop.f32.mrf.mxu1 }
 0x53f   : > { %v3386_v61 = vadd.f32 %v3385_v48, %v3297_v10  ;;  %v3316_v7 = vpop.f32.mrf.mxu0  ;;  %v11708_v50 = vpop.f32.mrf.mxu2  ;;  %v11722_v48 = vor.u32 %v7893_v53, %v7597_v56  ;;  %v14007_v53 = vld [vmem:[#allocation39_spill] sm:$0xff]  ;;  %v14008_v56 = vld [vmem:[#allocation37_spill] sm:$0xff] }
 0x541   : > { %v3641_v51 = vmax.f32 %v3386_v61, 0.0 }
 0x546   : > { %v3388_v27 = vpop.f32.mrf.mxu1 }
 0x547   : > { %3570 = vmatmul.bf16.gmra.mxu3 %v11500_v57  ;;  %v3389_v63 = vadd.f32 %v3388_v27, %v3300_v14  ;;  %v3639_v57 = vmax.f32 %v3384_v25, 0.0  ;;  %v3319_v31 = vpop.f32.mrf.mxu0  ;;  %v11719_v60 = vpop.f32.mrf.mxu2  ;;  %v7895_v14 = vld [vmem:[%s13409_s11 + $0xe4] sm:$0xf]  ;;  %v7605_v27 = vld [vmem:[%s13409_s11 + $0xe8] sm:$0xf0] }
 0x548   : > { %3427 = vmatmul.bf16.gmra.mxu1 %v11683_v3 }
 0x54e   : > { %3526 = vmatmul.bf16.gmra.mxu2 %v11530_v47  ;;  %v3390_v21 = vpop.f32.mrf.mxu1  ;;  %v11688_v47 = vpack.c.bf16 %v3641_v51, %v3639_v57  ;;  %v7897_v57 = vld [vmem:[%s13409_s11 + $0xf4] sm:$0xf] }
 0x54f   : > { %v3391_v34 = vadd.f32 %v3390_v21, %v3302_v28  ;;  %v3321_v24 = vpop.f32.mrf.mxu0  ;;  %v7613_v21 = vld [vmem:[%s13409_s11 + $0xf8] sm:$0xf0] }
 0x550   : > { %v11748_v62 = vor.u32 %v7897_v57, %v7613_v21  ;;  %v14009_v21 = vld [vmem:[#allocation33_spill] sm:$0xff] }
 0x551   : > { %v3645_v37 = vmax.f32 %v3391_v34, 0.0  ;;  %v14006_v34 = vld [vmem:[#allocation23_spill] sm:$0xff] }
 0x556   : > { %v3393_v36 = vpop.f32.mrf.mxu1 }
 0x557   : > { %3575 = vmatmul.bf16.gmra.mxu3 %v11535_v12  ;;  %v11705_v40 = vadd.f32 %v3393_v36, %v3305_v32  ;;  %v3643_v12 = vmax.f32 %v3389_v63, 0.0 }
 0x558   : > { %3432 = vmatmul.bf16.gmra.mxu1 %v11703_v5 }
 0x55e   : > { %3531 = vmatmul.bf16.gmra.mxu2 %v11572_v1  ;;  %v3395_v25 = vpop.f32.mrf.mxu1  ;;  %v11710_v1 = vpack.c.bf16 %v3645_v37, %v3643_v12  ;;  %v3320_v37 = vadd.f32 %v3319_v31, %v14006_v34  ;;  %v3465_v12 = vadd.f32 %v11639_v38, %v13996_v11  ;;  %v14011_v38 = vld [vmem:[#allocation35_spill] sm:$0xff] }
 0x566   : > { %v3398_v22 = vpop.f32.mrf.mxu1 }
 0x567   : > { %3580 = vmatmul.bf16.gmra.mxu3 %v11577_v30  ;;  %v11732_v30 = vpop.f32.mrf.mxu0 }
 0x568   : > { %3437 = vmatmul.bf16.gmra.mxu1 %v11722_v48  ;;  %14004 = vst [vmem:[#allocation71_spill] sm:$0xff] %v11732_v30 }
 0x56e   : > { %3536 = vmatmul.bf16.gmra.mxu2 %v11601_v26  ;;  %v3400_v10 = vpop.f32.mrf.mxu1  ;;  %v11734_v26 = vor.u32 %v7895_v14, %v7605_v27  ;;  %v3322_v14 = vadd.f32 %v3321_v24, %v14008_v56  ;;  %v11770_v24 = vpop.f32.mrf.mxu2 }
 0x56f   : > { %v11737_v63 = vpop.f32.mrf.mxu0 }
 0x570   : > { %14005 = vst [vmem:[#allocation22_spill] sm:$0xff] %v11737_v63 }
 0x576   : > { %v3403_v61 = vpop.f32.mrf.mxu1 }
 0x577   : > { %3585 = vmatmul.bf16.gmra.mxu3 %v11604_v41  ;;  %v3463_v41 = vadd.f32 %v11623_v20, %v13995_v46  ;;  %v11752_v36 = vpop.f32.mrf.mxu0 }
 0x578   : > { %3442 = vmatmul.bf16.gmra.mxu1 %v11734_v26 }
 0x57e   : > { %v3405_v51 = vpop.f32.mrf.mxu1 }
 0x57f   : > { %v11765_v11 = vpop.f32.mrf.mxu0 }
 0x586   : > { %v3408_v28 = vpop.f32.mrf.mxu1 }
 0x587   : > { %3590 = vmatmul.bf16.gmra.mxu3 %v11620_v23  ;;  %v3317_v23 = vadd.f32 %v3316_v7, %v14007_v53  ;;  %v3409_v46 = vadd.f32 %v3408_v28, %v3320_v37  ;;  %v3310_v7 = vadd.f32 %v11662_v45, %v14011_v38  ;;  %v3401_v28 = vadd.f32 %v3400_v10, %v3312_v49 }
 0x588   : > { %3447 = vmatmul.bf16.gmra.mxu1 %v11748_v62 }
 0x589   : > { %v3659_v9 = vmax.f32 %v3409_v46, 0.0  ;;  %v3653_v45 = vmax.f32 %v3401_v28, 0.0  ;;  %v3475_v28 = vadd.f32 %v11690_v44, %v14000_v43  ;;  %v3478_v43 = vadd.f32 %v11708_v50, %v14001_v0 }
 0x58a   : > { %v3551_v17 = vpop.f32.mrf.mxu3 }
 0x58b   : > { %v11750_v32 = vadd.f32 %v3551_v17, %v3463_v41  ;;  %v3315_v41 = vadd.f32 %v3314_v33, %v14009_v21  ;;  %v3406_v17 = vadd.f32 %v3405_v51, %v3317_v23  ;;  %v3468_v51 = vadd.f32 %v11646_v52, %v13997_v6  ;;  %v11780_v6 = vpop.f32.mrf.mxu0  ;;  %v11783_v52 = vpop.f32.mrf.mxu2 }
 0x58d   : > { %v3404_v31 = vadd.f32 %v3403_v61, %v3315_v41  ;;  %v3657_v37 = vmax.f32 %v3406_v17, 0.0  ;;  %v3399_v61 = vadd.f32 %v3398_v22, %v3310_v7  ;;  %v3473_v17 = vadd.f32 %v11685_v35, %v13999_v42 }
 0x58e   : > { %v3410_v27 = vpop.f32.mrf.mxu1 }
 0x58f   : > { %v3411_v18 = vadd.f32 %v3410_v27, %v3322_v14  ;;  %v3651_v27 = vmax.f32 %v3399_v61, 0.0 }
 0x591   : > { %v3661_v13 = vmax.f32 %v3411_v18, 0.0  ;;  %v3655_v18 = vmax.f32 %v3404_v31, 0.0 }
 0x592   : > { %v3553_v20 = vpop.f32.mrf.mxu3 }
 0x593   : > { %v11760_v57 = vadd.f32 %v3553_v20, %v3465_v12  ;;  %v3709_v33 = vpack.c.bf16 %v3661_v13, %v3659_v9  ;;  %v14012_v12 = vld [vmem:[#allocation38_spill] sm:$0xff]  ;;  %v3707_v20 = vpack.c.bf16 %v3657_v37, %v3655_v18  ;;  %v3705_v13 = vpack.c.bf16 %v3653_v45, %v3651_v27  ;;  %v11795_v7 = vpop.f32.mrf.mxu2 }
 0x594   : > { %v3307_v19 = vadd.f32 %v11642_v39, %v14012_v12  ;;  %v3470_v9 = vadd.f32 %v11665_v2, %v13998_v29  ;;  %v3647_v39 = vmax.f32 %v11705_v40, 0.0  ;;  %v11791_v2 = vpop.f32.mrf.mxu0 }
 0x595   : > { %3741 = vmatpush.bf16.msrb.mxu0 %v3709_v33  ;;  %v3634_v33 = vmax.f32 %v11760_v57, 0.0  ;;  %v3480_v57 = vadd.f32 %v11719_v60, %v14002_v8 }
 0x596   : > { %v11776_v14 = vpop.f32.mrf.mxu1  ;;  %v3396_v46 = vadd.f32 %v3395_v25, %v3307_v19 }
 0x597   : > { %3595 = vmatmul.bf16.gmra.mxu3 %v11637_v58  ;;  %14013 = vst [vmem:[#allocation122_spill] sm:$0xff] %v11776_v14 }
 0x598   : > { %v3649_v49 = vmax.f32 %v3396_v46, 0.0  ;;  %v3483_v46 = vadd.f32 %v11770_v24, %v14003_v54 }
 0x599   : > { %3742 = vmatpush.bf16.msrb.mxu0 %v3707_v20 }
 0x59a   : > { %v3556_v23 = vpop.f32.mrf.mxu3  ;;  %v3703_v41 = vpack.c.bf16 %v3649_v49, %v3647_v39 }
 0x59b   : > { %v3557_v58 = vadd.f32 %v3556_v23, %v3468_v51 }
 0x59c   : > { %v11803_v35 = vpop.f32.mrf.mxu0 }
 0x59d   : > { %3743 = vmatpush.bf16.msrb.mxu0 %v3705_v13  ;;  %v3636_v0 = vmax.f32 %v3557_v58, 0.0 }
 0x59e   : > { %v11785_v10 = vpop.f32.mrf.mxu1 }
 0x59f   : > { %14014 = vst [vmem:[#allocation95_spill] sm:$0xff] %v11785_v10 }
 0x5a1   : > { %3744 = vmatpush.bf16.msrb.mxu0 %v3703_v41 }
 0x5a2   : > { %v3558_v22 = vpop.f32.mrf.mxu3 }
 0x5a3   : > { %v3559_v25 = vadd.f32 %v3558_v22, %v3470_v9 }
 0x5a4   : > { %v11817_v61 = vpop.f32.mrf.mxu0 }
 0x5a5   : > { %3745 = vmatpush.bf16.msrb.mxu0 %v11710_v1  ;;  %v11805_v1 = vpop.f32.mrf.mxu2 }
 0x5a6   : > { %v11793_v40 = vpop.f32.mrf.mxu1 }
 0x5a7   : > { %3600 = vmatmul.bf16.gmra.mxu3 %v11660_v55  ;;  %14015 = vst [vmem:[#allocation52_spill] sm:$0xff] %v11793_v40 }
 0x5a9   : > { %3746 = vmatpush.bf16.msrb.mxu0 %v11688_v47  ;;  %v3632_v47 = vmax.f32 %v11750_v32, 0.0  ;;  %v3638_v32 = vmax.f32 %v3559_v25, 0.0 }
 0x5aa   : > { %v3561_v29 = vpop.f32.mrf.mxu3 }
 0x5ab   : > { %v3562_v31 = vadd.f32 %v3561_v29, %v3473_v17  ;;  %v11813_v44 = vpack.c.bf16 %v3634_v33, %v3632_v47  ;;  %v11828_v27 = vpack.c.bf16 %v3638_v32, %v3636_v0 }
 0x5ac   : > { %v11824_v50 = vpop.f32.mrf.mxu0 }
 0x5ad   : > { %3747 = vmatpush.bf16.msrb.mxu0 %v11667_v15  ;;  %v3492_v18 = vpop.f32.mrf.mxu2  ;;  %v3640_v39 = vmax.f32 %v3562_v31, 0.0 }
 0x5ae   : > { %v11801_v37 = vpop.f32.mrf.mxu1 }
 0x5b1   : > { %3748 = vmatpush.bf16.msrb.mxu0 %v11644_v4 }
 0x5b2   : > { %v3563_v55 = vpop.f32.mrf.mxu3 }
 0x5b3   : > { %v3564_v42 = vadd.f32 %v3563_v55, %v3475_v28 }
 0x5b4   : > { %v11834_v13 = vpop.f32.mrf.mxu0 }
 0x5b5   : > { %v3494_v45 = vpop.f32.mrf.mxu2  ;;  %v3642_v58 = vmax.f32 %v3564_v42, 0.0 }
 0x5b6   : > { %v11815_v51 = vpop.f32.mrf.mxu1 }
 0x5b7   : > { %3605 = vmatmul.bf16.gmra.mxu3 %v11683_v3  ;;  %v11839_v54 = vpack.c.bf16 %v3642_v58, %v3640_v39 }
 0x5ba   : > { %v3566_v15 = vpop.f32.mrf.mxu3 }
 0x5bb   : > { %v3567_v19 = vadd.f32 %v3566_v15, %v3478_v43 }
 0x5bc   : > { %v11843_v25 = vpop.f32.mrf.mxu0 }
 0x5bd   : > { %v3644_v33 = vmax.f32 %v3567_v19, 0.0  ;;  %v3495_v19 = vadd.f32 %v3494_v45, %v14007_v53 }
 0x5be   : > { %v11821_v23 = vpop.f32.mrf.mxu1 }
 0x5c2   : > { %v3568_v4 = vpop.f32.mrf.mxu3 }
 0x5c3   : > { %v3569_v3 = vadd.f32 %v3568_v4, %v3480_v57 }
 0x5c4   : > { %v11847_v55 = vpop.f32.mrf.mxu0 }
 0x5c5   : > { %v3646_v28 = vmax.f32 %v3569_v3, 0.0 }
 0x5c6   : > { %v11830_v49 = vpop.f32.mrf.mxu1 }
 0x5c7   : > { %3610 = vmatmul.bf16.gmra.mxu3 %v11703_v5  ;;  %v3497_v5 = vpop.f32.mrf.mxu2  ;;  %v11850_v31 = vpack.c.bf16 %v3646_v28, %v3644_v33  ;;  %v3493_v28 = vadd.f32 %v3492_v18, %v14009_v21  ;;  %v3485_v21 = vadd.f32 %v11783_v52, %v14012_v12  ;;  %v14017_v18 = vld [vmem:[#allocation73_spill] sm:$0xff] }
 0x5ca   : > { %v3571_v20 = vpop.f32.mrf.mxu3 }
 0x5cb   : > { %v11832_v8 = vadd.f32 %v3571_v20, %v3483_v46 }
 0x5cc   : > { %v3354_v43 = vpop.f32.mrf.mxu0 }
 0x5ce   : > { %v11836_v9 = vpop.f32.mrf.mxu1 }
 0x5cf   : > { %v3499_v41 = vpop.f32.mrf.mxu2 }
 0x5d0   : > { %v3500_v20 = vadd.f32 %v3499_v41, %v14008_v56 }
 0x5d2   : > { %v3573_v60 = vpop.f32.mrf.mxu3 }
 0x5d4   : > { %v3356_v32 = vpop.f32.mrf.mxu0 }
 0x5d6   : > { %v11841_v24 = vpop.f32.mrf.mxu1 }
 0x5d7   : > { %3615 = vmatmul.bf16.gmra.mxu3 %v11722_v48  ;;  %v3502_v42 = vpop.f32.mrf.mxu2 }
 0x5da   : > { %v3576_v22 = vpop.f32.mrf.mxu3 }
 0x5dc   : > { %v3359_v14 = vpop.f32.mrf.mxu0 }
 0x5de   : > { %v11845_v29 = vpop.f32.mrf.mxu1 }
 0x5df   : > { %v11854_v15 = vpop.f32.mrf.mxu2 }
 0x5e0   : > { %14016 = vst [vmem:[#allocation139_spill] sm:$0xff] %v11854_v15 }
 0x5e2   : > { %v3578_v17 = vpop.f32.mrf.mxu3 }
 0x5e6   : > { %v11852_v47 = vpop.f32.mrf.mxu1 }
 0x5e7   : > { %3620 = vmatmul.bf16.gmra.mxu3 %v11734_v26  ;;  %v3507_v46 = vpop.f32.mrf.mxu2  ;;  %v3498_v26 = vadd.f32 %v3497_v5, %v14006_v34  ;;  %v3488_v34 = vadd.f32 %v11795_v7, %v14011_v38  ;;  %v3503_v5 = vadd.f32 %v3502_v42, %v14017_v18 }
 0x5e9   : > { %v3577_v41 = vadd.f32 %v3576_v22, %v3488_v34 }
 0x5ea   : > { %v3581_v48 = vpop.f32.mrf.mxu3 }
 0x5eb   : > { %v3582_v10 = vadd.f32 %v3581_v48, %v3493_v28 }
 0x5ee   : > { %v11856_v4 = vpop.f32.mrf.mxu1 }
 0x5ef   : > { %v11865_v63 = vpop.f32.mrf.mxu2 }
 0x5f2   : > { %v3583_v57 = vpop.f32.mrf.mxu3 }
 0x5f3   : > { %v3584_v16 = vadd.f32 %v3583_v57, %v3495_v19  ;;  %v3656_v57 = vmax.f32 %v3582_v10, 0.0  ;;  %v3652_v19 = vmax.f32 %v3577_v41, 0.0  ;;  %v14018_v10 = vld [vmem:[#allocation47_spill] sm:$0xff] }
 0x5f5   : > { %v3658_v56 = vmax.f32 %v3584_v16, 0.0  ;;  %v11877_v16 = vld [vmem:[%s13411_s13] sm:$0xff] }
 0x5f6   : > { %v3443_v0 = vpop.f32.mrf.mxu1  ;;  %v3735_v52 = vunpack.c.l.b16 %v11877_v16 }
 0x5f7   : > { %3625 = vmatmul.bf16.gmra.mxu3 %v11748_v62  ;;  %v3490_v62 = vadd.f32 %v11805_v1, %v14010_v59  ;;  %v3574_v1 = vadd.f32 %v3573_v60, %v3485_v21  ;;  %v11881_v7 = vpop.f32.mrf.mxu2  ;;  %v3648_v60 = vmax.f32 %v11832_v8, 0.0  ;;  %v14022_v8 = vld [vmem:[#allocation60_spill] sm:$0xff] }
 0x5f8   : > { %v11884_v22 = vpack.c.b16 %v3735_v52, %v3735_v52  ;;  %v3352_v21 = vadd.f32 %v11847_v55, %v14022_v8 }
 0x5f9   : > { %v3579_v53 = vadd.f32 %v3578_v17, %v3490_v62  ;;  %v3650_v38 = vmax.f32 %v3574_v1, 0.0  ;;  %v14019_v17 = vld [vmem:[#allocation57_spill] sm:$0xff] }
 0x5fa   : > { %v3586_v3 = vpop.f32.mrf.mxu3  ;;  %v3357_v42 = vadd.f32 %v3356_v32, %v14019_v17  ;;  %3749 = vmatmul.bf16.vlgmr.msrb.gmra.mxu0 %v11884_v22  ;;  %v3441_v1 = vadd.f32 %v11856_v4, %v3352_v21 }
 0x5fb   : > { %v3587_v58 = vadd.f32 %v3586_v3, %v3498_v26  ;;  %v3654_v48 = vmax.f32 %v3579_v53, 0.0  ;;  %v3708_v26 = vpack.c.bf16 %v3658_v56, %v3656_v57  ;;  %v3704_v34 = vpack.c.bf16 %v3650_v38, %v3648_v60  ;;  %v14021_v53 = vld [vmem:[#allocation68_spill] sm:$0xff]  ;;  %v14023_v57 = vld [vmem:[#allocation49_spill] sm:$0xff] }
 0x5fd   : > { %v3660_v30 = vmax.f32 %v3587_v58, 0.0  ;;  %v3706_v12 = vpack.c.bf16 %v3654_v48, %v3652_v19 }
 0x5fe   : > { %v3445_v33 = vpop.f32.mrf.mxu1 }
 0x5ff   : > { %v3446_v56 = vadd.f32 %v3445_v33, %v3357_v42  ;;  %v14028_v42 = vld [vmem:[#allocation66_spill] sm:$0xff] }
 0x601   : > { %v3689_v48 = vmax.f32 %v3446_v56, 0.0 }
 0x602   : > { %v3588_v39 = vpop.f32.mrf.mxu3 }
 0x603   : > { %v3589_v15 = vadd.f32 %v3588_v39, %v3500_v20  ;;  %v14020_v20 = vld [vmem:[#allocation80_spill] sm:$0xff] }
 0x605   : > { %v3662_v40 = vmax.f32 %v3589_v15, 0.0 }
 0x606   : > { %v3448_v15 = vpop.f32.mrf.mxu1 }
 0x607   : > { %v3710_v45 = vpack.c.bf16 %v3662_v40, %v3660_v30  ;;  %v3361_v30 = vpop.f32.mrf.mxu0  ;;  %v3360_v40 = vadd.f32 %v3359_v14, %v14018_v10  ;;  %v3355_v14 = vadd.f32 %v3354_v43, %v14021_v53  ;;  %v14025_v43 = vld [vmem:[#allocation46_spill] sm:$0xff] }
 0x608   : > { %v3362_v58 = vadd.f32 %v3361_v30, %v14020_v20  ;;  %v3347_v33 = vadd.f32 %v11834_v13, %v14025_v43  ;;  %v11901_v30 = vpop.f32.mrf.mxu2 }
 0x609   : > { %3767 = vmatpush.bf16.msra.mxu0 %v3710_v45  ;;  %v3449_v39 = vadd.f32 %v3448_v15, %v3360_v40 }
 0x60a   : > { %v3591_v59 = vpop.f32.mrf.mxu3  ;;  %v3436_v52 = vadd.f32 %v11845_v29, %v3347_v33  ;;  %v14029_v29 = vld [vmem:[#allocation70_spill] sm:$0xff] }
 0x60b   : > { %v11872_v3 = vadd.f32 %v3591_v59, %v3503_v5  ;;  %v3444_v5 = vadd.f32 %v3443_v0, %v3355_v14  ;;  %v3691_v41 = vmax.f32 %v3449_v39, 0.0  ;;  %v3350_v59 = vadd.f32 %v11843_v25, %v14023_v57  ;;  %v14026_v25 = vld [vmem:[#allocation53_spill] sm:$0xff] }
 0x60c   : > { %v3345_v4 = vadd.f32 %v11824_v50, %v14026_v25 }
 0x60d   : > { %3768 = vmatpush.bf16.msra.mxu0 %v3708_v26  ;;  %v14024_v26 = vld [vmem:[#allocation78_spill] sm:$0xff]  ;;  %v3439_v55 = vadd.f32 %v11852_v47, %v3350_v59  ;;  %v3687_v0 = vmax.f32 %v3444_v5, 0.0 }
 0x60e   : > { %v3450_v62 = vpop.f32.mrf.mxu1  ;;  %v3508_v19 = vadd.f32 %v3507_v46, %v14024_v26  ;;  %v3685_v46 = vmax.f32 %v3441_v1, 0.0  ;;  %v3434_v60 = vadd.f32 %v11841_v24, %v3345_v4  ;;  %v14030_v24 = vld [vmem:[#allocation100_spill] sm:$0xff] }
 0x60f   : > { %v3451_v45 = vadd.f32 %v3450_v62, %v3362_v58  ;;  %v3723_v40 = vpack.c.bf16 %v3689_v48, %v3687_v0  ;;  %v3683_v47 = vmax.f32 %v3439_v55, 0.0  ;;  %v3340_v58 = vadd.f32 %v11803_v35, %v14028_v42  ;;  %v14034_v48 = vld [vmem:[#allocation22_spill] sm:$0xff] }
 0x610   : > { %v3681_v62 = vmax.f32 %v3436_v52, 0.0  ;;  %v3679_v14 = vmax.f32 %v3434_v60, 0.0  ;;  %v3335_v56 = vadd.f32 %v11780_v6, %v14030_v24  ;;  %v3330_v6 = vadd.f32 %v11752_v36, %v14024_v26  ;;  %v14036_v36 = vld [vmem:[#allocation71_spill] sm:$0xff]  ;;  %v14038_v52 = vld [vmem:[#allocation122_spill] sm:$0xff] }
 0x611   : > { %3769 = vmatpush.bf16.msra.mxu0 %v3706_v12  ;;  %v3693_v32 = vmax.f32 %v3451_v45, 0.0  ;;  %v3721_v50 = vpack.c.bf16 %v3685_v46, %v3683_v47  ;;  %v3517_v45 = vpop.f32.mrf.mxu2  ;;  %v3513_v1 = vadd.f32 %v11881_v7, %v14030_v24  ;;  %v14037_v26 = vld [vmem:[#allocation95_spill] sm:$0xff]  ;;  %v3736_v47 = vunpack.c.h.b16 %v11877_v16 }
 0x612   : > { %v11888_v28 = vpop.f32.mrf.mxu3  ;;  %v3719_v21 = vpack.c.bf16 %v3681_v62, %v3679_v14  ;;  %v3424_v5 = vadd.f32 %v11815_v51, %v3335_v56  ;;  %v11969_v24 = vld [vmem:[%s14040_s10 + $0x8] sm:$0xff] }
 0x613   : > { %v3725_v15 = vpack.c.bf16 %v3693_v32, %v3691_v41  ;;  %v14032_v32 = vld [vmem:[#allocation16_spill] sm:$0xff] }
 0x614   : > { %v3671_v33 = vmax.f32 %v3424_v5, 0.0 }
 0x615   : > { %3770 = vmatpush.bf16.msra.mxu0 %v3704_v34  ;;  %3754 = vmatpush.bf16.msrb.mxu1 %v3725_v15  ;;  %v3337_v34 = vadd.f32 %v11791_v2, %v14029_v29  ;;  %v3728_v2 = vld [vmem:[%s13412_s14] sm:$0xff]  ;;  %v14035_v15 = vld [vmem:[#allocation52_spill] sm:$0xff] }
 0x616   : > { %3731 = vperm.xlu2 %8006, %v3728_v2  }
 0x617   : > { %v3426_v35 = vadd.f32 %v11821_v23, %v3337_v34 }
 0x619   : > { %3771 = vmatpush.bf16.msra.mxu0 %v11850_v31  ;;  %v14027_v31 = vld [vmem:[#allocation42_spill] sm:$0xff]  ;;  %3755 = vmatpush.bf16.msrb.mxu1 %v3723_v40  ;;  %v11948_v40 = vpop.f32.mrf.mxu2 }
 0x61a   : > { %v3596_v38 = vpop.f32.mrf.mxu3  ;;  %v3342_v13 = vadd.f32 %v11817_v61, %v14027_v31 }
 0x61b   : > { %v11904_v12 = vadd.f32 %v3596_v38, %v3508_v19  ;;  %v3419_v19 = vadd.f32 %v14035_v15, %v3330_v6  ;;  %v12014_v15 = vld [vmem:[%s14040_s10 + $0x38] sm:$0xff] }
 0x61c   : > { %v3431_v39 = vadd.f32 %v11836_v9, %v3342_v13 }
 0x61d   : > { %3772 = vmatpush.bf16.msra.mxu0 %v11839_v54  ;;  %v3429_v54 = vadd.f32 %v11830_v49, %v3340_v58  ;;  %3756 = vmatpush.bf16.msrb.mxu1 %v3721_v50  ;;  %v3667_v7 = vmax.f32 %v3419_v19, 0.0  ;;  %v11958_v50 = vld [vmem:[%s14039_s28] sm:$0xff] }
 0x61e   : > { %v3677_v9 = vmax.f32 %v3431_v39, 0.0 }
 0x61f   : > { %v3675_v41 = vmax.f32 %v3429_v54, 0.0  ;;  %v3518_v54 = vadd.f32 %v3517_v45, %v14028_v42 }
 0x621   : > { %3773 = vmatpush.bf16.msra.mxu0 %v11828_v27  ;;  %v14031_v27 = vld [vmem:[#allocation20_spill] sm:$0xff]  ;;  %3757 = vmatpush.bf16.msrb.mxu1 %v3719_v21  ;;  %v3717_v59 = vpack.c.bf16 %v3677_v9, %v3675_v41  ;;  %v3522_v34 = vpop.f32.mrf.mxu2  ;;  %v11993_v41 = vld [vmem:[%s14040_s10 + $0x20] sm:$0xff] }
 0x622   : > { %v11920_v61 = vpop.f32.mrf.mxu3  ;;  %v3332_v49 = vadd.f32 %v11765_v11, %v14031_v27  ;;  %v14033_v11 = vld [vmem:[#allocation83_spill] sm:$0xff]  ;;  %v11976_v9 = vld [vmem:[%s14040_s10 + $0x10] sm:$0xff]  ;;  %v3523_v42 = vadd.f32 %v3522_v34, %v14026_v25 }
 0x623   : > { %v3327_v51 = vadd.f32 %v14034_v48, %v14033_v11 }
 0x624   : > { %v3421_v23 = vadd.f32 %v11801_v37, %v3332_v49  ;;  %v3325_v37 = vadd.f32 %v14036_v36, %v14017_v18  ;;  %v11953_v18 = vpack.c.b16 %v3736_v47, %v3736_v47  ;;  %v11986_v49 = vld [vmem:[%s14040_s10 + $0x18] sm:$0xff] }
 0x625   : > { %3774 = vmatpush.bf16.msra.mxu0 %v11813_v44  ;;  %v3673_v44 = vmax.f32 %v3426_v35, 0.0  ;;  %3758 = vmatpush.bf16.msrb.mxu1 %v3717_v59  ;;  %v3416_v38 = vadd.f32 %v14037_v26, %v3327_v51 }
 0x626   : > { %v3669_v4 = vmax.f32 %v3421_v23, 0.0  ;;  %v3414_v46 = vadd.f32 %v14038_v52, %v3325_v37  ;;  %v12000_v23 = vld [vmem:[%s14040_s10 + $0x28] sm:$0xff] }
 0x627   : > { %v3665_v13 = vmax.f32 %v3416_v38, 0.0  ;;  %v12028_v37 = vld [vmem:[%s14040_s10 + $0x48] sm:$0xff] }
 0x628   : > { %3775 = vmatmul.bf16.vlgmr.msra.gmra.mxu0 %v11884_v22  ;;  %v3715_v22 = vpack.c.bf16 %v3673_v44, %v3671_v33  ;;  %v3713_v60 = vpack.c.bf16 %v3669_v4, %v3667_v7  ;;  %v3663_v58 = vmax.f32 %v3414_v46, 0.0 }
 0x629   : > { %4128 = vmatpush.msrb.mxu0 %v14032_v32  ;;  %v3524_v56 = vpop.f32.mrf.mxu2 }
 0x62a   : > { %v3601_v55 = vpop.f32.mrf.mxu3  ;;  %3759 = vmatpush.bf16.msrb.mxu1 %v3715_v22  ;;  %v3711_v62 = vpack.c.bf16 %v3665_v13, %v3663_v58 }
 0x62b   : > { %v11942_v0 = vadd.f32 %v3601_v55, %v3513_v1  ;;  %v12007_v1 = vld [vmem:[%s14040_s10 + $0x30] sm:$0xff]  ;;  %v12021_v55 = vld [vmem:[%s14040_s10 + $0x40] sm:$0xff] }
 0x62e   : > { %3760 = vmatpush.bf16.msrb.mxu1 %v3713_v60 }
 0x631   : > { %v3527_v2 = vpop.f32.mrf.mxu2 }
 0x632   : > { %v11951_v39 = vpop.f32.mrf.mxu3  ;;  %3761 = vmatpush.bf16.msrb.mxu1 %v3711_v62 }
 0x635   : > { %3762 = vmatmul.bf16.vlgmr.msrb.gmra.mxu1 %v11953_v18 }
 0x638   : > { %7617 = vmatmul.msk.f32.vlgmr.msrb.gmra.mxu0 %vm928_vm2, %v11958_v50 }
 0x639   : > { %v3529_v6 = vpop.f32.mrf.mxu2 }
 0x63a   : > { %v3606_v16 = vpop.f32.mrf.mxu3  ;;  %v3530_v47 = vadd.f32 %v3529_v6, %v14022_v8 }
 0x63b   : > { %v11964_v14 = vadd.f32 %v3606_v16, %v3518_v54 }
 0x640   : > { %7618 = vmatmul.msk.f32.gmra.mxu0 %vm928_vm2, %v11969_v24 }
 0x641   : > { %v3532_v44 = vpop.f32.mrf.mxu2 }
 0x642   : > { %v3608_v35 = vpop.f32.mrf.mxu3  ;;  %v3533_v7 = vadd.f32 %v3532_v44, %v14021_v53  ;;  %v3525_v53 = vadd.f32 %v3524_v56, %v14025_v43  ;;  %v3515_v56 = vadd.f32 %v11901_v30, %v14029_v29 }
 0x648   : > { %7619 = vmatmul.msk.f32.gmra.mxu0 %vm928_vm2, %v11976_v9 }
 0x649   : > { %v3534_v48 = vpop.f32.mrf.mxu2 }
 0x64a   : > { %v3611_v45 = vpop.f32.mrf.mxu3  ;;  %v3535_v4 = vadd.f32 %v3534_v48, %v14019_v17  ;;  %v3528_v17 = vadd.f32 %v3527_v2, %v14023_v57  ;;  %v3520_v48 = vadd.f32 %v11948_v40, %v14027_v31  ;;  %v12051_v57 = vld [vmem:[%s14040_s10 + $0x58] sm:$0xff]  ;;  %v3604_v40 = vadd.f32 %v11951_v39, %v3515_v56  ;;  %v12248_v56 = vld [vmem:[%s14040_s10 + $0xf0] sm:$0xff] }
 0x64b   : > { %v11981_v21 = vadd.f32 %v3611_v45, %v3523_v42 }
 0x64c   : > { %v3609_v2 = vadd.f32 %v3608_v35, %v3520_v48  ;;  %v3510_v35 = vadd.f32 %v11865_v63, %v14031_v27  ;;  %v3674_v29 = vmax.f32 %v3604_v40, 0.0  ;;  %v3672_v63 = vmax.f32 %v11942_v0, 0.0  ;;  %v12229_v48 = vld [vmem:[%s14040_s10 + $0xe0] sm:$0xff] }
 0x64d   : > { %v3680_v31 = vmax.f32 %v11981_v21, 0.0 }
 0x64e   : > { %v3599_v30 = vadd.f32 %v11920_v61, %v3510_v35  ;;  %v12260_v35 = vld [vmem:[%s14040_s10 + $0xf8] sm:$0xff] }
 0x650   : > { %7620 = vmatmul.msk.f32.gmra.mxu0 %vm928_vm2, %v11986_v49 }
 0x651   : > { %v3537_v33 = vpop.f32.mrf.mxu2 }
 0x652   : > { %v3613_v5 = vpop.f32.mrf.mxu3  ;;  %v3538_v38 = vadd.f32 %v3537_v33, %v14018_v10  ;;  %v12040_v10 = vld [vmem:[%s14040_s10 + $0x50] sm:$0xff]  ;;  %v3676_v33 = vmax.f32 %v11964_v14, 0.0  ;;  %v3670_v14 = vmax.f32 %v3599_v30, 0.0  ;;  %v14049_v30 = vld [vmem:[#allocation77_spill] sm:$0xff] }
 0x653   : > { %v3614_v45 = vadd.f32 %v3613_v5, %v3525_v53  ;;  %v3678_v5 = vmax.f32 %v3609_v2, 0.0  ;;  %v12239_v2 = vld [vmem:[%s14040_s10 + $0xe8] sm:$0xff] }
 0x655   : > { %v3718_v21 = vpack.c.bf16 %v3678_v5, %v3676_v33  ;;  %v14048_v33 = vld [vmem:[#allocation94_spill] sm:$0xff] }
 0x658   : > { %7621 = vmatmul.msk.f32.gmra.mxu0 %vm928_vm2, %v11993_v41 }
 0x659   : > { %v3539_v26 = vpop.f32.mrf.mxu2 }
 0x65a   : > { %v3616_v25 = vpop.f32.mrf.mxu3  ;;  %v3540_v22 = vadd.f32 %v3539_v26, %v14020_v20  ;;  %v14042_v26 = vld [vmem:[#allocation139_spill] sm:$0xff] }
 0x65b   : > { %v3617_v42 = vadd.f32 %v3616_v25, %v3528_v17 }
 0x660   : > { %7622 = vmatmul.msk.f32.gmra.mxu0 %vm928_vm2, %v12000_v23 }
 0x662   : > { %v3618_v59 = vpop.f32.mrf.mxu3 }
 0x663   : > { %v3619_v54 = vadd.f32 %v3618_v59, %v3530_v47  ;;  %v3682_v59 = vmax.f32 %v3614_v45, 0.0  ;;  %v12202_v45 = vld [vmem:[%s14040_s10 + $0xc8] sm:$0xff] }
 0x665   : > { %v3686_v6 = vmax.f32 %v3619_v54, 0.0  ;;  %v3720_v25 = vpack.c.bf16 %v3682_v59, %v3680_v31  ;;  %v14047_v31 = vld [vmem:[#allocation87_spill] sm:$0xff] }
 0x668   : > { %7623 = vmatmul.msk.f32.gmra.mxu0 %vm928_vm2, %v12007_v1 }
 0x66a   : > { %v3621_v51 = vpop.f32.mrf.mxu3 }
 0x66b   : > { %v3622_v58 = vadd.f32 %v3621_v51, %v3533_v7  ;;  %v3684_v51 = vmax.f32 %v3617_v42, 0.0  ;;  %v12184_v42 = vld [vmem:[%s14040_s10 + $0xb8] sm:$0xff] }
 0x66d   : > { %v3688_v8 = vmax.f32 %v3622_v58, 0.0 }
 0x670   : > { %7624 = vmatmul.msk.f32.gmra.mxu0 %vm928_vm2, %v12014_v15 }
 0x672   : > { %v3623_v19 = vpop.f32.mrf.mxu3 }
 0x673   : > { %v3624_v13 = vadd.f32 %v3623_v19, %v3535_v4  ;;  %v3722_v19 = vpack.c.bf16 %v3686_v6, %v3684_v51  ;;  %v3716_v4 = vpack.c.bf16 %v3674_v29, %v3672_v63  ;;  %v12211_v6 = vld [vmem:[%s14040_s10 + $0xd0] sm:$0xff] }
 0x674   : > { %v14051_v63 = vld [vmem:[#allocation104_spill] sm:$0xff] }
 0x675   : > { %v3690_v20 = vmax.f32 %v3624_v13, 0.0  ;;  %v14043_v13 = vld [vmem:[#allocation17_spill] sm:$0xff] }
 0x677   : > { %v3724_v44 = vpack.c.bf16 %v3690_v20, %v3688_v8  ;;  %v12055_v43 = vpop.f32.mrf.mxu0  ;;  %v12193_v8 = vld [vmem:[%s14040_s10 + $0xc0] sm:$0xff] }
 0x678   : > { %7625 = vmatmul.msk.f32.gmra.mxu0 %vm928_vm2, %v12021_v55  ;;  %14041 = vst [vmem:[#allocation62_spill] sm:$0xff] %v12055_v43 }
 0x67a   : > { %v3626_v36 = vpop.f32.mrf.mxu3 }
 0x67b   : > { %v3627_v52 = vadd.f32 %v3626_v36, %v3538_v38  ;;  %v12067_v36 = vld [vmem:[%s14040_s10 + $0x60] sm:$0xff]  ;;  %v3505_v38 = vadd.f32 %v14042_v26, %v14033_v11  ;;  %v3806_v11 = vld [vmem:[%s14040_s10 + $0x68] sm:$0xff] }
 0x67d   : > { %v3692_v62 = vmax.f32 %v3627_v52, 0.0  ;;  %v3594_v27 = vadd.f32 %v11888_v28, %v3505_v38  ;;  %v12089_v28 = vld [vmem:[%s14040_s10 + $0x70] sm:$0xff] }
 0x67f   : > { %v3752_v39 = vpop.f32.mrf.mxu0  ;;  %v3666_v61 = vmax.f32 %v3594_v27, 0.0 }
 0x680   : > { %7626 = vmatmul.msk.f32.gmra.mxu0 %vm928_vm2, %v12028_v37 }
 0x682   : > { %v3628_v46 = vpop.f32.mrf.mxu3 }
 0x683   : > { %v3629_v60 = vadd.f32 %v3628_v46, %v3540_v22  ;;  %v3668_v22 = vmax.f32 %v11904_v12, 0.0  ;;  %v3664_v46 = vmax.f32 %v11872_v3, 0.0 }
 0x685   : > { %v3694_v34 = vmax.f32 %v3629_v60, 0.0  ;;  %v3714_v52 = vpack.c.bf16 %v3670_v14, %v3668_v22  ;;  %v3712_v7 = vpack.c.bf16 %v3666_v61, %v3664_v46  ;;  %v12098_v60 = vld [vmem:[%s14040_s10 + $0x78] sm:$0xff]  ;;  %v14052_v22 = vld [vmem:[#allocation102_spill] sm:$0xff] }
 0x687   : > { %v3726_v16 = vpack.c.bf16 %v3694_v34, %v3692_v62 }
 0x688   : > { %7627 = vmatmul.msk.f32.gmra.mxu0 %vm928_vm2, %v12040_v10 }
 0x689   : > { %3780 = vmatpush.bf16.msra.mxu1 %v3726_v16 }
 0x68d   : > { %3781 = vmatpush.bf16.msra.mxu1 %v3724_v44  ;;  %v12220_v44 = vld [vmem:[%s14040_s10 + $0xd8] sm:$0xff] }
 0x690   : > { %7628 = vmatmul.msk.f32.gmra.mxu0 %vm928_vm2, %v12051_v57 }
 0x691   : > { %3782 = vmatpush.bf16.msra.mxu1 %v3722_v19 }
 0x695   : > { %3783 = vmatpush.bf16.msra.mxu1 %v3720_v25 }
 0x698   : > { %7629 = vmatmul.msk.f32.gmra.mxu0 %vm928_vm2, %v12067_v36 }
 0x699   : > { %3784 = vmatpush.bf16.msra.mxu1 %v3718_v21  ;;  %v14050_v21 = vld [vmem:[#allocation82_spill] sm:$0xff] }
 0x69d   : > { %3785 = vmatpush.bf16.msra.mxu1 %v3716_v4 }
 0x6a0   : > { %7630 = vmatmul.msk.f32.gmra.mxu0 %vm928_vm2, %v3806_v11 }
 0x6a1   : > { %3786 = vmatpush.bf16.msra.mxu1 %v3714_v52 }
 0x6a5   : > { %3787 = vmatpush.bf16.msra.mxu1 %v3712_v7  ;;  %v12082_v0 = vpop.f32.mrf.mxu0 }
 0x6a6   : > { %14044 = vst [vmem:[#allocation54_spill] sm:$0xff] %v12082_v0 }
 0x6a8   : > { %3788 = vmatmul.bf16.vlgmr.msra.gmra.mxu1 %v11953_v18  ;;  %7631 = vmatmul.msk.f32.gmra.mxu0 %vm928_vm2, %v12089_v28  ;;  %v12109_v18 = vld [vmem:[%s14040_s10 + $0x80] sm:$0xff] }
 0x6a9   : > { %4241 = vmatpush.msrb.mxu1 %v14043_v13 }
 0x6ad   : > { %v3778_v3 = vpop.f32.mrf.mxu0 }
 0x6b0   : > { %7632 = vmatmul.msk.f32.gmra.mxu0 %vm928_vm2, %v12098_v60 }
 0x6b2   : > { %v12093_v12 = vpop.f32.mrf.mxu1 }
 0x6b3   : > { %14045 = vst [vmem:[#allocation59_spill] sm:$0xff] %v12093_v12 }
 0x6b5   : > { %v12100_v47 = vpop.f32.mrf.mxu0 }
 0x6b8   : > { %7649 = vmatmul.msk.f32.vlgmr.msrb.gmra.mxu1 %vm928_vm2, %v11958_v50  ;;  %7633 = vmatmul.msk.f32.gmra.mxu0 %vm928_vm2, %v12109_v18  ;;  %v12120_v50 = vld [vmem:[%s14040_s10 + $0x88] sm:$0xff] }
 0x6ba   : > { %v3765_v58 = vpop.f32.mrf.mxu1 }
 0x6bd   : > { %v12111_v62 = vpop.f32.mrf.mxu0 }
 0x6c0   : > { %7650 = vmatmul.msk.f32.gmra.mxu1 %vm928_vm2, %v11969_v24  ;;  %7634 = vmatmul.msk.f32.gmra.mxu0 %vm928_vm2, %v12120_v50  ;;  %v12131_v24 = vld [vmem:[%s14040_s10 + $0x90] sm:$0xff] }
 0x6c5   : > { %v12122_v34 = vpop.f32.mrf.mxu0 }
 0x6c8   : > { %7651 = vmatmul.msk.f32.gmra.mxu1 %vm928_vm2, %v11976_v9  ;;  %7635 = vmatmul.msk.f32.gmra.mxu0 %vm928_vm2, %v12131_v24  ;;  %v12142_v9 = vld [vmem:[%s14040_s10 + $0x98] sm:$0xff] }
 0x6cd   : > { %v12133_v17 = vpop.f32.mrf.mxu0 }
 0x6d0   : > { %7652 = vmatmul.msk.f32.gmra.mxu1 %vm928_vm2, %v11986_v49  ;;  %7636 = vmatmul.msk.f32.gmra.mxu0 %vm928_vm2, %v12142_v9  ;;  %v12153_v49 = vld [vmem:[%s14040_s10 + $0xa0] sm:$0xff] }
 0x6d5   : > { %v12144_v54 = vpop.f32.mrf.mxu0 }
 0x6d8   : > { %7653 = vmatmul.msk.f32.gmra.mxu1 %vm928_vm2, %v11993_v41  ;;  %7637 = vmatmul.msk.f32.gmra.mxu0 %vm928_vm2, %v12153_v49  ;;  %v12164_v41 = vld [vmem:[%s14040_s10 + $0xa8] sm:$0xff] }
 0x6dd   : > { %v12155_v20 = vpop.f32.mrf.mxu0 }
 0x6e0   : > { %7654 = vmatmul.msk.f32.gmra.mxu1 %vm928_vm2, %v12000_v23  ;;  %7638 = vmatmul.msk.f32.gmra.mxu0 %vm928_vm2, %v12164_v41  ;;  %v12175_v23 = vld [vmem:[%s14040_s10 + $0xb0] sm:$0xff] }
 0x6e5   : > { %v12166_v16 = vpop.f32.mrf.mxu0 }
 0x6e8   : > { %7655 = vmatmul.msk.f32.gmra.mxu1 %vm928_vm2, %v12007_v1  ;;  %7639 = vmatmul.msk.f32.gmra.mxu0 %vm928_vm2, %v12175_v23 }
 0x6ed   : > { %v4151_v53 = vpop.f32.mrf.mxu0 }
 0x6f0   : > { %7656 = vmatmul.msk.f32.gmra.mxu1 %vm928_vm2, %v12014_v15  ;;  %7640 = vmatmul.msk.f32.gmra.mxu0 %vm928_vm2, %v12184_v42 }
 0x6f5   : > { %v4154_v1 = vpop.f32.mrf.mxu0 }
 0x6f8   : > { %7657 = vmatmul.msk.f32.gmra.mxu1 %vm928_vm2, %v12021_v55  ;;  %7641 = vmatmul.msk.f32.gmra.mxu0 %vm928_vm2, %v12193_v8 }
 0x6fd   : > { %v4157_v15 = vpop.f32.mrf.mxu0 }
 0x700   : > { %7658 = vmatmul.msk.f32.gmra.mxu1 %vm928_vm2, %v12028_v37  ;;  %7642 = vmatmul.msk.f32.gmra.mxu0 %vm928_vm2, %v12202_v45 }
 0x705   : > { %v4160_v55 = vpop.f32.mrf.mxu0 }
 0x706   : > { %v4161_v61 = vadd.f32 %v4160_v55, %v14052_v22 }
 0x708   : > { %7659 = vmatmul.msk.f32.gmra.mxu1 %vm928_vm2, %v12040_v10  ;;  %7643 = vmatmul.msk.f32.gmra.mxu0 %vm928_vm2, %v12211_v6 }
 0x70d   : > { %v4163_v37 = vpop.f32.mrf.mxu0 }
 0x70e   : > { %v4164_v27 = vadd.f32 %v4163_v37, %v14051_v63  ;;  %v4359_v37 = vmax.f32 %v4161_v61, 0.0  ;;  %v14060_v61 = vld [vmem:[#allocation117_spill] sm:$0xff] }
 0x710   : > { %7660 = vmatmul.msk.f32.gmra.mxu1 %vm928_vm2, %v12051_v57  ;;  %7644 = vmatmul.msk.f32.gmra.mxu0 %vm928_vm2, %v12220_v44  ;;  %v4361_v3 = vmax.f32 %v4164_v27, 0.0 }
 0x715   : > { %v4166_v10 = vpop.f32.mrf.mxu0 }
 0x716   : > { %v4167_v39 = vadd.f32 %v4166_v10, %v14050_v21  ;;  %v14055_v10 = vld [vmem:[#allocation113_spill] sm:$0xff] }
 0x718   : > { %7661 = vmatmul.msk.f32.gmra.mxu1 %vm928_vm2, %v12067_v36  ;;  %7645 = vmatmul.msk.f32.gmra.mxu0 %vm928_vm2, %v12229_v48  ;;  %v4363_v52 = vmax.f32 %v4167_v39, 0.0 }
 0x71d   : > { %v4169_v57 = vpop.f32.mrf.mxu0 }
 0x71e   : > { %v4170_v36 = vadd.f32 %v4169_v57, %v14048_v33  ;;  %v4152_v57 = vadd.f32 %v4151_v53, %v14055_v10  ;;  %v14058_v53 = vld [vmem:[#allocation114_spill] sm:$0xff] }
 0x720   : > { %7662 = vmatmul.msk.f32.gmra.mxu1 %vm928_vm2, %v3806_v11  ;;  %7646 = vmatmul.msk.f32.gmra.mxu0 %vm928_vm2, %v12239_v2  ;;  %v4365_v14 = vmax.f32 %v4170_v36, 0.0  ;;  %v14053_v11 = vld [vmem:[#allocation96_spill] sm:$0xff]  ;;  %v4353_v39 = vmax.f32 %v4152_v57, 0.0 }
 0x725   : > { %v12234_v51 = vpop.f32.mrf.mxu1  ;;  %v4172_v19 = vpop.f32.mrf.mxu0 }
 0x726   : > { %14046 = vst [vmem:[#allocation29_spill] sm:$0xff] %v12234_v51  ;;  %v4173_v40 = vadd.f32 %v4172_v19, %v14047_v31  ;;  %v14056_v19 = vld [vmem:[#allocation36_spill] sm:$0xff] }
 0x728   : > { %7663 = vmatmul.msk.f32.gmra.mxu1 %vm928_vm2, %v12089_v28  ;;  %7647 = vmatmul.msk.f32.gmra.mxu0 %vm928_vm2, %v12248_v56  ;;  %v4367_v26 = vmax.f32 %v4173_v40, 0.0  ;;  %v4158_v28 = vadd.f32 %v4157_v15, %v14053_v11  ;;  %v4149_v40 = vadd.f32 %v12166_v16, %v14056_v19  ;;  %v14059_v16 = vld [vmem:[#allocation85_spill] sm:$0xff] }
 0x729   : > { %v4140_v27 = vadd.f32 %v12133_v17, %v14059_v16  ;;  %v14062_v17 = vld [vmem:[#allocation56_spill] sm:$0xff] }
 0x72a   : > { %v4357_v55 = vmax.f32 %v4158_v28, 0.0 }
 0x72d   : > { %v3791_v59 = vpop.f32.mrf.mxu1  ;;  %v4175_v25 = vpop.f32.mrf.mxu0 }
 0x72e   : > { %v4176_v29 = vadd.f32 %v4175_v25, %v14049_v30  ;;  %v4413_v59 = vpack.c.bf16 %v4361_v3, %v4359_v37  ;;  %v4131_v37 = vadd.f32 %v12100_v47, %v14062_v17 }
 0x730   : > { %7664 = vmatmul.msk.f32.gmra.mxu1 %vm928_vm2, %v12098_v60  ;;  %v4369_v38 = vmax.f32 %v4176_v29, 0.0  ;;  %7648 = vmatmul.msk.f32.gmra.mxu0 %vm928_vm2, %v12260_v35  ;;  %v4415_v60 = vpack.c.bf16 %v4365_v14, %v4363_v52  ;;  %v14057_v29 = vld [vmem:[#allocation115_spill] sm:$0xff]  ;;  %v4137_v52 = vadd.f32 %v12122_v34, %v14060_v61 }
 0x732   : > { %v4417_v4 = vpack.c.bf16 %v4369_v38, %v4367_v26  ;;  %v4143_v26 = vadd.f32 %v12144_v54, %v14058_v53  ;;  %v4351_v38 = vmax.f32 %v4149_v40, 0.0  ;;  %v4345_v54 = vmax.f32 %v4140_v27, 0.0  ;;  %v7683_v40 = vld [vmem:[%s13415_s17] sm:$0xf] }
 0x733   : > { %v4343_v57 = vmax.f32 %v4137_v52, 0.0  ;;  %v7699_v52 = vld [vmem:[%s13415_s17 + $0x20] sm:$0xf] }
 0x734   : > { %4819 = vmatpush.bf16.msra.mxu2 %v4417_v4  ;;  %v4409_v4 = vpack.c.bf16 %v4353_v39, %v4351_v38  ;;  %v4347_v28 = vmax.f32 %v4143_v26, 0.0  ;;  %v7691_v26 = vld [vmem:[%s13415_s17 + $0x10] sm:$0xf]  ;;  %v7902_v38 = vld [vmem:[%s13415_s17 + $0x14] sm:$0xf0] }
 0x735   : > { %v12255_v5 = vpop.f32.mrf.mxu1  ;;  %v12273_v7 = vpop.f32.mrf.mxu0 }
 0x738   : > { %7665 = vmatmul.msk.f32.gmra.mxu1 %vm928_vm2, %v12109_v18  ;;  %v14054_v18 = vld [vmem:[#allocation107_spill] sm:$0xff]  ;;  %4820 = vmatpush.bf16.msra.mxu2 %v4415_v60 }
 0x739   : > { %v4155_v58 = vadd.f32 %v4154_v1, %v14054_v18 }
 0x73b   : > { %v4355_v25 = vmax.f32 %v4155_v58, 0.0 }
 0x73c   : > { %4821 = vmatpush.bf16.msra.mxu2 %v4413_v59  ;;  %v4339_v59 = vmax.f32 %v4131_v37, 0.0  ;;  %v7707_v37 = vld [vmem:[%s13415_s17 + $0x30] sm:$0xf] }
 0x73d   : > { %v12271_v46 = vpop.f32.mrf.mxu1  ;;  %v12284_v15 = vpop.f32.mrf.mxu0  ;;  %v4411_v1 = vpack.c.bf16 %v4357_v55, %v4355_v25  ;;  %v4405_v55 = vpack.c.bf16 %v4345_v54, %v4343_v57  ;;  %v7906_v57 = vld [vmem:[%s13415_s17 + $0x34] sm:$0xf0] }
 0x740   : > { %7666 = vmatmul.msk.f32.gmra.mxu1 %vm928_vm2, %v12120_v50  ;;  %v4146_v50 = vadd.f32 %v12155_v20, %v14057_v29  ;;  %4822 = vmatpush.bf16.msra.mxu2 %v4411_v1 }
 0x742   : > { %v4349_v14 = vmax.f32 %v4146_v50, 0.0 }
 0x744   : > { %4823 = vmatpush.bf16.msra.mxu2 %v4409_v4  ;;  %v4407_v58 = vpack.c.bf16 %v4349_v14, %v4347_v28  ;;  %v12337_v14 = vor.u32 %v7902_v38, %v7691_v26  ;;  %v7904_v28 = vld [vmem:[%s13415_s17 + $0x24] sm:$0xf0] }
 0x745   : > { %v12282_v36 = vpop.f32.mrf.mxu1  ;;  %v12298_v3 = vpop.f32.mrf.mxu0 }
 0x748   : > { %7667 = vmatmul.msk.f32.gmra.mxu1 %vm928_vm2, %v12131_v24  ;;  %v14061_v24 = vld [vmem:[#allocation120_spill] sm:$0xff]  ;;  %4824 = vmatpush.bf16.msra.mxu2 %v4407_v58 }
 0x749   : > { %v4134_v60 = vadd.f32 %v12111_v62, %v14061_v24  ;;  %v7900_v62 = vld [vmem:[%s13415_s17 + $0x4] sm:$0xf0] }
 0x74a   : > { %v12316_v47 = vor.u32 %v7900_v62, %v7683_v40  ;;  %v7715_v40 = vld [vmem:[%s13415_s17 + $0x40] sm:$0xf]  ;;  %v7908_v62 = vld [vmem:[%s13415_s17 + $0x44] sm:$0xf0] }
 0x74b   : > { %v4341_v34 = vmax.f32 %v4134_v60, 0.0  ;;  %v12386_v38 = vor.u32 %v7908_v62, %v7715_v40 }
 0x74c   : > { %4825 = vmatpush.bf16.msra.mxu2 %v4405_v55 }
 0x74d   : > { %v12296_v20 = vpop.f32.mrf.mxu1  ;;  %v4403_v50 = vpack.c.bf16 %v4341_v34, %v4339_v59 }
 0x750   : > { %7668 = vmatmul.msk.f32.gmra.mxu1 %vm928_vm2, %v12142_v9  ;;  %v12314_v9 = vpop.f32.mrf.mxu0  ;;  %4826 = vmatpush.bf16.msra.mxu2 %v4403_v50 }
 0x753   : > { %4827 = vmatmul.bf16.vlgmr.msra.gmra.mxu2 %v12316_v47 }
 0x755   : > { %v12312_v25 = vpop.f32.mrf.mxu1 }
 0x758   : > { %7669 = vmatmul.msk.f32.gmra.mxu1 %vm928_vm2, %v12153_v49  ;;  %v12323_v1 = vpop.f32.mrf.mxu0 }
 0x75d   : > { %v12321_v39 = vpop.f32.mrf.mxu1 }
 0x760   : > { %7670 = vmatmul.msk.f32.gmra.mxu1 %vm928_vm2, %v12164_v41  ;;  %v12335_v49 = vpop.f32.mrf.mxu0 }
 0x763   : > { %4832 = vmatmul.bf16.gmra.mxu2 %v12337_v14 }
 0x765   : > { %v12333_v27 = vpop.f32.mrf.mxu1 }
 0x768   : > { %7671 = vmatmul.msk.f32.gmra.mxu1 %vm928_vm2, %v12175_v23  ;;  %v12344_v4 = vpop.f32.mrf.mxu0  ;;  %v12356_v23 = vor.u32 %v7904_v28, %v7699_v52  ;;  %v7910_v28 = vld [vmem:[%s13415_s17 + $0x54] sm:$0xf0] }
 0x76d   : > { %v12342_v41 = vpop.f32.mrf.mxu1 }
 0x770   : > { %7672 = vmatmul.msk.f32.gmra.mxu1 %vm928_vm2, %v12184_v42  ;;  %v12354_v54 = vpop.f32.mrf.mxu0 }
 0x773   : > { %4837 = vmatmul.bf16.gmra.mxu2 %v12356_v23 }
 0x775   : > { %v4267_v60 = vpop.f32.mrf.mxu1 }
 0x778   : > { %7673 = vmatmul.msk.f32.gmra.mxu1 %vm928_vm2, %v12193_v8  ;;  %v12361_v42 = vpop.f32.mrf.mxu0  ;;  %v12373_v8 = vor.u32 %v7906_v57, %v7707_v37 }
 0x77d   : > { %v4270_v58 = vpop.f32.mrf.mxu1 }
 0x780   : > { %7674 = vmatmul.msk.f32.gmra.mxu1 %vm928_vm2, %v12202_v45  ;;  %v12371_v55 = vpop.f32.mrf.mxu0 }
 0x783   : > { %4842 = vmatmul.bf16.gmra.mxu2 %v12373_v8 }
 0x785   : > { %v4273_v34 = vpop.f32.mrf.mxu1 }
 0x786   : > { %v4274_v43 = vadd.f32 %v4273_v34, %v14052_v22  ;;  %v14065_v22 = vld [vmem:[#allocation88_spill] sm:$0xff]  ;;  %v14066_v34 = vld [vmem:[#allocation90_spill] sm:$0xff] }
 0x788   : > { %7675 = vmatmul.msk.f32.gmra.mxu1 %vm928_vm2, %v12211_v6  ;;  %v4208_v45 = vpop.f32.mrf.mxu0 }
 0x78d   : > { %v4276_v59 = vpop.f32.mrf.mxu1 }
 0x790   : > { %7676 = vmatmul.msk.f32.gmra.mxu1 %vm928_vm2, %v12220_v44  ;;  %v4211_v26 = vpop.f32.mrf.mxu0  ;;  %v7723_v44 = vld [vmem:[%s13415_s17 + $0x50] sm:$0xf] }
 0x791   : > { %v12399_v40 = vor.u32 %v7910_v28, %v7723_v44  ;;  %v4277_v44 = vadd.f32 %v4276_v59, %v14051_v63 }
 0x793   : > { %4847 = vmatmul.bf16.gmra.mxu2 %v12386_v38  ;;  %v4362_v63 = vmax.f32 %v4277_v44, 0.0 }
 0x795   : > { %v4279_v50 = vpop.f32.mrf.mxu1 }
 0x796   : > { %v4280_v51 = vadd.f32 %v4279_v50, %v14050_v21  ;;  %v4360_v50 = vmax.f32 %v4274_v43, 0.0 }
 0x798   : > { %7677 = vmatmul.msk.f32.gmra.mxu1 %vm928_vm2, %v12229_v48  ;;  %v4214_v52 = vpop.f32.mrf.mxu0  ;;  %v4414_v44 = vpack.c.bf16 %v4362_v63, %v4360_v50 }
 0x79d   : > { %v4282_v6 = vpop.f32.mrf.mxu1 }
 0x79e   : > { %v4283_v62 = vadd.f32 %v4282_v6, %v14048_v33 }
 0x7a0   : > { %7678 = vmatmul.msk.f32.gmra.mxu1 %vm928_vm2, %v12239_v2  ;;  %v4217_v57 = vpop.f32.mrf.mxu0 }
 0x7a3   : > { %4852 = vmatmul.bf16.gmra.mxu2 %v12399_v40 }
 0x7a5   : > { %v4285_v37 = vpop.f32.mrf.mxu1 }
 0x7a6   : > { %v4286_v48 = vadd.f32 %v4285_v37, %v14047_v31  ;;  %v4364_v31 = vmax.f32 %v4280_v51, 0.0  ;;  %v14063_v37 = vld [vmem:[#allocation86_spill] sm:$0xff]  ;;  %v4218_v51 = vadd.f32 %v4217_v57, %v14065_v22 }
 0x7a8   : > { %7679 = vmatmul.msk.f32.gmra.mxu1 %vm928_vm2, %v12248_v56  ;;  %v4220_v13 = vpop.f32.mrf.mxu0  ;;  %v4368_v0 = vmax.f32 %v4286_v48, 0.0  ;;  %v4366_v56 = vmax.f32 %v4283_v62, 0.0  ;;  %v14067_v48 = vld [vmem:[#allocation81_spill] sm:$0xff]  ;;  %v4397_v57 = vmax.f32 %v4218_v51, 0.0 }
 0x7a9   : > { %v4221_v33 = vadd.f32 %v4220_v13, %v14063_v37  ;;  %v4268_v13 = vadd.f32 %v4267_v60, %v14054_v18  ;;  %v4262_v18 = vadd.f32 %v12333_v27, %v14056_v19  ;;  %v14069_v60 = vld [vmem:[#allocation92_spill] sm:$0xff]  ;;  %v4256_v27 = vadd.f32 %v12312_v25, %v14058_v53 }
 0x7aa   : > { %v4250_v53 = vadd.f32 %v12282_v36, %v14060_v61  ;;  %v4247_v36 = vadd.f32 %v12271_v46, %v14061_v24 }
 0x7ab   : > { %v4399_v62 = vmax.f32 %v4221_v33, 0.0  ;;  %v4356_v43 = vmax.f32 %v4268_v13, 0.0  ;;  %v4348_v25 = vmax.f32 %v4256_v27, 0.0  ;;  %v14078_v27 = vld [vmem:[#allocation48_spill] sm:$0xff] }
 0x7ac   : > { %v4342_v46 = vmax.f32 %v4247_v36, 0.0  ;;  %v7901_v36 = vld [vmem:[%s13415_s17 + $0x14] sm:$0xf] }
 0x7ad   : > { %v4288_v2 = vpop.f32.mrf.mxu1 }
 0x7ae   : > { %v4289_v32 = vadd.f32 %v4288_v2, %v14049_v30  ;;  %v7731_v30 = vld [vmem:[%s13415_s17 + $0x60] sm:$0xf]  ;;  %v4215_v2 = vadd.f32 %v4214_v52, %v14067_v48  ;;  %v4209_v52 = vadd.f32 %v4208_v45, %v14069_v60  ;;  %v14071_v45 = vld [vmem:[#allocation109_spill] sm:$0xff] }
 0x7b0   : > { %v4370_v12 = vmax.f32 %v4289_v32, 0.0  ;;  %7680 = vmatmul.msk.f32.gmra.mxu1 %vm928_vm2, %v12260_v35  ;;  %v7912_v32 = vld [vmem:[%s13415_s17 + $0x64] sm:$0xf0]  ;;  %v4271_v35 = vadd.f32 %v4270_v58, %v14053_v11  ;;  %v4265_v11 = vadd.f32 %v12342_v41, %v14055_v10  ;;  %v4395_v33 = vmax.f32 %v4215_v2, 0.0  ;;  %v14073_v2 = vld [vmem:[#allocation21_spill] sm:$0xff] }
 0x7b1   : > { %v12425_v6 = vor.u32 %v7912_v32, %v7731_v30  ;;  %v4259_v10 = vadd.f32 %v12321_v39, %v14057_v29  ;;  %v14070_v32 = vld [vmem:[#allocation112_spill] sm:$0xff]  ;;  %v4253_v29 = vadd.f32 %v12296_v20, %v14059_v16  ;;  %v7914_v20 = vld [vmem:[%s13415_s17 + $0x74] sm:$0xf0] }
 0x7b2   : > { %v4418_v28 = vpack.c.bf16 %v4370_v12, %v4368_v0  ;;  %v4223_v0 = vpop.f32.mrf.mxu0  ;;  %v4416_v12 = vpack.c.bf16 %v4366_v56, %v4364_v31  ;;  %v4358_v58 = vmax.f32 %v4271_v35, 0.0  ;;  %v14068_v56 = vld [vmem:[#allocation105_spill] sm:$0xff]  ;;  %v4354_v41 = vmax.f32 %v4265_v11, 0.0  ;;  %v7739_v16 = vld [vmem:[%s13415_s17 + $0x70] sm:$0xf] }
 0x7b3   : > { %v4224_v59 = vadd.f32 %v4223_v0, %v14066_v34  ;;  %v4212_v31 = vadd.f32 %v4211_v26, %v14068_v56  ;;  %4857 = vmatmul.bf16.gmra.mxu2 %v12425_v6  ;;  %v4206_v35 = vadd.f32 %v12371_v55, %v14070_v32  ;;  %v4431_v19 = vpack.c.bf16 %v4397_v57, %v4395_v33  ;;  %v14074_v11 = vld [vmem:[#allocation116_spill] sm:$0xff] }
 0x7b4   : > { %4997 = vmatpush.bf16.msra.mxu0 %v4418_v28  ;;  %v4412_v26 = vpack.c.bf16 %v4358_v58, %v4356_v43  ;;  %v4352_v0 = vmax.f32 %v4262_v18, 0.0  ;;  %v4350_v39 = vmax.f32 %v4259_v10, 0.0  ;;  %v4346_v61 = vmax.f32 %v4253_v29, 0.0  ;;  %v14075_v43 = vld [vmem:[#allocation97_spill] sm:$0xff]  ;;  %v14076_v10 = vld [vmem:[#allocation119_spill] sm:$0xff] }
 0x7b5   : > { %v12419_v21 = vpop.f32.mrf.mxu1  ;;  %v4401_v28 = vmax.f32 %v4224_v59, 0.0  ;;  %v4393_v63 = vmax.f32 %v4212_v31, 0.0  ;;  %v14072_v59 = vld [vmem:[#allocation40_spill] sm:$0xff]  ;;  %v4389_v13 = vmax.f32 %v4206_v35, 0.0  ;;  %v4244_v31 = vadd.f32 %v12255_v5, %v14062_v17  ;;  %v14077_v5 = vld [vmem:[#allocation118_spill] sm:$0xff] }
 0x7b6   : > { %14064 = vst [vmem:[#allocation67_spill] sm:$0xff] %v12419_v21  ;;  %v4410_v51 = vpack.c.bf16 %v4354_v41, %v4352_v0  ;;  %v4200_v55 = vadd.f32 %v12354_v54, %v14072_v59  ;;  %v4344_v57 = vmax.f32 %v4250_v53, 0.0  ;;  %v12467_v18 = vor.u32 %v7914_v20, %v7739_v16  ;;  %v7755_v16 = vld [vmem:[%s13415_s17 + $0x90] sm:$0xf]  ;;  %v7918_v20 = vld [vmem:[%s13415_s17 + $0x94] sm:$0xf0] }
 0x7b7   : > { %v4433_v21 = vpack.c.bf16 %v4401_v28, %v4399_v62  ;;  %v4408_v28 = vpack.c.bf16 %v4350_v39, %v4348_v25  ;;  %v4188_v41 = vadd.f32 %v12314_v9, %v14076_v10  ;;  %v4340_v35 = vmax.f32 %v4244_v31, 0.0  ;;  %v14079_v9 = vld [vmem:[#allocation50_spill] sm:$0xff]  ;;  %v7920_v31 = vld [vmem:[%s13415_s17 + $0xa4] sm:$0xf0] }
 0x7b8   : > { %4998 = vmatpush.bf16.msra.mxu0 %v4416_v12  ;;  %v4391_v12 = vmax.f32 %v4209_v52, 0.0  ;;  %v4385_v58 = vmax.f32 %v4200_v55, 0.0  ;;  %v4191_v52 = vadd.f32 %v12323_v1, %v14075_v43  ;;  %v4406_v24 = vpack.c.bf16 %v4346_v61, %v4344_v57  ;;  %v7693_v61 = vld [vmem:[%s13415_s17 + $0x18] sm:$0xf0]  ;;  %v7903_v57 = vld [vmem:[%s13415_s17 + $0x24] sm:$0xf] }
 0x7b9   : > { %4908 = vmatpush.bf16.msra.mxu3 %v4433_v21  ;;  %v4203_v21 = vadd.f32 %v12361_v42, %v14071_v45  ;;  %v4197_v42 = vadd.f32 %v12344_v4, %v14073_v2  ;;  %v4194_v4 = vadd.f32 %v12335_v49, %v14074_v11  ;;  %v4185_v17 = vadd.f32 %v12298_v3, %v14077_v5 }
 0x7ba   : > { %v4429_v50 = vpack.c.bf16 %v4393_v63, %v4391_v12  ;;  %v4379_v63 = vmax.f32 %v4191_v52, 0.0  ;;  %v4404_v1 = vpack.c.bf16 %v4342_v46, %v4340_v35  ;;  %v4182_v0 = vadd.f32 %v12284_v15, %v14078_v27  ;;  %v7916_v15 = vld [vmem:[%s13415_s17 + $0x84] sm:$0xf0]  ;;  %v7701_v52 = vld [vmem:[%s13415_s17 + $0x28] sm:$0xf0] }
 0x7bb   : > { %v4387_v62 = vmax.f32 %v4203_v21, 0.0  ;;  %v4383_v33 = vmax.f32 %v4197_v42, 0.0  ;;  %v4381_v49 = vmax.f32 %v4194_v4, 0.0  ;;  %v4377_v21 = vmax.f32 %v4188_v41, 0.0  ;;  %v7771_v41 = vld [vmem:[%s13415_s17 + $0xb0] sm:$0xf] }
 0x7bc   : > { %4999 = vmatpush.bf16.msra.mxu0 %v4414_v44  ;;  %v4179_v29 = vadd.f32 %v12273_v7, %v14079_v9  ;;  %v4375_v39 = vmax.f32 %v4185_v17, 0.0  ;;  %v7899_v7 = vld [vmem:[%s13415_s17 + $0x4] sm:$0xf]  ;;  %v12520_v4 = vor.u32 %v7918_v20, %v7755_v16  ;;  %v7709_v35 = vld [vmem:[%s13415_s17 + $0x38] sm:$0xf0] }
 0x7bd   : > { %v12435_v30 = vpop.f32.mrf.mxu1  ;;  %4909 = vmatpush.bf16.msra.mxu3 %v4431_v19  ;;  %v4427_v44 = vpack.c.bf16 %v4389_v13, %v4387_v62  ;;  %v4423_v12 = vpack.c.bf16 %v4381_v49, %v4379_v63  ;;  %v7747_v13 = vld [vmem:[%s13415_s17 + $0x80] sm:$0xf]  ;;  %v7922_v49 = vld [vmem:[%s13415_s17 + $0xb4] sm:$0xf0]  ;;  %v7909_v16 = vld [vmem:[%s13415_s17 + $0x54] sm:$0xf] }
 0x7be   : > { %v4421_v55 = vpack.c.bf16 %v4377_v21, %v4375_v39  ;;  %v4371_v3 = vmax.f32 %v4179_v29, 0.0  ;;  %v12497_v25 = vor.u32 %v7916_v15, %v7747_v13  ;;  %v7924_v29 = vld [vmem:[%s13415_s17 + $0xc4] sm:$0xf0]  ;;  %v7907_v39 = vld [vmem:[%s13415_s17 + $0x44] sm:$0xf] }
 0x7bf   : > { %v7725_v20 = vld [vmem:[%s13415_s17 + $0x58] sm:$0xf0] }
 0x7c0   : > { %5000 = vmatpush.bf16.msra.mxu0 %v4412_v26  ;;  %v4425_v26 = vpack.c.bf16 %v4385_v58, %v4383_v33 }
 0x7c1   : > { %4910 = vmatpush.bf16.msra.mxu3 %v4429_v50  ;;  %v7685_v50 = vld [vmem:[%s13415_s17 + $0x8] sm:$0xf0] }
 0x7c2   : > { %v12499_v42 = vor.u32 %v7899_v7, %v7685_v50  ;;  %v7787_v50 = vld [vmem:[%s13415_s17 + $0xd0] sm:$0xf] }
 0x7c3   : > { %4862 = vmatmul.bf16.gmra.mxu2 %v12467_v18 }
 0x7c4   : > { %5001 = vmatpush.bf16.msra.mxu0 %v4410_v51  ;;  %v4373_v51 = vmax.f32 %v4182_v0, 0.0 }
 0x7c5   : > { %v12459_v54 = vpop.f32.mrf.mxu1  ;;  %4911 = vmatpush.bf16.msra.mxu3 %v4427_v44  ;;  %v7763_v44 = vld [vmem:[%s13415_s17 + $0xa0] sm:$0xf] }
 0x7c6   : > { %v12543_v46 = vor.u32 %v7920_v31, %v7763_v44 }
 0x7c8   : > { %5002 = vmatpush.bf16.msra.mxu0 %v4408_v28 }
 0x7c9   : > { %4912 = vmatpush.bf16.msra.mxu3 %v4425_v26  ;;  %v7905_v26 = vld [vmem:[%s13415_s17 + $0x34] sm:$0xf] }
 0x7cc   : > { %5003 = vmatpush.bf16.msra.mxu0 %v4406_v24 }
 0x7cd   : > { %v12476_v19 = vpop.f32.mrf.mxu1  ;;  %4913 = vmatpush.bf16.msra.mxu3 %v4423_v12  ;;  %v7779_v12 = vld [vmem:[%s13415_s17 + $0xc0] sm:$0xf] }
 0x7d0   : > { %5004 = vmatpush.bf16.msra.mxu0 %v4404_v1  ;;  %v12566_v1 = vor.u32 %v7905_v26, %v7709_v35 }
 0x7d1   : > { %4914 = vmatpush.bf16.msra.mxu3 %v4421_v55 }
 0x7d3   : > { %5005 = vmatmul.bf16.vlgmr.msra.gmra.mxu0 %v12316_v47  ;;  %v4419_v47 = vpack.c.bf16 %v4373_v51, %v4371_v3  ;;  %4867 = vmatmul.bf16.gmra.mxu2 %v12497_v25  ;;  %v7717_v51 = vld [vmem:[%s13415_s17 + $0x48] sm:$0xf0]  ;;  %v12585_v3 = vor.u32 %v7924_v29, %v7779_v12 }
 0x7d5   : > { %v12495_v53 = vpop.f32.mrf.mxu1  ;;  %4915 = vmatpush.bf16.msra.mxu3 %v4419_v47  ;;  %v7926_v47 = vld [vmem:[%s13415_s17 + $0xd4] sm:$0xf0] }
 0x7d6   : > { %v12562_v63 = vpop.f32.mrf.mxu2 }
 0x7d8   : > { %4916 = vmatmul.bf16.vlgmr.msra.gmra.mxu3 %v12499_v42 }
 0x7dd   : > { %v12503_v62 = vpop.f32.mrf.mxu1 }
 0x7de   : > { %v12570_v21 = vpop.f32.mrf.mxu2 }
 0x7e3   : > { %5010 = vmatmul.bf16.gmra.mxu0 %v12337_v14  ;;  %v12522_v14 = vor.u32 %v7901_v36, %v7693_v61  ;;  %4872 = vmatmul.bf16.gmra.mxu2 %v12520_v4  ;;  %v12610_v61 = vor.u32 %v7909_v16, %v7725_v20 }
 0x7e5   : > { %v12518_v28 = vpop.f32.mrf.mxu1 }
 0x7e6   : > { %v12589_v13 = vpop.f32.mrf.mxu2 }
 0x7e8   : > { %4921 = vmatmul.bf16.gmra.mxu3 %v12522_v14 }
 0x7ed   : > { %v12526_v58 = vpop.f32.mrf.mxu1 }
 0x7ee   : > { %v12594_v7 = vpop.f32.mrf.mxu2  ;;  %v4313_v16 = vadd.f32 %v12526_v58, %v14072_v59 }
 0x7f3   : > { %5015 = vmatmul.bf16.gmra.mxu0 %v12356_v23  ;;  %v12545_v23 = vor.u32 %v7903_v57, %v7701_v52  ;;  %4877 = vmatmul.bf16.gmra.mxu2 %v12543_v46 }
 0x7f5   : > { %v12541_v33 = vpop.f32.mrf.mxu1 }
 0x7f6   : > { %v12615_v57 = vpop.f32.mrf.mxu2 }
 0x7f8   : > { %4926 = vmatmul.bf16.gmra.mxu3 %v12545_v23 }
 0x7fd   : > { %v4318_v24 = vpop.f32.mrf.mxu1 }
 0x803   : > { %5020 = vmatmul.bf16.gmra.mxu0 %v12373_v8  ;;  %v12564_v8 = vor.u32 %v7922_v49, %v7771_v41 }
 0x805   : > { %v4321_v17 = vpop.f32.mrf.mxu1  ;;  %4882 = vmatmul.bf16.gmra.mxu2 %v12564_v8 }
 0x808   : > { %4931 = vmatmul.bf16.gmra.mxu3 %v12566_v1 }
 0x80d   : > { %v4324_v0 = vpop.f32.mrf.mxu1 }
 0x813   : > { %5025 = vmatmul.bf16.gmra.mxu0 %v12386_v38  ;;  %v12587_v38 = vor.u32 %v7907_v39, %v7717_v51  ;;  %v4325_v39 = vadd.f32 %v4324_v0, %v14068_v56  ;;  %v4319_v0 = vadd.f32 %v4318_v24, %v14070_v32  ;;  %v4310_v32 = vadd.f32 %v12518_v28, %v14073_v2 }
 0x815   : > { %v4327_v55 = vpop.f32.mrf.mxu1  ;;  %4887 = vmatmul.bf16.gmra.mxu2 %v12585_v3  ;;  %v4390_v20 = vmax.f32 %v4319_v0, 0.0  ;;  %v4384_v59 = vmax.f32 %v4310_v32, 0.0  ;;  %v14082_v0 = vld [vmem:[#allocation110_spill] sm:$0xff]  ;;  %v7765_v32 = vld [vmem:[%s13415_s17 + $0xa8] sm:$0xf0] }
 0x816   : > { %v4328_v49 = vadd.f32 %v4327_v55, %v14067_v48  ;;  %v7911_v48 = vld [vmem:[%s13415_s17 + $0x64] sm:$0xf]  ;;  %v4394_v55 = vmax.f32 %v4325_v39, 0.0 }
 0x818   : > { %4936 = vmatmul.bf16.gmra.mxu3 %v12587_v38  ;;  %v4396_v51 = vmax.f32 %v4328_v49, 0.0 }
 0x81d   : > { %v4330_v15 = vpop.f32.mrf.mxu1 }
 0x81e   : > { %v4331_v52 = vadd.f32 %v4330_v15, %v14065_v22  ;;  %v4322_v22 = vadd.f32 %v4321_v17, %v14069_v60  ;;  %v12636_v15 = vpop.f32.mrf.mxu2  ;;  %v4316_v17 = vadd.f32 %v12541_v33, %v14071_v45  ;;  %v4304_v33 = vadd.f32 %v12495_v53, %v14075_v43  ;;  %v7930_v43 = vld [vmem:[%s13415_s17 + $0xf4] sm:$0xf0] }
 0x820   : > { %v4398_v12 = vmax.f32 %v4331_v52, 0.0  ;;  %v4388_v24 = vmax.f32 %v4316_v17, 0.0  ;;  %v4301_v52 = vadd.f32 %v12476_v19, %v14076_v10  ;;  %v4380_v28 = vmax.f32 %v4304_v33, 0.0  ;;  %v7913_v10 = vld [vmem:[%s13415_s17 + $0x74] sm:$0xf] }
 0x821   : > { %v4295_v19 = vadd.f32 %v12435_v30, %v14078_v27 }
 0x822   : > { %v4432_v56 = vpack.c.bf16 %v4398_v12, %v4396_v51  ;;  %v4428_v45 = vpack.c.bf16 %v4390_v20, %v4388_v24  ;;  %v4378_v53 = vmax.f32 %v4301_v52, 0.0  ;;  %v14084_v24 = vld [vmem:[#allocation111_spill] sm:$0xff] }
 0x823   : > { %5030 = vmatmul.bf16.gmra.mxu0 %v12399_v40  ;;  %v12608_v40 = vor.u32 %v7926_v47, %v7787_v50  ;;  %v4392_v47 = vmax.f32 %v4322_v22, 0.0 }
 0x825   : > { %v4333_v36 = vpop.f32.mrf.mxu1  ;;  %4892 = vmatmul.bf16.gmra.mxu2 %v12608_v40 }
 0x826   : > { %v4334_v44 = vadd.f32 %v4333_v36, %v14063_v37  ;;  %v7795_v37 = vld [vmem:[%s13415_s17 + $0xe0] sm:$0xf]  ;;  %v4430_v36 = vpack.c.bf16 %v4394_v55, %v4392_v47  ;;  %v12654_v58 = vpop.f32.mrf.mxu2  ;;  %v4831_v55 = vadd.f32 %v12570_v21, %v14082_v0  ;;  %v7919_v21 = vld [vmem:[%s13415_s17 + $0xa4] sm:$0xf] }
 0x827   : > { %v12725_v33 = vor.u32 %v7919_v21, %v7765_v32 }
 0x828   : > { %4941 = vmatmul.bf16.gmra.mxu3 %v12610_v61  ;;  %v4400_v26 = vmax.f32 %v4334_v44, 0.0  ;;  %v4307_v44 = vadd.f32 %v12503_v62, %v14074_v11  ;;  %v7803_v11 = vld [vmem:[%s13415_s17 + $0xf0] sm:$0xf]  ;;  %v4298_v62 = vadd.f32 %v12459_v54, %v14077_v5  ;;  %v14080_v5 = vld [vmem:[#allocation67_spill] sm:$0xff] }
 0x82a   : > { %v4376_v12 = vmax.f32 %v4298_v62, 0.0  ;;  %v7773_v62 = vld [vmem:[%s13415_s17 + $0xb8] sm:$0xf0] }
 0x82c   : > { %v4422_v39 = vpack.c.bf16 %v4378_v53, %v4376_v12 }
 0x82d   : > { %v4336_v31 = vpop.f32.mrf.mxu1 }
 0x82e   : > { %v4337_v41 = vadd.f32 %v4336_v31, %v14066_v34  ;;  %v7928_v34 = vld [vmem:[%s13415_s17 + $0xe4] sm:$0xf0]  ;;  %v4386_v31 = vmax.f32 %v4313_v16, 0.0  ;;  %v12681_v51 = vpop.f32.mrf.mxu2  ;;  %v14083_v16 = vld [vmem:[#allocation25_spill] sm:$0xff] }
 0x82f   : > { %v12638_v50 = vor.u32 %v7928_v34, %v7795_v37  ;;  %v7749_v37 = vld [vmem:[%s13415_s17 + $0x88] sm:$0xf0]  ;;  %v14081_v34 = vld [vmem:[#allocation137_spill] sm:$0xff] }
 0x830   : > { %v4402_v35 = vmax.f32 %v4337_v41, 0.0  ;;  %v4382_v41 = vmax.f32 %v4307_v44, 0.0  ;;  %v4426_v2 = vpack.c.bf16 %v4386_v31, %v4384_v59  ;;  %v4836_v44 = vadd.f32 %v12594_v7, %v14084_v24 }
 0x832   : > { %v4434_v29 = vpack.c.bf16 %v4402_v35, %v4400_v26  ;;  %v4424_v49 = vpack.c.bf16 %v4382_v41, %v4380_v28  ;;  %v12675_v26 = vor.u32 %v7930_v43, %v7803_v11  ;;  %v4292_v35 = vadd.f32 %v14080_v5, %v14079_v9  ;;  %v7915_v9 = vld [vmem:[%s13415_s17 + $0x84] sm:$0xf]  ;;  %v7921_v11 = vld [vmem:[%s13415_s17 + $0xb4] sm:$0xf] }
 0x833   : > { %5035 = vmatmul.bf16.gmra.mxu0 %v12425_v6  ;;  %v7733_v6 = vld [vmem:[%s13415_s17 + $0x68] sm:$0xf0]  ;;  %v12693_v22 = vor.u32 %v7915_v9, %v7749_v37  ;;  %v14086_v43 = vld [vmem:[#allocation108_spill] sm:$0xff]  ;;  %v12748_v53 = vor.u32 %v7921_v11, %v7773_v62 }
 0x834   : > { %5086 = vmatpush.bf16.msra.mxu1 %v4434_v29  ;;  %v12640_v60 = vor.u32 %v7911_v48, %v7733_v6  ;;  %v4374_v29 = vmax.f32 %v4295_v19, 0.0  ;;  %v4372_v30 = vmax.f32 %v4292_v35, 0.0  ;;  %v4829_v48 = vadd.f32 %v12562_v63, %v14081_v34  ;;  %v7781_v9 = vld [vmem:[%s13415_s17 + $0xc8] sm:$0xf0] }
 0x835   : > { %4897 = vmatmul.bf16.gmra.mxu2 %v12638_v50 }
 0x836   : > { %v4420_v27 = vpack.c.bf16 %v4374_v29, %v4372_v30 }
 0x838   : > { %5087 = vmatpush.bf16.msra.mxu1 %v4432_v56  ;;  %4946 = vmatmul.bf16.gmra.mxu3 %v12640_v60 }
 0x83c   : > { %5088 = vmatpush.bf16.msra.mxu1 %v4430_v36 }
 0x840   : > { %5089 = vmatpush.bf16.msra.mxu1 %v4428_v45 }
 0x843   : > { %5040 = vmatmul.bf16.gmra.mxu0 %v12467_v18  ;;  %v7741_v18 = vld [vmem:[%s13415_s17 + $0x78] sm:$0xf0] }
 0x844   : > { %5090 = vmatpush.bf16.msra.mxu1 %v4426_v2  ;;  %v12677_v54 = vor.u32 %v7913_v10, %v7741_v18 }
 0x845   : > { %4902 = vmatmul.bf16.gmra.mxu2 %v12675_v26 }
 0x848   : > { %5091 = vmatpush.bf16.msra.mxu1 %v4424_v49  ;;  %4951 = vmatmul.bf16.gmra.mxu3 %v12677_v54  ;;  %v14087_v49 = vld [vmem:[#allocation133_spill] sm:$0xff] }
 0x849   : > { %v4844_v5 = vadd.f32 %v12654_v58, %v14087_v49  ;;  %v14088_v58 = vld [vmem:[#allocation89_spill] sm:$0xff] }
 0x84a   : > { %v4846_v37 = vadd.f32 %v12681_v51, %v14088_v58 }
 0x84c   : > { %5092 = vmatpush.bf16.msra.mxu1 %v4422_v39 }
 0x850   : > { %5093 = vmatpush.bf16.msra.mxu1 %v4420_v27  ;;  %v7923_v27 = vld [vmem:[%s13415_s17 + $0xc4] sm:$0xf] }
 0x853   : > { %5045 = vmatmul.bf16.gmra.mxu0 %v12497_v25  ;;  %5094 = vmatmul.bf16.vlgmr.msra.gmra.mxu1 %v12499_v42  ;;  %v7917_v25 = vld [vmem:[%s13415_s17 + $0x94] sm:$0xf]  ;;  %v7757_v42 = vld [vmem:[%s13415_s17 + $0x98] sm:$0xf0] }
 0x854   : > { %v12708_v63 = vor.u32 %v7917_v25, %v7757_v42 }
 0x858   : > { %4956 = vmatmul.bf16.gmra.mxu3 %v12693_v22 }
 0x85b   : > { %v4917_v6 = vpop.f32.mrf.mxu3 }
 0x85c   : > { %v4918_v56 = vadd.f32 %v4917_v6, %v4829_v48 }
 0x85e   : > { %v5175_v7 = vmax.f32 %v4918_v56, 0.0 }
 0x863   : > { %5050 = vmatmul.bf16.gmra.mxu0 %v12520_v4  ;;  %5099 = vmatmul.bf16.gmra.mxu1 %v12522_v14  ;;  %v4919_v17 = vpop.f32.mrf.mxu3  ;;  %v4848_v4 = vpop.f32.mrf.mxu2  ;;  %v4834_v14 = vadd.f32 %v12589_v13, %v14083_v16 }
 0x864   : > { %v4920_v47 = vadd.f32 %v4919_v17, %v4831_v55 }
 0x866   : > { %v5177_v28 = vmax.f32 %v4920_v47, 0.0 }
 0x868   : > { %4961 = vmatmul.bf16.gmra.mxu3 %v12708_v63  ;;  %v12744_v10 = vpack.c.bf16 %v5177_v28, %v5175_v7  ;;  %v7797_v28 = vld [vmem:[%s13415_s17 + $0xe8] sm:$0xf0] }
 0x86b   : > { %v4922_v20 = vpop.f32.mrf.mxu3  ;;  %v12723_v31 = vpop.f32.mrf.mxu2 }
 0x86c   : > { %v4923_v36 = vadd.f32 %v4922_v20, %v4834_v14 }
 0x86e   : > { %v5179_v39 = vmax.f32 %v4923_v36, 0.0  ;;  %v7925_v36 = vld [vmem:[%s13415_s17 + $0xd4] sm:$0xf] }
 0x873   : > { %5055 = vmatmul.bf16.gmra.mxu0 %v12543_v46  ;;  %5104 = vmatmul.bf16.gmra.mxu1 %v12545_v23  ;;  %v4924_v13 = vpop.f32.mrf.mxu3  ;;  %v12728_v46 = vpop.f32.mrf.mxu0  ;;  %v14085_v23 = vld [vmem:[#allocation26_spill] sm:$0xff] }
 0x874   : > { %v4925_v45 = vadd.f32 %v4924_v13, %v4836_v44  ;;  %v4839_v59 = vadd.f32 %v12615_v57, %v14085_v23  ;;  %v12732_v2 = vpop.f32.mrf.mxu2  ;;  %v4841_v57 = vadd.f32 %v12636_v15, %v14086_v43 }
 0x876   : > { %v5181_v15 = vmax.f32 %v4925_v45, 0.0 }
 0x878   : > { %4966 = vmatmul.bf16.gmra.mxu3 %v12725_v33  ;;  %v12767_v48 = vpack.c.bf16 %v5181_v15, %v5179_v39 }
 0x87b   : > { %v4927_v52 = vpop.f32.mrf.mxu3  ;;  %v12746_v18 = vpop.f32.mrf.mxu0 }
 0x87c   : > { %v4928_v41 = vadd.f32 %v4927_v52, %v4839_v59 }
 0x87e   : > { %v5183_v51 = vmax.f32 %v4928_v41, 0.0  ;;  %v7927_v41 = vld [vmem:[%s13415_s17 + $0xe4] sm:$0xf] }
 0x87f   : > { %v12806_v62 = vor.u32 %v7927_v41, %v7797_v28  ;;  %v14094_v41 = vld [vmem:[#allocation127_spill] sm:$0xff] }
 0x883   : > { %5060 = vmatmul.bf16.gmra.mxu0 %v12564_v8  ;;  %5109 = vmatmul.bf16.gmra.mxu1 %v12566_v1  ;;  %v4929_v19 = vpop.f32.mrf.mxu3  ;;  %v12750_v1 = vpop.f32.mrf.mxu2 }
 0x884   : > { %v4930_v8 = vadd.f32 %v4929_v19, %v4841_v57  ;;  %v12755_v29 = vpop.f32.mrf.mxu0  ;;  %v4856_v28 = vadd.f32 %v12750_v1, %v14094_v41 }
 0x886   : > { %v5185_v14 = vmax.f32 %v4930_v8, 0.0  ;;  %v7929_v8 = vld [vmem:[%s13415_s17 + $0xf4] sm:$0xf] }
 0x888   : > { %4971 = vmatmul.bf16.gmra.mxu3 %v12748_v53  ;;  %v12787_v21 = vpack.c.bf16 %v5185_v14, %v5183_v51 }
 0x88b   : > { %v4932_v35 = vpop.f32.mrf.mxu3  ;;  %v4858_v30 = vpop.f32.mrf.mxu2 }
 0x88c   : > { %v4933_v12 = vadd.f32 %v4932_v35, %v4844_v5  ;;  %v12771_v25 = vpop.f32.mrf.mxu0  ;;  %v7805_v5 = vld [vmem:[%s13415_s17 + $0xf8] sm:$0xf0] }
 0x88d   : > { %v12821_v15 = vor.u32 %v7929_v8, %v7805_v5 }
 0x88e   : > { %v5187_v52 = vmax.f32 %v4933_v12, 0.0 }
 0x893   : > { %5065 = vmatmul.bf16.gmra.mxu0 %v12585_v3  ;;  %5114 = vmatmul.bf16.gmra.mxu1 %v12587_v38  ;;  %v4934_v6 = vpop.f32.mrf.mxu3  ;;  %v12769_v3 = vor.u32 %v7923_v27, %v7781_v9  ;;  %v14089_v38 = vld [vmem:[#allocation130_spill] sm:$0xff]  ;;  %v4860_v55 = vpop.f32.mrf.mxu2 }
 0x894   : > { %v4935_v56 = vadd.f32 %v4934_v6, %v4846_v37  ;;  %v4849_v42 = vadd.f32 %v4848_v4, %v14089_v38  ;;  %v12779_v20 = vpop.f32.mrf.mxu0  ;;  %v7789_v4 = vld [vmem:[%s13415_s17 + $0xd8] sm:$0xf0] }
 0x895   : > { %v12791_v44 = vor.u32 %v7925_v36, %v7789_v4  ;;  %v14090_v37 = vld [vmem:[#allocation121_spill] sm:$0xff]  ;;  %v14093_v4 = vld [vmem:[#allocation123_spill] sm:$0xff] }
 0x896   : > { %v5189_v45 = vmax.f32 %v4935_v56, 0.0  ;;  %v14091_v56 = vld [vmem:[#allocation44_spill] sm:$0xff] }
 0x898   : > { %4976 = vmatmul.bf16.gmra.mxu3 %v12769_v3  ;;  %v12804_v7 = vpack.c.bf16 %v5189_v45, %v5187_v52  ;;  %v4859_v45 = vadd.f32 %v4858_v30, %v14093_v4  ;;  %v5009_v52 = vadd.f32 %v12746_v18, %v14082_v0  ;;  %v14096_v4 = vld [vmem:[#allocation131_spill] sm:$0xff]  ;;  %v14097_v18 = vld [vmem:[#allocation138_spill] sm:$0xff] }
 0x899   : > { %v4851_v0 = vadd.f32 %v12723_v31, %v14096_v4 }
 0x89b   : > { %v4937_v17 = vpop.f32.mrf.mxu3 }
 0x89c   : > { %v12775_v47 = vadd.f32 %v4937_v17, %v4849_v42  ;;  %v4861_v42 = vadd.f32 %v4860_v55, %v14091_v56  ;;  %v14092_v17 = vld [vmem:[#allocation32_spill] sm:$0xff] }
 0x8a3   : > { %5070 = vmatmul.bf16.gmra.mxu0 %v12608_v40  ;;  %5119 = vmatmul.bf16.gmra.mxu1 %v12610_v61  ;;  %v12789_v32 = vpop.f32.mrf.mxu3  ;;  %v4863_v40 = vpop.f32.mrf.mxu2 }
 0x8a4   : > { %v12794_v61 = vpop.f32.mrf.mxu0  ;;  %v4864_v6 = vadd.f32 %v4863_v40, %v14090_v37 }
 0x8a8   : > { %4981 = vmatmul.bf16.gmra.mxu3 %v12791_v44 }
 0x8ab   : > { %v4942_v13 = vpop.f32.mrf.mxu3  ;;  %v4865_v59 = vpop.f32.mrf.mxu2 }
 0x8ac   : > { %v12808_v57 = vpop.f32.mrf.mxu0  ;;  %v4866_v14 = vadd.f32 %v4865_v59, %v14092_v17  ;;  %v14095_v59 = vld [vmem:[#allocation75_spill] sm:$0xff] }
 0x8b3   : > { %5075 = vmatmul.bf16.gmra.mxu0 %v12638_v50  ;;  %5124 = vmatmul.bf16.gmra.mxu1 %v12640_v60  ;;  %v4944_v11 = vpop.f32.mrf.mxu3  ;;  %v4868_v50 = vpop.f32.mrf.mxu2 }
 0x8b4   : > { %v12811_v60 = vpop.f32.mrf.mxu0 }
 0x8b8   : > { %4986 = vmatmul.bf16.gmra.mxu3 %v12806_v62 }
 0x8bb   : > { %v4947_v19 = vpop.f32.mrf.mxu3  ;;  %v4870_v35 = vpop.f32.mrf.mxu2 }
 0x8bc   : > { %v4948_v40 = vadd.f32 %v4947_v19, %v4859_v45  ;;  %v5012_v19 = vadd.f32 %v12755_v29, %v14083_v16  ;;  %v5191_v29 = vmax.f32 %v12775_v47, 0.0 }
 0x8be   : > { %v5199_v1 = vmax.f32 %v4948_v40, 0.0 }
 0x8c3   : > { %5080 = vmatmul.bf16.gmra.mxu0 %v12675_v26  ;;  %5129 = vmatmul.bf16.gmra.mxu1 %v12677_v54  ;;  %v4949_v12 = vpop.f32.mrf.mxu3  ;;  %v5007_v26 = vadd.f32 %v12728_v46, %v14081_v34  ;;  %v4873_v27 = vpop.f32.mrf.mxu2 }
 0x8c4   : > { %v4950_v34 = vadd.f32 %v4949_v12, %v4861_v42  ;;  %v4869_v12 = vadd.f32 %v4868_v50, %v14097_v18 }
 0x8c6   : > { %v5201_v30 = vmax.f32 %v4950_v34, 0.0 }
 0x8c8   : > { %4991 = vmatmul.bf16.gmra.mxu3 %v12821_v15 }
 0x8cb   : > { %v4952_v39 = vpop.f32.mrf.mxu3  ;;  %v4875_v55 = vpop.f32.mrf.mxu2 }
 0x8cc   : > { %v4953_v51 = vadd.f32 %v4952_v39, %v4864_v6  ;;  %v4854_v39 = vadd.f32 %v12732_v2, %v14095_v59 }
 0x8ce   : > { %v5203_v5 = vmax.f32 %v4953_v51, 0.0  ;;  %v4943_v42 = vadd.f32 %v4942_v13, %v4854_v39 }
 0x8d0   : > { %v5095_v54 = vpop.f32.mrf.mxu1  ;;  %v5195_v34 = vmax.f32 %v4943_v42, 0.0 }
 0x8d1   : > { %v12826_v9 = vadd.f32 %v5095_v54, %v5007_v26  ;;  %v4945_v54 = vadd.f32 %v4944_v11, %v4856_v28  ;;  %v5251_v11 = vpack.c.bf16 %v5201_v30, %v5199_v1  ;;  %v14098_v28 = vld [vmem:[#allocation140_spill] sm:$0xff] }
 0x8d2   : > { %v4871_v16 = vadd.f32 %v4870_v35, %v14098_v28 }
 0x8d3   : > { %5134 = vmatmul.bf16.gmra.mxu1 %v12693_v22  ;;  %v4954_v36 = vpop.f32.mrf.mxu3  ;;  %v5197_v2 = vmax.f32 %v4945_v54, 0.0 }
 0x8d4   : > { %v4955_v46 = vadd.f32 %v4954_v36, %v4866_v14  ;;  %v12846_v14 = vpop.f32.mrf.mxu0  ;;  %v4940_v36 = vadd.f32 %v12789_v32, %v4851_v0  ;;  %v5014_v32 = vadd.f32 %v12771_v25, %v14084_v24  ;;  %v14099_v0 = vld [vmem:[#allocation106_spill] sm:$0xff]  ;;  %v5017_v24 = vadd.f32 %v12779_v20, %v14085_v23 }
 0x8d5   : > { %v5249_v13 = vpack.c.bf16 %v5197_v2, %v5195_v34  ;;  %v4874_v35 = vadd.f32 %v4873_v27, %v14099_v0  ;;  %v14100_v27 = vld [vmem:[#allocation136_spill] sm:$0xff]  ;;  %v5019_v20 = vadd.f32 %v12794_v61, %v14086_v43  ;;  %v5176_v61 = vmax.f32 %v12826_v9, 0.0 }
 0x8d6   : > { %v5205_v22 = vmax.f32 %v4955_v46, 0.0  ;;  %v5193_v50 = vmax.f32 %v4940_v36, 0.0  ;;  %v4878_v46 = vpop.f32.mrf.mxu2  ;;  %v4876_v36 = vadd.f32 %v4875_v55, %v14100_v27  ;;  %v5024_v9 = vadd.f32 %v12811_v60, %v14088_v58 }
 0x8d8   : > { %v5097_v8 = vpop.f32.mrf.mxu1  ;;  %v5253_v6 = vpack.c.bf16 %v5205_v22, %v5203_v5  ;;  %v5247_v5 = vpack.c.bf16 %v5193_v50, %v5191_v29  ;;  %v5022_v29 = vadd.f32 %v12808_v57, %v14087_v49 }
 0x8d9   : > { %v12837_v26 = vadd.f32 %v5097_v8, %v5009_v52 }
 0x8da   : > { %5285 = vmatpush.bf16.msrb.mxu2 %v5253_v6 }
 0x8db   : > { %v4957_v51 = vpop.f32.mrf.mxu3  ;;  %v5178_v50 = vmax.f32 %v12837_v26, 0.0 }
 0x8dc   : > { %v4958_v45 = vadd.f32 %v4957_v51, %v4869_v12  ;;  %v12856_v22 = vpop.f32.mrf.mxu0 }
 0x8de   : > { %5286 = vmatpush.bf16.msrb.mxu2 %v5251_v11  ;;  %v5207_v54 = vmax.f32 %v4958_v45, 0.0  ;;  %v4880_v47 = vpop.f32.mrf.mxu2 }
 0x8e0   : > { %v5100_v52 = vpop.f32.mrf.mxu1 }
 0x8e1   : > { %v12849_v31 = vadd.f32 %v5100_v52, %v5012_v19  ;;  %v12870_v19 = vld [vmem:[%s13417_s19] sm:$0xff] }
 0x8e2   : > { %5287 = vmatpush.bf16.msrb.mxu2 %v5249_v13 }
 0x8e3   : > { %5139 = vmatmul.bf16.gmra.mxu1 %v12708_v63  ;;  %v4959_v8 = vpop.f32.mrf.mxu3 }
 0x8e4   : > { %v4960_v40 = vadd.f32 %v4959_v8, %v4871_v16  ;;  %v12872_v51 = vpop.f32.mrf.mxu0 }
 0x8e6   : > { %v5209_v30 = vmax.f32 %v4960_v40, 0.0  ;;  %5288 = vmatpush.bf16.msrb.mxu2 %v5247_v5  ;;  %v4883_v2 = vpop.f32.mrf.mxu2  ;;  %v14102_v5 = vld [vmem:[#allocation103_spill] sm:$0xff] }
 0x8e8   : > { %v5102_v39 = vpop.f32.mrf.mxu1  ;;  %v12858_v63 = vpack.c.bf16 %v5209_v30, %v5207_v54 }
 0x8e9   : > { %v5103_v6 = vadd.f32 %v5102_v39, %v5014_v32  ;;  %v12893_v32 = vpack.c.bf16 %v5178_v50, %v5176_v61  ;;  %v4881_v39 = vadd.f32 %v4880_v47, %v14102_v5 }
 0x8ea   : > { %5289 = vmatpush.bf16.msrb.mxu2 %v12804_v7  ;;  %v5279_v7 = vunpack.c.l.b16 %v12870_v19 }
 0x8eb   : > { %v4962_v12 = vpop.f32.mrf.mxu3 }
 0x8ec   : > { %v4963_v25 = vadd.f32 %v4962_v12, %v4874_v35  ;;  %v12880_v11 = vpack.c.b16 %v5279_v7, %v5279_v7  ;;  %v12886_v55 = vpop.f32.mrf.mxu0  ;;  %v14103_v7 = vld [vmem:[#allocation134_spill] sm:$0xff] }
 0x8ee   : > { %5290 = vmatpush.bf16.msrb.mxu2 %v12787_v21  ;;  %v5211_v52 = vmax.f32 %v4963_v25, 0.0  ;;  %v4885_v26 = vpop.f32.mrf.mxu2 }
 0x8f0   : > { %v5105_v42 = vpop.f32.mrf.mxu1 }
 0x8f1   : > { %v12865_v1 = vadd.f32 %v5105_v42, %v5017_v24  ;;  %v5182_v24 = vmax.f32 %v5103_v6, 0.0  ;;  %v14104_v6 = vld [vmem:[#allocation135_spill] sm:$0xff] }
 0x8f2   : > { %5291 = vmatpush.bf16.msrb.mxu2 %v12767_v48  ;;  %v14101_v48 = vld [vmem:[#allocation74_spill] sm:$0xff] }
 0x8f3   : > { %5144 = vmatmul.bf16.gmra.mxu1 %v12725_v33  ;;  %v4964_v23 = vpop.f32.mrf.mxu3  ;;  %v4879_v43 = vadd.f32 %v4878_v46, %v14101_v48 }
 0x8f4   : > { %v4965_v21 = vadd.f32 %v4964_v23, %v4876_v36  ;;  %v12897_v54 = vpop.f32.mrf.mxu0  ;;  %v4884_v36 = vadd.f32 %v4883_v2, %v14103_v7  ;;  %v5027_v23 = vadd.f32 %v12846_v14, %v14089_v38 }
 0x8f6   : > { %v5213_v34 = vmax.f32 %v4965_v21, 0.0  ;;  %5292 = vmatpush.bf16.msrb.mxu2 %v12744_v10  ;;  %v4888_v42 = vpop.f32.mrf.mxu2 }
 0x8f8   : > { %v5107_v45 = vpop.f32.mrf.mxu1  ;;  %v12884_v13 = vpack.c.bf16 %v5213_v34, %v5211_v52  ;;  %v4886_v52 = vadd.f32 %v4885_v26, %v14104_v6 }
 0x8f9   : > { %v5108_v33 = vadd.f32 %v5107_v45, %v5019_v20  ;;  %5293 = vmatmul.bf16.vlgmr.msrb.gmra.mxu2 %v12880_v11 }
 0x8fb   : > { %v4967_v16 = vpop.f32.mrf.mxu3  ;;  %v5186_v38 = vmax.f32 %v5108_v33, 0.0 }
 0x8fc   : > { %v4968_v8 = vadd.f32 %v4967_v16, %v4879_v43  ;;  %v5038_v58 = vpop.f32.mrf.mxu0 }
 0x8fe   : > { %v5215_v12 = vmax.f32 %v4968_v8, 0.0  ;;  %v12913_v34 = vpop.f32.mrf.mxu2 }
 0x900   : > { %v5110_v10 = vpop.f32.mrf.mxu1 }
 0x901   : > { %v5111_v40 = vadd.f32 %v5110_v10, %v5022_v29  ;;  %v14105_v29 = vld [vmem:[#allocation101_spill] sm:$0xff]  ;;  %v5184_v10 = vmax.f32 %v12865_v1, 0.0 }
 0x902   : > { %v4889_v8 = vadd.f32 %v4888_v42, %v14105_v29  ;;  %v5034_v29 = vadd.f32 %v12886_v55, %v14094_v41 }
 0x903   : > { %5149 = vmatmul.bf16.gmra.mxu1 %v12748_v53  ;;  %v4969_v30 = vpop.f32.mrf.mxu3  ;;  %v5180_v53 = vmax.f32 %v12849_v31, 0.0 }
 0x904   : > { %v4970_v46 = vadd.f32 %v4969_v30, %v4881_v39  ;;  %v5041_v16 = vpop.f32.mrf.mxu0 }
 0x905   : > { %v12907_v21 = vpack.c.bf16 %v5182_v24, %v5180_v53  ;;  %v5188_v24 = vmax.f32 %v5111_v40, 0.0  ;;  %v5042_v40 = vadd.f32 %v5041_v16, %v14090_v37 }
 0x906   : > { %v5217_v49 = vmax.f32 %v4970_v46, 0.0  ;;  %v12923_v26 = vpop.f32.mrf.mxu2 }
 0x908   : > { %v5112_v35 = vpop.f32.mrf.mxu1  ;;  %v12901_v25 = vpack.c.bf16 %v5217_v49, %v5215_v12 }
 0x909   : > { %v5113_v57 = vadd.f32 %v5112_v35, %v5024_v9 }
 0x90b   : > { %v4972_v47 = vpop.f32.mrf.mxu3  ;;  %v5190_v49 = vmax.f32 %v5113_v57, 0.0 }
 0x90c   : > { %v4973_v20 = vadd.f32 %v4972_v47, %v4884_v36  ;;  %v5043_v46 = vpop.f32.mrf.mxu0 }
 0x90d   : > { %v12932_v36 = vpack.c.bf16 %v5190_v49, %v5188_v24 }
 0x90e   : > { %v5219_v43 = vmax.f32 %v4973_v20, 0.0  ;;  %v12928_v12 = vpop.f32.mrf.mxu2 }
 0x910   : > { %v5115_v60 = vpop.f32.mrf.mxu1 }
 0x911   : > { %v12909_v45 = vadd.f32 %v5115_v60, %v5027_v23 }
 0x913   : > { %5154 = vmatmul.bf16.gmra.mxu1 %v12769_v3  ;;  %v4974_v2 = vpop.f32.mrf.mxu3  ;;  %v12921_v3 = vpack.c.bf16 %v5186_v38, %v5184_v10  ;;  %v14106_v10 = vld [vmem:[#allocation123_spill] sm:$0xff] }
 0x914   : > { %v4975_v50 = vadd.f32 %v4974_v2, %v4886_v52  ;;  %v5046_v42 = vpop.f32.mrf.mxu0 }
 0x916   : > { %v5221_v61 = vmax.f32 %v4975_v50, 0.0  ;;  %v4898_v47 = vpop.f32.mrf.mxu2 }
 0x918   : > { %v5117_v31 = vpop.f32.mrf.mxu1  ;;  %v12915_v14 = vpack.c.bf16 %v5221_v61, %v5219_v43  ;;  %v5039_v43 = vadd.f32 %v5038_v58, %v14091_v56  ;;  %v5044_v61 = vadd.f32 %v5043_v46, %v14092_v17  ;;  %v5032_v56 = vadd.f32 %v12872_v51, %v14095_v59 }
 0x919   : > { %v5029_v46 = vadd.f32 %v12856_v22, %v14096_v4  ;;  %v14109_v4 = vld [vmem:[#allocation69_spill] sm:$0xff] }
 0x91b   : > { %v4977_v39 = vpop.f32.mrf.mxu3  ;;  %v5118_v41 = vadd.f32 %v5117_v31, %v5029_v46 }
 0x91c   : > { %v12919_v30 = vadd.f32 %v4977_v39, %v4889_v8  ;;  %v5037_v39 = vadd.f32 %v12897_v54, %v14106_v10 }
 0x91e   : > { %v4900_v60 = vpop.f32.mrf.mxu2 }
 0x920   : > { %v5120_v9 = vpop.f32.mrf.mxu1 }
 0x923   : > { %5159 = vmatmul.bf16.gmra.mxu1 %v12791_v44  ;;  %v12926_v35 = vpop.f32.mrf.mxu3  ;;  %v5048_v44 = vpop.f32.mrf.mxu0 }
 0x926   : > { %v4903_v38 = vpop.f32.mrf.mxu2 }
 0x928   : > { %v5122_v33 = vpop.f32.mrf.mxu1 }
 0x929   : > { %v5123_v17 = vadd.f32 %v5122_v33, %v5034_v29  ;;  %v14108_v29 = vld [vmem:[#allocation126_spill] sm:$0xff] }
 0x92a   : > { %v4901_v33 = vadd.f32 %v4900_v60, %v14108_v29 }
 0x92b   : > { %v12930_v1 = vpop.f32.mrf.mxu3  ;;  %v12937_v50 = vpop.f32.mrf.mxu0 }
 0x930   : > { %v5125_v53 = vpop.f32.mrf.mxu1 }
 0x931   : > { %v5126_v6 = vadd.f32 %v5125_v53, %v5037_v39  ;;  %v5198_v53 = vmax.f32 %v5123_v17, 0.0 }
 0x933   : > { %5164 = vmatmul.bf16.gmra.mxu1 %v12806_v62  ;;  %v12935_v23 = vpop.f32.mrf.mxu3  ;;  %v12947_v37 = vpop.f32.mrf.mxu0 }
 0x938   : > { %v5127_v20 = vpop.f32.mrf.mxu1 }
 0x939   : > { %v5128_v49 = vadd.f32 %v5127_v20, %v5039_v43  ;;  %v5047_v20 = vadd.f32 %v5046_v42, %v14097_v18  ;;  %v14110_v42 = vld [vmem:[#allocation124_spill] sm:$0xff] }
 0x93a   : > { %v4899_v39 = vadd.f32 %v4898_v47, %v14110_v42 }
 0x93b   : > { %v4987_v52 = vpop.f32.mrf.mxu3  ;;  %v5202_v58 = vmax.f32 %v5128_v49, 0.0  ;;  %v5049_v49 = vadd.f32 %v5048_v44, %v14098_v28 }
 0x940   : > { %v5130_v2 = vpop.f32.mrf.mxu1 }
 0x941   : > { %v5131_v62 = vadd.f32 %v5130_v2, %v5042_v40  ;;  %v5121_v2 = vadd.f32 %v5120_v9, %v5032_v56  ;;  %v5200_v40 = vmax.f32 %v5126_v6, 0.0  ;;  %v5056_v9 = vpop.f32.mrf.mxu0  ;;  %v5192_v6 = vmax.f32 %v12909_v45, 0.0 }
 0x943   : > { %5169 = vmatmul.bf16.gmra.mxu1 %v12821_v15  ;;  %v4989_v57 = vpop.f32.mrf.mxu3  ;;  %v5204_v15 = vmax.f32 %v5131_v62, 0.0  ;;  %v5252_v43 = vpack.c.bf16 %v5202_v58, %v5200_v40  ;;  %v4905_v62 = vpop.f32.mrf.mxu2  ;;  %v5196_v51 = vmax.f32 %v5121_v2, 0.0  ;;  %v4988_v58 = vadd.f32 %v4987_v52, %v4899_v39 }
 0x944   : > { %v4906_v22 = vadd.f32 %v4905_v62, %v14109_v4 }
 0x945   : > { %v5250_v10 = vpack.c.bf16 %v5198_v53, %v5196_v51  ;;  %v5052_v53 = vadd.f32 %v12937_v50, %v14099_v0  ;;  %v5054_v0 = vadd.f32 %v12947_v37, %v14100_v27 }
 0x948   : > { %v5132_v8 = vpop.f32.mrf.mxu1 }
 0x949   : > { %v5133_v24 = vadd.f32 %v5132_v8, %v5044_v61  ;;  %v14107_v8 = vld [vmem:[#allocation43_spill] sm:$0xff] }
 0x94a   : > { %v4904_v59 = vadd.f32 %v4903_v38, %v14107_v8  ;;  %v14111_v38 = vld [vmem:[#allocation93_spill] sm:$0xff] }
 0x94b   : > { %v5206_v7 = vmax.f32 %v5133_v24, 0.0  ;;  %v4992_v54 = vpop.f32.mrf.mxu3  ;;  %v4990_v24 = vadd.f32 %v4989_v57, %v4901_v33  ;;  %v4896_v56 = vadd.f32 %v12928_v12, %v14111_v38  ;;  %v14113_v57 = vld [vmem:[#allocation132_spill] sm:$0xff] }
 0x94c   : > { %v4993_v18 = vadd.f32 %v4992_v54, %v4904_v59 }
 0x94d   : > { %v5254_v16 = vpack.c.bf16 %v5206_v7, %v5204_v15  ;;  %v5194_v7 = vmax.f32 %v5118_v41, 0.0  ;;  %v4985_v2 = vadd.f32 %v12935_v23, %v4896_v56  ;;  %v5233_v47 = vmax.f32 %v4990_v24, 0.0 }
 0x94e   : > { %v4891_v41 = vadd.f32 %v12913_v34, %v14113_v57 }
 0x94f   : > { %5311 = vmatpush.bf16.msra.mxu2 %v5254_v16  ;;  %v5248_v17 = vpack.c.bf16 %v5194_v7, %v5192_v6  ;;  %v5235_v16 = vmax.f32 %v4993_v18, 0.0  ;;  %v5229_v23 = vmax.f32 %v4985_v2, 0.0  ;;  %v5223_v7 = vmax.f32 %v12919_v30, 0.0 }
 0x950   : > { %v5135_v55 = vpop.f32.mrf.mxu1  ;;  %v5057_v30 = vadd.f32 %v5056_v9, %v14101_v48  ;;  %v5280_v18 = vunpack.c.h.b16 %v12870_v19  ;;  %v14114_v9 = vld [vmem:[#allocation134_spill] sm:$0xff] }
 0x951   : > { %v5136_v61 = vadd.f32 %v5135_v55, %v5047_v20  ;;  %v14112_v20 = vld [vmem:[#allocation129_spill] sm:$0xff]  ;;  %v5231_v55 = vmax.f32 %v4988_v58, 0.0 }
 0x952   : > { %v4894_v45 = vadd.f32 %v12923_v26, %v14112_v20  ;;  %v4980_v26 = vadd.f32 %v12926_v35, %v4891_v41 }
 0x953   : > { %5312 = vmatpush.bf16.msra.mxu2 %v5252_v43  ;;  %v4994_v31 = vpop.f32.mrf.mxu3  ;;  %v5208_v28 = vmax.f32 %v5136_v61, 0.0  ;;  %v5267_v43 = vpack.c.bf16 %v5233_v47, %v5231_v55  ;;  %v5058_v61 = vpop.f32.mrf.mxu0 }
 0x954   : > { %v4995_v15 = vadd.f32 %v4994_v31, %v4906_v22  ;;  %v4983_v12 = vadd.f32 %v12930_v1, %v4894_v45  ;;  %v5225_v51 = vmax.f32 %v4980_v26, 0.0  ;;  %v5059_v6 = vadd.f32 %v5058_v61, %v14102_v5 }
 0x956   : > { %v5237_v46 = vmax.f32 %v4995_v15, 0.0  ;;  %v5227_v59 = vmax.f32 %v4983_v12, 0.0  ;;  %v5263_v35 = vpack.c.bf16 %v5225_v51, %v5223_v7  ;;  %v14115_v15 = vld [vmem:[#allocation135_spill] sm:$0xff] }
 0x957   : > { %5313 = vmatpush.bf16.msra.mxu2 %v5250_v10 }
 0x958   : > { %v5137_v60 = vpop.f32.mrf.mxu1  ;;  %v5269_v40 = vpack.c.bf16 %v5237_v46, %v5235_v16  ;;  %v5265_v1 = vpack.c.bf16 %v5229_v23, %v5227_v59 }
 0x959   : > { %v5138_v54 = vadd.f32 %v5137_v60, %v5049_v49 }
 0x95a   : > { %5298 = vmatpush.bf16.msrb.mxu3 %v5269_v40 }
 0x95b   : > { %v5210_v44 = vmax.f32 %v5138_v54, 0.0  ;;  %5314 = vmatpush.bf16.msra.mxu2 %v5248_v17  ;;  %v5061_v33 = vpop.f32.mrf.mxu0  ;;  %v14116_v54 = vld [vmem:[#allocation101_spill] sm:$0xff] }
 0x95c   : > { %v5062_v49 = vadd.f32 %v5061_v33, %v14114_v9 }
 0x95d   : > { %v12968_v52 = vpack.c.bf16 %v5210_v44, %v5208_v28 }
 0x95e   : > { %5299 = vmatpush.bf16.msrb.mxu3 %v5267_v43 }
 0x95f   : > { %5315 = vmatpush.bf16.msra.mxu2 %v12932_v36 }
 0x960   : > { %v5140_v62 = vpop.f32.mrf.mxu1 }
 0x961   : > { %v5141_v34 = vadd.f32 %v5140_v62, %v5052_v53 }
 0x962   : > { %5300 = vmatpush.bf16.msrb.mxu3 %v5265_v1 }
 0x963   : > { %5316 = vmatpush.bf16.msra.mxu2 %v12921_v3  ;;  %v5212_v22 = vmax.f32 %v5141_v34, 0.0  ;;  %v5063_v37 = vpop.f32.mrf.mxu0 }
 0x964   : > { %v5064_v5 = vadd.f32 %v5063_v37, %v14115_v15 }
 0x966   : > { %5301 = vmatpush.bf16.msrb.mxu3 %v5263_v35 }
 0x967   : > { %5317 = vmatpush.bf16.msra.mxu2 %v12907_v21 }
 0x968   : > { %v5142_v50 = vpop.f32.mrf.mxu1 }
 0x969   : > { %v5143_v36 = vadd.f32 %v5142_v50, %v5054_v0 }
 0x96a   : > { %5302 = vmatpush.bf16.msrb.mxu3 %v12915_v14 }
 0x96b   : > { %v5214_v10 = vmax.f32 %v5143_v36, 0.0  ;;  %5318 = vmatpush.bf16.msra.mxu2 %v12893_v32  ;;  %v12989_v32 = vpack.c.b16 %v5280_v18, %v5280_v18 }
 0x96d   : > { %v12981_v3 = vpack.c.bf16 %v5214_v10, %v5212_v22 }
 0x96e   : > { %5319 = vmatmul.bf16.vlgmr.msra.gmra.mxu2 %v12880_v11  ;;  %5303 = vmatpush.bf16.msrb.mxu3 %v12901_v25  ;;  %v5066_v25 = vpop.f32.mrf.mxu0 }
 0x96f   : > { %v5067_v45 = vadd.f32 %v5066_v25, %v14116_v54 }
 0x970   : > { %v5145_v27 = vpop.f32.mrf.mxu1 }
 0x971   : > { %v5146_v21 = vadd.f32 %v5145_v27, %v5057_v30 }
 0x972   : > { %5304 = vmatpush.bf16.msrb.mxu3 %v12884_v13 }
 0x973   : > { %v5216_v11 = vmax.f32 %v5146_v21, 0.0 }
 0x976   : > { %5305 = vmatpush.bf16.msrb.mxu3 %v12858_v63  ;;  %v5068_v17 = vpop.f32.mrf.mxu0 }
 0x978   : > { %v5147_v14 = vpop.f32.mrf.mxu1 }
 0x979   : > { %v5148_v31 = vadd.f32 %v5147_v14, %v5059_v6  ;;  %5306 = vmatmul.bf16.vlgmr.msrb.gmra.mxu3 %v12989_v32 }
 0x97b   : > { %v5218_v39 = vmax.f32 %v5148_v31, 0.0 }
 0x97c   : > { %v12994_v24 = vpop.f32.mrf.mxu2 }
 0x97d   : > { %v5260_v48 = vpack.c.bf16 %v5218_v39, %v5216_v11 }
 0x97e   : > { %v5071_v40 = vpop.f32.mrf.mxu0 }
 0x97f   : > { %v5072_v30 = vadd.f32 %v5071_v40, %v14112_v20  ;;  %v14117_v20 = vld [vmem:[#allocation125_spill] sm:$0xff] }
 0x980   : > { %v5150_v19 = vpop.f32.mrf.mxu1 }
 0x981   : > { %v5151_v13 = vadd.f32 %v5150_v19, %v5062_v49 }
 0x983   : > { %v5220_v63 = vmax.f32 %v5151_v13, 0.0 }
 0x984   : > { %v5296_v56 = vpop.f32.mrf.mxu2 }
 0x986   : > { %v5073_v44 = vpop.f32.mrf.mxu0 }
 0x987   : > { %v5074_v36 = vadd.f32 %v5073_v44, %v14111_v38 }
 0x988   : > { %v5152_v60 = vpop.f32.mrf.mxu1 }
 0x989   : > { %v5153_v58 = vadd.f32 %v5152_v60, %v5064_v5  ;;  %v14118_v5 = vld [vmem:[#allocation141_spill] sm:$0xff] }
 0x98a   : > { %v5295_v56 = vadd.f32 %v12994_v24, %v14118_v5 }
 0x98b   : > { %v5222_v16 = vmax.f32 %v5153_v58, 0.0 }
 0x98d   : > { %v5262_v46 = vpack.c.bf16 %v5222_v16, %v5220_v63 }
 0x98e   : > { %v5076_v12 = vpop.f32.mrf.mxu0 }
 0x98f   : > { %v5077_v0 = vadd.f32 %v5076_v12, %v14110_v42 }
 0x990   : > { %v5155_v2 = vpop.f32.mrf.mxu1 }
 0x991   : > { %v5156_v47 = vadd.f32 %v5155_v2, %v5067_v45 }
 0x993   : > { %v5224_v11 = vmax.f32 %v5156_v47, 0.0 }
 0x996   : > { %v5078_v53 = vpop.f32.mrf.mxu0 }
 0x997   : > { %v5079_v34 = vadd.f32 %v5078_v53, %v14108_v29  ;;  %v5069_v29 = vadd.f32 %v5068_v17, %v14113_v57  ;;  %v6311_v57 = vmax.f32 %v14117_v20, 0.0 }
 0x998   : > { %v5157_v28 = vpop.f32.mrf.mxu1 }
 0x999   : > { %v5158_v18 = vadd.f32 %v5157_v28, %v5069_v29  ;;  %v6315_v25 = vmul.f32 5.55473, %v6311_v57  ;;  %v14122_v29 = vld [vmem:[#allocation27_spill] sm:$0xff] }
 0x99b   : > { %v5226_v31 = vmax.f32 %v5158_v18, 0.0  ;;  %v6317_v49 = vadd.f32 6.8316, %v6315_v25 }
 0x99d   : > { %v5264_v39 = vpack.c.bf16 %v5226_v31, %v5224_v11  ;;  %v6319_v19 = vsub.f32 0.0, %v6317_v49 }
 0x99e   : > { %v5081_v43 = vpop.f32.mrf.mxu0 }
 0x99f   : > { %v5082_v59 = vadd.f32 %v5081_v43, %v14107_v8  ;;  %v6321_v15 = vmul.f32 %v6319_v19, %v6311_v57 }
 0x9a0   : > { %v5160_v41 = vpop.f32.mrf.mxu1 }
 0x9a1   : > { %v5161_v37 = vadd.f32 %v5160_v41, %v5072_v30  ;;  %v6323_v17 = vmul.f32 0.6931472, %v6321_v15 }
 0x9a3   : > { %v5228_v14 = vmax.f32 %v5161_v37, 0.0  ;;  %v6325_v58 = vmul.f32 1.442695, %v6323_v17  ;;  %v6720_v37 = vperm.slane %v14122_v29, 4  ;;  %v14126_v17 = vld [vmem:[#allocation30_spill] sm:$0xff] }
 0x9a6   : > { %v5083_v62 = vpop.f32.mrf.mxu0 }
 0x9a7   : > { %v5084_v51 = vadd.f32 %v5083_v62, %v14109_v4 }
 0x9a8   : > { %v5162_v55 = vpop.f32.mrf.mxu1 }
 0x9a9   : > { %v5163_v27 = vadd.f32 %v5162_v55, %v5074_v36 }
 0x9ab   : > { %v5230_v6 = vmax.f32 %v5163_v27, 0.0 }
 0x9ad   : > { %v5266_v38 = vpack.c.bf16 %v5230_v6, %v5228_v14  ;;  %v14123_v6 = vld [vmem:[#allocation143_spill] sm:$0xff]  ;;  %v14124_v14 = vld [vmem:[#allocation142_spill] sm:$0xff] }
 0x9ae   : > { %v6722_v31 = vmul.f32 %v6720_v37, %v14124_v14 }
 0x9b0   : > { %v5165_v26 = vpop.f32.mrf.mxu1 }
 0x9b1   : > { %v5166_v33 = vadd.f32 %v5165_v26, %v5077_v0 }
 0x9b3   : > { %v5232_v4 = vmax.f32 %v5166_v33, 0.0 }
 0x9b8   : > { %v5167_v23 = vpop.f32.mrf.mxu1 }
 0x9b9   : > { %v5168_v35 = vadd.f32 %v5167_v23, %v5079_v34  ;;  %v14120_v23 = vld [vmem:[#allocation76_spill] sm:$0xff] }
 0x9ba   : > { %v6345_v43 = vmax.f32 %v14120_v23, 0.0 }
 0x9bb   : > { %v5234_v21 = vmax.f32 %v5168_v35, 0.0 }
 0x9bd   : > { %v5268_v42 = vpack.c.bf16 %v5234_v21, %v5232_v4  ;;  %v14121_v21 = vld [vmem:[#allocation65_spill] sm:$0xff] }
 0x9c0   : > { %v5170_v61 = vpop.f32.mrf.mxu1 }
 0x9c1   : > { %v5171_v1 = vadd.f32 %v5170_v61, %v5082_v59  ;;  %v6397_v59 = vmul.f32 4.0, %v6345_v43 }
 0x9c3   : > { %v5236_v22 = vmax.f32 %v5171_v1, 0.0 }
 0x9c8   : > { %v5172_v7 = vpop.f32.mrf.mxu1 }
 0x9c9   : > { %v5173_v50 = vadd.f32 %v5172_v7, %v5084_v51 }
 0x9cb   : > { %v5238_v10 = vmax.f32 %v5173_v50, 0.0 }
 0x9cd   : > { %v5270_v8 = vpack.c.bf16 %v5238_v10, %v5236_v22 }
 0x9cf   : > { %5324 = vmatpush.bf16.msra.mxu3 %v5270_v8  ;;  %v6716_v8 = vperm.slane %v14121_v21, 4 }
 0x9d3   : > { %5325 = vmatpush.bf16.msra.mxu3 %v5268_v42  ;;  %v6718_v42 = vmul.f32 %v6716_v8, %v14123_v6 }
 0x9d5   : > { %v6724_v19 = vadd.f32 %v6722_v31, %v6718_v42 }
 0x9d7   : > { %5326 = vmatpush.bf16.msra.mxu3 %v5266_v38 }
 0x9db   : > { %5327 = vmatpush.bf16.msra.mxu3 %v5264_v39  ;;  %v14125_v39 = vld [vmem:[#allocation58_spill] sm:$0xff] }
 0x9dc   : > { %v6726_v20 = vperm.slane %v14125_v39, 4 }
 0x9df   : > { %5328 = vmatpush.bf16.msra.mxu3 %v5262_v46 }
 0x9e3   : > { %5329 = vmatpush.bf16.msra.mxu3 %v5260_v48 }
 0x9e7   : > { %5330 = vmatpush.bf16.msra.mxu3 %v12981_v3 }
 0x9eb   : > { %5331 = vmatpush.bf16.msra.mxu3 %v12968_v52 }
 0x9ee   : > { %5332 = vmatmul.bf16.vlgmr.msra.gmra.mxu3 %v12989_v32  ;;  %v14119_v32 = vld [vmem:[#allocation144_spill] sm:$0xff] }
 0x9ef   : > { %v6213_v16 = vmul.f32 4.0, %v14119_v32  ;;  %v6399_v22 = vmul.f32 %v6397_v59, %v14119_v32 }
 0x9f1   : > { %v13009_v9 = vpop.f32.mrf.mxu2  ;;  %v6215_v2 = vadd.f32 1e-08, %v6213_v16  ;;  %v6401_v4 = vadd.f32 1e-08, %v6399_v22  ;;  %v6792_v22 = vperm.slane %v14120_v23, 4 }
 0x9f9   : > { %v5322_v13 = vpop.f32.mrf.mxu2 }
 0x9fc   : > { %v5307_v48 = vpop.f32.mrf.mxu3 }
 0x9fd   : > { %v5308_v60 = vadd.f32 %v5307_v48, %v5295_v56  ;;  %v6728_v48 = vmul.f32 %v6726_v20, %v14126_v17 }
 0x9ff   : > { %v5345_v3 = vmul.f32 0.5, %v5308_v60  ;;  %v13024_v60 = vpop.permute.xlu2 %6501 }
 0xa01   : > { %8032 = vtanh.f32 %v5345_v3 }
 0xa02   : > { %8034 = vpow2.f32 %v6325_v58 }
 0xa03   : > { %8036 = vrcp.f32 %v6215_v2 }
 0xa04   : > { %v5309_v52 = vpop.f32.mrf.mxu3 }
 0xa07   : > { %v8033_v63 = vpop.eup %8032 }
 0xa08   : > { %v5349_v46 = vadd.f32 1.0, %v8033_v63  ;;  %v8035_v54 = vpop.eup %8034  ;;  %v6730_v63 = vadd.f32 %v6728_v48, %v6724_v19 }
 0xa09   : > { %v6329_v28 = vperm.slane %v8035_v54, 0  ;;  %v8037_v34 = vpop.eup %8036 }
 0xa0a   : > { %v5351_v45 = vmul.f32 0.5, %v5349_v46  ;;  %v6221_v33 = vrot.slane %v8037_v34, 4 }
 0xa0c   : > { %v6123_v47 = vmul.f32 %v5351_v45, %v5351_v45  ;;  %v6313_v40 = vsub.f32 1.0, %v5351_v45  ;;  %v6347_v44 = vadd.f32 1.0, %v5351_v45 }
 0xa0e   : > { %v6125_v24 = vmul.f32 %v6123_v47, %v6123_v47  ;;  %v6331_v41 = vmul.f32 %v6329_v28, %v6313_v40  ;;  %v6349_v12 = vmul.f32 %v6347_v44, %v6347_v44 }
 0xa10   : > { %v6127_v55 = vadd.f32 1e-08, %v6125_v24  ;;  %v6333_v53 = vadd.f32 %v6331_v41, %v5351_v45  ;;  %v6351_v26 = vmul.f32 0.125, %v6349_v12 }
 0xa12   : > { %8038 = vrcp.f32 %v6127_v55  ;;  %v6353_v61 = vsub.f32 1.0, %v6351_v26  ;;  %v6365_v1 = vrot.slane %v6351_v26, 4 }
 0xa14   : > { %v6357_v62 = vrot.slane %v6353_v61, 4 }
 0xa16   : > { %v6361_v51 = vmul.f32 %v6357_v62, %v6345_v43  ;;  %v6377_v7 = vmul.f32 %v6357_v62, %v14119_v32 }
 0xa18   : > { %v8039_v0 = vpop.eup %8038  ;;  %v6369_v35 = vadd.f32 %v6365_v1, %v6361_v51  ;;  %v6379_v50 = vadd.f32 %v6377_v7, %v6365_v1 }
 0xa19   : > { %v6131_v36 = vmul.f32 2.0, %v8039_v0  ;;  %v6133_v3 = vmul.f32 0.31830987, %v8039_v0 }
 0xa1a   : > { %v6371_v10 = vadd.f32 1e-08, %v6369_v35  ;;  %v6381_v30 = vadd.f32 1e-08, %v6379_v50 }
 0xa1b   : > { %v6225_v27 = vmul.f32 %v6221_v33, %v6131_v36  ;;  %v14127_v36 = vld [vmem:[#allocation145_spill] sm:$0xff] }
 0xa1c   : > { %8040 = vrcp.f32 %v6371_v10 }
 0xa1d   : > { %8042 = vrcp.f32 %v6381_v30  ;;  %v6417_v18 = vadd.f32 1e-08, %v6225_v27  ;;  %v6774_v1 = vperm.slane %v6225_v27, 0 }
 0xa1f   : > { %8044 = vrcp.f32 %v6417_v18 }
 0xa20   : > { %8046 = vrcp.f32 %v6401_v4 }
 0xa22   : > { %v8041_v38 = vpop.eup %8040 }
 0xa23   : > { %v8043_v11 = vpop.eup %8042  ;;  %v6375_v57 = vmul.f32 %v8041_v38, %v6345_v43 }
 0xa24   : > { %v6385_v25 = vmul.f32 %v8043_v11, %v14119_v32 }
 0xa25   : > { %v8045_v49 = vpop.eup %8044 }
 0xa26   : > { %v6387_v13 = vmul.f32 %v6385_v25, %v6375_v57  ;;  %v6732_v15 = vperm.slane %v8045_v49, 0  ;;  %v8047_v56 = vpop.eup %8046 }
 0xa27   : > { %v6407_v46 = vrot.slane %v8047_v56, 4 }
 0xa28   : > { %v6391_v58 = vrot.slane %v6387_v13, 4  ;;  %v6734_v52 = vmul.f32 %v6732_v15, %v13024_v60 }
 0xa2a   : > { %v6395_v16 = vmul.f32 %v6391_v58, %v6133_v3  ;;  %v6736_v54 = vmul.f32 %v6734_v52, %v6734_v52  ;;  %v6740_v45 = vmul.f32 2.0, %v6734_v52  ;;  %v6770_v34 = vadd.f32 1.0, %v6734_v52 }
 0xa2b   : > { %v6790_v33 = vmul.f32 %v6734_v52, %v14127_v36 }
 0xa2c   : > { %v6411_v2 = vmul.f32 %v6407_v46, %v6395_v16  ;;  %v6738_v32 = vadd.f32 1.0, %v6736_v54  ;;  %v6742_v47 = vmul.f32 %v6740_v45, %v6730_v63 }
 0xa2d   : > { %v6794_v30 = vadd.f32 %v6792_v22, %v6790_v33 }
 0xa2e   : > { %v6413_v40 = vperm.slane %v6411_v2, 0  ;;  %v6744_v28 = vadd.f32 %v6742_v47, %v6738_v32 }
 0xa30   : > { %v13027_v44 = vmul.f32 %v6413_v40, %v6333_v53  ;;  %v6746_v24 = vadd.f32 1e-08, %v6744_v28 }
 0xa32   : > { %8048 = vrsqrt.f32 %v6746_v24  ;;  %vm6754_vm7 = vweird.f32 %v6746_v24 }
 0xa38   : > { %v8049_v41 = vpop.eup %8048 }
 0xa39   : > { %v6749_v12 = vmul.f32 %v8049_v41, %v6746_v24  ;;  %vm6755_vm2 = vweird.f32 %v8049_v41 }
 0xa3a   : > { %vm6756_vm8 = vmor %vm6754_vm7, %vm6755_vm2 }
 0xa3b   : > { %v6750_v55 = vmul.f32 %v8049_v41, %v6749_v12 }
 0xa3d   : > { %v6751_v26 = vmul.f32 0.5, %v6750_v55 }
 0xa3f   : > { %v6752_v43 = vsub.f32 1.5, %v6751_v26 }
 0xa41   : > { %v6753_v61 = vmul.f32 %v8049_v41, %v6752_v43 }
 0xa43   : > { %v6757_v62 = vsel %vm6756_vm8, %v8049_v41, %v6753_v61 }
 0xa44   : > { %v6768_v59 = vmul.f32 %v6757_v62, %v6744_v28  ;;  %v13033_v8 = vmul.f32 %v6794_v30, %v6757_v62 }
 0xa46   : > { %v6772_v51 = vmin.f32 %v6768_v59, %v6770_v34  ;;  %vm7024_vm1 = vcmp.ge.f32.partialorder %v13033_v8, 0.0 }
 0xa48   : > { %v6776_v7 = vmul.f32 %v6774_v1, %v6772_v51  ;;  %v6780_v0 = vsub.f32 %v6772_v51, %v6734_v52 }
 0xa4a   : > { %v6778_v53 = vmax.f32 %v6776_v7, 0.0001  ;;  %v7825_v35 = vadd.f32 -1.0, %v6780_v0 }
 0xa4c   : > { %v13029_v50 = vmul.f32 %v7825_v35, %v6774_v1  ;;  %8050 = vrcp.f32 %v6778_v53  ;;  %v13045_v40 = vmax.f32 %v6778_v53, 0.0001 }
 0xa4e   : > { %v6966_v41 = vmul.f32 %v13045_v40, %v13045_v40  ;;  %v6998_v55 = vmul.f32 6.2201, %v13045_v40  ;;  %vm6975_vm14 = vcmp.eq.f32.partialorder %v13045_v40, inf  ;;  %vm6977_vm15 = vcmp.eq.f32.partialorder %v13045_v40, 0.0 }
 0xa50   : > { %v7000_v59 = vadd.f32 %v6998_v55, %v6966_v41 }
 0xa52   : > { %v8051_v10 = vpop.eup %8050  ;;  %v7002_v35 = vadd.f32 10.2415, %v7000_v59 }
 0xa53   : > { %v6800_v21 = vmul.f32 0.0315, %v8051_v10 }
 0xa55   : > { %v6802_v29 = vmul.f32 %v6800_v21, %v6800_v21  ;;  %v6806_v37 = vmul.f32 2.0, %v6800_v21  ;;  %v6836_v49 = vadd.f32 1.0, %v6800_v21  ;;  %v6852_v26 = vadd.f32 %v6800_v21, %v13033_v8 }
 0xa57   : > { %v6804_v4 = vadd.f32 1.0, %v6802_v29  ;;  %v6808_v27 = vmul.f32 %v6806_v37, %v13033_v8 }
 0xa59   : > { %v6810_v18 = vadd.f32 %v6808_v27, %v6804_v4 }
 0xa5b   : > { %v6812_v42 = vadd.f32 1e-08, %v6810_v18 }
 0xa5d   : > { %8052 = vrsqrt.f32 %v6812_v42  ;;  %vm6820_vm10 = vweird.f32 %v6812_v42 }
 0xa63   : > { %v8053_v31 = vpop.eup %8052 }
 0xa64   : > { %v6815_v38 = vmul.f32 %v8053_v31, %v6812_v42  ;;  %vm6821_vm9 = vweird.f32 %v8053_v31  ;;  %v6992_v42 = vmul.f32 1.6988, %v6966_v41  ;;  %v6464_v41 = vpop.permute.xlu2 %6463 }
 0xa65   : > { %vm6822_vm11 = vmor %vm6820_vm10, %vm6821_vm9 }
 0xa66   : > { %v6816_v11 = vmul.f32 %v8053_v31, %v6815_v38  ;;  %v6994_v38 = vmul.f32 10.8438, %v13045_v40 }
 0xa68   : > { %v6817_v39 = vmul.f32 0.5, %v6816_v11 }
 0xa6a   : > { %v6818_v20 = vsub.f32 1.5, %v6817_v39 }
 0xa6c   : > { %v6819_v23 = vmul.f32 %v8053_v31, %v6818_v20 }
 0xa6e   : > { %v6823_v57 = vsel %vm6822_vm11, %v8053_v31, %v6819_v23  ;;  %v6996_v23 = vadd.f32 %v6994_v38, %v6992_v42 }
 0xa6f   : > { %v6834_v25 = vmul.f32 %v6823_v57, %v6810_v18  ;;  %v13056_v34 = vmul.f32 %v6852_v26, %v6823_v57 }
 0xa71   : > { %v6838_v19 = vmin.f32 %v6834_v25, %v6836_v49  ;;  %v6912_v10 = vand.u32 2147483647, %v13056_v34  ;;  %v6978_v25 = vand.u32 2147483648, %v13045_v40  ;;  %v14128_v49 = vld [vmem:[#allocation34_spill] sm:$0xff]  ;;  %vm6920_vm0 = vcmp.ge.f32.partialorder %v13056_v34, 0.0 }
 0xa73   : > { %v6840_v13 = vmul.f32 %v6838_v19, %v6778_v53  ;;  %v6842_v15 = vsub.f32 %v6838_v19, %v6800_v21  ;;  %v6312_v19 = vmax.f32 %v14128_v49, 0.0 }
 0xa75   : > { %v7827_v56 = vadd.f32 -1.0, %v6842_v15  ;;  %v13036_v48 = vmax.f32 %v6840_v13, 0.0001 }
 0xa77   : > { %v13038_v3 = vmul.f32 %v7827_v56, %v6778_v53  ;;  %v6862_v58 = vmul.f32 %v13036_v48, %v13036_v48  ;;  %8054 = vrsqrt.f32 %v13036_v48  ;;  %v6894_v52 = vmul.f32 6.2201, %v13036_v48 }
 0xa78   : > { %v6890_v24 = vmul.f32 10.8438, %v13036_v48  ;;  %vm6871_vm12 = vcmp.eq.f32.partialorder %v13036_v48, inf  ;;  %v6874_v62 = vand.u32 2147483648, %v13036_v48  ;;  %vm6873_vm13 = vcmp.eq.f32.partialorder %v13036_v48, 0.0 }
 0xa79   : > { %v6896_v63 = vadd.f32 %v6894_v52, %v6862_v58  ;;  %v6888_v47 = vmul.f32 1.6988, %v6862_v58  ;;  %v6942_v27 = vsub.f32 0.0, %v13036_v48  ;;  %v6457_v52 = vpop.permute.xlu1 %6456 }
 0xa7b   : > { %v6898_v46 = vadd.f32 10.2415, %v6896_v63  ;;  %v6892_v61 = vadd.f32 %v6890_v24, %v6888_v47  ;;  %v6944_v39 = vmul.f32 1.442695, %v6942_v27  ;;  %v7016_v47 = vand.u32 2147483647, %v13033_v8 }
 0xa7d   : > { %v8055_v16 = vpop.eup %8054  ;;  %8056 = vrcp.f32 %v6898_v46 }
 0xa7e   : > { %v6865_v54 = vmul.f32 %v8055_v16, %v13036_v48  ;;  %8058 = vrsqrt.f32 %v13045_v40 }
 0xa7f   : > { %8060 = vrcp.f32 %v7002_v35 }
 0xa80   : > { %v6866_v45 = vmul.f32 %v8055_v16, %v6865_v54  ;;  %v6459_v54 = vmul.f32 %v6457_v52, %v14127_v36 }
 0xa81   : > { %v13088_v27 = vpop.permute.xlu1 %6507 }
 0xa82   : > { %v6867_v2 = vmul.f32 0.5, %v6866_v45  ;;  %v6316_v45 = vmul.f32 5.55473, %v6312_v19 }
 0xa83   : > { %v8057_v12 = vpop.eup %8056 }
 0xa84   : > { %v6868_v32 = vsub.f32 1.5, %v6867_v2  ;;  %v6902_v1 = vmul.f32 %v8057_v12, %v6892_v61  ;;  %v8059_v0 = vpop.eup %8058  ;;  %v6318_v59 = vadd.f32 6.8316, %v6316_v45 }
 0xa85   : > { %v6969_v33 = vmul.f32 %v8059_v0, %v13045_v40  ;;  %v8061_v11 = vpop.eup %8060 }
 0xa86   : > { %v6869_v28 = vmul.f32 %v8055_v16, %v6868_v32  ;;  %v7006_v15 = vmul.f32 %v8061_v11, %v6996_v23 }
 0xa87   : > { %v6970_v30 = vmul.f32 %v8059_v0, %v6969_v33 }
 0xa88   : > { %v6870_v43 = vmul.f32 %v6869_v28, %v13036_v48  ;;  %v14129_v28 = vld [vmem:[#allocation79_spill] sm:$0xff] }
 0xa89   : > { %v6971_v37 = vmul.f32 0.5, %v6970_v30  ;;  %v6460_v24 = vmul.f32 %v6457_v52, %v14129_v28  ;;  %v6320_v30 = vsub.f32 0.0, %v6318_v59 }
 0xa8a   : > { %v6872_v51 = vsel %vm6871_vm12, %v13036_v48, %v6870_v43 }
 0xa8b   : > { %v6875_v7 = vsel %vm6873_vm13, %v6874_v62, %v6872_v51  ;;  %v6972_v18 = vsub.f32 1.5, %v6971_v37  ;;  %v13073_v62 = vadd.f32 %v6464_v41, %v6459_v54  ;;  %v6848_v51 = vmul.f32 1.442695, %v13038_v3 }
 0xa8c   : > { %v6904_v53 = vmul.f32 %v6902_v1, %v6875_v7  ;;  %v7046_v7 = vsub.f32 0.0, %v13045_v40 }
 0xa8d   : > { %v6973_v31 = vmul.f32 %v8059_v0, %v6972_v18  ;;  %v13077_v0 = vadd.f32 %v6464_v41, %v6460_v24  ;;  %v13080_v33 = vadd.f32 1e-08, %v13073_v62  ;;  %v6786_v41 = vmul.f32 1.442695, %v13029_v50 }
 0xa8e   : > { %v6906_v22 = vsub.f32 0.0, %v6904_v53 }
 0xa8f   : > { %v6974_v20 = vmul.f32 %v6973_v31, %v13045_v40  ;;  %vm6476_vm4 = vweird.f32 %v13080_v33 }
 0xa90   : > { %v6908_v21 = vmul.f32 1.442695, %v6906_v22  ;;  %v6914_v29 = vmul.f32 %v6912_v10, %v6906_v22  ;;  %v7048_v10 = vmul.f32 1.442695, %v7046_v7 }
 0xa91   : > { %v6976_v13 = vsel %vm6975_vm14, %v13045_v40, %v6974_v20 }
 0xa92   : > { %8062 = vpow2.f32 %v6908_v21  ;;  %v6916_v4 = vmul.f32 1.442695, %v6914_v29  ;;  %v6979_v58 = vsel %vm6977_vm15, %v6978_v25, %v6976_v13  ;;  %v13085_v21 = vadd.f32 1e-08, %v13077_v0 }
 0xa93   : > { %v7008_v46 = vmul.f32 %v7006_v15, %v6979_v58  ;;  %v5321_v15 = vadd.f32 %v13009_v9, %v14118_v5 }
 0xa94   : > { %8064 = vpow2.f32 %v6916_v4  ;;  %vm6486_vm2 = vweird.f32 %v13085_v21 }
 0xa95   : > { %8066 = vpow2.f32 %v6944_v39  ;;  %v7010_v32 = vsub.f32 0.0, %v7008_v46  ;;  %v5333_v46 = vpop.f32.mrf.mxu3 }
 0xa96   : > { %v5334_v45 = vadd.f32 %v5333_v46, %v5321_v15 }
 0xa97   : > { %v7012_v26 = vmul.f32 1.442695, %v7010_v32  ;;  %v7018_v43 = vmul.f32 %v7016_v47, %v7010_v32 }
 0xa98   : > { %v8063_v57 = vpop.eup %8062  ;;  %v5346_v5 = vmul.f32 0.5, %v5334_v45 }
 0xa99   : > { %v6930_v63 = vsub.f32 1.0, %v8063_v57  ;;  %v7020_v1 = vmul.f32 1.442695, %v7018_v43 }
 0xa9a   : > { %v8065_v56 = vpop.eup %8064 }
 0xa9b   : > { %v6932_v16 = vadd.f32 1.0, %v8065_v56  ;;  %v6922_v12 = vmul.f32 %v8065_v56, %v8063_v57  ;;  %v8067_v61 = vpop.eup %8066  ;;  %v6926_v22 = vsub.f32 %v8065_v56, %v8063_v57 }
 0xa9c   : > { %v6948_v35 = vsub.f32 1.0, %v8067_v61 }
 0xa9d   : > { %v6934_v2 = vmul.f32 %v6932_v16, %v6930_v63  ;;  %v6924_v53 = vsub.f32 1.0, %v6922_v12  ;;  %v5335_v43 = vpop.f32.mrf.mxu3 }
 0xa9e   : > { %v6950_v37 = vmul.f32 6.2831855, %v6948_v35 }
 0xa9f   : > { %v6936_v55 = vadd.f32 1e-08, %v6934_v2  ;;  %v6928_v29 = vsel %vm6920_vm0, %v6924_v53, %v6926_v22  ;;  %v13096_v2 = vpop.permute.xlu1 %6663 }
 0xaa1   : > { %8068 = vrcp.f32 %v6936_v55 }
 0xaa2   : > { %8070 = vpow2.f32 %v7012_v26 }
 0xaa3   : > { %8072 = vpow2.f32 %v7020_v1 }
 0xaa4   : > { %8074 = vrcp.f32 %v13036_v48  ;;  %v6322_v48 = vmul.f32 %v6320_v30, %v6312_v19 }
 0xaa5   : > { %8076 = vpow2.f32 %v6848_v51 }
 0xaa6   : > { %8078 = vrsqrt.f32 %v13080_v33  ;;  %v6324_v56 = vmul.f32 0.6931472, %v6322_v48 }
 0xaa7   : > { %v8069_v3 = vpop.eup %8068  ;;  %8080 = vpow2.f32 %v7048_v10  ;;  %v13107_v51 = vpop.permute.xlu1 %6681 }
 0xaa8   : > { %v8071_v4 = vpop.eup %8070  ;;  %v6940_v18 = vmul.f32 %v8069_v3, %v6928_v29  ;;  %8082 = vrsqrt.f32 %v13085_v21  ;;  %v6327_v8 = vmul.f32 1.442695, %v6324_v56 }
 0xaa9   : > { %v8073_v42 = vpop.eup %8072  ;;  %v7034_v39 = vsub.f32 1.0, %v8071_v4 }
 0xaaa   : > { %v8075_v31 = vpop.eup %8074  ;;  %v6956_v38 = vmul.f32 %v6948_v35, %v6940_v18  ;;  %v7026_v11 = vmul.f32 %v8073_v42, %v8071_v4  ;;  %v7036_v34 = vadd.f32 1.0, %v8073_v42  ;;  %v7030_v49 = vsub.f32 %v8073_v42, %v8071_v4  ;;  %v14130_v35 = vld [vmem:[#allocation31_spill] sm:$0xff] }
 0xaab   : > { %v8077_v20 = vpop.eup %8076  ;;  %v6954_v23 = vmul.f32 %v8075_v31, %v6950_v37 }
 0xaac   : > { %v6958_v57 = vadd.f32 %v8067_v61, %v6956_v38  ;;  %v7028_v25 = vsub.f32 1.0, %v7026_v11  ;;  %v7038_v13 = vmul.f32 %v7036_v34, %v7034_v39  ;;  %v13094_v19 = vpop.eup %8078  ;;  %v6858_v58 = vmul.f32 32.708, %v8077_v20 }
 0xaad   : > { %v8081_v54 = vpop.eup %8080  ;;  %v6471_v9 = vmul.f32 %v13094_v19, %v13080_v33  ;;  %vm6477_vm3 = vweird.f32 %v13094_v19 }
 0xaae   : > { %v6960_v52 = vmul.f32 %v6958_v57, %v6954_v23  ;;  %v7032_v63 = vsel %vm7024_vm1, %v7028_v25, %v7030_v49  ;;  %v7040_v16 = vadd.f32 1e-08, %v7038_v13  ;;  %v13098_v47 = vpop.eup %8082  ;;  %v7052_v24 = vsub.f32 1.0, %v8081_v54  ;;  %vm6478_vm5 = vmor %vm6476_vm4, %vm6477_vm3 }
 0xaaf   : > { %v6472_v12 = vmul.f32 %v13094_v19, %v6471_v9  ;;  %v6481_v55 = vmul.f32 %v13098_v47, %v13085_v21  ;;  %v13112_v23 = vpop.permute.xlu1 %6697  ;;  %vm6487_vm6 = vweird.f32 %v13098_v47 }
 0xab0   : > { %v6962_v32 = vmul.f32 %v6960_v52, %v6858_v58  ;;  %8084 = vrcp.f32 %v7040_v16  ;;  %v7054_v59 = vmul.f32 6.2831855, %v7052_v24  ;;  %vm6488_vm7 = vmor %vm6486_vm2, %vm6487_vm6 }
 0xab1   : > { %8086 = vtanh.f32 %v5346_v5  ;;  %v6473_v7 = vmul.f32 0.5, %v6472_v12  ;;  %v6482_v53 = vmul.f32 %v13098_v47, %v6481_v55 }
 0xab2   : > { %8088 = vrcp.f32 %v13045_v40  ;;  %v6214_v40 = vmul.f32 4.0, %v14130_v35 }
 0xab3   : > { %8090 = vpow2.f32 %v6327_v8  ;;  %v6483_v4 = vmul.f32 0.5, %v6482_v53  ;;  %v6474_v18 = vsub.f32 1.5, %v6473_v7 }
 0xab4   : > { %8092 = vpow2.f32 %v6786_v41  ;;  %v6216_v48 = vadd.f32 1e-08, %v6214_v40 }
 0xab5   : > { %v6475_v13 = vmul.f32 %v13094_v19, %v6474_v18  ;;  %v6484_v15 = vsub.f32 1.5, %v6483_v4 }
 0xab6   : > { %v8085_v26 = vpop.eup %8084  ;;  %8094 = vrcp.f32 %v6216_v48 }
 0xab7   : > { %v7044_v61 = vmul.f32 %v8085_v26, %v7032_v63  ;;  %v8087_v1 = vpop.eup %8086  ;;  %v13123_v8 = vsel %vm6478_vm5, %v13094_v19, %v6475_v13  ;;  %vm6644_vm5 = vcmp.ge.f32.partialorder %v14127_v36, 0.0 }
 0xab8   : > { %v8089_v22 = vpop.eup %8088  ;;  %v5350_v10 = vadd.f32 1.0, %v8087_v1 }
 0xab9   : > { %v7060_v50 = vmul.f32 %v7052_v24, %v7044_v61  ;;  %v8091_v30 = vpop.eup %8090  ;;  %v7058_v3 = vmul.f32 %v8089_v22, %v7054_v59  ;;  %v6490_v61 = vmul.f32 %v13123_v8, %v13073_v62  ;;  %v14132_v62 = vld [vmem:[#allocation84_spill] sm:$0xff] }
 0xaba   : > { %v5352_v37 = vmul.f32 0.5, %v5350_v10  ;;  %v8093_v31 = vpop.eup %8092  ;;  %v6330_v39 = vperm.slane %v8091_v30, 0  ;;  %v6496_v10 = vpop.permute.xlu0 %6495  ;;  %v6717_v18 = vperm.slane %v14132_v62, 4 }
 0xabb   : > { %v7062_v29 = vadd.f32 %v8081_v54, %v7060_v50  ;;  %v6856_v56 = vmul.f32 %v8093_v31, %v13112_v23  ;;  %v14131_v54 = vld [vmem:[#allocation91_spill] sm:$0xff] }
 0xabc   : > { %v6124_v38 = vmul.f32 %v5352_v37, %v5352_v37  ;;  %v6314_v11 = vsub.f32 1.0, %v5352_v37  ;;  %v6348_v34 = vadd.f32 1.0, %v5352_v37  ;;  %v6346_v45 = vmax.f32 %v14131_v54, 0.0  ;;  %v8095_v55 = vpop.eup %8094 }
 0xabd   : > { %v7064_v42 = vmul.f32 %v7062_v29, %v7058_v3  ;;  %v6222_v22 = vrot.slane %v8095_v55, 4  ;;  %v13135_v29 = vmin.f32 %v6490_v61, %v6496_v10  ;;  %v6793_v61 = vperm.slane %v14131_v54, 4 }
 0xabe   : > { %v6126_v57 = vmul.f32 %v6124_v38, %v6124_v38  ;;  %v6332_v25 = vmul.f32 %v6330_v39, %v6314_v11  ;;  %v6350_v49 = vmul.f32 %v6348_v34, %v6348_v34  ;;  %v6398_v12 = vmul.f32 4.0, %v6346_v45 }
 0xabf   : > { %v7066_v20 = vmul.f32 31.7003, %v7064_v42  ;;  %v14133_v42 = vld [vmem:[#allocation128_spill] sm:$0xff] }
 0xac0   : > { %v6128_v52 = vadd.f32 1e-08, %v6126_v57  ;;  %v13116_v63 = vadd.f32 %v6332_v25, %v5352_v37  ;;  %v6352_v16 = vmul.f32 0.125, %v6350_v49  ;;  %v6400_v21 = vmul.f32 %v6398_v12, %v14130_v35 }
 0xac1   : > { %v7068_v58 = vsub.f32 %v6962_v32, %v7066_v20  ;;  %v6485_v32 = vmul.f32 %v13098_v47, %v6484_v15  ;;  %v6504_v20 = vmul.f32 %v13024_v60, %v13135_v29  ;;  %v6719_v57 = vmul.f32 %v6717_v18, %v14123_v6  ;;  %v14134_v15 = vld [vmem:[#allocation28_spill] sm:$0xff] }
 0xac2   : > { %8096 = vrcp.f32 %v6128_v52  ;;  %v6354_v9 = vsub.f32 1.0, %v6352_v16  ;;  %v6366_v26 = vrot.slane %v6352_v16, 4  ;;  %v6402_v38 = vadd.f32 1e-08, %v6400_v21 }
 0xac3   : > { %v7070_v46 = vmul.f32 %v7068_v58, %v6856_v56  ;;  %v13132_v1 = vsel %vm6488_vm7, %v13098_v47, %v6485_v32  ;;  %v6721_v47 = vperm.slane %v14133_v42, 4  ;;  %v6727_v56 = vperm.slane %v14134_v15, 4 }
 0xac4   : > { %v6358_v24 = vrot.slane %v6354_v9, 4  ;;  %v6491_v48 = vmul.f32 %v13132_v1, %v13077_v0  ;;  %vm6645_vm7 = vcmp.ge.f32.partialorder %v14129_v28, 0.0 }
 0xac5   : > { %v7072_v5 = vrot.slane %v7070_v46, 4  ;;  %v6723_v25 = vmul.f32 %v6721_v47, %v14124_v14 }
 0xac6   : > { %v6362_v33 = vmul.f32 %v6358_v24, %v6346_v45  ;;  %v6378_v43 = vmul.f32 %v6358_v24, %v14130_v35  ;;  %v13144_v34 = vmin.f32 %v6491_v48, %v6496_v10 }
 0xac7   : > { %v7073_v41 = vadd.f32 %v7072_v5, %v7070_v46  ;;  %v6725_v46 = vadd.f32 %v6723_v25, %v6719_v57  ;;  %v13157_v5 = vmax.f32 %v6504_v20, 0.0001 }
 0xac8   : > { %v8097_v59 = vpop.eup %8096  ;;  %v6370_v7 = vadd.f32 %v6366_v26, %v6362_v33  ;;  %v6380_v53 = vadd.f32 %v6378_v43, %v6366_v26  ;;  %v6505_v9 = vmul.f32 %v13024_v60, %v13144_v34 }
 0xac9   : > { %v7074_v19 = vrot.slane %v7073_v41, 2  ;;  %v6132_v40 = vmul.f32 2.0, %v8097_v59  ;;  %v6134_v24 = vmul.f32 0.31830987, %v8097_v59  ;;  %v6528_v18 = vmul.f32 %v13157_v5, %v13157_v5 }
 0xaca   : > { %v6372_v30 = vadd.f32 1e-08, %v6370_v7  ;;  %v6382_v3 = vadd.f32 1e-08, %v6380_v53  ;;  %v13163_v55 = vmax.f32 %v6505_v9, 0.0001 }
 0xacb   : > { %v7075_v50 = vadd.f32 %v7074_v19, %v7073_v41  ;;  %v13137_v4 = vmul.f32 %v6222_v22, %v6132_v40  ;;  %v6560_v42 = vmul.f32 6.2201, %v13157_v5  ;;  %vm6537_vm11 = vcmp.eq.f32.partialorder %v13157_v5, inf }
 0xacc   : > { %8098 = vrcp.f32 %v6372_v30  ;;  %vm6539_vm12 = vcmp.eq.f32.partialorder %v13157_v5, 0.0  ;;  %vm6549_vm13 = vcmp.eq.f32.partialorder %v13163_v55, inf  ;;  %vm6551_vm14 = vcmp.eq.f32.partialorder %v13163_v55, 0.0 }
 0xacd   : > { %v7076_v37 = vrot.slane %v7075_v50, 1  ;;  %8100 = vrcp.f32 %v6382_v3  ;;  %v6418_v11 = vadd.f32 1e-08, %v13137_v4 }
 0xacf   : > { %v7077_v31 = vadd.f32 %v7076_v37, %v7075_v50  ;;  %8102 = vrcp.f32 %v6418_v11  ;;  %v6529_v11 = vmul.f32 %v13163_v55, %v13163_v55 }
 0xad0   : > { %8104 = vrcp.f32 %v6402_v38 }
 0xad1   : > { %v7084_v39 = vmax.f32 %v7077_v31, 0.0  ;;  %8106 = vrsqrt.f32 %v13157_v5 }
 0xad2   : > { %v8099_v0 = vpop.eup %8098  ;;  %8108 = vrsqrt.f32 %v13163_v55 }
 0xad3   : > { %v13151_v49 = vmul.f32 %v7084_v39, %v13027_v44  ;;  %v8101_v13 = vpop.eup %8100  ;;  %v6376_v58 = vmul.f32 %v8099_v0, %v6346_v45  ;;  %v6729_v44 = vmul.f32 %v6727_v56, %v14126_v17  ;;  %v6561_v39 = vmul.f32 6.2201, %v13163_v55 }
 0xad4   : > { %v6386_v52 = vmul.f32 %v8101_v13, %v14130_v35 }
 0xad5   : > { %v8103_v16 = vpop.eup %8102  ;;  %v6731_v45 = vadd.f32 %v6729_v44, %v6725_v46  ;;  %v6563_v15 = vadd.f32 %v6561_v39, %v6529_v11 }
 0xad6   : > { %v6388_v6 = vmul.f32 %v6386_v52, %v6376_v58  ;;  %v6733_v14 = vperm.slane %v8103_v16, 0  ;;  %v8105_v32 = vpop.eup %8104 }
 0xad7   : > { %v6408_v33 = vrot.slane %v8105_v32, 4  ;;  %v8107_v22 = vpop.eup %8106 }
 0xad8   : > { %v6392_v41 = vrot.slane %v6388_v6, 4  ;;  %v13161_v12 = vmul.f32 %v6733_v14, %v13024_v60  ;;  %v6531_v30 = vmul.f32 %v8107_v22, %v13157_v5  ;;  %v8109_v54 = vpop.eup %8108  ;;  %v6565_v14 = vadd.f32 10.2415, %v6563_v15 }
 0xad9   : > { %v6543_v37 = vmul.f32 %v8109_v54, %v13163_v55 }
 0xada   : > { %v6396_v35 = vmul.f32 %v6392_v41, %v6134_v24  ;;  %v6737_v26 = vmul.f32 %v13161_v12, %v13161_v12  ;;  %v6741_v43 = vmul.f32 2.0, %v13161_v12  ;;  %v6791_v17 = vmul.f32 %v13161_v12, %v14129_v28 }
 0xadb   : > { %v6532_v3 = vmul.f32 %v8107_v22, %v6531_v30  ;;  %v6544_v31 = vmul.f32 %v8109_v54, %v6543_v37  ;;  %v6771_v9 = vadd.f32 1.0, %v13161_v12  ;;  %v6775_v41 = vperm.slane %v13137_v4, 0 }
 0xadc   : > { %v6412_v19 = vmul.f32 %v6408_v33, %v6396_v35  ;;  %v6739_v59 = vadd.f32 1.0, %v6737_v26  ;;  %v6743_v7 = vmul.f32 %v6741_v43, %v6731_v45  ;;  %v6795_v53 = vadd.f32 %v6793_v61, %v6791_v17 }
 0xadd   : > { %v6533_v48 = vmul.f32 0.5, %v6532_v3  ;;  %v6545_v25 = vmul.f32 0.5, %v6544_v31  ;;  %v6554_v45 = vmul.f32 1.6988, %v6528_v18  ;;  %v6556_v26 = vmul.f32 10.8438, %v13157_v5  ;;  %v6636_v31 = vpop.permute.xlu2 %6635 }
 0xade   : > { %v6414_v50 = vperm.slane %v6412_v19, 0  ;;  %v6745_v40 = vadd.f32 %v6743_v7, %v6739_v59  ;;  %v6540_v4 = vand.u32 2147483648, %v13157_v5  ;;  %v6557_v30 = vmul.f32 10.8438, %v13163_v55 }
 0xadf   : > { %v6534_v57 = vsub.f32 1.5, %v6533_v48  ;;  %v6546_v52 = vsub.f32 1.5, %v6545_v25  ;;  %v6558_v7 = vadd.f32 %v6556_v26, %v6554_v45  ;;  %v6520_v37 = vadd.f32 %v13088_v27, %v14127_v36 }
 0xae0   : > { %v13174_v21 = vmul.f32 %v6414_v50, %v13116_v63  ;;  %v6747_v10 = vadd.f32 1e-08, %v6745_v40  ;;  %v6562_v63 = vadd.f32 %v6560_v42, %v6528_v18  ;;  %v6631_v42 = vand.u32 2147483647, %v14127_v36 }
 0xae1   : > { %v6535_v58 = vmul.f32 %v8107_v22, %v6534_v57  ;;  %v6547_v44 = vmul.f32 %v8109_v54, %v6546_v52  ;;  %v13217_v39 = vmul.f32 %v6520_v37, %v13123_v8 }
 0xae2   : > { %8110 = vrsqrt.f32 %v6747_v10  ;;  %v6564_v13 = vadd.f32 10.2415, %v6562_v63  ;;  %vm6764_vm9 = vweird.f32 %v6747_v10 }
 0xae3   : > { %v6536_v32 = vmul.f32 %v6535_v58, %v13157_v5  ;;  %v6548_v17 = vmul.f32 %v6547_v44, %v13163_v55  ;;  %vm6586_vm2 = vcmp.ge.f32.partialorder %v13217_v39, 0.0 }
 0xae4   : > { %8112 = vrcp.f32 %v6564_v13  ;;  %v6638_v13 = vmul.f32 %v6636_v31, %v6631_v42 }
 0xae5   : > { %8114 = vrcp.f32 %v6565_v14  ;;  %v6538_v61 = vsel %vm6537_vm11, %v13157_v5, %v6536_v32 }
 0xae8   : > { %v8111_v62 = vpop.eup %8110 }
 0xae9   : > { %v6759_v47 = vmul.f32 %v8111_v62, %v6747_v10  ;;  %vm6765_vm8 = vweird.f32 %v8111_v62  ;;  %v6550_v10 = vsel %vm6549_vm13, %v13163_v55, %v6548_v17 }
 0xaea   : > { %vm6766_vm10 = vmor %vm6764_vm9, %vm6765_vm8  ;;  %v8113_v43 = vpop.eup %8112 }
 0xaeb   : > { %v6760_v38 = vmul.f32 %v8111_v62, %v6759_v47  ;;  %v6568_v22 = vmul.f32 %v8113_v43, %v6558_v7  ;;  %v8115_v3 = vpop.eup %8114 }
 0xaed   : > { %v6761_v20 = vmul.f32 0.5, %v6760_v38 }
 0xaef   : > { %v6762_v0 = vsub.f32 1.5, %v6761_v20 }
 0xaf1   : > { %v6763_v56 = vmul.f32 %v8111_v62, %v6762_v0  ;;  %v6521_v0 = vadd.f32 %v13088_v27, %v14129_v28 }
 0xaf3   : > { %v6767_v16 = vsel %vm6766_vm10, %v8111_v62, %v6763_v56  ;;  %v6552_v62 = vand.u32 2147483648, %v13163_v55  ;;  %v13233_v14 = vmul.f32 %v6521_v0, %v13132_v1  ;;  %v6510_v0 = vsub.f32 %v13135_v29, %v13088_v27  ;;  %v13259_v29 = vpop.permute.xlu2 %6647 }
 0xaf4   : > { %v6769_v46 = vmul.f32 %v6767_v16, %v6745_v40  ;;  %v13185_v6 = vmul.f32 %v6795_v53, %v6767_v16  ;;  %v6555_v53 = vmul.f32 1.6988, %v6529_v11  ;;  %v6541_v40 = vsel %vm6539_vm12, %v6540_v4, %v6538_v61 }
 0xaf5   : > { %v6570_v48 = vmul.f32 %v6568_v22, %v6541_v40  ;;  %v6553_v38 = vsel %vm6551_vm14, %v6552_v62, %v6550_v10  ;;  %v6579_v61 = vand.u32 2147483647, %v13233_v14  ;;  %vm6587_vm8 = vcmp.ge.f32.partialorder %v13233_v14, 0.0 }
 0xaf6   : > { %v6773_v24 = vmin.f32 %v6769_v46, %v6771_v9  ;;  %v6559_v47 = vadd.f32 %v6557_v30, %v6555_v53  ;;  %v6578_v46 = vand.u32 2147483647, %v13217_v39  ;;  %vm7025_vm6 = vcmp.ge.f32.partialorder %v13185_v6, 0.0 }
 0xaf7   : > { %v6572_v56 = vsub.f32 0.0, %v6570_v48 }
 0xaf8   : > { %v6777_v35 = vmul.f32 %v6775_v41, %v6773_v24  ;;  %v6781_v33 = vsub.f32 %v6773_v24, %v13161_v12  ;;  %v6569_v20 = vmul.f32 %v8115_v3, %v6559_v47  ;;  %v6640_v24 = vmul.f32 1.442695, %v6638_v13 }
 0xaf9   : > { %v6574_v40 = vmul.f32 1.442695, %v6572_v56 }
 0xafa   : > { %v13194_v19 = vmax.f32 %v6777_v35, 0.0001  ;;  %v7826_v59 = vadd.f32 -1.0, %v6781_v33  ;;  %v6571_v15 = vmul.f32 %v6569_v20, %v6553_v38  ;;  %v6632_v35 = vand.u32 2147483647, %v14129_v28 }
 0xafc   : > { %v13198_v12 = vmul.f32 %v7826_v59, %v6775_v41  ;;  %8116 = vrcp.f32 %v13194_v19  ;;  %v13202_v50 = vmax.f32 %v13194_v19, 0.0001  ;;  %v6580_v41 = vmul.f32 %v6578_v46, %v6572_v56 }
 0xafd   : > { %v6573_v33 = vsub.f32 0.0, %v6571_v15  ;;  %v6639_v7 = vmul.f32 %v6636_v31, %v6632_v35 }
 0xafe   : > { %v6967_v54 = vmul.f32 %v13202_v50, %v13202_v50  ;;  %8118 = vrsqrt.f32 %v13202_v50  ;;  %v6999_v18 = vmul.f32 6.2201, %v13202_v50  ;;  %v6582_v1 = vmul.f32 1.442695, %v6580_v41 }
 0xaff   : > { %v6581_v53 = vmul.f32 %v6579_v61, %v6573_v33  ;;  %v6995_v10 = vmul.f32 10.8438, %v13202_v50  ;;  %v6642_v62 = vmul.f32 1.442695, %v6639_v7  ;;  %vm6987_vm15 = vcmp.eq.f32.partialorder %v13202_v50, inf }
 0xb00   : > { %v7001_v63 = vadd.f32 %v6999_v18, %v6967_v54  ;;  %v6993_v4 = vmul.f32 1.6988, %v6967_v54  ;;  %v6990_v42 = vand.u32 2147483648, %v13202_v50  ;;  %vm6989_vm0 = vcmp.eq.f32.partialorder %v13202_v50, 0.0 }
 0xb01   : > { %v6584_v18 = vmul.f32 1.442695, %v6581_v53  ;;  %v6576_v38 = vmul.f32 1.442695, %v6573_v33  ;;  %v6608_v41 = vsub.f32 0.0, %v13157_v5 }
 0xb02   : > { %v8117_v11 = vpop.eup %8116  ;;  %v7003_v8 = vadd.f32 10.2415, %v7001_v63  ;;  %v6997_v37 = vadd.f32 %v6995_v10, %v6993_v4 }
 0xb03   : > { %v13219_v57 = vmul.f32 0.0315, %v8117_v11  ;;  %v6610_v10 = vmul.f32 1.442695, %v6608_v41 }
 0xb04   : > { %v8119_v25 = vpop.eup %8118  ;;  %8120 = vrcp.f32 %v7003_v8 }
 0xb05   : > { %v6803_v58 = vmul.f32 %v13219_v57, %v13219_v57  ;;  %v6807_v52 = vmul.f32 2.0, %v13219_v57  ;;  %v13228_v16 = vadd.f32 %v13219_v57, %v13185_v6  ;;  %v6981_v9 = vmul.f32 %v8119_v25, %v13202_v50 }
 0xb06   : > { %8122 = vpow2.f32 %v6640_v24 }
 0xb07   : > { %v6805_v32 = vadd.f32 1.0, %v6803_v58  ;;  %v6809_v44 = vmul.f32 %v6807_v52, %v13185_v6  ;;  %v6982_v45 = vmul.f32 %v8119_v25, %v6981_v9  ;;  %v7017_v58 = vand.u32 2147483647, %v13185_v6 }
 0xb09   : > { %v13237_v26 = vadd.f32 %v6809_v44, %v6805_v32  ;;  %v6983_v43 = vmul.f32 0.5, %v6982_v45  ;;  %v7823_v44 = vadd.f32 -1.0, %v6510_v0 }
 0xb0a   : > { %v8121_v30 = vpop.eup %8120 }
 0xb0b   : > { %v6813_v17 = vadd.f32 1e-08, %v13237_v26  ;;  %v6984_v59 = vsub.f32 1.5, %v6983_v43  ;;  %v7007_v48 = vmul.f32 %v8121_v30, %v6997_v37  ;;  %v6514_v53 = vmul.f32 %v7823_v44, %v13024_v60 }
 0xb0c   : > { %v13245_v47 = vpop.eup %8122  ;;  %v6837_v37 = vadd.f32 1.0, %v13219_v57 }
 0xb0d   : > { %8124 = vrsqrt.f32 %v6813_v17  ;;  %v6985_v22 = vmul.f32 %v8119_v25, %v6984_v59  ;;  %v6659_v25 = vadd.f32 1.0, %v13245_v47  ;;  %vm6830_vm3 = vweird.f32 %v6813_v17 }
 0xb0e   : > { %8126 = vpow2.f32 %v6582_v1  ;;  %v13271_v4 = vmul.f32 %v13245_v47, %v13259_v29 }
 0xb0f   : > { %v6986_v3 = vmul.f32 %v6985_v22, %v13202_v50  ;;  %8128 = vpow2.f32 %v6574_v40  ;;  %v6666_v32 = vmul.f32 %v13096_v2, %v6659_v25 }
 0xb10   : > { %8130 = vpow2.f32 %v6584_v18 }
 0xb11   : > { %v6988_v54 = vsel %vm6987_vm15, %v13202_v50, %v6986_v3  ;;  %8132 = vpow2.f32 %v6642_v62  ;;  %v6668_v7 = vadd.f32 1e-08, %v6666_v32  ;;  %v7047_v3 = vsub.f32 0.0, %v13202_v50 }
 0xb12   : > { %v6991_v63 = vsel %vm6989_vm0, %v6990_v42, %v6988_v54  ;;  %8134 = vpow2.f32 %v6576_v38  ;;  %vm7130_vm0 = vcmask 1042432  }
 0xb13   : > { %v8125_v31 = vpop.eup %8124  ;;  %v7009_v20 = vmul.f32 %v7007_v48, %v6991_v63  ;;  %v6652_v48 = vsub.f32 1.0, %v13271_v4 }
 0xb14   : > { %v6825_v11 = vmul.f32 %v8125_v31, %v6813_v17  ;;  %v13252_v13 = vpop.eup %8126  ;;  %vm6831_vm1 = vweird.f32 %v8125_v31 }
 0xb15   : > { %v7011_v56 = vsub.f32 0.0, %v7009_v20  ;;  %v13255_v52 = vpop.eup %8128  ;;  %v6598_v24 = vadd.f32 1.0, %v13252_v13  ;;  %vm6832_vm4 = vmor %vm6830_vm3, %vm6831_vm1  ;;  %vm7136_vm1 = vcmask 1043456  }
 0xb16   : > { %v6826_v15 = vmul.f32 %v8125_v31, %v6825_v11  ;;  %v13262_v33 = vpop.eup %8130  ;;  %v6596_v43 = vsub.f32 1.0, %v13255_v52  ;;  %v6516_v11 = vmul.f32 1.442695, %v6514_v53 }
 0xb17   : > { %v7014_v46 = vmul.f32 1.442695, %v7011_v56  ;;  %v7019_v9 = vmul.f32 %v7017_v58, %v7011_v56  ;;  %v13265_v61 = vpop.eup %8132  ;;  %v6599_v22 = vadd.f32 1.0, %v13262_v33  ;;  %v6511_v58 = vsub.f32 %v13144_v34, %v13088_v27 }
 0xb18   : > { %v6827_v8 = vmul.f32 0.5, %v6826_v15  ;;  %v13267_v59 = vpop.eup %8134  ;;  %v6600_v40 = vmul.f32 %v6598_v24, %v6596_v43  ;;  %v6660_v18 = vadd.f32 1.0, %v13265_v61  ;;  %v6609_v24 = vsub.f32 0.0, %v13163_v55 }
 0xb19   : > { %v7022_v35 = vmul.f32 1.442695, %v7019_v9  ;;  %8136 = vpow2.f32 %v7014_v46  ;;  %v6597_v42 = vsub.f32 1.0, %v13267_v59  ;;  %v6588_v9 = vmul.f32 %v13255_v52, %v13252_v13 }
 0xb1a   : > { %v6828_v45 = vsub.f32 1.5, %v6827_v8  ;;  %v6602_v38 = vadd.f32 1e-08, %v6600_v40  ;;  %v6667_v56 = vmul.f32 %v13096_v2, %v6660_v18  ;;  %v6654_v43 = vsub.f32 %v13245_v47, %v13259_v29 }
 0xb1b   : > { %8138 = vpow2.f32 %v7022_v35  ;;  %v6601_v20 = vmul.f32 %v6599_v22, %v6597_v42  ;;  %v6589_v36 = vmul.f32 %v13267_v59, %v13262_v33  ;;  %v6651_v18 = vmul.f32 %v13265_v61, %v13259_v29 }
 0xb1c   : > { %v6829_v1 = vmul.f32 %v8125_v31, %v6828_v45  ;;  %8140 = vrcp.f32 %v6668_v7  ;;  %v6669_v4 = vadd.f32 1e-08, %v6667_v56  ;;  %v6590_v7 = vsub.f32 1.0, %v6588_v9 }
 0xb1d   : > { %8142 = vpow2.f32 %v6610_v10  ;;  %v6603_v35 = vadd.f32 1e-08, %v6601_v20  ;;  %v6656_v47 = vsel %vm6644_vm5, %v6652_v48, %v6654_v43 }
 0xb1e   : > { %v6833_v30 = vsel %vm6832_vm4, %v8125_v31, %v6829_v1  ;;  %8144 = vrcp.f32 %v6602_v38 }
 0xb1f   : > { %v6835_v17 = vmul.f32 %v6833_v30, %v13237_v26  ;;  %v13279_v62 = vmul.f32 %v13228_v16, %v6833_v30  ;;  %v8137_v54 = vpop.eup %8136  ;;  %v7050_v26 = vmul.f32 1.442695, %v7047_v3  ;;  %v7824_v30 = vadd.f32 -1.0, %v6511_v58 }
 0xb20   : > { %v7035_v8 = vsub.f32 1.0, %v8137_v54  ;;  %v6592_v3 = vsub.f32 %v13252_v13, %v13255_v52 }
 0xb21   : > { %v6839_v63 = vmin.f32 %v6835_v17, %v6837_v37  ;;  %v8139_v31 = vpop.eup %8138  ;;  %8146 = vpow2.f32 %v7050_v26  ;;  %v6515_v39 = vmul.f32 %v7824_v30, %v13024_v60  ;;  %v6593_v60 = vsub.f32 %v13262_v33, %v13267_v59 }
 0xb22   : > { %v7027_v0 = vmul.f32 %v8139_v31, %v8137_v54  ;;  %v7031_v15 = vsub.f32 %v8139_v31, %v8137_v54  ;;  %v7037_v46 = vadd.f32 1.0, %v8139_v31  ;;  %v8141_v45 = vpop.eup %8140  ;;  %v6594_v42 = vsel %vm6586_vm2, %v6590_v7, %v6592_v3 }
 0xb23   : > { %v6841_v25 = vmul.f32 %v6839_v63, %v13194_v19  ;;  %v6843_v16 = vsub.f32 %v6839_v63, %v13219_v57  ;;  %v13300_v34 = vpop.eup %8142  ;;  %v6672_v37 = vmul.f32 %v8141_v45, %v6656_v47  ;;  %v6676_v63 = vpop.permute.xlu0 %6675  ;;  %v6591_v31 = vsub.f32 1.0, %v6589_v36 }
 0xb24   : > { %v7029_v41 = vsub.f32 1.0, %v7027_v0  ;;  %v7039_v57 = vmul.f32 %v7037_v46, %v7035_v8  ;;  %v8145_v10 = vpop.eup %8144  ;;  %v6518_v8 = vmul.f32 1.442695, %v6515_v39  ;;  %vm6921_vm11 = vcmp.ge.f32.partialorder %v13279_v62, 0.0 }
 0xb25   : > { %v7828_v32 = vadd.f32 -1.0, %v6843_v16  ;;  %v13291_v44 = vmax.f32 %v6841_v25, 0.0001  ;;  %v6606_v38 = vmul.f32 %v8145_v10, %v6594_v42  ;;  %v6653_v25 = vsub.f32 1.0, %v6651_v18  ;;  %v6688_v10 = vpop.permute.xlu2 %6687 }
 0xb26   : > { %v7033_v40 = vsel %vm7025_vm6, %v7029_v41, %v7031_v15  ;;  %v7041_v22 = vadd.f32 1e-08, %v7039_v57  ;;  %v6678_v16 = vmul.f32 %v6676_v63, %v6672_v37  ;;  %v6655_v15 = vsub.f32 %v13265_v61, %v13259_v29 }
 0xb27   : > { %v13295_v2 = vmul.f32 %v7828_v32, %v13194_v19  ;;  %v6863_v27 = vmul.f32 %v13291_v44, %v13291_v44  ;;  %8148 = vrsqrt.f32 %v13291_v44  ;;  %v6895_v1 = vmul.f32 6.2201, %v13291_v44  ;;  %v8147_v17 = vpop.eup %8146 }
 0xb28   : > { %8150 = vpow2.f32 %v6516_v11  ;;  %v6612_v19 = vmul.f32 1.442695, %v6609_v24  ;;  %v7053_v48 = vsub.f32 1.0, %v8147_v17  ;;  %v6614_v11 = vsub.f32 1.0, %v13300_v34 }
 0xb29   : > { %v6897_v53 = vadd.f32 %v6895_v1, %v6863_v27  ;;  %8152 = vrcp.f32 %v6603_v35  ;;  %v6595_v32 = vsel %vm6587_vm8, %v6591_v31, %v6593_v60  ;;  %v6889_v57 = vmul.f32 1.6988, %v6863_v27 }
 0xb2a   : > { %8154 = vrcp.f32 %v7041_v22  ;;  %v7055_v46 = vmul.f32 6.2831855, %v7053_v48  ;;  %v6616_v24 = vmul.f32 6.2831855, %v6614_v11  ;;  %v6657_v29 = vsel %vm6645_vm7, %v6653_v25, %v6655_v15 }
 0xb2b   : > { %8156 = vrcp.f32 %v6669_v4  ;;  %v6899_v54 = vadd.f32 10.2415, %v6897_v53  ;;  %v6684_v33 = vadd.f32 %v13107_v51, %v6678_v16  ;;  %v6891_v4 = vmul.f32 10.8438, %v13291_v44 }
 0xb2c   : > { %8158 = vpow2.f32 %v6612_v19  ;;  %vm6883_vm9 = vcmp.eq.f32.partialorder %v13291_v44, inf  ;;  %vm6885_vm10 = vcmp.eq.f32.partialorder %v13291_v44, 0.0 }
 0xb2d   : > { %v8149_v6 = vpop.eup %8148  ;;  %8160 = vrcp.f32 %v13157_v5  ;;  %v6622_v5 = vmul.f32 %v6614_v11, %v6606_v38  ;;  %v6893_v22 = vadd.f32 %v6891_v4, %v6889_v57  ;;  %v6690_v42 = vmul.f32 %v6688_v10, %v6684_v33  ;;  %v14135_v57 = vld [vmem:[#allocation62_spill] sm:$0xff]  ;;  %v14136_v4 = vld [vmem:[#allocation59_spill] sm:$0xff] }
 0xb2e   : > { %v6877_v13 = vmul.f32 %v8149_v6, %v13291_v44  ;;  %v8151_v52 = vpop.eup %8150  ;;  %8162 = vrcp.f32 %v13202_v50  ;;  %v6913_v11 = vand.u32 2147483647, %v13279_v62 }
 0xb2f   : > { %v8153_v26 = vpop.eup %8152  ;;  %8164 = vrcp.f32 %v6899_v54  ;;  %v6624_v1 = vadd.f32 %v13300_v34, %v6622_v5  ;;  %v6886_v34 = vand.u32 2147483648, %v13291_v44  ;;  %v6524_v18 = vmul.f32 32.708, %v8151_v52 }
 0xb30   : > { %v6878_v20 = vmul.f32 %v8149_v6, %v6877_v13  ;;  %v8155_v0 = vpop.eup %8154  ;;  %v6607_v35 = vmul.f32 %v8153_v26, %v6595_v32  ;;  %8166 = vpow2.f32 %v6518_v8  ;;  %v6692_v25 = vmul.f32 31.7003, %v6690_v42 }
 0xb31   : > { %v8157_v58 = vpop.eup %8156  ;;  %v7045_v50 = vmul.f32 %v8155_v0, %v7033_v40  ;;  %8168 = vrcp.f32 %v13163_v55  ;;  %v6943_v52 = vsub.f32 0.0, %v13291_v44 }
 0xb32   : > { %v6879_v56 = vmul.f32 0.5, %v6878_v20  ;;  %v8159_v9 = vpop.eup %8158  ;;  %v6673_v43 = vmul.f32 %v8157_v58, %v6657_v29 }
 0xb33   : > { %v8161_v45 = vpop.eup %8160  ;;  %v7061_v61 = vmul.f32 %v7053_v48, %v7045_v50  ;;  %v6615_v19 = vsub.f32 1.0, %v8159_v9  ;;  %v6946_v50 = vmul.f32 1.442695, %v6943_v52 }
 0xb34   : > { %v6880_v41 = vsub.f32 1.5, %v6879_v56  ;;  %v8163_v59 = vpop.eup %8162  ;;  %v6620_v40 = vmul.f32 %v8161_v45, %v6616_v24  ;;  %v6679_v37 = vmul.f32 %v6676_v63, %v6673_v43 }
 0xb35   : > { %v8165_v7 = vpop.eup %8164  ;;  %v7059_v53 = vmul.f32 %v8163_v59, %v7055_v46  ;;  %v7063_v27 = vadd.f32 %v8147_v17, %v7061_v61  ;;  %v6623_v30 = vmul.f32 %v6615_v19, %v6607_v35  ;;  %v6617_v55 = vmul.f32 6.2831855, %v6615_v19 }
 0xb36   : > { %v6881_v14 = vmul.f32 %v8149_v6, %v6880_v41  ;;  %v6626_v47 = vmul.f32 %v6624_v1, %v6620_v40  ;;  %v6903_v17 = vmul.f32 %v8165_v7, %v6893_v22  ;;  %v8167_v38 = vpop.eup %8166  ;;  %v6685_v20 = vadd.f32 %v13107_v51, %v6679_v37 }
 0xb37   : > { %v13334_v3 = vmul.f32 %v7063_v27, %v7059_v53  ;;  %v6625_v13 = vadd.f32 %v8159_v9, %v6623_v30  ;;  %v8169_v39 = vpop.eup %8168  ;;  %v6525_v5 = vmul.f32 32.708, %v8167_v38  ;;  %v3732_v9 = vpop.permute.xlu2 %3731 }
 0xb38   : > { %v6882_v28 = vmul.f32 %v6881_v14, %v13291_v44  ;;  %v6628_v48 = vmul.f32 %v6626_v47, %v6524_v18  ;;  %v6621_v26 = vmul.f32 %v8169_v39, %v6617_v55  ;;  %v6691_v56 = vmul.f32 %v6688_v10, %v6685_v20  ;;  %v14137_v47 = vld [vmem:[#allocation54_spill] sm:$0xff]  ;;  %v14138_v55 = vld [vmem:[#allocation29_spill] sm:$0xff] }
 0xb39   : > { %v3751_v45 = vadd.f32 %v14135_v57, %v3732_v9  ;;  %v14140_v57 = vmov 0  }
 0xb3a   : > { %v6884_v36 = vsel %vm6883_vm9, %v13291_v44, %v6882_v28  ;;  %v6627_v15 = vmul.f32 %v6625_v13, %v6621_v26  ;;  %v6694_v63 = vsub.f32 %v6628_v48, %v6692_v25  ;;  %v6693_v46 = vmul.f32 31.7003, %v6691_v56 }
 0xb3b   : > { %v6887_v6 = vsel %vm6885_vm10, %v6886_v34, %v6884_v36  ;;  %v3764_v7 = vadd.f32 %v14136_v4, %v3751_v45  ;;  %v6850_v28 = vmul.f32 1.442695, %v13295_v2  ;;  %v3777_v36 = vadd.f32 %v14137_v47, %v3732_v9  ;;  %v14139_v9 = vld [vmem:[#allocation16_spill] sm:$0xff]  ;;  %v14142_v4 = vld [vmem:[#allocation18_spill] sm:$0xff]  ;;  %v14143_v47 = vld [vmem:[#allocation19_spill] sm:$0xff] }
 0xb3c   : > { %v6905_v54 = vmul.f32 %v6903_v17, %v6887_v6  ;;  %v6629_v58 = vmul.f32 %v6627_v15, %v6525_v5  ;;  %v6700_v8 = vmul.f32 %v13112_v23, %v6694_v63  ;;  %v6788_v17 = vmul.f32 1.442695, %v13198_v12 }
 0xb3d   : > { %v5337_v10 = vmul.f32 0.5, %v3764_v7  ;;  %v3790_v6 = vadd.f32 %v14138_v55, %v3777_v36  ;;  %v7067_v63 = vmul.f32 31.7003, %v13334_v3  ;;  %vm7100_vm12 = vcmp.gt.f32.partialorder %v14139_v9, 0.5 }
 0xb3e   : > { %v6907_v31 = vsub.f32 0.0, %v6905_v54  ;;  %v6695_v32 = vsub.f32 %v6629_v58, %v6693_v46  ;;  %v6702_v41 = vrot.slane %v6700_v8, 4  ;;  %v7102_v45 = vsel %vm7100_vm12, 1, %v14140_v57 }
 0xb3f   : > { %v7108_v7 = vrot.slane %v14142_v4, 2  ;;  %v7109_v36 = vrot.slane %v14143_v47, 2 }
 0xb40   : > { %v6910_v16 = vmul.f32 1.442695, %v6907_v31  ;;  %v6915_v0 = vmul.f32 %v6913_v11, %v6907_v31  ;;  %v6701_v59 = vmul.f32 %v13112_v23, %v6695_v32  ;;  %v6703_v14 = vadd.f32 %v6702_v41, %v6700_v8 }
 0xb42   : > { %8170 = vpow2.f32 %v6910_v16  ;;  %v6918_v60 = vmul.f32 1.442695, %v6915_v0  ;;  %v6708_v40 = vrot.slane %v6701_v59, 4  ;;  %v6704_v22 = vrot.slane %v6703_v14, 2 }
 0xb44   : > { %8172 = vpow2.f32 %v6918_v60  ;;  %v6709_v34 = vadd.f32 %v6708_v40, %v6701_v59  ;;  %v6705_v62 = vadd.f32 %v6704_v22, %v6703_v14 }
 0xb45   : > { %8174 = vpow2.f32 %v6946_v50 }
 0xb46   : > { %v6710_v2 = vrot.slane %v6709_v34, 2  ;;  %v6706_v38 = vrot.slane %v6705_v62, 1 }
 0xb48   : > { %v8171_v51 = vpop.eup %8170  ;;  %v6711_v20 = vadd.f32 %v6710_v2, %v6709_v34  ;;  %v6707_v12 = vadd.f32 %v6706_v38, %v6705_v62  ;;  %v7126_v2 = vrot.slane %v14139_v9, 3 }
 0xb49   : > { %v6931_v33 = vsub.f32 1.0, %v8171_v51 }
 0xb4a   : > { %v8173_v24 = vpop.eup %8172  ;;  %v6712_v60 = vrot.slane %v6711_v20, 1  ;;  %v6714_v52 = vmax.f32 %v6707_v12, 0.0 }
 0xb4b   : > { %v6923_v35 = vmul.f32 %v8173_v24, %v8171_v51  ;;  %v6927_v29 = vsub.f32 %v8173_v24, %v8171_v51  ;;  %v6933_v61 = vadd.f32 1.0, %v8173_v24  ;;  %v8175_v27 = vpop.eup %8174 }
 0xb4c   : > { %v6949_v30 = vsub.f32 1.0, %v8175_v27  ;;  %v6713_v46 = vadd.f32 %v6712_v60, %v6711_v20  ;;  %v7088_v51 = vmul.f32 0.31830987, %v6714_v52 }
 0xb4d   : > { %v6925_v43 = vsub.f32 1.0, %v6923_v35  ;;  %v6935_v1 = vmul.f32 %v6933_v61, %v6931_v33  ;;  %v7104_v33 = vperm.slane %v7102_v45, 6  ;;  %v14141_v61 = vld [vmem:[#allocation17_spill] sm:$0xff] }
 0xb4e   : > { %v6951_v42 = vmul.f32 6.2831855, %v6949_v30  ;;  %vm7101_vm13 = vcmp.gt.f32.partialorder %v14141_v61, 0.5 }
 0xb4f   : > { %v6929_v19 = vsel %vm6921_vm11, %v6925_v43, %v6927_v29  ;;  %v6937_v53 = vadd.f32 1e-08, %v6935_v1  ;;  %v6715_v29 = vmax.f32 %v6713_v46, 0.0  ;;  %vm7106_vm14 = vcmp.eq.s32.totalorder %v7104_v33, 1 }
 0xb51   : > { %8176 = vrcp.f32 %v6937_v53  ;;  %v7089_v1 = vmul.f32 0.31830987, %v6715_v29  ;;  %v7103_v53 = vsel %vm7101_vm13, 1, %v14140_v57 }
 0xb52   : > { %8178 = vrcp.f32 %v13291_v44  ;;  %v5338_v44 = vmul.f32 0.5, %v3790_v6 }
 0xb53   : > { %8180 = vpow2.f32 %v6850_v28  ;;  %v7105_v28 = vperm.slane %v7103_v53, 6 }
 0xb54   : > { %8182 = vtanh.f32 %v5337_v10 }
 0xb55   : > { %8184 = vpow2.f32 %v6788_v17  ;;  %vm7107_vm15 = vcmp.eq.s32.totalorder %v7105_v28, 1 }
 0xb56   : > { %8186 = vtanh.f32 %v5338_v44 }
 0xb57   : > { %v8177_v37 = vpop.eup %8176 }
 0xb58   : > { %v6941_v18 = vmul.f32 %v8177_v37, %v6929_v19  ;;  %v8179_v54 = vpop.eup %8178 }
 0xb59   : > { %v8181_v39 = vpop.eup %8180  ;;  %v6955_v48 = vmul.f32 %v8179_v54, %v6951_v42 }
 0xb5a   : > { %v6957_v13 = vmul.f32 %v6949_v30, %v6941_v18  ;;  %v8183_v11 = vpop.eup %8182  ;;  %v6859_v26 = vmul.f32 32.708, %v8181_v39  ;;  %v7127_v18 = vrot.slane %v14141_v61, 3 }
 0xb5b   : > { %v8185_v16 = vpop.eup %8184  ;;  %v5341_v0 = vadd.f32 1.0, %v8183_v11 }
 0xb5c   : > { %v6959_v31 = vadd.f32 %v8175_v27, %v6957_v13  ;;  %v6857_v5 = vmul.f32 %v8185_v16, %v13112_v23  ;;  %v8187_v50 = vpop.eup %8186 }
 0xb5d   : > { %v5343_v58 = vmul.f32 0.5, %v5341_v0  ;;  %v5342_v41 = vadd.f32 1.0, %v8187_v50 }
 0xb5e   : > { %v6961_v25 = vmul.f32 %v6959_v31, %v6955_v48 }
 0xb5f   : > { %v7090_v24 = vmul.f32 %v7088_v51, %v5343_v58  ;;  %v5344_v59 = vmul.f32 0.5, %v5342_v41 }
 0xb60   : > { %v6963_v15 = vmul.f32 %v6961_v25, %v6859_v26 }
 0xb61   : > { %v7094_v23 = vrot.slane %v7090_v24, 7  ;;  %v7091_v27 = vmul.f32 %v7089_v1, %v5344_v59 }
 0xb62   : > { %v7069_v56 = vsub.f32 %v6963_v15, %v7067_v63 }
 0xb63   : > { %v7098_v14 = vadd.f32 %v7094_v23, %v13151_v49  ;;  %v7095_v30 = vrot.slane %v7091_v27, 7 }
 0xb64   : > { %v7071_v8 = vmul.f32 %v7069_v56, %v6857_v5 }
 0xb65   : > { %v7112_v22 = vsel %vm7106_vm14, %v7098_v14, %v7108_v7 }
 0xb66   : > { %v7078_v32 = vrot.slane %v7071_v8, 4  ;;  %v7114_v17 = vmax.f32 %v7112_v22, 0.0 }
 0xb68   : > { %v7079_v35 = vadd.f32 %v7078_v32, %v7071_v8  ;;  %v7116_v37 = vmin.f32 %v7114_v17, 1.0 }
 0xb6a   : > { %v7080_v3 = vrot.slane %v7079_v35, 2  ;;  %v7120_v42 = vrot.slane %v7116_v37, 1 }
 0xb6c   : > { %v7081_v43 = vadd.f32 %v7080_v3, %v7079_v35  ;;  %v7131_v13 = vsel %vm7130_vm0, %v7120_v42, %v7126_v2 }
 0xb6e   : > { %v7082_v19 = vrot.slane %v7081_v43, 1 }
 0xb70   : > { %v7083_v40 = vadd.f32 %v7082_v19, %v7081_v43 }
 0xb72   : > { %v7085_v10 = vmax.f32 %v7083_v40, 0.0 }
 0xb74   : > { %v7087_v34 = vmul.f32 %v7085_v10, %v13174_v21 }
 0xb76   : > { %v7099_v49 = vadd.f32 %v7095_v30, %v7087_v34 }
 0xb78   : > { %v7113_v62 = vsel %vm7107_vm15, %v7099_v49, %v7109_v36 }
 0xb79   : > { %v7115_v55 = vmax.f32 %v7113_v62, 0.0 }
 0xb7b   : > { %v7117_v6 = vmin.f32 %v7115_v55, 1.0 }
 0xb7d   : > { %v7121_v54 = vrot.slane %v7117_v6, 1 }
 0xb7f   : > { %v7132_v38 = vsel %vm7130_vm0, %v7121_v54, %v7127_v18 }
 0xb80   : > { %v7135_v21 = vrot.slane %v7132_v38, 4 }
 0xb82   : > { %v7137_v39 = vsel %vm7136_vm1, %v7131_v13, %v7135_v21 }
 0xb83   : > { %7139 = vst [vmem:[%s8473_s5] sm:$0xff] %v7137_v39 }
 0xb84 PF: > { %s7931_s25 = sshll.u32 %s8423_s15, 3  ;;  %s7154_s4 = sshll.u32 %s8473_s5, 4  ;;  %s7155_s4 = int_to_ptr.vmem [resolvable:$true] %s7154_s4 }
 0xb85   : > { %s7152_s3 = scalar_lea.hbm %s13419_s21, %s7931_s25  ;;  %s7141_s27 = scalar_lea.sflag [#allocation6], %s8460_s2 }
 0xb86   : > { %s7156_s23 = sshll.u32 %s7152_s3, 4  ;;  %s8226_s15 = scalar_lea.hbm %s13419_s21, 16  ;;  %s7157_s23 = int_to_ptr.hbm [resolvable:$true] %s7156_s23 }
 0xb87   : > { %s8220_s28 = sshra.s32 %s7157_s23, 4  ;;  %s8221_s28 = int_to_ptr.hbm [resolvable:$true] %s8220_s28 }
 0xb88   : > { %s8222_s26 = scalar_lea.hbm %s8221_s28, 8  ;;  %p8227_p4 = scmp.lt.s32.totalorder %s8221_s28, %s13419_s21 }
 0xb89   : > { %p8223_p1 = scmp.ne.s32.totalorder %s8221_s28, %s8222_s26  ;;  %p8228_p5 = scmp.lt.s32.totalorder %s8226_s15, %s8222_s26 }
 0xb8b   : > { %p8224_p2 = pnand %p8223_p1, %p8441_p6  ;;  %p8229_p7 = por %p8228_p5, %p8227_p4 }
 0xb8d   : > { %p8225_p3 = pneg %p8224_p2 }
 0xb8f   : > { %p8230_p10 = pnand %p8229_p7, %p8225_p3 }
 0xb91   : > { %8233 = shalt.err (!%p8230_p10)
}
 0xb92   : > { %7934 = dma.vmem_to_hbm [thread:$0]  (%p8441_p6), %s7155_s4, 128, %s7157_s23, %s7141_s27  }
 0xb93 PF: > { %s14144_s2 = sld [smem:[#allocation9_spill]]  ;;  %p7937_p11 = pnand %p7224_p9, %p8445_p8 }
 0xb95   : > { %p7938_p12 = pneg %p7937_p11 }
 0xb99   : > { %s7168_s22 = sand.u32 1, %s14144_s2  }
 0xb9a   : > { %s7169_s6 = scalar_lea.sflag [#allocation6], %s7168_s22 }
 0xb9b   : > { %8253 = dma.done.wait (%p7938_p12), %s7169_s6, 128  }
 0xb9c   : > { %8255 = vsyncadd (%p7938_p12), %s7169_s6, 4294967168  ;;  %s14147_s0 = sld [smem:[#allocation13_spill]] }
 0xb9d   : > { %s14148_s3 = sld [smem:[#allocation10_spill]] }
 0xb9e   : > { %s14149_s28 = sld [smem:[#allocation11_spill]] }
 0xb9f   : > { %s14150_s29 = sld [smem:[#allocation14_spill]] }
 0xba2   : > { %p39_p13 = scmp.ge.s32.totalorder %s14147_s0, 4  }
 0xba4   :  { %41 = sbr.rel (!%p39_p13) target bundleno = 26 (0x1a), region = 171 }
 0xba9   :  { %7175 = vsyncpa [#allocation6], 1 }
 0xbaa   :  { %7177 = vsyncpa [#allocation6 + $0x1], 1 }

</bundles_post_ra>
